<compile_context>
chip_gen: v5e
topology: v5e:2x2
jax: 0.10.0
libtpu: 0.0.40
codegen_flags: <defaults>
</compile_context>

<pallas_src>
import functools

import jax
import jax.numpy as jnp
from jax.experimental import pallas as pl
from jax.experimental.pallas import tpu as pltpu

DTYPE = jnp.bfloat16          # storage dtype (activations + weights)
ACC = jnp.float32             # accumulation dtype inside kernels
LN_EPS = 1e-5                 # torch.nn.LayerNorm default
GRN_EPS = 1e-6


# ----------------------------------------------------------------------------
# hardware-aware knobs
# ----------------------------------------------------------------------------
def _vmem_capacity_bytes():
    try:
        return int(pltpu.get_tpu_info().vmem_capacity_bytes)
    except Exception:
        return 64 << 20          # conservative default (v7x-sized) if query fails


_VMEM_CAP = _vmem_capacity_bytes()
# Never request the whole physical VMEM (v7x: ~48 of 64 MiB; v5e/v6e: ~96 of 128 MiB).
_VMEM_REQ_CAP = max(16 << 20, min(int(_VMEM_CAP * 0.75), _VMEM_CAP - (16 << 20)))
_TM = 1024 if _VMEM_CAP >= (96 << 20) else 512   # row tile for the matmul kernels


def _cparams(dims, tile_bytes):
    """dimension_semantics + explicit VMEM budget (only when above the default scoped limit)."""
    need = int(tile_bytes) + (4 << 20)
    vmem = min(need, _VMEM_REQ_CAP) if need > (16 << 20) else None
    return pltpu.CompilerParams(dimension_semantics=dims, vmem_limit_bytes=vmem)


def _row_tiles(M):
    """Row tile (multiple of 8 when tiled) and cdiv grid size; ragged tails are masked by Pallas."""
    tm = min(M, _TM)
    return tm, pl.cdiv(M, tm)


# ---- single-buffering of grid-invariant operands (feature probed at runtime) -------------------
_BUFFERED_OK = False


def _probe_buffered():
    """Check that pipeline_mode=pl.Buffered(1) is supported; fall back to default buffering."""
    global _BUFFERED_OK
    try:
        def _k(x_ref, c_ref, o_ref):
            o_ref[...] = x_ref[...] + c_ref[...]

        out = pl.pallas_call(
            _k,
            out_shape=jax.ShapeDtypeStruct((16, 128), jnp.float32),
            grid=(2,),
            in_specs=[pl.BlockSpec((8, 128), lambda i: (i, 0)),
                      pl.BlockSpec((8, 128), lambda i: (0, 0),
                                   pipeline_mode=pl.Buffered(1))],
            out_specs=pl.BlockSpec((8, 128), lambda i: (i, 0)),
        )(jnp.ones((16, 128), jnp.float32), jnp.full((8, 128), 2.0, jnp.float32))
        jax.block_until_ready(out)
        _BUFFERED_OK = bool(jnp.all(out == 3.0))
    except Exception:
        _BUFFERED_OK = False
    return _BUFFERED_OK


def _const_spec(shape, grid_rank):
    """BlockSpec for a grid-invariant operand (single-buffered when supported)."""
    zeros = (0,) * len(shape)
    if grid_rank == 1:
        imap = lambda i: zeros
    elif grid_rank == 2:
        imap = lambda i, j: zeros
    else:
        imap = lambda *idx: zeros
    if _BUFFERED_OK:
        return pl.BlockSpec(shape, imap, pipeline_mode=pl.Buffered(1))
    return pl.BlockSpec(shape, imap)


# ----------------------------------------------------------------------------
# small math helpers
# ----------------------------------------------------------------------------
def _gelu_tanh(x):
    # tanh-approximate GELU: the tanh runs on the EUP slot instead of a VALU erf polynomial.
    # TODO(synk): ~1e-3 relative deviation from torch's exact erf GELU.
    return 0.5 * x * (1.0 + jnp.tanh(0.7978845608028654 * (x + 0.044715 * x * x * x)))


# ----------------------------------------------------------------------------
# Pallas kernels: row-tiled matmuls (optionally fused with (grouped) LayerNorm)
# ----------------------------------------------------------------------------
def _linear_kernel(x_ref, w_ref, b_ref, o_ref):
    acc = jnp.dot(x_ref[...].astype(ACC), w_ref[...].astype(ACC), preferred_element_type=ACC)
    o_ref[...] = (acc + b_ref[...].astype(ACC)).astype(o_ref.dtype)


def pallas_linear(x, w, b):
    """y = x @ w + b, row-tiled over M (cdiv grid, masked ragged tail)."""
    M, K = x.shape
    N = w.shape[1]
    tm, g = _row_tiles(M)
    tile_bytes = 4 * (2 * tm * K + 2 * tm * N + K * N + N)
    return pl.pallas_call(
        _linear_kernel,
        out_shape=jax.ShapeDtypeStruct((M, N), x.dtype),
        grid=(g,),
        in_specs=[pl.BlockSpec((tm, K), lambda i: (i, 0)),
                  _const_spec((K, N), 1),
                  _const_spec((1, N), 1)],
        out_specs=pl.BlockSpec((tm, N), lambda i: (i, 0)),
        compiler_params=_cparams(("parallel",), tile_bytes),
    )(x, w, b.reshape(1, N))


def _dual_linear_kernel(xa_ref, xb_ref, wa_ref, wb_ref, b_ref, o_ref):
    acc = jnp.dot(xa_ref[...].astype(ACC), wa_ref[...].astype(ACC), preferred_element_type=ACC)
    acc = acc + jnp.dot(xb_ref[...].astype(ACC), wb_ref[...].astype(ACC),
                        preferred_element_type=ACC)
    o_ref[...] = (acc + b_ref[...].astype(ACC)).astype(o_ref.dtype)


def pallas_dual_linear(xa, xb, wa, wb, b):
    """y = xa @ wa + xb @ wb + b  (fused skip-concat + 1x1 channel reduce)."""
    M, Ka = xa.shape
    Kb = xb.shape[1]
    N = wa.shape[1]
    tm, g = _row_tiles(M)
    tile_bytes = 4 * (2 * tm * (Ka + Kb) + 2 * tm * N + (Ka + Kb) * N + N)
    return pl.pallas_call(
        _dual_linear_kernel,
        out_shape=jax.ShapeDtypeStruct((M, N), xa.dtype),
        grid=(g,),
        in_specs=[pl.BlockSpec((tm, Ka), lambda i: (i, 0)),
                  pl.BlockSpec((tm, Kb), lambda i: (i, 0)),
                  _const_spec((Ka, N), 1),
                  _const_spec((Kb, N), 1),
                  _const_spec((1, N), 1)],
        out_specs=pl.BlockSpec((tm, N), lambda i: (i, 0)),
        compiler_params=_cparams(("parallel",), tile_bytes),
    )(xa, xb, wa, wb, b.reshape(1, N))


def _preln_grouped_linear_kernel(x_ref, r_ref, e_ref, g_ref, bln_ref, w_ref, b_ref, o_ref, *, inv_c):
    # grouped (per-source-pixel) LayerNorm over groups of size c in K, then x @ w + b.
    # thin (K,g) reduce + (g,K) expand matmuls instead of a dense (K,K) group-sum matrix.
    x = x_ref[...].astype(ACC)
    R = r_ref[...]
    E = e_ref[...]
    mu = jnp.dot(jnp.dot(x, R, preferred_element_type=ACC), E, preferred_element_type=ACC) * inv_c
    d = x - mu
    var = jnp.dot(jnp.dot(d * d, R, preferred_element_type=ACC), E,
                  preferred_element_type=ACC) * inv_c
    xn = d * jax.lax.rsqrt(var + LN_EPS) * g_ref[...] + bln_ref[...]
    acc = jnp.dot(xn, w_ref[...].astype(ACC), preferred_element_type=ACC)
    o_ref[...] = (acc + b_ref[...].astype(ACC)).astype(o_ref.dtype)


def pallas_preln_linear(x, ln_g, ln_b, w, b, groups):
    """Grouped pre-LayerNorm fused into a following matmul (used by the downsample layers)."""
    M, K = x.shape
    N = w.shape[1]
    c = K // groups
    tm, g = _row_tiles(M)
    R = jnp.kron(jnp.eye(groups, dtype=ACC), jnp.ones((c, 1), ACC))      # (K, groups) one-hot
    E = R.T                                                              # (groups, K)
    gt = jnp.tile(ln_g.astype(ACC), groups).reshape(1, K)
    bt = jnp.tile(ln_b.astype(ACC), groups).reshape(1, K)
    tile_bytes = 4 * (5 * tm * K + 2 * tm * N + 2 * K * groups + K * N + 2 * K + N)
    return pl.pallas_call(
        functools.partial(_preln_grouped_linear_kernel, inv_c=1.0 / c),
        out_shape=jax.ShapeDtypeStruct((M, N), x.dtype),
        grid=(g,),
        in_specs=[pl.BlockSpec((tm, K), lambda i: (i, 0)),
                  _const_spec((K, groups), 1),
                  _const_spec((groups, K), 1),
                  _const_spec((1, K), 1),
                  _const_spec((1, K), 1),
                  _const_spec((K, N), 1),
                  _const_spec((1, N), 1)],
        out_specs=pl.BlockSpec((tm, N), lambda i: (i, 0)),
        compiler_params=_cparams(("parallel",), tile_bytes),
    )(x, R, E, gt, bt, w, b.reshape(1, N))


def _linear_postln_g1_kernel(x_ref, w_ref, b_ref, g_ref, bln_ref, o_ref):
    y = jnp.dot(x_ref[...].astype(ACC), w_ref[...].astype(ACC),
                preferred_element_type=ACC) + b_ref[...].astype(ACC)
    mu = jnp.mean(y, axis=-1, keepdims=True)
    d = y - mu
    var = jnp.mean(d * d, axis=-1, keepdims=True)
    o_ref[...] = (d * jax.lax.rsqrt(var + LN_EPS) * g_ref[...] + bln_ref[...]).astype(o_ref.dtype)


def _linear_postln_gn_kernel(x_ref, w_ref, b_ref, r_ref, e_ref, g_ref, bln_ref, o_ref, *, inv_c):
    y = jnp.dot(x_ref[...].astype(ACC), w_ref[...].astype(ACC),
                preferred_element_type=ACC) + b_ref[...].astype(ACC)
    R = r_ref[...]
    E = e_ref[...]
    mu = jnp.dot(jnp.dot(y, R, preferred_element_type=ACC), E, preferred_element_type=ACC) * inv_c
    d = y - mu
    var = jnp.dot(jnp.dot(d * d, R, preferred_element_type=ACC), E,
                  preferred_element_type=ACC) * inv_c
    o_ref[...] = (d * jax.lax.rsqrt(var + LN_EPS) * g_ref[...] + bln_ref[...]).astype(o_ref.dtype)


def pallas_linear_postln(x, w, b, ln_g, ln_b, groups):
    """(x @ w + b) then (grouped) LayerNorm over the N dim, fused in one kernel."""
    M, K = x.shape
    N = w.shape[1]
    c = N // groups
    tm, g = _row_tiles(M)
    gt = jnp.tile(ln_g.astype(ACC), groups).reshape(1, N)
    bt = jnp.tile(ln_b.astype(ACC), groups).reshape(1, N)
    tile_bytes = 4 * (2 * tm * K + 5 * tm * N + K * N + 2 * N * max(groups, 1) + 3 * N)
    if groups == 1:
        kern = _linear_postln_g1_kernel
        ops = (x, w, b.reshape(1, N), gt, bt)
        specs = [pl.BlockSpec((tm, K), lambda i: (i, 0)),
                 _const_spec((K, N), 1),
                 _const_spec((1, N), 1),
                 _const_spec((1, N), 1),
                 _const_spec((1, N), 1)]
    else:
        R = jnp.kron(jnp.eye(groups, dtype=ACC), jnp.ones((c, 1), ACC))
        kern = functools.partial(_linear_postln_gn_kernel, inv_c=1.0 / c)
        ops = (x, w, b.reshape(1, N), R, R.T, gt, bt)
        specs = [pl.BlockSpec((tm, K), lambda i: (i, 0)),
                 _const_spec((K, N), 1),
                 _const_spec((1, N), 1),
                 _const_spec((N, groups), 1),
                 _const_spec((groups, N), 1),
                 _const_spec((1, N), 1),
                 _const_spec((1, N), 1)]
    return pl.pallas_call(
        kern,
        out_shape=jax.ShapeDtypeStruct((M, N), x.dtype),
        grid=(g,),
        in_specs=specs,
        out_specs=pl.BlockSpec((tm, N), lambda i: (i, 0)),
        compiler_params=_cparams(("parallel",), tile_bytes),
    )(*ops)


# ----------------------------------------------------------------------------
# ConvNeXt-V2 block
#   dwconv7x7 -> LN -> Linear(C,4C) -> GELU -> GRN -> Linear(4C,C) -> +residual
# ----------------------------------------------------------------------------
def _dwconv7(x, row, col, w, H, W, K):
    """Depthwise KxK 'same' conv on a flattened (HWp, C) f32 image using pltpu.roll + masks."""
    HWp = x.shape[0]
    acc = jnp.zeros_like(x)
    for ky in range(K):
        dy = ky - K // 2
        if abs(dy) >= H:               # statically impossible tap
            continue
        ybase = x if dy == 0 else pltpu.roll(x, shift=(-dy * W) % HWp, axis=0)
        rvalid = (row + dy >= 0) & (row + dy < H)
        part = jnp.zeros_like(x)
        for kx in range(K):
            dx = kx - K // 2
            if abs(dx) >= W:
                continue
            shifted = ybase if dx == 0 else pltpu.roll(ybase, shift=(-dx) % HWp, axis=0)
            cvalid = (col + dx >= 0) & (col + dx < W)
            idx = ky * K + kx
            part = part + jnp.where(cvalid, shifted, 0.0) * w[idx:idx + 1, :]
        acc = acc + jnp.where(rvalid, part, 0.0)
    return acc


def _cnblock_fused_kernel(x_ref, row_ref, col_ref, dww_ref, dwb_ref, lng_ref, lnb_ref,
                          w1_ref, b1_ref, gg_ref, gb_ref, w2_ref, b2_ref, o_ref, *, H, W, K):
    x = x_ref[...].astype(ACC)                                   # (HWp, C)
    row = row_ref[...]
    col = col_ref[...]
    y = _dwconv7(x, row, col, dww_ref[...].astype(ACC), H, W, K) + dwb_ref[...].astype(ACC)

    mu = jnp.mean(y, axis=-1, keepdims=True)
    var = jnp.mean((y - mu) ** 2, axis=-1, keepdims=True)
    xn = (y - mu) * jax.lax.rsqrt(var + LN_EPS) * lng_ref[...].astype(ACC) \
         + lnb_ref[...].astype(ACC)

    h = jnp.dot(xn, w1_ref[...].astype(ACC), preferred_element_type=ACC) + b1_ref[...].astype(ACC)
    h = _gelu_tanh(h)

    # GRN over the full (real) spatial extent of this image
    valid = row < H                                              # excludes alignment-padding rows
    hm = jnp.where(valid, h, 0.0)
    gx = jnp.sqrt(jnp.sum(hm * hm, axis=0, keepdims=True))
    nx = gx / (jnp.mean(gx, axis=-1, keepdims=True) + GRN_EPS)
    h = gg_ref[...].astype(ACC) * (h * nx) + gb_ref[...].astype(ACC) + h

    out = jnp.dot(h, w2_ref[...].astype(ACC), preferred_element_type=ACC) + b2_ref[...].astype(ACC)
    o_ref[...] = (out + x).astype(o_ref.dtype)                   # StochasticDepth == identity


def _cnblock_prep(x):
    """Flatten spatial dims, pad rows to a multiple of 8 (sublane alignment for pltpu.roll)."""
    B, H, W, C = x.shape
    HW = H * W
    HW8 = ((HW + 7) // 8) * 8
    xf = x.reshape(B, HW, C)
    if HW8 != HW:
        xf = jnp.pad(xf, ((0, 0), (0, HW8 - HW), (0, 0)))
    idx = jnp.arange(HW8, dtype=jnp.int32)
    row = jnp.where(idx < HW, idx // W, H).astype(jnp.int32).reshape(HW8, 1)
    col = jnp.where(idx < HW, idx % W, W).astype(jnp.int32).reshape(HW8, 1)
    return xf, row, col, HW, HW8


def convnext_block_fused(x, p):
    """Whole ConvNeXt-V2 block as a single per-image kernel (grid=(B,))."""
    B, H, W, C = x.shape
    K = 7
    C4 = 4 * C
    xf, row, col, HW, HW8 = _cnblock_prep(x)
    kern = functools.partial(_cnblock_fused_kernel, H=H, W=W, K=K)
    tile_bytes = 4 * (6 * HW8 * C + 4 * HW8 * C4 + 2 * C * C4 + K * K * C + 8 * C4)
    out = pl.pallas_call(
        kern,
        out_shape=jax.ShapeDtypeStruct((B, HW8, C), x.dtype),
        grid=(B,),
        in_specs=[pl.BlockSpec((None, HW8, C), lambda b: (b, 0, 0)),
                  _const_spec((HW8, 1), 1),
                  _const_spec((HW8, 1), 1),
                  _const_spec((K * K, C), 1),
                  _const_spec((1, C), 1),
                  _const_spec((1, C), 1),
                  _const_spec((1, C), 1),
                  _const_spec((C, C4), 1),
                  _const_spec((1, C4), 1),
                  _const_spec((1, C4), 1),
                  _const_spec((1, C4), 1),
                  _const_spec((C4, C), 1),
                  _const_spec((1, C), 1)],
        out_specs=pl.BlockSpec((None, HW8, C), lambda b: (b, 0, 0)),
        compiler_params=_cparams(("parallel",), tile_bytes),
    )(xf, row, col,
      p["dw_w"].reshape(K * K, C), p["dw_b"].reshape(1, C),
      p["ln_g"].reshape(1, C), p["ln_b"].reshape(1, C),
      p["w1"], p["b1"].reshape(1, C4),
      p["grn_g"].reshape(1, C4), p["grn_b"].reshape(1, C4),
      p["w2"], p["b2"].reshape(1, C))
    return out[:, :HW, :].reshape(B, H, W, C)


# ---- HW-tiled fallback (two-pass GRN), used when the fused working set exceeds the VMEM budget.
def _dwln_kernel(x_ref, row_ref, col_ref, dww_ref, dwb_ref, lng_ref, lnb_ref, y_ref, *, H, W, K):
    x = x_ref[...].astype(ACC)
    y = _dwconv7(x, row_ref[...], col_ref[...], dww_ref[...].astype(ACC), H, W, K) \
        + dwb_ref[...].astype(ACC)
    mu = jnp.mean(y, axis=-1, keepdims=True)
    var = jnp.mean((y - mu) ** 2, axis=-1, keepdims=True)
    y_ref[...] = ((y - mu) * jax.lax.rsqrt(var + LN_EPS) * lng_ref[...].astype(ACC)
                  + lnb_ref[...].astype(ACC)).astype(y_ref.dtype)


def _mlp1_ssq_kernel(y_ref, w1_ref, b1_ref, h_ref, ssq_ref, *, n_valid, tr):
    t = pl.program_id(1)
    h = jnp.dot(y_ref[...].astype(ACC), w1_ref[...].astype(ACC),
                preferred_element_type=ACC) + b1_ref[...].astype(ACC)
    h = _gelu_tanh(h)
    h_ref[...] = h.astype(h_ref.dtype)
    rows = jax.lax.broadcasted_iota(jnp.int32, (tr, 1), 0) + t * tr
    hm = jnp.where(rows < n_valid, h, 0.0)                    # mask ragged tail / padding rows
    part = jnp.sum(hm * hm, axis=0, keepdims=True)            # (1, 4C)

    @pl.when(t == 0)
    def _init():
        ssq_ref[...] = part

    @pl.when(t > 0)
    def _accum():
        ssq_ref[...] = ssq_ref[...] + part


def _grn_mlp2_kernel(h_ref, ssq_ref, xr_ref, gg_ref, gb_ref, w2_ref, b2_ref, o_ref):
    h = h_ref[...].astype(ACC)
    gx = jnp.sqrt(ssq_ref[...].astype(ACC))
    nx = gx / (jnp.mean(gx, axis=-1, keepdims=True) + GRN_EPS)
    h = gg_ref[...].astype(ACC) * (h * nx) + gb_ref[...].astype(ACC) + h
    out = jnp.dot(h, w2_ref[...].astype(ACC), preferred_element_type=ACC) + b2_ref[...].astype(ACC)
    o_ref[...] = (out + xr_ref[...].astype(ACC)).astype(o_ref.dtype)


def convnext_block_tiled(x, p, row_tile=None):
    """ConvNeXt-V2 block as dwconv+LN (per image) -> row-tiled MLP1/GELU + ssq accumulation
    -> row-tiled GRN + MLP2 + residual (two-pass GRN)."""
    B, H, W, C = x.shape
    K = 7
    C4 = 4 * C
    xf, row, col, HW, HW8 = _cnblock_prep(x)

    # pass 1: dwconv 7x7 + LayerNorm (per image)
    # TODO(synk): for very large images this pass should itself be H-tiled with halo rows.
    y = pl.pallas_call(
        functools.partial(_dwln_kernel, H=H, W=W, K=K),
        out_shape=jax.ShapeDtypeStruct((B, HW8, C), ACC),
        grid=(B,),
        in_specs=[pl.BlockSpec((None, HW8, C), lambda b: (b, 0, 0)),
                  _const_spec((HW8, 1), 1),
                  _const_spec((HW8, 1), 1),
                  _const_spec((K * K, C), 1),
                  _const_spec((1, C), 1),
                  _const_spec((1, C), 1),
                  _const_spec((1, C), 1)],
        out_specs=pl.BlockSpec((None, HW8, C), lambda b: (b, 0, 0)),
        compiler_params=_cparams(("parallel",), 4 * 5 * HW8 * C),
    )(xf, row, col, p["dw_w"].reshape(K * K, C), p["dw_b"].reshape(1, C),
      p["ln_g"].reshape(1, C), p["ln_b"].reshape(1, C))

    tr = min(HW8, _TM) if row_tile is None else min(row_tile, HW8)
    nT = pl.cdiv(HW8, tr)

    # pass 2: Linear(C,4C) + GELU, accumulate per-channel sum of squares (GRN pass 1)
    h, ssq = pl.pallas_call(
        functools.partial(_mlp1_ssq_kernel, n_valid=HW, tr=tr),
        out_shape=(jax.ShapeDtypeStruct((B, HW8, C4), ACC),
                   jax.ShapeDtypeStruct((B, 1, C4), ACC)),
        grid=(B, nT),
        in_specs=[pl.BlockSpec((None, tr, C), lambda b, t: (b, t, 0)),
                  _const_spec((C, C4), 2),
                  _const_spec((1, C4), 2)],
        out_specs=(pl.BlockSpec((None, tr, C4), lambda b, t: (b, t, 0)),
                   pl.BlockSpec((None, 1, C4), lambda b, t: (b, 0, 0))),
        compiler_params=_cparams(("parallel", "arbitrary"), 4 * (2 * tr * C + 3 * tr * C4 + C * C4)),
    )(y, p["w1"], p["b1"].reshape(1, C4))

    # pass 3: GRN (global stats) + Linear(4C,C) + residual (GRN pass 2)
    out = pl.pallas_call(
        _grn_mlp2_kernel,
        out_shape=jax.ShapeDtypeStruct((B, HW8, C), x.dtype),
        grid=(B, nT),
        in_specs=[pl.BlockSpec((None, tr, C4), lambda b, t: (b, t, 0)),
                  pl.BlockSpec((None, 1, C4), lambda b, t: (b, 0, 0)),
                  pl.BlockSpec((None, tr, C), lambda b, t: (b, t, 0)),
                  _const_spec((1, C4), 2),
                  _const_spec((1, C4), 2),
                  _const_spec((C4, C), 2),
                  _const_spec((1, C), 2)],
        out_specs=pl.BlockSpec((None, tr, C), lambda b, t: (b, t, 0)),
        compiler_params=_cparams(("parallel", "parallel"), 4 * (3 * tr * C4 + 3 * tr * C + C4 * C)),
    )(h, ssq, xf, p["grn_g"].reshape(1, C4), p["grn_b"].reshape(1, C4),
      p["w2"], p["b2"].reshape(1, C))

    return out[:, :HW, :].reshape(B, H, W, C)


def pallas_convnext_block(x, p):
    """Pick the fully-fused per-image kernel when its f32 working set fits the VMEM budget,
    otherwise the HW-tiled two-pass-GRN pipeline (v7x's 64 MiB VMEM / large images)."""
    B, H, W, C = x.shape
    HW8 = ((H * W + 7) // 8) * 8
    fused_bytes = 4 * (6 * HW8 * C + 4 * HW8 * 4 * C + 2 * C * 4 * C + 49 * C)
    if fused_bytes <= int(0.5 * _VMEM_REQ_CAP):
        return convnext_block_fused(x, p)
    return convnext_block_tiled(x, p)


# ----------------------------------------------------------------------------
# Composite ops (thin JAX glue around the Pallas kernels)
# ----------------------------------------------------------------------------
def conv_patch_ln(x, w, b, k, cout, ln_g, ln_b):
    """Strided conv (kernel==stride==k) fused with LayerNorm(cout) (post-LN, groups=1)."""
    B, H, W, Cin = x.shape
    Ho, Wo = H // k, W // k
    # TODO(synk): the patch extraction is still one XLA copy through HBM; an in-kernel
    # (k rows x W x Cin) stripe BlockSpec would remove it.
    patches = (x.reshape(B, Ho, k, Wo, k, Cin)
               .transpose(0, 1, 3, 2, 4, 5)
               .reshape(B * Ho * Wo, k * k * Cin))
    y = pallas_linear_postln(patches, w, b, ln_g, ln_b, groups=1)
    return y.reshape(B, Ho, Wo, cout)


def ln_conv_patch(x, ln_g, ln_b, w, b, k, cout):
    """LayerNorm(Cin) fused with a strided conv (kernel==stride==k) (grouped pre-LN)."""
    B, H, W, Cin = x.shape
    Ho, Wo = H // k, W // k
    patches = (x.reshape(B, Ho, k, Wo, k, Cin)
               .transpose(0, 1, 3, 2, 4, 5)
               .reshape(B * Ho * Wo, k * k * Cin))
    y = pallas_preln_linear(patches, ln_g, ln_b, w, b, groups=k * k)
    return y.reshape(B, Ho, Wo, cout)


def convtranspose_ln(x, w, b, k, cout, ln_g, ln_b):
    """Transposed conv (kernel==stride==k) fused with LayerNorm(cout) (grouped post-LN)."""
    B, H, W, Cin = x.shape
    y = pallas_linear_postln(x.reshape(B * H * W, Cin), w, jnp.tile(b, (k * k,)),
                             ln_g, ln_b, groups=k * k)
    # TODO(synk): the pixel-shuffle is one XLA transpose through HBM; it could be folded into
    # the downstream kernel's input index_map.
    y = (y.reshape(B, H, W, k, k, cout)
         .transpose(0, 1, 3, 2, 4, 5)
         .reshape(B, H * k, W * k, cout))
    return y


def concat_reduce1x1(x, bridge, w, b):
    """cat([x, bridge], channel) -> 1x1 conv, without materializing the 2C concat tensor."""
    B, H, W, C = x.shape
    cout = w.shape[1]
    y = pallas_dual_linear(x.reshape(B * H * W, C), bridge.reshape(B * H * W, C),
                           w[:C], w[C:], b)
    return y.reshape(B, H, W, cout)


def conv1x1(x, w, b):
    # TODO(synk): output_channels==1 forces lane-sparse masked stores; fusing this head into the
    # preceding final_up kernel (or padding channels toward 128) would avoid the vst.msk penalty.
    B, H, W, Cin = x.shape
    cout = w.shape[1]
    y = pallas_linear(x.reshape(B * H * W, Cin), w, b)
    return y.reshape(B, H, W, cout)


# ----------------------------------------------------------------------------
# Parameter init (deterministic, shapes follow the PyTorch module)
# ----------------------------------------------------------------------------
def _xavier(key, shape, fan_in, fan_out):
    limit = float((6.0 / (fan_in + fan_out)) ** 0.5)
    return jax.random.uniform(key, shape, DTYPE, minval=-limit, maxval=limit)


def _cn_block_params(kit, C):
    return dict(
        dw_w=_xavier(next(kit), (7, 7, C), 49, 49),
        dw_b=jnp.zeros((C,), DTYPE),
        ln_g=jnp.ones((C,), DTYPE), ln_b=jnp.zeros((C,), DTYPE),
        w1=_xavier(next(kit), (C, 4 * C), C, 4 * C),
        b1=jnp.zeros((4 * C,), DTYPE),
        grn_g=jnp.zeros((4 * C,), DTYPE),          # ConvNeXt-V2 GRN init is zeros
        grn_b=jnp.zeros((4 * C,), DTYPE),
        w2=_xavier(next(kit), (4 * C, C), 4 * C, C),
        b2=jnp.zeros((C,), DTYPE),
    )


def init_params(key, image_shape, feature_maps, cn_layers, stem_k, output_channels):
    kit = iter(jax.random.split(key, 128))
    depth = len(feature_maps) - 1
    cin, fm0 = image_shape[-1], feature_maps[0]
    P = {}
    P["stem"] = dict(
        w=_xavier(next(kit), (stem_k * stem_k * cin, fm0),
                  stem_k * stem_k * cin, stem_k * stem_k * fm0),
        b=jnp.zeros((fm0,), DTYPE),
        ln_g=jnp.ones((fm0,), DTYPE), ln_b=jnp.zeros((fm0,), DTYPE))
    P["down"], P["pool"] = [], []
    for i in range(depth):
        C = feature_maps[i]
        P["down"].append([_cn_block_params(kit, C) for _ in range(cn_layers[i])])
        P["pool"].append(dict(
            ln_g=jnp.ones((C,), DTYPE), ln_b=jnp.zeros((C,), DTYPE),
            w=_xavier(next(kit), (4 * C, feature_maps[i + 1]), 4 * C, 4 * feature_maps[i + 1]),
            b=jnp.zeros((feature_maps[i + 1],), DTYPE)))
    P["bottleneck"] = [_cn_block_params(kit, feature_maps[-1]) for _ in range(cn_layers[-1])]
    P["up"] = []
    in_ch = feature_maps[-1]
    for i in range(depth - 1, -1, -1):
        out_ch = feature_maps[i]
        P["up"].append(dict(
            w=_xavier(next(kit), (in_ch, 4 * out_ch), 4 * in_ch, 4 * out_ch),
            b=jnp.zeros((out_ch,), DTYPE),
            ln_g=jnp.ones((out_ch,), DTYPE), ln_b=jnp.zeros((out_ch,), DTYPE),
            red_w=_xavier(next(kit), (2 * out_ch, out_ch), 2 * out_ch, out_ch),
            red_b=jnp.zeros((out_ch,), DTYPE),
            blocks=[_cn_block_params(kit, out_ch) for _ in range(cn_layers[i])]))
        in_ch = out_ch
    P["final_up"] = dict(
        w=_xavier(next(kit), (fm0, stem_k * stem_k * fm0),
                  stem_k * stem_k * fm0, stem_k * stem_k * fm0),
        b=jnp.zeros((fm0,), DTYPE),
        ln_g=jnp.ones((fm0,), DTYPE), ln_b=jnp.zeros((fm0,), DTYPE))
    P["last"] = dict(
        w=_xavier(next(kit), (fm0, output_channels[0]), fm0, output_channels[0]),
        b=jnp.zeros((output_channels[0],), DTYPE))
    return P


# ----------------------------------------------------------------------------
# Full forward (mirrors U_NeXt_V2.forward, single-head, no contrast, 2D, eval)
# ----------------------------------------------------------------------------
def unext_v2_forward(x_nchw, P, feature_maps, cn_layers, stem_k):
    x = jnp.transpose(x_nchw, (0, 2, 3, 1))                  # NCHW -> NHWC
    depth = len(feature_maps) - 1

    # stem: strided conv (k==stride) + LayerNorm(channels), fused
    x = conv_patch_ln(x, P["stem"]["w"], P["stem"]["b"], stem_k, feature_maps[0],
                      P["stem"]["ln_g"], P["stem"]["ln_b"])

    blocks = []
    for i in range(depth):
        for bp in P["down"][i]:
            x = pallas_convnext_block(x, bp)
        blocks.append(x)
        dp = P["pool"][i]
        x = ln_conv_patch(x, dp["ln_g"], dp["ln_b"], dp["w"], dp["b"], 2, feature_maps[i + 1])

    for bp in P["bottleneck"]:
        x = pallas_convnext_block(x, bp)

    for j, i in enumerate(range(depth - 1, -1, -1)):
        up = P["up"][j]
        bridge = blocks[-j - 1]
        x = convtranspose_ln(x, up["w"], up["b"], 2, feature_maps[i], up["ln_g"], up["ln_b"])
        x = concat_reduce1x1(x, bridge, up["red_w"], up["red_b"])   # fused cat + 1x1 reduce
        for bp in up["blocks"]:
            x = pallas_convnext_block(x, bp)

    fp = P["final_up"]
    x = convtranspose_ln(x, fp["w"], fp["b"], stem_k, feature_maps[0],
                         fp["ln_g"], fp["ln_b"])

    out = conv1x1(x, P["last"]["w"], P["last"]["b"])          # 1x1 head -> 'pred'
    return jnp.transpose(out, (0, 3, 1, 2))                   # NHWC -> NCHW


# ----------------------------------------------------------------------------
# Pure-JAX reference of one ConvNeXt-V2 block (for self-checking the Pallas kernels)
# ----------------------------------------------------------------------------
def cnblock_reference(x, p):
    f = lambda a: a.astype(jnp.float32)
    B, H, W, C = x.shape
    xf = f(x)
    w = f(p["dw_w"])
    xp = jnp.pad(xf, ((0, 0), (3, 3), (3, 3), (0, 0)))
    y = sum(xp[:, ky:ky + H, kx:kx + W, :] * w[ky, kx]
            for ky in range(7) for kx in range(7)) + f(p["dw_b"])
    mu = y.mean(-1, keepdims=True)
    var = ((y - mu) ** 2).mean(-1, keepdims=True)
    yn = (y - mu) * jax.lax.rsqrt(var + LN_EPS) * f(p["ln_g"]) + f(p["ln_b"])
    h = jnp.dot(yn.reshape(-1, C), f(p["w1"]),
                precision="highest").reshape(B, H, W, 4 * C) + f(p["b1"])
    h = _gelu_tanh(h)
    gx = jnp.sqrt(jnp.sum(h * h, axis=(1, 2), keepdims=True))
    nx = gx / (jnp.mean(gx, axis=-1, keepdims=True) + GRN_EPS)
    h = f(p["grn_g"]) * (h * nx) + f(p["grn_b"]) + h
    out = jnp.dot(h.reshape(-1, 4 * C), f(p["w2"]),
                  precision="highest").reshape(B, H, W, C) + f(p["b2"])
    return (out + xf).astype(x.dtype)


# ----------------------------------------------------------------------------
if __name__ == "__main__":
    feature_maps = [32, 64, 128]       # small depth-2 U-NeXt (default widths, fewer levels)
    cn_layers = [1, 1, 1]
    stem_k = 2
    image_shape = (16, 16, 1)          # (y, x, channels)
    batch = 2

    _probe_buffered()                  # decide single-buffered weight specs before tracing

    key = jax.random.PRNGKey(0)
    kp, kx, kg1, kg2, kb = jax.random.split(key, 5)
    P = init_params(kp, image_shape, feature_maps, cn_layers, stem_k, output_channels=[1])
    x = jax.random.normal(kx, (batch, image_shape[-1], image_shape[0], image_shape[1]), DTYPE)

    # ---- self-check: fused block vs HW-tiled two-pass-GRN block vs pure-JAX reference
    bp = dict(P["down"][0][0])
    bp["grn_g"] = jax.random.normal(kg1, bp["grn_g"].shape, DTYPE) * 0.5   # exercise the GRN
    bp["grn_b"] = jax.random.normal(kg2, bp["grn_b"].shape, DTYPE) * 0.5
    hb, wb = image_shape[0] // stem_k, image_shape[1] // stem_k
    xblk = jax.random.normal(kb, (batch, hb, wb, feature_maps[0]), DTYPE)
    ref = cnblock_reference(xblk, bp)
    fused = convnext_block_fused(xblk, bp)
    tiled = convnext_block_tiled(xblk, bp, row_tile=24)   # >1 HW tile + a ragged tail
    jax.block_until_ready((ref, fused, tiled))
    tol = 0.05 + 0.05 * float(jnp.max(jnp.abs(ref.astype(jnp.float32))))
    assert float(jnp.max(jnp.abs(fused.astype(jnp.float32) - ref.astype(jnp.float32)))) < tol
    assert float(jnp.max(jnp.abs(tiled.astype(jnp.float32) - ref.astype(jnp.float32)))) < tol

    # ---- full forward
    fwd = jax.jit(functools.partial(unext_v2_forward,
                                    feature_maps=feature_maps,
                                    cn_layers=cn_layers,
                                    stem_k=stem_k))
    out = fwd(x, P)
    jax.block_until_ready(out)
    assert out.shape == (batch, 1, image_shape[0], image_shape[1]), out.shape
    assert bool(jnp.all(jnp.isfinite(out.astype(jnp.float32))))
    print("KERNEL_OK")
</pallas_src>

<mosaic_0001>
module attributes {stable_mosaic.version = 11 : i64} {
  func.func @_k(%arg0: i32, %arg1: memref<8x128xf32, #tpu.memory_space<vmem>>, %arg2: memref<8x128xf32, #tpu.memory_space<vmem>>, %arg3: memref<8x128xf32, #tpu.memory_space<vmem>>) attributes {dimension_semantics = [#tpu.dimension_semantics<arbitrary>], iteration_bounds = array<i64: 2>, scalar_prefetch = 0 : i64, scratch_operands = 0 : i64, tpu.core_type = #tpu.core_type<tc>, window_params = [{transform_indices = @transform_0, window_bounds = array<i64: 8, 128>}, {pipeline_mode = #tpu.pipeline_mode<synchronous>, transform_indices = @transform_1, window_bounds = array<i64: 8, 128>}, {transform_indices = @transform_2, window_bounds = array<i64: 8, 128>}]} {
    %c0 = arith.constant 0 : index
    %c0_0 = arith.constant 0 : index
    %0 = vector.load %arg1[%c0, %c0_0] : memref<8x128xf32, #tpu.memory_space<vmem>>, vector<8x128xf32>
    %c0_1 = arith.constant 0 : index
    %c0_2 = arith.constant 0 : index
    %1 = vector.load %arg2[%c0_1, %c0_2] : memref<8x128xf32, #tpu.memory_space<vmem>>, vector<8x128xf32>
    %2 = arith.addf %0, %1 : vector<8x128xf32>
    %c0_3 = arith.constant 0 : index
    %c0_4 = arith.constant 0 : index
    %3 = vector.load %arg3[%c0_3, %c0_4] : memref<8x128xf32, #tpu.memory_space<vmem>>, vector<8x128xf32>
    tpu.vector_store %arg3[%c0_3, %c0_4], %2 {strides = array<i32>} : memref<8x128xf32, #tpu.memory_space<vmem>>, vector<8x128xf32>,
    return
  }
  func.func @transform_0(%arg0: i32) -> (i32, i32) {
    %c0_i32 = arith.constant 0 : i32
    %c0_i32_0 = arith.constant 0 : i32
    return %arg0, %c0_i32 : i32, i32
  }
  func.func @transform_1(%arg0: i32) -> (i32, i32) {
    %c0_i32 = arith.constant 0 : i32
    %c0_i32_0 = arith.constant 0 : i32
    %c0_i32_1 = arith.constant 0 : i32
    return %c0_i32, %c0_i32_0 : i32, i32
  }
  func.func @transform_2(%arg0: i32) -> (i32, i32) {
    %c0_i32 = arith.constant 0 : i32
    %c0_i32_0 = arith.constant 0 : i32
    return %arg0, %c0_i32 : i32, i32
  }
}

module attributes {stable_mosaic.version = 11 : i64} {
  func.func @_cnblock_fused_kernel(%arg0: i32, %arg1: memref<1x64x32xbf16, #tpu.memory_space<vmem>>, %arg2: memref<64x1xi32, #tpu.memory_space<vmem>>, %arg3: memref<64x1xi32, #tpu.memory_space<vmem>>, %arg4: memref<49x32xbf16, #tpu.memory_space<vmem>>, %arg5: memref<1x32xbf16, #tpu.memory_space<vmem>>, %arg6: memref<1x32xbf16, #tpu.memory_space<vmem>>, %arg7: memref<1x32xbf16, #tpu.memory_space<vmem>>, %arg8: memref<32x128xbf16, #tpu.memory_space<vmem>>, %arg9: memref<1x128xbf16, #tpu.memory_space<vmem>>, %arg10: memref<1x128xbf16, #tpu.memory_space<vmem>>, %arg11: memref<1x128xbf16, #tpu.memory_space<vmem>>, %arg12: memref<128x32xbf16, #tpu.memory_space<vmem>>, %arg13: memref<1x32xbf16, #tpu.memory_space<vmem>>, %arg14: memref<1x64x32xbf16, #tpu.memory_space<vmem>>) attributes {dimension_semantics = [#tpu.dimension_semantics<parallel>], iteration_bounds = array<i64: 2>, scalar_prefetch = 0 : i64, scratch_operands = 0 : i64, tpu.core_type = #tpu.core_type<tc>, window_params = [{transform_indices = @transform_0, window_bounds = array<i64: 1, 64, 32>}, {pipeline_mode = #tpu.pipeline_mode<synchronous>, transform_indices = @transform_1, window_bounds = array<i64: 64, 1>}, {pipeline_mode = #tpu.pipeline_mode<synchronous>, transform_indices = @transform_2, window_bounds = array<i64: 64, 1>}, {pipeline_mode = #tpu.pipeline_mode<synchronous>, transform_indices = @transform_3, window_bounds = array<i64: 49, 32>}, {pipeline_mode = #tpu.pipeline_mode<synchronous>, transform_indices = @transform_4, window_bounds = array<i64: 1, 32>}, {pipeline_mode = #tpu.pipeline_mode<synchronous>, transform_indices = @transform_5, window_bounds = array<i64: 1, 32>}, {pipeline_mode = #tpu.pipeline_mode<synchronous>, transform_indices = @transform_6, window_bounds = array<i64: 1, 32>}, {pipeline_mode = #tpu.pipeline_mode<synchronous>, transform_indices = @transform_7, window_bounds = array<i64: 32, 128>}, {pipeline_mode = #tpu.pipeline_mode<synchronous>, transform_indices = @transform_8, window_bounds = array<i64: 1, 128>}, {pipeline_mode = #tpu.pipeline_mode<synchronous>, transform_indices = @transform_9, window_bounds = array<i64: 1, 128>}, {pipeline_mode = #tpu.pipeline_mode<synchronous>, transform_indices = @transform_10, window_bounds = array<i64: 1, 128>}, {pipeline_mode = #tpu.pipeline_mode<synchronous>, transform_indices = @transform_11, window_bounds = array<i64: 128, 32>}, {pipeline_mode = #tpu.pipeline_mode<synchronous>, transform_indices = @transform_12, window_bounds = array<i64: 1, 32>}, {transform_indices = @transform_13, window_bounds = array<i64: 1, 64, 32>}]} {
    %c0 = arith.constant 0 : index
    %c0_0 = arith.constant 0 : index
    %c0_1 = arith.constant 0 : index
    %0 = vector.load %arg1[%c0, %c0_0, %c0_1] : memref<1x64x32xbf16, #tpu.memory_space<vmem>>, vector<1x64x32xbf16>
    %1 = vector.shape_cast %0 : vector<1x64x32xbf16> to vector<64x32xbf16>
    %2 = arith.extf %1 : vector<64x32xbf16> to vector<64x32xf32>
    %c0_2 = arith.constant 0 : index
    %c0_3 = arith.constant 0 : index
    %3 = vector.load %arg2[%c0_2, %c0_3] : memref<64x1xi32, #tpu.memory_space<vmem>>, vector<64x1xi32>
    %c0_4 = arith.constant 0 : index
    %c0_5 = arith.constant 0 : index
    %4 = vector.load %arg3[%c0_4, %c0_5] : memref<64x1xi32, #tpu.memory_space<vmem>>, vector<64x1xi32>
    %c0_6 = arith.constant 0 : index
    %c0_7 = arith.constant 0 : index
    %5 = vector.load %arg4[%c0_6, %c0_7] : memref<49x32xbf16, #tpu.memory_space<vmem>>, vector<49x32xbf16>
    %6 = arith.extf %5 : vector<49x32xbf16> to vector<49x32xf32>
    %cst = arith.constant 0.000000e+00 : f32
    %7 = vector.broadcast %cst : f32 to vector<64x32xf32>
    %c24_i32 = arith.constant 24 : i32
    %8 = tpu.dynamic_rotate %2 by %c24_i32 dim 0 : vector<64x32xf32>, i32 -> vector<64x32xf32>
    %c-3_i32 = arith.constant -3 : i32
    %9 = vector.broadcast %c-3_i32 : i32 to vector<64x1xi32>
    %10 = arith.addi %3, %9 : vector<64x1xi32>
    %c0_i32 = arith.constant 0 : i32
    %11 = vector.broadcast %c0_i32 : i32 to vector<64x1xi32>
    %12 = arith.cmpi sge, %10, %11 : vector<64x1xi32>
    %c-3_i32_8 = arith.constant -3 : i32
    %13 = vector.broadcast %c-3_i32_8 : i32 to vector<64x1xi32>
    %14 = arith.addi %3, %13 : vector<64x1xi32>
    %c8_i32 = arith.constant 8 : i32
    %15 = vector.broadcast %c8_i32 : i32 to vector<64x1xi32>
    %16 = arith.cmpi slt, %14, %15 : vector<64x1xi32>
    %17 = arith.andi %12, %16 : vector<64x1xi1>
    %cst_9 = arith.constant 0.000000e+00 : f32
    %18 = vector.broadcast %cst_9 : f32 to vector<64x32xf32>
    %c3_i32 = arith.constant 3 : i32
    %19 = tpu.dynamic_rotate %8 by %c3_i32 dim 0 : vector<64x32xf32>, i32 -> vector<64x32xf32>
    %c-3_i32_10 = arith.constant -3 : i32
    %20 = vector.broadcast %c-3_i32_10 : i32 to vector<64x1xi32>
    %21 = arith.addi %4, %20 : vector<64x1xi32>
    %c0_i32_11 = arith.constant 0 : i32
    %22 = vector.broadcast %c0_i32_11 : i32 to vector<64x1xi32>
    %23 = arith.cmpi sge, %21, %22 : vector<64x1xi32>
    %c-3_i32_12 = arith.constant -3 : i32
    %24 = vector.broadcast %c-3_i32_12 : i32 to vector<64x1xi32>
    %25 = arith.addi %4, %24 : vector<64x1xi32>
    %c8_i32_13 = arith.constant 8 : i32
    %26 = vector.broadcast %c8_i32_13 : i32 to vector<64x1xi32>
    %27 = arith.cmpi slt, %25, %26 : vector<64x1xi32>
    %28 = arith.andi %23, %27 : vector<64x1xi1>
    %cst_14 = arith.constant 0.000000e+00 : f32
    %29 = vector.shape_cast %28 : vector<64x1xi1> to vector<64x1xi1>
    %30 = vector.broadcast %29 : vector<64x1xi1> to vector<64x32xi1>
    %31 = vector.broadcast %cst_14 : f32 to vector<64x32xf32>
    %32 = arith.select %30, %19, %31 : vector<64x32xi1>, vector<64x32xf32>
    %33 = vector.extract_strided_slice %6 {offsets = [0, 0], sizes = [1, 32], strides = [1, 1]} : vector<49x32xf32> to vector<1x32xf32>
    %34 = vector.broadcast %33 : vector<1x32xf32> to vector<64x32xf32>
    %35 = arith.mulf %32, %34 : vector<64x32xf32>
    %36 = arith.addf %18, %35 : vector<64x32xf32>
    %c2_i32 = arith.constant 2 : i32
    %37 = tpu.dynamic_rotate %8 by %c2_i32 dim 0 : vector<64x32xf32>, i32 -> vector<64x32xf32>
    %c-2_i32 = arith.constant -2 : i32
    %38 = vector.broadcast %c-2_i32 : i32 to vector<64x1xi32>
    %39 = arith.addi %4, %38 : vector<64x1xi32>
    %c0_i32_15 = arith.constant 0 : i32
    %40 = vector.broadcast %c0_i32_15 : i32 to vector<64x1xi32>
    %41 = arith.cmpi sge, %39, %40 : vector<64x1xi32>
    %c-2_i32_16 = arith.constant -2 : i32
    %42 = vector.broadcast %c-2_i32_16 : i32 to vector<64x1xi32>
    %43 = arith.addi %4, %42 : vector<64x1xi32>
    %c8_i32_17 = arith.constant 8 : i32
    %44 = vector.broadcast %c8_i32_17 : i32 to vector<64x1xi32>
    %45 = arith.cmpi slt, %43, %44 : vector<64x1xi32>
    %46 = arith.andi %41, %45 : vector<64x1xi1>
    %cst_18 = arith.constant 0.000000e+00 : f32
    %47 = vector.shape_cast %46 : vector<64x1xi1> to vector<64x1xi1>
    %48 = vector.broadcast %47 : vector<64x1xi1> to vector<64x32xi1>
    %49 = vector.broadcast %cst_18 : f32 to vector<64x32xf32>
    %50 = arith.select %48, %37, %49 : vector<64x32xi1>, vector<64x32xf32>
    %51 = vector.extract_strided_slice %6 {offsets = [1, 0], sizes = [1, 32], strides = [1, 1]} : vector<49x32xf32> to vector<1x32xf32>
    %52 = vector.broadcast %51 : vector<1x32xf32> to vector<64x32xf32>
    %53 = arith.mulf %50, %52 : vector<64x32xf32>
    %54 = arith.addf %36, %53 : vector<64x32xf32>
    %c1_i32 = arith.constant 1 : i32
    %55 = tpu.dynamic_rotate %8 by %c1_i32 dim 0 : vector<64x32xf32>, i32 -> vector<64x32xf32>
    %c-1_i32 = arith.constant -1 : i32
    %56 = vector.broadcast %c-1_i32 : i32 to vector<64x1xi32>
    %57 = arith.addi %4, %56 : vector<64x1xi32>
    %c0_i32_19 = arith.constant 0 : i32
    %58 = vector.broadcast %c0_i32_19 : i32 to vector<64x1xi32>
    %59 = arith.cmpi sge, %57, %58 : vector<64x1xi32>
    %c-1_i32_20 = arith.constant -1 : i32
    %60 = vector.broadcast %c-1_i32_20 : i32 to vector<64x1xi32>
    %61 = arith.addi %4, %60 : vector<64x1xi32>
    %c8_i32_21 = arith.constant 8 : i32
    %62 = vector.broadcast %c8_i32_21 : i32 to vector<64x1xi32>
    %63 = arith.cmpi slt, %61, %62 : vector<64x1xi32>
    %64 = arith.andi %59, %63 : vector<64x1xi1>
    %cst_22 = arith.constant 0.000000e+00 : f32
    %65 = vector.shape_cast %64 : vector<64x1xi1> to vector<64x1xi1>
    %66 = vector.broadcast %65 : vector<64x1xi1> to vector<64x32xi1>
    %67 = vector.broadcast %cst_22 : f32 to vector<64x32xf32>
    %68 = arith.select %66, %55, %67 : vector<64x32xi1>, vector<64x32xf32>
    %69 = vector.extract_strided_slice %6 {offsets = [2, 0], sizes = [1, 32], strides = [1, 1]} : vector<49x32xf32> to vector<1x32xf32>
    %70 = vector.broadcast %69 : vector<1x32xf32> to vector<64x32xf32>
    %71 = arith.mulf %68, %70 : vector<64x32xf32>
    %72 = arith.addf %54, %71 : vector<64x32xf32>
    %c0_i32_23 = arith.constant 0 : i32
    %73 = vector.broadcast %c0_i32_23 : i32 to vector<64x1xi32>
    %74 = arith.addi %4, %73 : vector<64x1xi32>
    %c0_i32_24 = arith.constant 0 : i32
    %75 = vector.broadcast %c0_i32_24 : i32 to vector<64x1xi32>
    %76 = arith.cmpi sge, %74, %75 : vector<64x1xi32>
    %c0_i32_25 = arith.constant 0 : i32
    %77 = vector.broadcast %c0_i32_25 : i32 to vector<64x1xi32>
    %78 = arith.addi %4, %77 : vector<64x1xi32>
    %c8_i32_26 = arith.constant 8 : i32
    %79 = vector.broadcast %c8_i32_26 : i32 to vector<64x1xi32>
    %80 = arith.cmpi slt, %78, %79 : vector<64x1xi32>
    %81 = arith.andi %76, %80 : vector<64x1xi1>
    %cst_27 = arith.constant 0.000000e+00 : f32
    %82 = vector.shape_cast %81 : vector<64x1xi1> to vector<64x1xi1>
    %83 = vector.broadcast %82 : vector<64x1xi1> to vector<64x32xi1>
    %84 = vector.broadcast %cst_27 : f32 to vector<64x32xf32>
    %85 = arith.select %83, %8, %84 : vector<64x32xi1>, vector<64x32xf32>
    %86 = vector.extract_strided_slice %6 {offsets = [3, 0], sizes = [1, 32], strides = [1, 1]} : vector<49x32xf32> to vector<1x32xf32>
    %87 = vector.broadcast %86 : vector<1x32xf32> to vector<64x32xf32>
    %88 = arith.mulf %85, %87 : vector<64x32xf32>
    %89 = arith.addf %72, %88 : vector<64x32xf32>
    %c63_i32 = arith.constant 63 : i32
    %90 = tpu.dynamic_rotate %8 by %c63_i32 dim 0 : vector<64x32xf32>, i32 -> vector<64x32xf32>
    %c1_i32_28 = arith.constant 1 : i32
    %91 = vector.broadcast %c1_i32_28 : i32 to vector<64x1xi32>
    %92 = arith.addi %4, %91 : vector<64x1xi32>
    %c0_i32_29 = arith.constant 0 : i32
    %93 = vector.broadcast %c0_i32_29 : i32 to vector<64x1xi32>
    %94 = arith.cmpi sge, %92, %93 : vector<64x1xi32>
    %c1_i32_30 = arith.constant 1 : i32
    %95 = vector.broadcast %c1_i32_30 : i32 to vector<64x1xi32>
    %96 = arith.addi %4, %95 : vector<64x1xi32>
    %c8_i32_31 = arith.constant 8 : i32
    %97 = vector.broadcast %c8_i32_31 : i32 to vector<64x1xi32>
    %98 = arith.cmpi slt, %96, %97 : vector<64x1xi32>
    %99 = arith.andi %94, %98 : vector<64x1xi1>
    %cst_32 = arith.constant 0.000000e+00 : f32
    %100 = vector.shape_cast %99 : vector<64x1xi1> to vector<64x1xi1>
    %101 = vector.broadcast %100 : vector<64x1xi1> to vector<64x32xi1>
    %102 = vector.broadcast %cst_32 : f32 to vector<64x32xf32>
    %103 = arith.select %101, %90, %102 : vector<64x32xi1>, vector<64x32xf32>
    %104 = vector.extract_strided_slice %6 {offsets = [4, 0], sizes = [1, 32], strides = [1, 1]} : vector<49x32xf32> to vector<1x32xf32>
    %105 = vector.broadcast %104 : vector<1x32xf32> to vector<64x32xf32>
    %106 = arith.mulf %103, %105 : vector<64x32xf32>
    %107 = arith.addf %89, %106 : vector<64x32xf32>
    %c62_i32 = arith.constant 62 : i32
    %108 = tpu.dynamic_rotate %8 by %c62_i32 dim 0 : vector<64x32xf32>, i32 -> vector<64x32xf32>
    %c2_i32_33 = arith.constant 2 : i32
    %109 = vector.broadcast %c2_i32_33 : i32 to vector<64x1xi32>
    %110 = arith.addi %4, %109 : vector<64x1xi32>
    %c0_i32_34 = arith.constant 0 : i32
    %111 = vector.broadcast %c0_i32_34 : i32 to vector<64x1xi32>
    %112 = arith.cmpi sge, %110, %111 : vector<64x1xi32>
    %c2_i32_35 = arith.constant 2 : i32
    %113 = vector.broadcast %c2_i32_35 : i32 to vector<64x1xi32>
    %114 = arith.addi %4, %113 : vector<64x1xi32>
    %c8_i32_36 = arith.constant 8 : i32
    %115 = vector.broadcast %c8_i32_36 : i32 to vector<64x1xi32>
    %116 = arith.cmpi slt, %114, %115 : vector<64x1xi32>
    %117 = arith.andi %112, %116 : vector<64x1xi1>
    %cst_37 = arith.constant 0.000000e+00 : f32
    %118 = vector.shape_cast %117 : vector<64x1xi1> to vector<64x1xi1>
    %119 = vector.broadcast %118 : vector<64x1xi1> to vector<64x32xi1>
    %120 = vector.broadcast %cst_37 : f32 to vector<64x32xf32>
    %121 = arith.select %119, %108, %120 : vector<64x32xi1>, vector<64x32xf32>
    %122 = vector.extract_strided_slice %6 {offsets = [5, 0], sizes = [1, 32], strides = [1, 1]} : vector<49x32xf32> to vector<1x32xf32>
    %123 = vector.broadcast %122 : vector<1x32xf32> to vector<64x32xf32>
    %124 = arith.mulf %121, %123 : vector<64x32xf32>
    %125 = arith.addf %107, %124 : vector<64x32xf32>
    %c61_i32 = arith.constant 61 : i32
    %126 = tpu.dynamic_rotate %8 by %c61_i32 dim 0 : vector<64x32xf32>, i32 -> vector<64x32xf32>
    %c3_i32_38 = arith.constant 3 : i32
    %127 = vector.broadcast %c3_i32_38 : i32 to vector<64x1xi32>
    %128 = arith.addi %4, %127 : vector<64x1xi32>
    %c0_i32_39 = arith.constant 0 : i32
    %129 = vector.broadcast %c0_i32_39 : i32 to vector<64x1xi32>
    %130 = arith.cmpi sge, %128, %129 : vector<64x1xi32>
    %c3_i32_40 = arith.constant 3 : i32
    %131 = vector.broadcast %c3_i32_40 : i32 to vector<64x1xi32>
    %132 = arith.addi %4, %131 : vector<64x1xi32>
    %c8_i32_41 = arith.constant 8 : i32
    %133 = vector.broadcast %c8_i32_41 : i32 to vector<64x1xi32>
    %134 = arith.cmpi slt, %132, %133 : vector<64x1xi32>
    %135 = arith.andi %130, %134 : vector<64x1xi1>
    %cst_42 = arith.constant 0.000000e+00 : f32
    %136 = vector.shape_cast %135 : vector<64x1xi1> to vector<64x1xi1>
    %137 = vector.broadcast %136 : vector<64x1xi1> to vector<64x32xi1>
    %138 = vector.broadcast %cst_42 : f32 to vector<64x32xf32>
    %139 = arith.select %137, %126, %138 : vector<64x32xi1>, vector<64x32xf32>
    %140 = vector.extract_strided_slice %6 {offsets = [6, 0], sizes = [1, 32], strides = [1, 1]} : vector<49x32xf32> to vector<1x32xf32>
    %141 = vector.broadcast %140 : vector<1x32xf32> to vector<64x32xf32>
    %142 = arith.mulf %139, %141 : vector<64x32xf32>
    %143 = arith.addf %125, %142 : vector<64x32xf32>
    %cst_43 = arith.constant 0.000000e+00 : f32
    %144 = vector.shape_cast %17 : vector<64x1xi1> to vector<64x1xi1>
    %145 = vector.broadcast %144 : vector<64x1xi1> to vector<64x32xi1>
    %146 = vector.broadcast %cst_43 : f32 to vector<64x32xf32>
    %147 = arith.select %145, %143, %146 : vector<64x32xi1>, vector<64x32xf32>
    %148 = arith.addf %7, %147 : vector<64x32xf32>
    %c16_i32 = arith.constant 16 : i32
    %149 = tpu.dynamic_rotate %2 by %c16_i32 dim 0 : vector<64x32xf32>, i32 -> vector<64x32xf32>
    %c-2_i32_44 = arith.constant -2 : i32
    %150 = vector.broadcast %c-2_i32_44 : i32 to vector<64x1xi32>
    %151 = arith.addi %3, %150 : vector<64x1xi32>
    %c0_i32_45 = arith.constant 0 : i32
    %152 = vector.broadcast %c0_i32_45 : i32 to vector<64x1xi32>
    %153 = arith.cmpi sge, %151, %152 : vector<64x1xi32>
    %c-2_i32_46 = arith.constant -2 : i32
    %154 = vector.broadcast %c-2_i32_46 : i32 to vector<64x1xi32>
    %155 = arith.addi %3, %154 : vector<64x1xi32>
    %c8_i32_47 = arith.constant 8 : i32
    %156 = vector.broadcast %c8_i32_47 : i32 to vector<64x1xi32>
    %157 = arith.cmpi slt, %155, %156 : vector<64x1xi32>
    %158 = arith.andi %153, %157 : vector<64x1xi1>
    %cst_48 = arith.constant 0.000000e+00 : f32
    %159 = vector.broadcast %cst_48 : f32 to vector<64x32xf32>
    %c3_i32_49 = arith.constant 3 : i32
    %160 = tpu.dynamic_rotate %149 by %c3_i32_49 dim 0 : vector<64x32xf32>, i32 -> vector<64x32xf32>
    %c-3_i32_50 = arith.constant -3 : i32
    %161 = vector.broadcast %c-3_i32_50 : i32 to vector<64x1xi32>
    %162 = arith.addi %4, %161 : vector<64x1xi32>
    %c0_i32_51 = arith.constant 0 : i32
    %163 = vector.broadcast %c0_i32_51 : i32 to vector<64x1xi32>
    %164 = arith.cmpi sge, %162, %163 : vector<64x1xi32>
    %c-3_i32_52 = arith.constant -3 : i32
    %165 = vector.broadcast %c-3_i32_52 : i32 to vector<64x1xi32>
    %166 = arith.addi %4, %165 : vector<64x1xi32>
    %c8_i32_53 = arith.constant 8 : i32
    %167 = vector.broadcast %c8_i32_53 : i32 to vector<64x1xi32>
    %168 = arith.cmpi slt, %166, %167 : vector<64x1xi32>
    %169 = arith.andi %164, %168 : vector<64x1xi1>
    %cst_54 = arith.constant 0.000000e+00 : f32
    %170 = vector.shape_cast %169 : vector<64x1xi1> to vector<64x1xi1>
    %171 = vector.broadcast %170 : vector<64x1xi1> to vector<64x32xi1>
    %172 = vector.broadcast %cst_54 : f32 to vector<64x32xf32>
    %173 = arith.select %171, %160, %172 : vector<64x32xi1>, vector<64x32xf32>
    %174 = vector.extract_strided_slice %6 {offsets = [7, 0], sizes = [1, 32], strides = [1, 1]} : vector<49x32xf32> to vector<1x32xf32>
    %175 = vector.broadcast %174 : vector<1x32xf32> to vector<64x32xf32>
    %176 = arith.mulf %173, %175 : vector<64x32xf32>
    %177 = arith.addf %159, %176 : vector<64x32xf32>
    %c2_i32_55 = arith.constant 2 : i32
    %178 = tpu.dynamic_rotate %149 by %c2_i32_55 dim 0 : vector<64x32xf32>, i32 -> vector<64x32xf32>
    %c-2_i32_56 = arith.constant -2 : i32
    %179 = vector.broadcast %c-2_i32_56 : i32 to vector<64x1xi32>
    %180 = arith.addi %4, %179 : vector<64x1xi32>
    %c0_i32_57 = arith.constant 0 : i32
    %181 = vector.broadcast %c0_i32_57 : i32 to vector<64x1xi32>
    %182 = arith.cmpi sge, %180, %181 : vector<64x1xi32>
    %c-2_i32_58 = arith.constant -2 : i32
    %183 = vector.broadcast %c-2_i32_58 : i32 to vector<64x1xi32>
    %184 = arith.addi %4, %183 : vector<64x1xi32>
    %c8_i32_59 = arith.constant 8 : i32
    %185 = vector.broadcast %c8_i32_59 : i32 to vector<64x1xi32>
    %186 = arith.cmpi slt, %184, %185 : vector<64x1xi32>
    %187 = arith.andi %182, %186 : vector<64x1xi1>
    %cst_60 = arith.constant 0.000000e+00 : f32
    %188 = vector.shape_cast %187 : vector<64x1xi1> to vector<64x1xi1>
    %189 = vector.broadcast %188 : vector<64x1xi1> to vector<64x32xi1>
    %190 = vector.broadcast %cst_60 : f32 to vector<64x32xf32>
    %191 = arith.select %189, %178, %190 : vector<64x32xi1>, vector<64x32xf32>
    %192 = vector.extract_strided_slice %6 {offsets = [8, 0], sizes = [1, 32], strides = [1, 1]} : vector<49x32xf32> to vector<1x32xf32>
    %193 = vector.broadcast %192 : vector<1x32xf32> to vector<64x32xf32>
    %194 = arith.mulf %191, %193 : vector<64x32xf32>
    %195 = arith.addf %177, %194 : vector<64x32xf32>
    %c1_i32_61 = arith.constant 1 : i32
    %196 = tpu.dynamic_rotate %149 by %c1_i32_61 dim 0 : vector<64x32xf32>, i32 -> vector<64x32xf32>
    %c-1_i32_62 = arith.constant -1 : i32
    %197 = vector.broadcast %c-1_i32_62 : i32 to vector<64x1xi32>
    %198 = arith.addi %4, %197 : vector<64x1xi32>
    %c0_i32_63 = arith.constant 0 : i32
    %199 = vector.broadcast %c0_i32_63 : i32 to vector<64x1xi32>
    %200 = arith.cmpi sge, %198, %199 : vector<64x1xi32>
    %c-1_i32_64 = arith.constant -1 : i32
    %201 = vector.broadcast %c-1_i32_64 : i32 to vector<64x1xi32>
    %202 = arith.addi %4, %201 : vector<64x1xi32>
    %c8_i32_65 = arith.constant 8 : i32
    %203 = vector.broadcast %c8_i32_65 : i32 to vector<64x1xi32>
    %204 = arith.cmpi slt, %202, %203 : vector<64x1xi32>
    %205 = arith.andi %200, %204 : vector<64x1xi1>
    %cst_66 = arith.constant 0.000000e+00 : f32
    %206 = vector.shape_cast %205 : vector<64x1xi1> to vector<64x1xi1>
    %207 = vector.broadcast %206 : vector<64x1xi1> to vector<64x32xi1>
    %208 = vector.broadcast %cst_66 : f32 to vector<64x32xf32>
    %209 = arith.select %207, %196, %208 : vector<64x32xi1>, vector<64x32xf32>
    %210 = vector.extract_strided_slice %6 {offsets = [9, 0], sizes = [1, 32], strides = [1, 1]} : vector<49x32xf32> to vector<1x32xf32>
    %211 = vector.broadcast %210 : vector<1x32xf32> to vector<64x32xf32>
    %212 = arith.mulf %209, %211 : vector<64x32xf32>
    %213 = arith.addf %195, %212 : vector<64x32xf32>
    %c0_i32_67 = arith.constant 0 : i32
    %214 = vector.broadcast %c0_i32_67 : i32 to vector<64x1xi32>
    %215 = arith.addi %4, %214 : vector<64x1xi32>
    %c0_i32_68 = arith.constant 0 : i32
    %216 = vector.broadcast %c0_i32_68 : i32 to vector<64x1xi32>
    %217 = arith.cmpi sge, %215, %216 : vector<64x1xi32>
    %c0_i32_69 = arith.constant 0 : i32
    %218 = vector.broadcast %c0_i32_69 : i32 to vector<64x1xi32>
    %219 = arith.addi %4, %218 : vector<64x1xi32>
    %c8_i32_70 = arith.constant 8 : i32
    %220 = vector.broadcast %c8_i32_70 : i32 to vector<64x1xi32>
    %221 = arith.cmpi slt, %219, %220 : vector<64x1xi32>
    %222 = arith.andi %217, %221 : vector<64x1xi1>
    %cst_71 = arith.constant 0.000000e+00 : f32
    %223 = vector.shape_cast %222 : vector<64x1xi1> to vector<64x1xi1>
    %224 = vector.broadcast %223 : vector<64x1xi1> to vector<64x32xi1>
    %225 = vector.broadcast %cst_71 : f32 to vector<64x32xf32>
    %226 = arith.select %224, %149, %225 : vector<64x32xi1>, vector<64x32xf32>
    %227 = vector.extract_strided_slice %6 {offsets = [10, 0], sizes = [1, 32], strides = [1, 1]} : vector<49x32xf32> to vector<1x32xf32>
    %228 = vector.broadcast %227 : vector<1x32xf32> to vector<64x32xf32>
    %229 = arith.mulf %226, %228 : vector<64x32xf32>
    %230 = arith.addf %213, %229 : vector<64x32xf32>
    %c63_i32_72 = arith.constant 63 : i32
    %231 = tpu.dynamic_rotate %149 by %c63_i32_72 dim 0 : vector<64x32xf32>, i32 -> vector<64x32xf32>
    %c1_i32_73 = arith.constant 1 : i32
    %232 = vector.broadcast %c1_i32_73 : i32 to vector<64x1xi32>
    %233 = arith.addi %4, %232 : vector<64x1xi32>
    %c0_i32_74 = arith.constant 0 : i32
    %234 = vector.broadcast %c0_i32_74 : i32 to vector<64x1xi32>
    %235 = arith.cmpi sge, %233, %234 : vector<64x1xi32>
    %c1_i32_75 = arith.constant 1 : i32
    %236 = vector.broadcast %c1_i32_75 : i32 to vector<64x1xi32>
    %237 = arith.addi %4, %236 : vector<64x1xi32>
    %c8_i32_76 = arith.constant 8 : i32
    %238 = vector.broadcast %c8_i32_76 : i32 to vector<64x1xi32>
    %239 = arith.cmpi slt, %237, %238 : vector<64x1xi32>
    %240 = arith.andi %235, %239 : vector<64x1xi1>
    %cst_77 = arith.constant 0.000000e+00 : f32
    %241 = vector.shape_cast %240 : vector<64x1xi1> to vector<64x1xi1>
    %242 = vector.broadcast %241 : vector<64x1xi1> to vector<64x32xi1>
    %243 = vector.broadcast %cst_77 : f32 to vector<64x32xf32>
    %244 = arith.select %242, %231, %243 : vector<64x32xi1>, vector<64x32xf32>
    %245 = vector.extract_strided_slice %6 {offsets = [11, 0], sizes = [1, 32], strides = [1, 1]} : vector<49x32xf32> to vector<1x32xf32>
    %246 = vector.broadcast %245 : vector<1x32xf32> to vector<64x32xf32>
    %247 = arith.mulf %244, %246 : vector<64x32xf32>
    %248 = arith.addf %230, %247 : vector<64x32xf32>
    %c62_i32_78 = arith.constant 62 : i32
    %249 = tpu.dynamic_rotate %149 by %c62_i32_78 dim 0 : vector<64x32xf32>, i32 -> vector<64x32xf32>
    %c2_i32_79 = arith.constant 2 : i32
    %250 = vector.broadcast %c2_i32_79 : i32 to vector<64x1xi32>
    %251 = arith.addi %4, %250 : vector<64x1xi32>
    %c0_i32_80 = arith.constant 0 : i32
    %252 = vector.broadcast %c0_i32_80 : i32 to vector<64x1xi32>
    %253 = arith.cmpi sge, %251, %252 : vector<64x1xi32>
    %c2_i32_81 = arith.constant 2 : i32
    %254 = vector.broadcast %c2_i32_81 : i32 to vector<64x1xi32>
    %255 = arith.addi %4, %254 : vector<64x1xi32>
    %c8_i32_82 = arith.constant 8 : i32
    %256 = vector.broadcast %c8_i32_82 : i32 to vector<64x1xi32>
    %257 = arith.cmpi slt, %255, %256 : vector<64x1xi32>
    %258 = arith.andi %253, %257 : vector<64x1xi1>
    %cst_83 = arith.constant 0.000000e+00 : f32
    %259 = vector.shape_cast %258 : vector<64x1xi1> to vector<64x1xi1>
    %260 = vector.broadcast %259 : vector<64x1xi1> to vector<64x32xi1>
    %261 = vector.broadcast %cst_83 : f32 to vector<64x32xf32>
    %262 = arith.select %260, %249, %261 : vector<64x32xi1>, vector<64x32xf32>
    %263 = vector.extract_strided_slice %6 {offsets = [12, 0], sizes = [1, 32], strides = [1, 1]} : vector<49x32xf32> to vector<1x32xf32>
    %264 = vector.broadcast %263 : vector<1x32xf32> to vector<64x32xf32>
    %265 = arith.mulf %262, %264 : vector<64x32xf32>
    %266 = arith.addf %248, %265 : vector<64x32xf32>
    %c61_i32_84 = arith.constant 61 : i32
    %267 = tpu.dynamic_rotate %149 by %c61_i32_84 dim 0 : vector<64x32xf32>, i32 -> vector<64x32xf32>
    %c3_i32_85 = arith.constant 3 : i32
    %268 = vector.broadcast %c3_i32_85 : i32 to vector<64x1xi32>
    %269 = arith.addi %4, %268 : vector<64x1xi32>
    %c0_i32_86 = arith.constant 0 : i32
    %270 = vector.broadcast %c0_i32_86 : i32 to vector<64x1xi32>
    %271 = arith.cmpi sge, %269, %270 : vector<64x1xi32>
    %c3_i32_87 = arith.constant 3 : i32
    %272 = vector.broadcast %c3_i32_87 : i32 to vector<64x1xi32>
    %273 = arith.addi %4, %272 : vector<64x1xi32>
    %c8_i32_88 = arith.constant 8 : i32
    %274 = vector.broadcast %c8_i32_88 : i32 to vector<64x1xi32>
    %275 = arith.cmpi slt, %273, %274 : vector<64x1xi32>
    %276 = arith.andi %271, %275 : vector<64x1xi1>
    %cst_89 = arith.constant 0.000000e+00 : f32
    %277 = vector.shape_cast %276 : vector<64x1xi1> to vector<64x1xi1>
    %278 = vector.broadcast %277 : vector<64x1xi1> to vector<64x32xi1>
    %279 = vector.broadcast %cst_89 : f32 to vector<64x32xf32>
    %280 = arith.select %278, %267, %279 : vector<64x32xi1>, vector<64x32xf32>
    %281 = vector.extract_strided_slice %6 {offsets = [13, 0], sizes = [1, 32], strides = [1, 1]} : vector<49x32xf32> to vector<1x32xf32>
    %282 = vector.broadcast %281 : vector<1x32xf32> to vector<64x32xf32>
    %283 = arith.mulf %280, %282 : vector<64x32xf32>
    %284 = arith.addf %266, %283 : vector<64x32xf32>
    %cst_90 = arith.constant 0.000000e+00 : f32
    %285 = vector.shape_cast %158 : vector<64x1xi1> to vector<64x1xi1>
    %286 = vector.broadcast %285 : vector<64x1xi1> to vector<64x32xi1>
    %287 = vector.broadcast %cst_90 : f32 to vector<64x32xf32>
    %288 = arith.select %286, %284, %287 : vector<64x32xi1>, vector<64x32xf32>
    %289 = arith.addf %148, %288 : vector<64x32xf32>
    %c8_i32_91 = arith.constant 8 : i32
    %290 = tpu.dynamic_rotate %2 by %c8_i32_91 dim 0 : vector<64x32xf32>, i32 -> vector<64x32xf32>
    %c-1_i32_92 = arith.constant -1 : i32
    %291 = vector.broadcast %c-1_i32_92 : i32 to vector<64x1xi32>
    %292 = arith.addi %3, %291 : vector<64x1xi32>
    %c0_i32_93 = arith.constant 0 : i32
    %293 = vector.broadcast %c0_i32_93 : i32 to vector<64x1xi32>
    %294 = arith.cmpi sge, %292, %293 : vector<64x1xi32>
    %c-1_i32_94 = arith.constant -1 : i32
    %295 = vector.broadcast %c-1_i32_94 : i32 to vector<64x1xi32>
    %296 = arith.addi %3, %295 : vector<64x1xi32>
    %c8_i32_95 = arith.constant 8 : i32
    %297 = vector.broadcast %c8_i32_95 : i32 to vector<64x1xi32>
    %298 = arith.cmpi slt, %296, %297 : vector<64x1xi32>
    %299 = arith.andi %294, %298 : vector<64x1xi1>
    %cst_96 = arith.constant 0.000000e+00 : f32
    %300 = vector.broadcast %cst_96 : f32 to vector<64x32xf32>
    %c3_i32_97 = arith.constant 3 : i32
    %301 = tpu.dynamic_rotate %290 by %c3_i32_97 dim 0 : vector<64x32xf32>, i32 -> vector<64x32xf32>
    %c-3_i32_98 = arith.constant -3 : i32
    %302 = vector.broadcast %c-3_i32_98 : i32 to vector<64x1xi32>
    %303 = arith.addi %4, %302 : vector<64x1xi32>
    %c0_i32_99 = arith.constant 0 : i32
    %304 = vector.broadcast %c0_i32_99 : i32 to vector<64x1xi32>
    %305 = arith.cmpi sge, %303, %304 : vector<64x1xi32>
    %c-3_i32_100 = arith.constant -3 : i32
    %306 = vector.broadcast %c-3_i32_100 : i32 to vector<64x1xi32>
    %307 = arith.addi %4, %306 : vector<64x1xi32>
    %c8_i32_101 = arith.constant 8 : i32
    %308 = vector.broadcast %c8_i32_101 : i32 to vector<64x1xi32>
    %309 = arith.cmpi slt, %307, %308 : vector<64x1xi32>
    %310 = arith.andi %305, %309 : vector<64x1xi1>
    %cst_102 = arith.constant 0.000000e+00 : f32
    %311 = vector.shape_cast %310 : vector<64x1xi1> to vector<64x1xi1>
    %312 = vector.broadcast %311 : vector<64x1xi1> to vector<64x32xi1>
    %313 = vector.broadcast %cst_102 : f32 to vector<64x32xf32>
    %314 = arith.select %312, %301, %313 : vector<64x32xi1>, vector<64x32xf32>
    %315 = vector.extract_strided_slice %6 {offsets = [14, 0], sizes = [1, 32], strides = [1, 1]} : vector<49x32xf32> to vector<1x32xf32>
    %316 = vector.broadcast %315 : vector<1x32xf32> to vector<64x32xf32>
    %317 = arith.mulf %314, %316 : vector<64x32xf32>
    %318 = arith.addf %300, %317 : vector<64x32xf32>
    %c2_i32_103 = arith.constant 2 : i32
    %319 = tpu.dynamic_rotate %290 by %c2_i32_103 dim 0 : vector<64x32xf32>, i32 -> vector<64x32xf32>
    %c-2_i32_104 = arith.constant -2 : i32
    %320 = vector.broadcast %c-2_i32_104 : i32 to vector<64x1xi32>
    %321 = arith.addi %4, %320 : vector<64x1xi32>
    %c0_i32_105 = arith.constant 0 : i32
    %322 = vector.broadcast %c0_i32_105 : i32 to vector<64x1xi32>
    %323 = arith.cmpi sge, %321, %322 : vector<64x1xi32>
    %c-2_i32_106 = arith.constant -2 : i32
    %324 = vector.broadcast %c-2_i32_106 : i32 to vector<64x1xi32>
    %325 = arith.addi %4, %324 : vector<64x1xi32>
    %c8_i32_107 = arith.constant 8 : i32
    %326 = vector.broadcast %c8_i32_107 : i32 to vector<64x1xi32>
    %327 = arith.cmpi slt, %325, %326 : vector<64x1xi32>
    %328 = arith.andi %323, %327 : vector<64x1xi1>
    %cst_108 = arith.constant 0.000000e+00 : f32
    %329 = vector.shape_cast %328 : vector<64x1xi1> to vector<64x1xi1>
    %330 = vector.broadcast %329 : vector<64x1xi1> to vector<64x32xi1>
    %331 = vector.broadcast %cst_108 : f32 to vector<64x32xf32>
    %332 = arith.select %330, %319, %331 : vector<64x32xi1>, vector<64x32xf32>
    %333 = vector.extract_strided_slice %6 {offsets = [15, 0], sizes = [1, 32], strides = [1, 1]} : vector<49x32xf32> to vector<1x32xf32>
    %334 = vector.broadcast %333 : vector<1x32xf32> to vector<64x32xf32>
    %335 = arith.mulf %332, %334 : vector<64x32xf32>
    %336 = arith.addf %318, %335 : vector<64x32xf32>
    %c1_i32_109 = arith.constant 1 : i32
    %337 = tpu.dynamic_rotate %290 by %c1_i32_109 dim 0 : vector<64x32xf32>, i32 -> vector<64x32xf32>
    %c-1_i32_110 = arith.constant -1 : i32
    %338 = vector.broadcast %c-1_i32_110 : i32 to vector<64x1xi32>
    %339 = arith.addi %4, %338 : vector<64x1xi32>
    %c0_i32_111 = arith.constant 0 : i32
    %340 = vector.broadcast %c0_i32_111 : i32 to vector<64x1xi32>
    %341 = arith.cmpi sge, %339, %340 : vector<64x1xi32>
    %c-1_i32_112 = arith.constant -1 : i32
    %342 = vector.broadcast %c-1_i32_112 : i32 to vector<64x1xi32>
    %343 = arith.addi %4, %342 : vector<64x1xi32>
    %c8_i32_113 = arith.constant 8 : i32
    %344 = vector.broadcast %c8_i32_113 : i32 to vector<64x1xi32>
    %345 = arith.cmpi slt, %343, %344 : vector<64x1xi32>
    %346 = arith.andi %341, %345 : vector<64x1xi1>
    %cst_114 = arith.constant 0.000000e+00 : f32
    %347 = vector.shape_cast %346 : vector<64x1xi1> to vector<64x1xi1>
    %348 = vector.broadcast %347 : vector<64x1xi1> to vector<64x32xi1>
    %349 = vector.broadcast %cst_114 : f32 to vector<64x32xf32>
    %350 = arith.select %348, %337, %349 : vector<64x32xi1>, vector<64x32xf32>
    %351 = vector.extract_strided_slice %6 {offsets = [16, 0], sizes = [1, 32], strides = [1, 1]} : vector<49x32xf32> to vector<1x32xf32>
    %352 = vector.broadcast %351 : vector<1x32xf32> to vector<64x32xf32>
    %353 = arith.mulf %350, %352 : vector<64x32xf32>
    %354 = arith.addf %336, %353 : vector<64x32xf32>
    %c0_i32_115 = arith.constant 0 : i32
    %355 = vector.broadcast %c0_i32_115 : i32 to vector<64x1xi32>
    %356 = arith.addi %4, %355 : vector<64x1xi32>
    %c0_i32_116 = arith.constant 0 : i32
    %357 = vector.broadcast %c0_i32_116 : i32 to vector<64x1xi32>
    %358 = arith.cmpi sge, %356, %357 : vector<64x1xi32>
    %c0_i32_117 = arith.constant 0 : i32
    %359 = vector.broadcast %c0_i32_117 : i32 to vector<64x1xi32>
    %360 = arith.addi %4, %359 : vector<64x1xi32>
    %c8_i32_118 = arith.constant 8 : i32
    %361 = vector.broadcast %c8_i32_118 : i32 to vector<64x1xi32>
    %362 = arith.cmpi slt, %360, %361 : vector<64x1xi32>
    %363 = arith.andi %358, %362 : vector<64x1xi1>
    %cst_119 = arith.constant 0.000000e+00 : f32
    %364 = vector.shape_cast %363 : vector<64x1xi1> to vector<64x1xi1>
    %365 = vector.broadcast %364 : vector<64x1xi1> to vector<64x32xi1>
    %366 = vector.broadcast %cst_119 : f32 to vector<64x32xf32>
    %367 = arith.select %365, %290, %366 : vector<64x32xi1>, vector<64x32xf32>
    %368 = vector.extract_strided_slice %6 {offsets = [17, 0], sizes = [1, 32], strides = [1, 1]} : vector<49x32xf32> to vector<1x32xf32>
    %369 = vector.broadcast %368 : vector<1x32xf32> to vector<64x32xf32>
    %370 = arith.mulf %367, %369 : vector<64x32xf32>
    %371 = arith.addf %354, %370 : vector<64x32xf32>
    %c63_i32_120 = arith.constant 63 : i32
    %372 = tpu.dynamic_rotate %290 by %c63_i32_120 dim 0 : vector<64x32xf32>, i32 -> vector<64x32xf32>
    %c1_i32_121 = arith.constant 1 : i32
    %373 = vector.broadcast %c1_i32_121 : i32 to vector<64x1xi32>
    %374 = arith.addi %4, %373 : vector<64x1xi32>
    %c0_i32_122 = arith.constant 0 : i32
    %375 = vector.broadcast %c0_i32_122 : i32 to vector<64x1xi32>
    %376 = arith.cmpi sge, %374, %375 : vector<64x1xi32>
    %c1_i32_123 = arith.constant 1 : i32
    %377 = vector.broadcast %c1_i32_123 : i32 to vector<64x1xi32>
    %378 = arith.addi %4, %377 : vector<64x1xi32>
    %c8_i32_124 = arith.constant 8 : i32
    %379 = vector.broadcast %c8_i32_124 : i32 to vector<64x1xi32>
    %380 = arith.cmpi slt, %378, %379 : vector<64x1xi32>
    %381 = arith.andi %376, %380 : vector<64x1xi1>
    %cst_125 = arith.constant 0.000000e+00 : f32
    %382 = vector.shape_cast %381 : vector<64x1xi1> to vector<64x1xi1>
    %383 = vector.broadcast %382 : vector<64x1xi1> to vector<64x32xi1>
    %384 = vector.broadcast %cst_125 : f32 to vector<64x32xf32>
    %385 = arith.select %383, %372, %384 : vector<64x32xi1>, vector<64x32xf32>
    %386 = vector.extract_strided_slice %6 {offsets = [18, 0], sizes = [1, 32], strides = [1, 1]} : vector<49x32xf32> to vector<1x32xf32>
    %387 = vector.broadcast %386 : vector<1x32xf32> to vector<64x32xf32>
    %388 = arith.mulf %385, %387 : vector<64x32xf32>
    %389 = arith.addf %371, %388 : vector<64x32xf32>
    %c62_i32_126 = arith.constant 62 : i32
    %390 = tpu.dynamic_rotate %290 by %c62_i32_126 dim 0 : vector<64x32xf32>, i32 -> vector<64x32xf32>
    %c2_i32_127 = arith.constant 2 : i32
    %391 = vector.broadcast %c2_i32_127 : i32 to vector<64x1xi32>
    %392 = arith.addi %4, %391 : vector<64x1xi32>
    %c0_i32_128 = arith.constant 0 : i32
    %393 = vector.broadcast %c0_i32_128 : i32 to vector<64x1xi32>
    %394 = arith.cmpi sge, %392, %393 : vector<64x1xi32>
    %c2_i32_129 = arith.constant 2 : i32
    %395 = vector.broadcast %c2_i32_129 : i32 to vector<64x1xi32>
    %396 = arith.addi %4, %395 : vector<64x1xi32>
    %c8_i32_130 = arith.constant 8 : i32
    %397 = vector.broadcast %c8_i32_130 : i32 to vector<64x1xi32>
    %398 = arith.cmpi slt, %396, %397 : vector<64x1xi32>
    %399 = arith.andi %394, %398 : vector<64x1xi1>
    %cst_131 = arith.constant 0.000000e+00 : f32
    %400 = vector.shape_cast %399 : vector<64x1xi1> to vector<64x1xi1>
    %401 = vector.broadcast %400 : vector<64x1xi1> to vector<64x32xi1>
    %402 = vector.broadcast %cst_131 : f32 to vector<64x32xf32>
    %403 = arith.select %401, %390, %402 : vector<64x32xi1>, vector<64x32xf32>
    %404 = vector.extract_strided_slice %6 {offsets = [19, 0], sizes = [1, 32], strides = [1, 1]} : vector<49x32xf32> to vector<1x32xf32>
    %405 = vector.broadcast %404 : vector<1x32xf32> to vector<64x32xf32>
    %406 = arith.mulf %403, %405 : vector<64x32xf32>
    %407 = arith.addf %389, %406 : vector<64x32xf32>
    %c61_i32_132 = arith.constant 61 : i32
    %408 = tpu.dynamic_rotate %290 by %c61_i32_132 dim 0 : vector<64x32xf32>, i32 -> vector<64x32xf32>
    %c3_i32_133 = arith.constant 3 : i32
    %409 = vector.broadcast %c3_i32_133 : i32 to vector<64x1xi32>
    %410 = arith.addi %4, %409 : vector<64x1xi32>
    %c0_i32_134 = arith.constant 0 : i32
    %411 = vector.broadcast %c0_i32_134 : i32 to vector<64x1xi32>
    %412 = arith.cmpi sge, %410, %411 : vector<64x1xi32>
    %c3_i32_135 = arith.constant 3 : i32
    %413 = vector.broadcast %c3_i32_135 : i32 to vector<64x1xi32>
    %414 = arith.addi %4, %413 : vector<64x1xi32>
    %c8_i32_136 = arith.constant 8 : i32
    %415 = vector.broadcast %c8_i32_136 : i32 to vector<64x1xi32>
    %416 = arith.cmpi slt, %414, %415 : vector<64x1xi32>
    %417 = arith.andi %412, %416 : vector<64x1xi1>
    %cst_137 = arith.constant 0.000000e+00 : f32
    %418 = vector.shape_cast %417 : vector<64x1xi1> to vector<64x1xi1>
    %419 = vector.broadcast %418 : vector<64x1xi1> to vector<64x32xi1>
    %420 = vector.broadcast %cst_137 : f32 to vector<64x32xf32>
    %421 = arith.select %419, %408, %420 : vector<64x32xi1>, vector<64x32xf32>
    %422 = vector.extract_strided_slice %6 {offsets = [20, 0], sizes = [1, 32], strides = [1, 1]} : vector<49x32xf32> to vector<1x32xf32>
    %423 = vector.broadcast %422 : vector<1x32xf32> to vector<64x32xf32>
    %424 = arith.mulf %421, %423 : vector<64x32xf32>
    %425 = arith.addf %407, %424 : vector<64x32xf32>
    %cst_138 = arith.constant 0.000000e+00 : f32
    %426 = vector.shape_cast %299 : vector<64x1xi1> to vector<64x1xi1>
    %427 = vector.broadcast %426 : vector<64x1xi1> to vector<64x32xi1>
    %428 = vector.broadcast %cst_138 : f32 to vector<64x32xf32>
    %429 = arith.select %427, %425, %428 : vector<64x32xi1>, vector<64x32xf32>
    %430 = arith.addf %289, %429 : vector<64x32xf32>
    %c0_i32_139 = arith.constant 0 : i32
    %431 = vector.broadcast %c0_i32_139 : i32 to vector<64x1xi32>
    %432 = arith.addi %3, %431 : vector<64x1xi32>
    %c0_i32_140 = arith.constant 0 : i32
    %433 = vector.broadcast %c0_i32_140 : i32 to vector<64x1xi32>
    %434 = arith.cmpi sge, %432, %433 : vector<64x1xi32>
    %c0_i32_141 = arith.constant 0 : i32
    %435 = vector.broadcast %c0_i32_141 : i32 to vector<64x1xi32>
    %436 = arith.addi %3, %435 : vector<64x1xi32>
    %c8_i32_142 = arith.constant 8 : i32
    %437 = vector.broadcast %c8_i32_142 : i32 to vector<64x1xi32>
    %438 = arith.cmpi slt, %436, %437 : vector<64x1xi32>
    %439 = arith.andi %434, %438 : vector<64x1xi1>
    %cst_143 = arith.constant 0.000000e+00 : f32
    %440 = vector.broadcast %cst_143 : f32 to vector<64x32xf32>
    %c3_i32_144 = arith.constant 3 : i32
    %441 = tpu.dynamic_rotate %2 by %c3_i32_144 dim 0 : vector<64x32xf32>, i32 -> vector<64x32xf32>
    %c-3_i32_145 = arith.constant -3 : i32
    %442 = vector.broadcast %c-3_i32_145 : i32 to vector<64x1xi32>
    %443 = arith.addi %4, %442 : vector<64x1xi32>
    %c0_i32_146 = arith.constant 0 : i32
    %444 = vector.broadcast %c0_i32_146 : i32 to vector<64x1xi32>
    %445 = arith.cmpi sge, %443, %444 : vector<64x1xi32>
    %c-3_i32_147 = arith.constant -3 : i32
    %446 = vector.broadcast %c-3_i32_147 : i32 to vector<64x1xi32>
    %447 = arith.addi %4, %446 : vector<64x1xi32>
    %c8_i32_148 = arith.constant 8 : i32
    %448 = vector.broadcast %c8_i32_148 : i32 to vector<64x1xi32>
    %449 = arith.cmpi slt, %447, %448 : vector<64x1xi32>
    %450 = arith.andi %445, %449 : vector<64x1xi1>
    %cst_149 = arith.constant 0.000000e+00 : f32
    %451 = vector.shape_cast %450 : vector<64x1xi1> to vector<64x1xi1>
    %452 = vector.broadcast %451 : vector<64x1xi1> to vector<64x32xi1>
    %453 = vector.broadcast %cst_149 : f32 to vector<64x32xf32>
    %454 = arith.select %452, %441, %453 : vector<64x32xi1>, vector<64x32xf32>
    %455 = vector.extract_strided_slice %6 {offsets = [21, 0], sizes = [1, 32], strides = [1, 1]} : vector<49x32xf32> to vector<1x32xf32>
    %456 = vector.broadcast %455 : vector<1x32xf32> to vector<64x32xf32>
    %457 = arith.mulf %454, %456 : vector<64x32xf32>
    %458 = arith.addf %440, %457 : vector<64x32xf32>
    %c2_i32_150 = arith.constant 2 : i32
    %459 = tpu.dynamic_rotate %2 by %c2_i32_150 dim 0 : vector<64x32xf32>, i32 -> vector<64x32xf32>
    %c-2_i32_151 = arith.constant -2 : i32
    %460 = vector.broadcast %c-2_i32_151 : i32 to vector<64x1xi32>
    %461 = arith.addi %4, %460 : vector<64x1xi32>
    %c0_i32_152 = arith.constant 0 : i32
    %462 = vector.broadcast %c0_i32_152 : i32 to vector<64x1xi32>
    %463 = arith.cmpi sge, %461, %462 : vector<64x1xi32>
    %c-2_i32_153 = arith.constant -2 : i32
    %464 = vector.broadcast %c-2_i32_153 : i32 to vector<64x1xi32>
    %465 = arith.addi %4, %464 : vector<64x1xi32>
    %c8_i32_154 = arith.constant 8 : i32
    %466 = vector.broadcast %c8_i32_154 : i32 to vector<64x1xi32>
    %467 = arith.cmpi slt, %465, %466 : vector<64x1xi32>
    %468 = arith.andi %463, %467 : vector<64x1xi1>
    %cst_155 = arith.constant 0.000000e+00 : f32
    %469 = vector.shape_cast %468 : vector<64x1xi1> to vector<64x1xi1>
    %470 = vector.broadcast %469 : vector<64x1xi1> to vector<64x32xi1>
    %471 = vector.broadcast %cst_155 : f32 to vector<64x32xf32>
    %472 = arith.select %470, %459, %471 : vector<64x32xi1>, vector<64x32xf32>
    %473 = vector.extract_strided_slice %6 {offsets = [22, 0], sizes = [1, 32], strides = [1, 1]} : vector<49x32xf32> to vector<1x32xf32>
    %474 = vector.broadcast %473 : vector<1x32xf32> to vector<64x32xf32>
    %475 = arith.mulf %472, %474 : vector<64x32xf32>
    %476 = arith.addf %458, %475 : vector<64x32xf32>
    %c1_i32_156 = arith.constant 1 : i32
    %477 = tpu.dynamic_rotate %2 by %c1_i32_156 dim 0 : vector<64x32xf32>, i32 -> vector<64x32xf32>
    %c-1_i32_157 = arith.constant -1 : i32
    %478 = vector.broadcast %c-1_i32_157 : i32 to vector<64x1xi32>
    %479 = arith.addi %4, %478 : vector<64x1xi32>
    %c0_i32_158 = arith.constant 0 : i32
    %480 = vector.broadcast %c0_i32_158 : i32 to vector<64x1xi32>
    %481 = arith.cmpi sge, %479, %480 : vector<64x1xi32>
    %c-1_i32_159 = arith.constant -1 : i32
    %482 = vector.broadcast %c-1_i32_159 : i32 to vector<64x1xi32>
    %483 = arith.addi %4, %482 : vector<64x1xi32>
    %c8_i32_160 = arith.constant 8 : i32
    %484 = vector.broadcast %c8_i32_160 : i32 to vector<64x1xi32>
    %485 = arith.cmpi slt, %483, %484 : vector<64x1xi32>
    %486 = arith.andi %481, %485 : vector<64x1xi1>
    %cst_161 = arith.constant 0.000000e+00 : f32
    %487 = vector.shape_cast %486 : vector<64x1xi1> to vector<64x1xi1>
    %488 = vector.broadcast %487 : vector<64x1xi1> to vector<64x32xi1>
    %489 = vector.broadcast %cst_161 : f32 to vector<64x32xf32>
    %490 = arith.select %488, %477, %489 : vector<64x32xi1>, vector<64x32xf32>
    %491 = vector.extract_strided_slice %6 {offsets = [23, 0], sizes = [1, 32], strides = [1, 1]} : vector<49x32xf32> to vector<1x32xf32>
    %492 = vector.broadcast %491 : vector<1x32xf32> to vector<64x32xf32>
    %493 = arith.mulf %490, %492 : vector<64x32xf32>
    %494 = arith.addf %476, %493 : vector<64x32xf32>
    %c0_i32_162 = arith.constant 0 : i32
    %495 = vector.broadcast %c0_i32_162 : i32 to vector<64x1xi32>
    %496 = arith.addi %4, %495 : vector<64x1xi32>
    %c0_i32_163 = arith.constant 0 : i32
    %497 = vector.broadcast %c0_i32_163 : i32 to vector<64x1xi32>
    %498 = arith.cmpi sge, %496, %497 : vector<64x1xi32>
    %c0_i32_164 = arith.constant 0 : i32
    %499 = vector.broadcast %c0_i32_164 : i32 to vector<64x1xi32>
    %500 = arith.addi %4, %499 : vector<64x1xi32>
    %c8_i32_165 = arith.constant 8 : i32
    %501 = vector.broadcast %c8_i32_165 : i32 to vector<64x1xi32>
    %502 = arith.cmpi slt, %500, %501 : vector<64x1xi32>
    %503 = arith.andi %498, %502 : vector<64x1xi1>
    %cst_166 = arith.constant 0.000000e+00 : f32
    %504 = vector.shape_cast %503 : vector<64x1xi1> to vector<64x1xi1>
    %505 = vector.broadcast %504 : vector<64x1xi1> to vector<64x32xi1>
    %506 = vector.broadcast %cst_166 : f32 to vector<64x32xf32>
    %507 = arith.select %505, %2, %506 : vector<64x32xi1>, vector<64x32xf32>
    %508 = vector.extract_strided_slice %6 {offsets = [24, 0], sizes = [1, 32], strides = [1, 1]} : vector<49x32xf32> to vector<1x32xf32>
    %509 = vector.broadcast %508 : vector<1x32xf32> to vector<64x32xf32>
    %510 = arith.mulf %507, %509 : vector<64x32xf32>
    %511 = arith.addf %494, %510 : vector<64x32xf32>
    %c63_i32_167 = arith.constant 63 : i32
    %512 = tpu.dynamic_rotate %2 by %c63_i32_167 dim 0 : vector<64x32xf32>, i32 -> vector<64x32xf32>
    %c1_i32_168 = arith.constant 1 : i32
    %513 = vector.broadcast %c1_i32_168 : i32 to vector<64x1xi32>
    %514 = arith.addi %4, %513 : vector<64x1xi32>
    %c0_i32_169 = arith.constant 0 : i32
    %515 = vector.broadcast %c0_i32_169 : i32 to vector<64x1xi32>
    %516 = arith.cmpi sge, %514, %515 : vector<64x1xi32>
    %c1_i32_170 = arith.constant 1 : i32
    %517 = vector.broadcast %c1_i32_170 : i32 to vector<64x1xi32>
    %518 = arith.addi %4, %517 : vector<64x1xi32>
    %c8_i32_171 = arith.constant 8 : i32
    %519 = vector.broadcast %c8_i32_171 : i32 to vector<64x1xi32>
    %520 = arith.cmpi slt, %518, %519 : vector<64x1xi32>
    %521 = arith.andi %516, %520 : vector<64x1xi1>
    %cst_172 = arith.constant 0.000000e+00 : f32
    %522 = vector.shape_cast %521 : vector<64x1xi1> to vector<64x1xi1>
    %523 = vector.broadcast %522 : vector<64x1xi1> to vector<64x32xi1>
    %524 = vector.broadcast %cst_172 : f32 to vector<64x32xf32>
    %525 = arith.select %523, %512, %524 : vector<64x32xi1>, vector<64x32xf32>
    %526 = vector.extract_strided_slice %6 {offsets = [25, 0], sizes = [1, 32], strides = [1, 1]} : vector<49x32xf32> to vector<1x32xf32>
    %527 = vector.broadcast %526 : vector<1x32xf32> to vector<64x32xf32>
    %528 = arith.mulf %525, %527 : vector<64x32xf32>
    %529 = arith.addf %511, %528 : vector<64x32xf32>
    %c62_i32_173 = arith.constant 62 : i32
    %530 = tpu.dynamic_rotate %2 by %c62_i32_173 dim 0 : vector<64x32xf32>, i32 -> vector<64x32xf32>
    %c2_i32_174 = arith.constant 2 : i32
    %531 = vector.broadcast %c2_i32_174 : i32 to vector<64x1xi32>
    %532 = arith.addi %4, %531 : vector<64x1xi32>
    %c0_i32_175 = arith.constant 0 : i32
    %533 = vector.broadcast %c0_i32_175 : i32 to vector<64x1xi32>
    %534 = arith.cmpi sge, %532, %533 : vector<64x1xi32>
    %c2_i32_176 = arith.constant 2 : i32
    %535 = vector.broadcast %c2_i32_176 : i32 to vector<64x1xi32>
    %536 = arith.addi %4, %535 : vector<64x1xi32>
    %c8_i32_177 = arith.constant 8 : i32
    %537 = vector.broadcast %c8_i32_177 : i32 to vector<64x1xi32>
    %538 = arith.cmpi slt, %536, %537 : vector<64x1xi32>
    %539 = arith.andi %534, %538 : vector<64x1xi1>
    %cst_178 = arith.constant 0.000000e+00 : f32
    %540 = vector.shape_cast %539 : vector<64x1xi1> to vector<64x1xi1>
    %541 = vector.broadcast %540 : vector<64x1xi1> to vector<64x32xi1>
    %542 = vector.broadcast %cst_178 : f32 to vector<64x32xf32>
    %543 = arith.select %541, %530, %542 : vector<64x32xi1>, vector<64x32xf32>
    %544 = vector.extract_strided_slice %6 {offsets = [26, 0], sizes = [1, 32], strides = [1, 1]} : vector<49x32xf32> to vector<1x32xf32>
    %545 = vector.broadcast %544 : vector<1x32xf32> to vector<64x32xf32>
    %546 = arith.mulf %543, %545 : vector<64x32xf32>
    %547 = arith.addf %529, %546 : vector<64x32xf32>
    %c61_i32_179 = arith.constant 61 : i32
    %548 = tpu.dynamic_rotate %2 by %c61_i32_179 dim 0 : vector<64x32xf32>, i32 -> vector<64x32xf32>
    %c3_i32_180 = arith.constant 3 : i32
    %549 = vector.broadcast %c3_i32_180 : i32 to vector<64x1xi32>
    %550 = arith.addi %4, %549 : vector<64x1xi32>
    %c0_i32_181 = arith.constant 0 : i32
    %551 = vector.broadcast %c0_i32_181 : i32 to vector<64x1xi32>
    %552 = arith.cmpi sge, %550, %551 : vector<64x1xi32>
    %c3_i32_182 = arith.constant 3 : i32
    %553 = vector.broadcast %c3_i32_182 : i32 to vector<64x1xi32>
    %554 = arith.addi %4, %553 : vector<64x1xi32>
    %c8_i32_183 = arith.constant 8 : i32
    %555 = vector.broadcast %c8_i32_183 : i32 to vector<64x1xi32>
    %556 = arith.cmpi slt, %554, %555 : vector<64x1xi32>
    %557 = arith.andi %552, %556 : vector<64x1xi1>
    %cst_184 = arith.constant 0.000000e+00 : f32
    %558 = vector.shape_cast %557 : vector<64x1xi1> to vector<64x1xi1>
    %559 = vector.broadcast %558 : vector<64x1xi1> to vector<64x32xi1>
    %560 = vector.broadcast %cst_184 : f32 to vector<64x32xf32>
    %561 = arith.select %559, %548, %560 : vector<64x32xi1>, vector<64x32xf32>
    %562 = vector.extract_strided_slice %6 {offsets = [27, 0], sizes = [1, 32], strides = [1, 1]} : vector<49x32xf32> to vector<1x32xf32>
    %563 = vector.broadcast %562 : vector<1x32xf32> to vector<64x32xf32>
    %564 = arith.mulf %561, %563 : vector<64x32xf32>
    %565 = arith.addf %547, %564 : vector<64x32xf32>
    %cst_185 = arith.constant 0.000000e+00 : f32
    %566 = vector.shape_cast %439 : vector<64x1xi1> to vector<64x1xi1>
    %567 = vector.broadcast %566 : vector<64x1xi1> to vector<64x32xi1>
    %568 = vector.broadcast %cst_185 : f32 to vector<64x32xf32>
    %569 = arith.select %567, %565, %568 : vector<64x32xi1>, vector<64x32xf32>
    %570 = arith.addf %430, %569 : vector<64x32xf32>
    %c56_i32 = arith.constant 56 : i32
    %571 = tpu.dynamic_rotate %2 by %c56_i32 dim 0 : vector<64x32xf32>, i32 -> vector<64x32xf32>
    %c1_i32_186 = arith.constant 1 : i32
    %572 = vector.broadcast %c1_i32_186 : i32 to vector<64x1xi32>
    %573 = arith.addi %3, %572 : vector<64x1xi32>
    %c0_i32_187 = arith.constant 0 : i32
    %574 = vector.broadcast %c0_i32_187 : i32 to vector<64x1xi32>
    %575 = arith.cmpi sge, %573, %574 : vector<64x1xi32>
    %c1_i32_188 = arith.constant 1 : i32
    %576 = vector.broadcast %c1_i32_188 : i32 to vector<64x1xi32>
    %577 = arith.addi %3, %576 : vector<64x1xi32>
    %c8_i32_189 = arith.constant 8 : i32
    %578 = vector.broadcast %c8_i32_189 : i32 to vector<64x1xi32>
    %579 = arith.cmpi slt, %577, %578 : vector<64x1xi32>
    %580 = arith.andi %575, %579 : vector<64x1xi1>
    %cst_190 = arith.constant 0.000000e+00 : f32
    %581 = vector.broadcast %cst_190 : f32 to vector<64x32xf32>
    %c3_i32_191 = arith.constant 3 : i32
    %582 = tpu.dynamic_rotate %571 by %c3_i32_191 dim 0 : vector<64x32xf32>, i32 -> vector<64x32xf32>
    %c-3_i32_192 = arith.constant -3 : i32
    %583 = vector.broadcast %c-3_i32_192 : i32 to vector<64x1xi32>
    %584 = arith.addi %4, %583 : vector<64x1xi32>
    %c0_i32_193 = arith.constant 0 : i32
    %585 = vector.broadcast %c0_i32_193 : i32 to vector<64x1xi32>
    %586 = arith.cmpi sge, %584, %585 : vector<64x1xi32>
    %c-3_i32_194 = arith.constant -3 : i32
    %587 = vector.broadcast %c-3_i32_194 : i32 to vector<64x1xi32>
    %588 = arith.addi %4, %587 : vector<64x1xi32>
    %c8_i32_195 = arith.constant 8 : i32
    %589 = vector.broadcast %c8_i32_195 : i32 to vector<64x1xi32>
    %590 = arith.cmpi slt, %588, %589 : vector<64x1xi32>
    %591 = arith.andi %586, %590 : vector<64x1xi1>
    %cst_196 = arith.constant 0.000000e+00 : f32
    %592 = vector.shape_cast %591 : vector<64x1xi1> to vector<64x1xi1>
    %593 = vector.broadcast %592 : vector<64x1xi1> to vector<64x32xi1>
    %594 = vector.broadcast %cst_196 : f32 to vector<64x32xf32>
    %595 = arith.select %593, %582, %594 : vector<64x32xi1>, vector<64x32xf32>
    %596 = vector.extract_strided_slice %6 {offsets = [28, 0], sizes = [1, 32], strides = [1, 1]} : vector<49x32xf32> to vector<1x32xf32>
    %597 = vector.broadcast %596 : vector<1x32xf32> to vector<64x32xf32>
    %598 = arith.mulf %595, %597 : vector<64x32xf32>
    %599 = arith.addf %581, %598 : vector<64x32xf32>
    %c2_i32_197 = arith.constant 2 : i32
    %600 = tpu.dynamic_rotate %571 by %c2_i32_197 dim 0 : vector<64x32xf32>, i32 -> vector<64x32xf32>
    %c-2_i32_198 = arith.constant -2 : i32
    %601 = vector.broadcast %c-2_i32_198 : i32 to vector<64x1xi32>
    %602 = arith.addi %4, %601 : vector<64x1xi32>
    %c0_i32_199 = arith.constant 0 : i32
    %603 = vector.broadcast %c0_i32_199 : i32 to vector<64x1xi32>
    %604 = arith.cmpi sge, %602, %603 : vector<64x1xi32>
    %c-2_i32_200 = arith.constant -2 : i32
    %605 = vector.broadcast %c-2_i32_200 : i32 to vector<64x1xi32>
    %606 = arith.addi %4, %605 : vector<64x1xi32>
    %c8_i32_201 = arith.constant 8 : i32
    %607 = vector.broadcast %c8_i32_201 : i32 to vector<64x1xi32>
    %608 = arith.cmpi slt, %606, %607 : vector<64x1xi32>
    %609 = arith.andi %604, %608 : vector<64x1xi1>
    %cst_202 = arith.constant 0.000000e+00 : f32
    %610 = vector.shape_cast %609 : vector<64x1xi1> to vector<64x1xi1>
    %611 = vector.broadcast %610 : vector<64x1xi1> to vector<64x32xi1>
    %612 = vector.broadcast %cst_202 : f32 to vector<64x32xf32>
    %613 = arith.select %611, %600, %612 : vector<64x32xi1>, vector<64x32xf32>
    %614 = vector.extract_strided_slice %6 {offsets = [29, 0], sizes = [1, 32], strides = [1, 1]} : vector<49x32xf32> to vector<1x32xf32>
    %615 = vector.broadcast %614 : vector<1x32xf32> to vector<64x32xf32>
    %616 = arith.mulf %613, %615 : vector<64x32xf32>
    %617 = arith.addf %599, %616 : vector<64x32xf32>
    %c1_i32_203 = arith.constant 1 : i32
    %618 = tpu.dynamic_rotate %571 by %c1_i32_203 dim 0 : vector<64x32xf32>, i32 -> vector<64x32xf32>
    %c-1_i32_204 = arith.constant -1 : i32
    %619 = vector.broadcast %c-1_i32_204 : i32 to vector<64x1xi32>
    %620 = arith.addi %4, %619 : vector<64x1xi32>
    %c0_i32_205 = arith.constant 0 : i32
    %621 = vector.broadcast %c0_i32_205 : i32 to vector<64x1xi32>
    %622 = arith.cmpi sge, %620, %621 : vector<64x1xi32>
    %c-1_i32_206 = arith.constant -1 : i32
    %623 = vector.broadcast %c-1_i32_206 : i32 to vector<64x1xi32>
    %624 = arith.addi %4, %623 : vector<64x1xi32>
    %c8_i32_207 = arith.constant 8 : i32
    %625 = vector.broadcast %c8_i32_207 : i32 to vector<64x1xi32>
    %626 = arith.cmpi slt, %624, %625 : vector<64x1xi32>
    %627 = arith.andi %622, %626 : vector<64x1xi1>
    %cst_208 = arith.constant 0.000000e+00 : f32
    %628 = vector.shape_cast %627 : vector<64x1xi1> to vector<64x1xi1>
    %629 = vector.broadcast %628 : vector<64x1xi1> to vector<64x32xi1>
    %630 = vector.broadcast %cst_208 : f32 to vector<64x32xf32>
    %631 = arith.select %629, %618, %630 : vector<64x32xi1>, vector<64x32xf32>
    %632 = vector.extract_strided_slice %6 {offsets = [30, 0], sizes = [1, 32], strides = [1, 1]} : vector<49x32xf32> to vector<1x32xf32>
    %633 = vector.broadcast %632 : vector<1x32xf32> to vector<64x32xf32>
    %634 = arith.mulf %631, %633 : vector<64x32xf32>
    %635 = arith.addf %617, %634 : vector<64x32xf32>
    %c0_i32_209 = arith.constant 0 : i32
    %636 = vector.broadcast %c0_i32_209 : i32 to vector<64x1xi32>
    %637 = arith.addi %4, %636 : vector<64x1xi32>
    %c0_i32_210 = arith.constant 0 : i32
    %638 = vector.broadcast %c0_i32_210 : i32 to vector<64x1xi32>
    %639 = arith.cmpi sge, %637, %638 : vector<64x1xi32>
    %c0_i32_211 = arith.constant 0 : i32
    %640 = vector.broadcast %c0_i32_211 : i32 to vector<64x1xi32>
    %641 = arith.addi %4, %640 : vector<64x1xi32>
    %c8_i32_212 = arith.constant 8 : i32
    %642 = vector.broadcast %c8_i32_212 : i32 to vector<64x1xi32>
    %643 = arith.cmpi slt, %641, %642 : vector<64x1xi32>
    %644 = arith.andi %639, %643 : vector<64x1xi1>
    %cst_213 = arith.constant 0.000000e+00 : f32
    %645 = vector.shape_cast %644 : vector<64x1xi1> to vector<64x1xi1>
    %646 = vector.broadcast %645 : vector<64x1xi1> to vector<64x32xi1>
    %647 = vector.broadcast %cst_213 : f32 to vector<64x32xf32>
    %648 = arith.select %646, %571, %647 : vector<64x32xi1>, vector<64x32xf32>
    %649 = vector.extract_strided_slice %6 {offsets = [31, 0], sizes = [1, 32], strides = [1, 1]} : vector<49x32xf32> to vector<1x32xf32>
    %650 = vector.broadcast %649 : vector<1x32xf32> to vector<64x32xf32>
    %651 = arith.mulf %648, %650 : vector<64x32xf32>
    %652 = arith.addf %635, %651 : vector<64x32xf32>
    %c63_i32_214 = arith.constant 63 : i32
    %653 = tpu.dynamic_rotate %571 by %c63_i32_214 dim 0 : vector<64x32xf32>, i32 -> vector<64x32xf32>
    %c1_i32_215 = arith.constant 1 : i32
    %654 = vector.broadcast %c1_i32_215 : i32 to vector<64x1xi32>
    %655 = arith.addi %4, %654 : vector<64x1xi32>
    %c0_i32_216 = arith.constant 0 : i32
    %656 = vector.broadcast %c0_i32_216 : i32 to vector<64x1xi32>
    %657 = arith.cmpi sge, %655, %656 : vector<64x1xi32>
    %c1_i32_217 = arith.constant 1 : i32
    %658 = vector.broadcast %c1_i32_217 : i32 to vector<64x1xi32>
    %659 = arith.addi %4, %658 : vector<64x1xi32>
    %c8_i32_218 = arith.constant 8 : i32
    %660 = vector.broadcast %c8_i32_218 : i32 to vector<64x1xi32>
    %661 = arith.cmpi slt, %659, %660 : vector<64x1xi32>
    %662 = arith.andi %657, %661 : vector<64x1xi1>
    %cst_219 = arith.constant 0.000000e+00 : f32
    %663 = vector.shape_cast %662 : vector<64x1xi1> to vector<64x1xi1>
    %664 = vector.broadcast %663 : vector<64x1xi1> to vector<64x32xi1>
    %665 = vector.broadcast %cst_219 : f32 to vector<64x32xf32>
    %666 = arith.select %664, %653, %665 : vector<64x32xi1>, vector<64x32xf32>
    %667 = vector.extract_strided_slice %6 {offsets = [32, 0], sizes = [1, 32], strides = [1, 1]} : vector<49x32xf32> to vector<1x32xf32>
    %668 = vector.broadcast %667 : vector<1x32xf32> to vector<64x32xf32>
    %669 = arith.mulf %666, %668 : vector<64x32xf32>
    %670 = arith.addf %652, %669 : vector<64x32xf32>
    %c62_i32_220 = arith.constant 62 : i32
    %671 = tpu.dynamic_rotate %571 by %c62_i32_220 dim 0 : vector<64x32xf32>, i32 -> vector<64x32xf32>
    %c2_i32_221 = arith.constant 2 : i32
    %672 = vector.broadcast %c2_i32_221 : i32 to vector<64x1xi32>
    %673 = arith.addi %4, %672 : vector<64x1xi32>
    %c0_i32_222 = arith.constant 0 : i32
    %674 = vector.broadcast %c0_i32_222 : i32 to vector<64x1xi32>
    %675 = arith.cmpi sge, %673, %674 : vector<64x1xi32>
    %c2_i32_223 = arith.constant 2 : i32
    %676 = vector.broadcast %c2_i32_223 : i32 to vector<64x1xi32>
    %677 = arith.addi %4, %676 : vector<64x1xi32>
    %c8_i32_224 = arith.constant 8 : i32
    %678 = vector.broadcast %c8_i32_224 : i32 to vector<64x1xi32>
    %679 = arith.cmpi slt, %677, %678 : vector<64x1xi32>
    %680 = arith.andi %675, %679 : vector<64x1xi1>
    %cst_225 = arith.constant 0.000000e+00 : f32
    %681 = vector.shape_cast %680 : vector<64x1xi1> to vector<64x1xi1>
    %682 = vector.broadcast %681 : vector<64x1xi1> to vector<64x32xi1>
    %683 = vector.broadcast %cst_225 : f32 to vector<64x32xf32>
    %684 = arith.select %682, %671, %683 : vector<64x32xi1>, vector<64x32xf32>
    %685 = vector.extract_strided_slice %6 {offsets = [33, 0], sizes = [1, 32], strides = [1, 1]} : vector<49x32xf32> to vector<1x32xf32>
    %686 = vector.broadcast %685 : vector<1x32xf32> to vector<64x32xf32>
    %687 = arith.mulf %684, %686 : vector<64x32xf32>
    %688 = arith.addf %670, %687 : vector<64x32xf32>
    %c61_i32_226 = arith.constant 61 : i32
    %689 = tpu.dynamic_rotate %571 by %c61_i32_226 dim 0 : vector<64x32xf32>, i32 -> vector<64x32xf32>
    %c3_i32_227 = arith.constant 3 : i32
    %690 = vector.broadcast %c3_i32_227 : i32 to vector<64x1xi32>
    %691 = arith.addi %4, %690 : vector<64x1xi32>
    %c0_i32_228 = arith.constant 0 : i32
    %692 = vector.broadcast %c0_i32_228 : i32 to vector<64x1xi32>
    %693 = arith.cmpi sge, %691, %692 : vector<64x1xi32>
    %c3_i32_229 = arith.constant 3 : i32
    %694 = vector.broadcast %c3_i32_229 : i32 to vector<64x1xi32>
    %695 = arith.addi %4, %694 : vector<64x1xi32>
    %c8_i32_230 = arith.constant 8 : i32
    %696 = vector.broadcast %c8_i32_230 : i32 to vector<64x1xi32>
    %697 = arith.cmpi slt, %695, %696 : vector<64x1xi32>
    %698 = arith.andi %693, %697 : vector<64x1xi1>
    %cst_231 = arith.constant 0.000000e+00 : f32
    %699 = vector.shape_cast %698 : vector<64x1xi1> to vector<64x1xi1>
    %700 = vector.broadcast %699 : vector<64x1xi1> to vector<64x32xi1>
    %701 = vector.broadcast %cst_231 : f32 to vector<64x32xf32>
    %702 = arith.select %700, %689, %701 : vector<64x32xi1>, vector<64x32xf32>
    %703 = vector.extract_strided_slice %6 {offsets = [34, 0], sizes = [1, 32], strides = [1, 1]} : vector<49x32xf32> to vector<1x32xf32>
    %704 = vector.broadcast %703 : vector<1x32xf32> to vector<64x32xf32>
    %705 = arith.mulf %702, %704 : vector<64x32xf32>
    %706 = arith.addf %688, %705 : vector<64x32xf32>
    %cst_232 = arith.constant 0.000000e+00 : f32
    %707 = vector.shape_cast %580 : vector<64x1xi1> to vector<64x1xi1>
    %708 = vector.broadcast %707 : vector<64x1xi1> to vector<64x32xi1>
    %709 = vector.broadcast %cst_232 : f32 to vector<64x32xf32>
    %710 = arith.select %708, %706, %709 : vector<64x32xi1>, vector<64x32xf32>
    %711 = arith.addf %570, %710 : vector<64x32xf32>
    %c48_i32 = arith.constant 48 : i32
    %712 = tpu.dynamic_rotate %2 by %c48_i32 dim 0 : vector<64x32xf32>, i32 -> vector<64x32xf32>
    %c2_i32_233 = arith.constant 2 : i32
    %713 = vector.broadcast %c2_i32_233 : i32 to vector<64x1xi32>
    %714 = arith.addi %3, %713 : vector<64x1xi32>
    %c0_i32_234 = arith.constant 0 : i32
    %715 = vector.broadcast %c0_i32_234 : i32 to vector<64x1xi32>
    %716 = arith.cmpi sge, %714, %715 : vector<64x1xi32>
    %c2_i32_235 = arith.constant 2 : i32
    %717 = vector.broadcast %c2_i32_235 : i32 to vector<64x1xi32>
    %718 = arith.addi %3, %717 : vector<64x1xi32>
    %c8_i32_236 = arith.constant 8 : i32
    %719 = vector.broadcast %c8_i32_236 : i32 to vector<64x1xi32>
    %720 = arith.cmpi slt, %718, %719 : vector<64x1xi32>
    %721 = arith.andi %716, %720 : vector<64x1xi1>
    %cst_237 = arith.constant 0.000000e+00 : f32
    %722 = vector.broadcast %cst_237 : f32 to vector<64x32xf32>
    %c3_i32_238 = arith.constant 3 : i32
    %723 = tpu.dynamic_rotate %712 by %c3_i32_238 dim 0 : vector<64x32xf32>, i32 -> vector<64x32xf32>
    %c-3_i32_239 = arith.constant -3 : i32
    %724 = vector.broadcast %c-3_i32_239 : i32 to vector<64x1xi32>
    %725 = arith.addi %4, %724 : vector<64x1xi32>
    %c0_i32_240 = arith.constant 0 : i32
    %726 = vector.broadcast %c0_i32_240 : i32 to vector<64x1xi32>
    %727 = arith.cmpi sge, %725, %726 : vector<64x1xi32>
    %c-3_i32_241 = arith.constant -3 : i32
    %728 = vector.broadcast %c-3_i32_241 : i32 to vector<64x1xi32>
    %729 = arith.addi %4, %728 : vector<64x1xi32>
    %c8_i32_242 = arith.constant 8 : i32
    %730 = vector.broadcast %c8_i32_242 : i32 to vector<64x1xi32>
    %731 = arith.cmpi slt, %729, %730 : vector<64x1xi32>
    %732 = arith.andi %727, %731 : vector<64x1xi1>
    %cst_243 = arith.constant 0.000000e+00 : f32
    %733 = vector.shape_cast %732 : vector<64x1xi1> to vector<64x1xi1>
    %734 = vector.broadcast %733 : vector<64x1xi1> to vector<64x32xi1>
    %735 = vector.broadcast %cst_243 : f32 to vector<64x32xf32>
    %736 = arith.select %734, %723, %735 : vector<64x32xi1>, vector<64x32xf32>
    %737 = vector.extract_strided_slice %6 {offsets = [35, 0], sizes = [1, 32], strides = [1, 1]} : vector<49x32xf32> to vector<1x32xf32>
    %738 = vector.broadcast %737 : vector<1x32xf32> to vector<64x32xf32>
    %739 = arith.mulf %736, %738 : vector<64x32xf32>
    %740 = arith.addf %722, %739 : vector<64x32xf32>
    %c2_i32_244 = arith.constant 2 : i32
    %741 = tpu.dynamic_rotate %712 by %c2_i32_244 dim 0 : vector<64x32xf32>, i32 -> vector<64x32xf32>
    %c-2_i32_245 = arith.constant -2 : i32
    %742 = vector.broadcast %c-2_i32_245 : i32 to vector<64x1xi32>
    %743 = arith.addi %4, %742 : vector<64x1xi32>
    %c0_i32_246 = arith.constant 0 : i32
    %744 = vector.broadcast %c0_i32_246 : i32 to vector<64x1xi32>
    %745 = arith.cmpi sge, %743, %744 : vector<64x1xi32>
    %c-2_i32_247 = arith.constant -2 : i32
    %746 = vector.broadcast %c-2_i32_247 : i32 to vector<64x1xi32>
    %747 = arith.addi %4, %746 : vector<64x1xi32>
    %c8_i32_248 = arith.constant 8 : i32
    %748 = vector.broadcast %c8_i32_248 : i32 to vector<64x1xi32>
    %749 = arith.cmpi slt, %747, %748 : vector<64x1xi32>
    %750 = arith.andi %745, %749 : vector<64x1xi1>
    %cst_249 = arith.constant 0.000000e+00 : f32
    %751 = vector.shape_cast %750 : vector<64x1xi1> to vector<64x1xi1>
    %752 = vector.broadcast %751 : vector<64x1xi1> to vector<64x32xi1>
    %753 = vector.broadcast %cst_249 : f32 to vector<64x32xf32>
    %754 = arith.select %752, %741, %753 : vector<64x32xi1>, vector<64x32xf32>
    %755 = vector.extract_strided_slice %6 {offsets = [36, 0], sizes = [1, 32], strides = [1, 1]} : vector<49x32xf32> to vector<1x32xf32>
    %756 = vector.broadcast %755 : vector<1x32xf32> to vector<64x32xf32>
    %757 = arith.mulf %754, %756 : vector<64x32xf32>
    %758 = arith.addf %740, %757 : vector<64x32xf32>
    %c1_i32_250 = arith.constant 1 : i32
    %759 = tpu.dynamic_rotate %712 by %c1_i32_250 dim 0 : vector<64x32xf32>, i32 -> vector<64x32xf32>
    %c-1_i32_251 = arith.constant -1 : i32
    %760 = vector.broadcast %c-1_i32_251 : i32 to vector<64x1xi32>
    %761 = arith.addi %4, %760 : vector<64x1xi32>
    %c0_i32_252 = arith.constant 0 : i32
    %762 = vector.broadcast %c0_i32_252 : i32 to vector<64x1xi32>
    %763 = arith.cmpi sge, %761, %762 : vector<64x1xi32>
    %c-1_i32_253 = arith.constant -1 : i32
    %764 = vector.broadcast %c-1_i32_253 : i32 to vector<64x1xi32>
    %765 = arith.addi %4, %764 : vector<64x1xi32>
    %c8_i32_254 = arith.constant 8 : i32
    %766 = vector.broadcast %c8_i32_254 : i32 to vector<64x1xi32>
    %767 = arith.cmpi slt, %765, %766 : vector<64x1xi32>
    %768 = arith.andi %763, %767 : vector<64x1xi1>
    %cst_255 = arith.constant 0.000000e+00 : f32
    %769 = vector.shape_cast %768 : vector<64x1xi1> to vector<64x1xi1>
    %770 = vector.broadcast %769 : vector<64x1xi1> to vector<64x32xi1>
    %771 = vector.broadcast %cst_255 : f32 to vector<64x32xf32>
    %772 = arith.select %770, %759, %771 : vector<64x32xi1>, vector<64x32xf32>
    %773 = vector.extract_strided_slice %6 {offsets = [37, 0], sizes = [1, 32], strides = [1, 1]} : vector<49x32xf32> to vector<1x32xf32>
    %774 = vector.broadcast %773 : vector<1x32xf32> to vector<64x32xf32>
    %775 = arith.mulf %772, %774 : vector<64x32xf32>
    %776 = arith.addf %758, %775 : vector<64x32xf32>
    %c0_i32_256 = arith.constant 0 : i32
    %777 = vector.broadcast %c0_i32_256 : i32 to vector<64x1xi32>
    %778 = arith.addi %4, %777 : vector<64x1xi32>
    %c0_i32_257 = arith.constant 0 : i32
    %779 = vector.broadcast %c0_i32_257 : i32 to vector<64x1xi32>
    %780 = arith.cmpi sge, %778, %779 : vector<64x1xi32>
    %c0_i32_258 = arith.constant 0 : i32
    %781 = vector.broadcast %c0_i32_258 : i32 to vector<64x1xi32>
    %782 = arith.addi %4, %781 : vector<64x1xi32>
    %c8_i32_259 = arith.constant 8 : i32
    %783 = vector.broadcast %c8_i32_259 : i32 to vector<64x1xi32>
    %784 = arith.cmpi slt, %782, %783 : vector<64x1xi32>
    %785 = arith.andi %780, %784 : vector<64x1xi1>
    %cst_260 = arith.constant 0.000000e+00 : f32
    %786 = vector.shape_cast %785 : vector<64x1xi1> to vector<64x1xi1>
    %787 = vector.broadcast %786 : vector<64x1xi1> to vector<64x32xi1>
    %788 = vector.broadcast %cst_260 : f32 to vector<64x32xf32>
    %789 = arith.select %787, %712, %788 : vector<64x32xi1>, vector<64x32xf32>
    %790 = vector.extract_strided_slice %6 {offsets = [38, 0], sizes = [1, 32], strides = [1, 1]} : vector<49x32xf32> to vector<1x32xf32>
    %791 = vector.broadcast %790 : vector<1x32xf32> to vector<64x32xf32>
    %792 = arith.mulf %789, %791 : vector<64x32xf32>
    %793 = arith.addf %776, %792 : vector<64x32xf32>
    %c63_i32_261 = arith.constant 63 : i32
    %794 = tpu.dynamic_rotate %712 by %c63_i32_261 dim 0 : vector<64x32xf32>, i32 -> vector<64x32xf32>
    %c1_i32_262 = arith.constant 1 : i32
    %795 = vector.broadcast %c1_i32_262 : i32 to vector<64x1xi32>
    %796 = arith.addi %4, %795 : vector<64x1xi32>
    %c0_i32_263 = arith.constant 0 : i32
    %797 = vector.broadcast %c0_i32_263 : i32 to vector<64x1xi32>
    %798 = arith.cmpi sge, %796, %797 : vector<64x1xi32>
    %c1_i32_264 = arith.constant 1 : i32
    %799 = vector.broadcast %c1_i32_264 : i32 to vector<64x1xi32>
    %800 = arith.addi %4, %799 : vector<64x1xi32>
    %c8_i32_265 = arith.constant 8 : i32
    %801 = vector.broadcast %c8_i32_265 : i32 to vector<64x1xi32>
    %802 = arith.cmpi slt, %800, %801 : vector<64x1xi32>
    %803 = arith.andi %798, %802 : vector<64x1xi1>
    %cst_266 = arith.constant 0.000000e+00 : f32
    %804 = vector.shape_cast %803 : vector<64x1xi1> to vector<64x1xi1>
    %805 = vector.broadcast %804 : vector<64x1xi1> to vector<64x32xi1>
    %806 = vector.broadcast %cst_266 : f32 to vector<64x32xf32>
    %807 = arith.select %805, %794, %806 : vector<64x32xi1>, vector<64x32xf32>
    %808 = vector.extract_strided_slice %6 {offsets = [39, 0], sizes = [1, 32], strides = [1, 1]} : vector<49x32xf32> to vector<1x32xf32>
    %809 = vector.broadcast %808 : vector<1x32xf32> to vector<64x32xf32>
    %810 = arith.mulf %807, %809 : vector<64x32xf32>
    %811 = arith.addf %793, %810 : vector<64x32xf32>
    %c62_i32_267 = arith.constant 62 : i32
    %812 = tpu.dynamic_rotate %712 by %c62_i32_267 dim 0 : vector<64x32xf32>, i32 -> vector<64x32xf32>
    %c2_i32_268 = arith.constant 2 : i32
    %813 = vector.broadcast %c2_i32_268 : i32 to vector<64x1xi32>
    %814 = arith.addi %4, %813 : vector<64x1xi32>
    %c0_i32_269 = arith.constant 0 : i32
    %815 = vector.broadcast %c0_i32_269 : i32 to vector<64x1xi32>
    %816 = arith.cmpi sge, %814, %815 : vector<64x1xi32>
    %c2_i32_270 = arith.constant 2 : i32
    %817 = vector.broadcast %c2_i32_270 : i32 to vector<64x1xi32>
    %818 = arith.addi %4, %817 : vector<64x1xi32>
    %c8_i32_271 = arith.constant 8 : i32
    %819 = vector.broadcast %c8_i32_271 : i32 to vector<64x1xi32>
    %820 = arith.cmpi slt, %818, %819 : vector<64x1xi32>
    %821 = arith.andi %816, %820 : vector<64x1xi1>
    %cst_272 = arith.constant 0.000000e+00 : f32
    %822 = vector.shape_cast %821 : vector<64x1xi1> to vector<64x1xi1>
    %823 = vector.broadcast %822 : vector<64x1xi1> to vector<64x32xi1>
    %824 = vector.broadcast %cst_272 : f32 to vector<64x32xf32>
    %825 = arith.select %823, %812, %824 : vector<64x32xi1>, vector<64x32xf32>
    %826 = vector.extract_strided_slice %6 {offsets = [40, 0], sizes = [1, 32], strides = [1, 1]} : vector<49x32xf32> to vector<1x32xf32>
    %827 = vector.broadcast %826 : vector<1x32xf32> to vector<64x32xf32>
    %828 = arith.mulf %825, %827 : vector<64x32xf32>
    %829 = arith.addf %811, %828 : vector<64x32xf32>
    %c61_i32_273 = arith.constant 61 : i32
    %830 = tpu.dynamic_rotate %712 by %c61_i32_273 dim 0 : vector<64x32xf32>, i32 -> vector<64x32xf32>
    %c3_i32_274 = arith.constant 3 : i32
    %831 = vector.broadcast %c3_i32_274 : i32 to vector<64x1xi32>
    %832 = arith.addi %4, %831 : vector<64x1xi32>
    %c0_i32_275 = arith.constant 0 : i32
    %833 = vector.broadcast %c0_i32_275 : i32 to vector<64x1xi32>
    %834 = arith.cmpi sge, %832, %833 : vector<64x1xi32>
    %c3_i32_276 = arith.constant 3 : i32
    %835 = vector.broadcast %c3_i32_276 : i32 to vector<64x1xi32>
    %836 = arith.addi %4, %835 : vector<64x1xi32>
    %c8_i32_277 = arith.constant 8 : i32
    %837 = vector.broadcast %c8_i32_277 : i32 to vector<64x1xi32>
    %838 = arith.cmpi slt, %836, %837 : vector<64x1xi32>
    %839 = arith.andi %834, %838 : vector<64x1xi1>
    %cst_278 = arith.constant 0.000000e+00 : f32
    %840 = vector.shape_cast %839 : vector<64x1xi1> to vector<64x1xi1>
    %841 = vector.broadcast %840 : vector<64x1xi1> to vector<64x32xi1>
    %842 = vector.broadcast %cst_278 : f32 to vector<64x32xf32>
    %843 = arith.select %841, %830, %842 : vector<64x32xi1>, vector<64x32xf32>
    %844 = vector.extract_strided_slice %6 {offsets = [41, 0], sizes = [1, 32], strides = [1, 1]} : vector<49x32xf32> to vector<1x32xf32>
    %845 = vector.broadcast %844 : vector<1x32xf32> to vector<64x32xf32>
    %846 = arith.mulf %843, %845 : vector<64x32xf32>
    %847 = arith.addf %829, %846 : vector<64x32xf32>
    %cst_279 = arith.constant 0.000000e+00 : f32
    %848 = vector.shape_cast %721 : vector<64x1xi1> to vector<64x1xi1>
    %849 = vector.broadcast %848 : vector<64x1xi1> to vector<64x32xi1>
    %850 = vector.broadcast %cst_279 : f32 to vector<64x32xf32>
    %851 = arith.select %849, %847, %850 : vector<64x32xi1>, vector<64x32xf32>
    %852 = arith.addf %711, %851 : vector<64x32xf32>
    %c40_i32 = arith.constant 40 : i32
    %853 = tpu.dynamic_rotate %2 by %c40_i32 dim 0 : vector<64x32xf32>, i32 -> vector<64x32xf32>
    %c3_i32_280 = arith.constant 3 : i32
    %854 = vector.broadcast %c3_i32_280 : i32 to vector<64x1xi32>
    %855 = arith.addi %3, %854 : vector<64x1xi32>
    %c0_i32_281 = arith.constant 0 : i32
    %856 = vector.broadcast %c0_i32_281 : i32 to vector<64x1xi32>
    %857 = arith.cmpi sge, %855, %856 : vector<64x1xi32>
    %c3_i32_282 = arith.constant 3 : i32
    %858 = vector.broadcast %c3_i32_282 : i32 to vector<64x1xi32>
    %859 = arith.addi %3, %858 : vector<64x1xi32>
    %c8_i32_283 = arith.constant 8 : i32
    %860 = vector.broadcast %c8_i32_283 : i32 to vector<64x1xi32>
    %861 = arith.cmpi slt, %859, %860 : vector<64x1xi32>
    %862 = arith.andi %857, %861 : vector<64x1xi1>
    %cst_284 = arith.constant 0.000000e+00 : f32
    %863 = vector.broadcast %cst_284 : f32 to vector<64x32xf32>
    %c3_i32_285 = arith.constant 3 : i32
    %864 = tpu.dynamic_rotate %853 by %c3_i32_285 dim 0 : vector<64x32xf32>, i32 -> vector<64x32xf32>
    %c-3_i32_286 = arith.constant -3 : i32
    %865 = vector.broadcast %c-3_i32_286 : i32 to vector<64x1xi32>
    %866 = arith.addi %4, %865 : vector<64x1xi32>
    %c0_i32_287 = arith.constant 0 : i32
    %867 = vector.broadcast %c0_i32_287 : i32 to vector<64x1xi32>
    %868 = arith.cmpi sge, %866, %867 : vector<64x1xi32>
    %c-3_i32_288 = arith.constant -3 : i32
    %869 = vector.broadcast %c-3_i32_288 : i32 to vector<64x1xi32>
    %870 = arith.addi %4, %869 : vector<64x1xi32>
    %c8_i32_289 = arith.constant 8 : i32
    %871 = vector.broadcast %c8_i32_289 : i32 to vector<64x1xi32>
    %872 = arith.cmpi slt, %870, %871 : vector<64x1xi32>
    %873 = arith.andi %868, %872 : vector<64x1xi1>
    %cst_290 = arith.constant 0.000000e+00 : f32
    %874 = vector.shape_cast %873 : vector<64x1xi1> to vector<64x1xi1>
    %875 = vector.broadcast %874 : vector<64x1xi1> to vector<64x32xi1>
    %876 = vector.broadcast %cst_290 : f32 to vector<64x32xf32>
    %877 = arith.select %875, %864, %876 : vector<64x32xi1>, vector<64x32xf32>
    %878 = vector.extract_strided_slice %6 {offsets = [42, 0], sizes = [1, 32], strides = [1, 1]} : vector<49x32xf32> to vector<1x32xf32>
    %879 = vector.broadcast %878 : vector<1x32xf32> to vector<64x32xf32>
    %880 = arith.mulf %877, %879 : vector<64x32xf32>
    %881 = arith.addf %863, %880 : vector<64x32xf32>
    %c2_i32_291 = arith.constant 2 : i32
    %882 = tpu.dynamic_rotate %853 by %c2_i32_291 dim 0 : vector<64x32xf32>, i32 -> vector<64x32xf32>
    %c-2_i32_292 = arith.constant -2 : i32
    %883 = vector.broadcast %c-2_i32_292 : i32 to vector<64x1xi32>
    %884 = arith.addi %4, %883 : vector<64x1xi32>
    %c0_i32_293 = arith.constant 0 : i32
    %885 = vector.broadcast %c0_i32_293 : i32 to vector<64x1xi32>
    %886 = arith.cmpi sge, %884, %885 : vector<64x1xi32>
    %c-2_i32_294 = arith.constant -2 : i32
    %887 = vector.broadcast %c-2_i32_294 : i32 to vector<64x1xi32>
    %888 = arith.addi %4, %887 : vector<64x1xi32>
    %c8_i32_295 = arith.constant 8 : i32
    %889 = vector.broadcast %c8_i32_295 : i32 to vector<64x1xi32>
    %890 = arith.cmpi slt, %888, %889 : vector<64x1xi32>
    %891 = arith.andi %886, %890 : vector<64x1xi1>
    %cst_296 = arith.constant 0.000000e+00 : f32
    %892 = vector.shape_cast %891 : vector<64x1xi1> to vector<64x1xi1>
    %893 = vector.broadcast %892 : vector<64x1xi1> to vector<64x32xi1>
    %894 = vector.broadcast %cst_296 : f32 to vector<64x32xf32>
    %895 = arith.select %893, %882, %894 : vector<64x32xi1>, vector<64x32xf32>
    %896 = vector.extract_strided_slice %6 {offsets = [43, 0], sizes = [1, 32], strides = [1, 1]} : vector<49x32xf32> to vector<1x32xf32>
    %897 = vector.broadcast %896 : vector<1x32xf32> to vector<64x32xf32>
    %898 = arith.mulf %895, %897 : vector<64x32xf32>
    %899 = arith.addf %881, %898 : vector<64x32xf32>
    %c1_i32_297 = arith.constant 1 : i32
    %900 = tpu.dynamic_rotate %853 by %c1_i32_297 dim 0 : vector<64x32xf32>, i32 -> vector<64x32xf32>
    %c-1_i32_298 = arith.constant -1 : i32
    %901 = vector.broadcast %c-1_i32_298 : i32 to vector<64x1xi32>
    %902 = arith.addi %4, %901 : vector<64x1xi32>
    %c0_i32_299 = arith.constant 0 : i32
    %903 = vector.broadcast %c0_i32_299 : i32 to vector<64x1xi32>
    %904 = arith.cmpi sge, %902, %903 : vector<64x1xi32>
    %c-1_i32_300 = arith.constant -1 : i32
    %905 = vector.broadcast %c-1_i32_300 : i32 to vector<64x1xi32>
    %906 = arith.addi %4, %905 : vector<64x1xi32>
    %c8_i32_301 = arith.constant 8 : i32
    %907 = vector.broadcast %c8_i32_301 : i32 to vector<64x1xi32>
    %908 = arith.cmpi slt, %906, %907 : vector<64x1xi32>
    %909 = arith.andi %904, %908 : vector<64x1xi1>
    %cst_302 = arith.constant 0.000000e+00 : f32
    %910 = vector.shape_cast %909 : vector<64x1xi1> to vector<64x1xi1>
    %911 = vector.broadcast %910 : vector<64x1xi1> to vector<64x32xi1>
    %912 = vector.broadcast %cst_302 : f32 to vector<64x32xf32>
    %913 = arith.select %911, %900, %912 : vector<64x32xi1>, vector<64x32xf32>
    %914 = vector.extract_strided_slice %6 {offsets = [44, 0], sizes = [1, 32], strides = [1, 1]} : vector<49x32xf32> to vector<1x32xf32>
    %915 = vector.broadcast %914 : vector<1x32xf32> to vector<64x32xf32>
    %916 = arith.mulf %913, %915 : vector<64x32xf32>
    %917 = arith.addf %899, %916 : vector<64x32xf32>
    %c0_i32_303 = arith.constant 0 : i32
    %918 = vector.broadcast %c0_i32_303 : i32 to vector<64x1xi32>
    %919 = arith.addi %4, %918 : vector<64x1xi32>
    %c0_i32_304 = arith.constant 0 : i32
    %920 = vector.broadcast %c0_i32_304 : i32 to vector<64x1xi32>
    %921 = arith.cmpi sge, %919, %920 : vector<64x1xi32>
    %c0_i32_305 = arith.constant 0 : i32
    %922 = vector.broadcast %c0_i32_305 : i32 to vector<64x1xi32>
    %923 = arith.addi %4, %922 : vector<64x1xi32>
    %c8_i32_306 = arith.constant 8 : i32
    %924 = vector.broadcast %c8_i32_306 : i32 to vector<64x1xi32>
    %925 = arith.cmpi slt, %923, %924 : vector<64x1xi32>
    %926 = arith.andi %921, %925 : vector<64x1xi1>
    %cst_307 = arith.constant 0.000000e+00 : f32
    %927 = vector.shape_cast %926 : vector<64x1xi1> to vector<64x1xi1>
    %928 = vector.broadcast %927 : vector<64x1xi1> to vector<64x32xi1>
    %929 = vector.broadcast %cst_307 : f32 to vector<64x32xf32>
    %930 = arith.select %928, %853, %929 : vector<64x32xi1>, vector<64x32xf32>
    %931 = vector.extract_strided_slice %6 {offsets = [45, 0], sizes = [1, 32], strides = [1, 1]} : vector<49x32xf32> to vector<1x32xf32>
    %932 = vector.broadcast %931 : vector<1x32xf32> to vector<64x32xf32>
    %933 = arith.mulf %930, %932 : vector<64x32xf32>
    %934 = arith.addf %917, %933 : vector<64x32xf32>
    %c63_i32_308 = arith.constant 63 : i32
    %935 = tpu.dynamic_rotate %853 by %c63_i32_308 dim 0 : vector<64x32xf32>, i32 -> vector<64x32xf32>
    %c1_i32_309 = arith.constant 1 : i32
    %936 = vector.broadcast %c1_i32_309 : i32 to vector<64x1xi32>
    %937 = arith.addi %4, %936 : vector<64x1xi32>
    %c0_i32_310 = arith.constant 0 : i32
    %938 = vector.broadcast %c0_i32_310 : i32 to vector<64x1xi32>
    %939 = arith.cmpi sge, %937, %938 : vector<64x1xi32>
    %c1_i32_311 = arith.constant 1 : i32
    %940 = vector.broadcast %c1_i32_311 : i32 to vector<64x1xi32>
    %941 = arith.addi %4, %940 : vector<64x1xi32>
    %c8_i32_312 = arith.constant 8 : i32
    %942 = vector.broadcast %c8_i32_312 : i32 to vector<64x1xi32>
    %943 = arith.cmpi slt, %941, %942 : vector<64x1xi32>
    %944 = arith.andi %939, %943 : vector<64x1xi1>
    %cst_313 = arith.constant 0.000000e+00 : f32
    %945 = vector.shape_cast %944 : vector<64x1xi1> to vector<64x1xi1>
    %946 = vector.broadcast %945 : vector<64x1xi1> to vector<64x32xi1>
    %947 = vector.broadcast %cst_313 : f32 to vector<64x32xf32>
    %948 = arith.select %946, %935, %947 : vector<64x32xi1>, vector<64x32xf32>
    %949 = vector.extract_strided_slice %6 {offsets = [46, 0], sizes = [1, 32], strides = [1, 1]} : vector<49x32xf32> to vector<1x32xf32>
    %950 = vector.broadcast %949 : vector<1x32xf32> to vector<64x32xf32>
    %951 = arith.mulf %948, %950 : vector<64x32xf32>
    %952 = arith.addf %934, %951 : vector<64x32xf32>
    %c62_i32_314 = arith.constant 62 : i32
    %953 = tpu.dynamic_rotate %853 by %c62_i32_314 dim 0 : vector<64x32xf32>, i32 -> vector<64x32xf32>
    %c2_i32_315 = arith.constant 2 : i32
    %954 = vector.broadcast %c2_i32_315 : i32 to vector<64x1xi32>
    %955 = arith.addi %4, %954 : vector<64x1xi32>
    %c0_i32_316 = arith.constant 0 : i32
    %956 = vector.broadcast %c0_i32_316 : i32 to vector<64x1xi32>
    %957 = arith.cmpi sge, %955, %956 : vector<64x1xi32>
    %c2_i32_317 = arith.constant 2 : i32
    %958 = vector.broadcast %c2_i32_317 : i32 to vector<64x1xi32>
    %959 = arith.addi %4, %958 : vector<64x1xi32>
    %c8_i32_318 = arith.constant 8 : i32
    %960 = vector.broadcast %c8_i32_318 : i32 to vector<64x1xi32>
    %961 = arith.cmpi slt, %959, %960 : vector<64x1xi32>
    %962 = arith.andi %957, %961 : vector<64x1xi1>
    %cst_319 = arith.constant 0.000000e+00 : f32
    %963 = vector.shape_cast %962 : vector<64x1xi1> to vector<64x1xi1>
    %964 = vector.broadcast %963 : vector<64x1xi1> to vector<64x32xi1>
    %965 = vector.broadcast %cst_319 : f32 to vector<64x32xf32>
    %966 = arith.select %964, %953, %965 : vector<64x32xi1>, vector<64x32xf32>
    %967 = vector.extract_strided_slice %6 {offsets = [47, 0], sizes = [1, 32], strides = [1, 1]} : vector<49x32xf32> to vector<1x32xf32>
    %968 = vector.broadcast %967 : vector<1x32xf32> to vector<64x32xf32>
    %969 = arith.mulf %966, %968 : vector<64x32xf32>
    %970 = arith.addf %952, %969 : vector<64x32xf32>
    %c61_i32_320 = arith.constant 61 : i32
    %971 = tpu.dynamic_rotate %853 by %c61_i32_320 dim 0 : vector<64x32xf32>, i32 -> vector<64x32xf32>
    %c3_i32_321 = arith.constant 3 : i32
    %972 = vector.broadcast %c3_i32_321 : i32 to vector<64x1xi32>
    %973 = arith.addi %4, %972 : vector<64x1xi32>
    %c0_i32_322 = arith.constant 0 : i32
    %974 = vector.broadcast %c0_i32_322 : i32 to vector<64x1xi32>
    %975 = arith.cmpi sge, %973, %974 : vector<64x1xi32>
    %c3_i32_323 = arith.constant 3 : i32
    %976 = vector.broadcast %c3_i32_323 : i32 to vector<64x1xi32>
    %977 = arith.addi %4, %976 : vector<64x1xi32>
    %c8_i32_324 = arith.constant 8 : i32
    %978 = vector.broadcast %c8_i32_324 : i32 to vector<64x1xi32>
    %979 = arith.cmpi slt, %977, %978 : vector<64x1xi32>
    %980 = arith.andi %975, %979 : vector<64x1xi1>
    %cst_325 = arith.constant 0.000000e+00 : f32
    %981 = vector.shape_cast %980 : vector<64x1xi1> to vector<64x1xi1>
    %982 = vector.broadcast %981 : vector<64x1xi1> to vector<64x32xi1>
    %983 = vector.broadcast %cst_325 : f32 to vector<64x32xf32>
    %984 = arith.select %982, %971, %983 : vector<64x32xi1>, vector<64x32xf32>
    %985 = vector.extract_strided_slice %6 {offsets = [48, 0], sizes = [1, 32], strides = [1, 1]} : vector<49x32xf32> to vector<1x32xf32>
    %986 = vector.broadcast %985 : vector<1x32xf32> to vector<64x32xf32>
    %987 = arith.mulf %984, %986 : vector<64x32xf32>
    %988 = arith.addf %970, %987 : vector<64x32xf32>
    %cst_326 = arith.constant 0.000000e+00 : f32
    %989 = vector.shape_cast %862 : vector<64x1xi1> to vector<64x1xi1>
    %990 = vector.broadcast %989 : vector<64x1xi1> to vector<64x32xi1>
    %991 = vector.broadcast %cst_326 : f32 to vector<64x32xf32>
    %992 = arith.select %990, %988, %991 : vector<64x32xi1>, vector<64x32xf32>
    %993 = arith.addf %852, %992 : vector<64x32xf32>
    %c0_327 = arith.constant 0 : index
    %c0_328 = arith.constant 0 : index
    %994 = vector.load %arg5[%c0_327, %c0_328] : memref<1x32xbf16, #tpu.memory_space<vmem>>, vector<1x32xbf16>
    %995 = arith.extf %994 : vector<1x32xbf16> to vector<1x32xf32>
    %996 = vector.broadcast %995 : vector<1x32xf32> to vector<64x32xf32>
    %997 = arith.addf %993, %996 : vector<64x32xf32>
    %cst_329 = arith.constant dense<0.000000e+00> : vector<64xf32>
    %998 = vector.multi_reduction <add>, %997, %cst_329 [1] : vector<64x32xf32> to vector<64xf32>
    %999 = vector.shape_cast %998 : vector<64xf32> to vector<64x1xf32>
    %cst_330 = arith.constant 3.200000e+01 : f32
    %1000 = vector.broadcast %cst_330 : f32 to vector<64x1xf32>
    %1001 = arith.divf %999, %1000 : vector<64x1xf32>
    %1002 = vector.broadcast %1001 : vector<64x1xf32> to vector<64x32xf32>
    %1003 = arith.subf %997, %1002 : vector<64x32xf32>
    %1004 = arith.mulf %1003, %1003 : vector<64x32xf32>
    %cst_331 = arith.constant dense<0.000000e+00> : vector<64xf32>
    %1005 = vector.multi_reduction <add>, %1004, %cst_331 [1] : vector<64x32xf32> to vector<64xf32>
    %1006 = vector.shape_cast %1005 : vector<64xf32> to vector<64x1xf32>
    %cst_332 = arith.constant 3.200000e+01 : f32
    %1007 = vector.broadcast %cst_332 : f32 to vector<64x1xf32>
    %1008 = arith.divf %1006, %1007 : vector<64x1xf32>
    %1009 = vector.broadcast %1001 : vector<64x1xf32> to vector<64x32xf32>
    %1010 = arith.subf %997, %1009 : vector<64x32xf32>
    %cst_333 = arith.constant 9.99999974E-6 : f32
    %1011 = vector.broadcast %cst_333 : f32 to vector<64x1xf32>
    %1012 = arith.addf %1008, %1011 : vector<64x1xf32>
    %1013 = math.rsqrt %1012 : vector<64x1xf32>
    %1014 = vector.broadcast %1013 : vector<64x1xf32> to vector<64x32xf32>
    %1015 = arith.mulf %1010, %1014 : vector<64x32xf32>
    %c0_334 = arith.constant 0 : index
    %c0_335 = arith.constant 0 : index
    %1016 = vector.load %arg6[%c0_334, %c0_335] : memref<1x32xbf16, #tpu.memory_space<vmem>>, vector<1x32xbf16>
    %1017 = arith.extf %1016 : vector<1x32xbf16> to vector<1x32xf32>
    %1018 = vector.broadcast %1017 : vector<1x32xf32> to vector<64x32xf32>
    %1019 = arith.mulf %1015, %1018 : vector<64x32xf32>
    %c0_336 = arith.constant 0 : index
    %c0_337 = arith.constant 0 : index
    %1020 = vector.load %arg7[%c0_336, %c0_337] : memref<1x32xbf16, #tpu.memory_space<vmem>>, vector<1x32xbf16>
    %1021 = arith.extf %1020 : vector<1x32xbf16> to vector<1x32xf32>
    %1022 = vector.broadcast %1021 : vector<1x32xf32> to vector<64x32xf32>
    %1023 = arith.addf %1019, %1022 : vector<64x32xf32>
    %c0_338 = arith.constant 0 : index
    %c0_339 = arith.constant 0 : index
    %1024 = vector.load %arg8[%c0_338, %c0_339] : memref<32x128xbf16, #tpu.memory_space<vmem>>, vector<32x128xbf16>
    %1025 = arith.extf %1024 : vector<32x128xbf16> to vector<32x128xf32>
    %cst_340 = arith.constant dense<0.000000e+00> : vector<64x128xf32>
    %1026 = tpu.matmul %1023, %1025, %cst_340 {dimension_numbers = #tpu.dot_dimension_numbers<[1], [0], [0], [1], [0, 0, 1, 1], [], []>} : vector<64x32xf32>, vector<32x128xf32>, vector<64x128xf32> -> vector<64x128xf32>
    %c0_341 = arith.constant 0 : index
    %c0_342 = arith.constant 0 : index
    %1027 = vector.load %arg9[%c0_341, %c0_342] : memref<1x128xbf16, #tpu.memory_space<vmem>>, vector<1x128xbf16>
    %1028 = arith.extf %1027 : vector<1x128xbf16> to vector<1x128xf32>
    %1029 = vector.broadcast %1028 : vector<1x128xf32> to vector<64x128xf32>
    %1030 = arith.addf %1026, %1029 : vector<64x128xf32>
    %cst_343 = arith.constant 5.000000e-01 : f32
    %1031 = vector.broadcast %cst_343 : f32 to vector<64x128xf32>
    %1032 = arith.mulf %1031, %1030 : vector<64x128xf32>
    %cst_344 = arith.constant 4.471500e-02 : f32
    %1033 = vector.broadcast %cst_344 : f32 to vector<64x128xf32>
    %1034 = arith.mulf %1033, %1030 : vector<64x128xf32>
    %1035 = arith.mulf %1034, %1030 : vector<64x128xf32>
    %1036 = arith.mulf %1035, %1030 : vector<64x128xf32>
    %1037 = arith.addf %1030, %1036 : vector<64x128xf32>
    %cst_345 = arith.constant 0.797884583 : f32
    %1038 = vector.broadcast %cst_345 : f32 to vector<64x128xf32>
    %1039 = arith.mulf %1038, %1037 : vector<64x128xf32>
    %1040 = math.tanh %1039 : vector<64x128xf32>
    %cst_346 = arith.constant 1.000000e+00 : f32
    %1041 = vector.broadcast %cst_346 : f32 to vector<64x128xf32>
    %1042 = arith.addf %1041, %1040 : vector<64x128xf32>
    %1043 = arith.mulf %1032, %1042 : vector<64x128xf32>
    %c8_i32_347 = arith.constant 8 : i32
    %1044 = vector.broadcast %c8_i32_347 : i32 to vector<64x1xi32>
    %1045 = arith.cmpi slt, %3, %1044 : vector<64x1xi32>
    %cst_348 = arith.constant 0.000000e+00 : f32
    %1046 = vector.shape_cast %1045 : vector<64x1xi1> to vector<64x1xi1>
    %1047 = vector.broadcast %1046 : vector<64x1xi1> to vector<64x128xi1>
    %1048 = vector.broadcast %cst_348 : f32 to vector<64x128xf32>
    %1049 = arith.select %1047, %1043, %1048 : vector<64x128xi1>, vector<64x128xf32>
    %1050 = arith.mulf %1049, %1049 : vector<64x128xf32>
    %cst_349 = arith.constant dense<0.000000e+00> : vector<128xf32>
    %1051 = vector.multi_reduction <add>, %1050, %cst_349 [0] : vector<64x128xf32> to vector<128xf32>
    %1052 = vector.shape_cast %1051 : vector<128xf32> to vector<1x128xf32>
    %1053 = math.sqrt %1052 : vector<1x128xf32>
    %cst_350 = arith.constant dense<0.000000e+00> : vector<1xf32>
    %1054 = vector.multi_reduction <add>, %1053, %cst_350 [1] : vector<1x128xf32> to vector<1xf32>
    %1055 = vector.shape_cast %1054 : vector<1xf32> to vector<1x1xf32>
    %cst_351 = arith.constant 1.280000e+02 : f32
    %1056 = vector.broadcast %cst_351 : f32 to vector<1x1xf32>
    %1057 = arith.divf %1055, %1056 : vector<1x1xf32>
    %cst_352 = arith.constant 9.99999997E-7 : f32
    %1058 = vector.broadcast %cst_352 : f32 to vector<1x1xf32>
    %1059 = arith.addf %1057, %1058 : vector<1x1xf32>
    %1060 = vector.broadcast %1059 : vector<1x1xf32> to vector<1x128xf32>
    %1061 = arith.divf %1053, %1060 : vector<1x128xf32>
    %c0_353 = arith.constant 0 : index
    %c0_354 = arith.constant 0 : index
    %1062 = vector.load %arg10[%c0_353, %c0_354] : memref<1x128xbf16, #tpu.memory_space<vmem>>, vector<1x128xbf16>
    %1063 = arith.extf %1062 : vector<1x128xbf16> to vector<1x128xf32>
    %1064 = vector.broadcast %1061 : vector<1x128xf32> to vector<64x128xf32>
    %1065 = arith.mulf %1043, %1064 : vector<64x128xf32>
    %1066 = vector.broadcast %1063 : vector<1x128xf32> to vector<64x128xf32>
    %1067 = arith.mulf %1066, %1065 : vector<64x128xf32>
    %c0_355 = arith.constant 0 : index
    %c0_356 = arith.constant 0 : index
    %1068 = vector.load %arg11[%c0_355, %c0_356] : memref<1x128xbf16, #tpu.memory_space<vmem>>, vector<1x128xbf16>
    %1069 = arith.extf %1068 : vector<1x128xbf16> to vector<1x128xf32>
    %1070 = vector.broadcast %1069 : vector<1x128xf32> to vector<64x128xf32>
    %1071 = arith.addf %1067, %1070 : vector<64x128xf32>
    %1072 = arith.addf %1071, %1043 : vector<64x128xf32>
    %c0_357 = arith.constant 0 : index
    %c0_358 = arith.constant 0 : index
    %1073 = vector.load %arg12[%c0_357, %c0_358] : memref<128x32xbf16, #tpu.memory_space<vmem>>, vector<128x32xbf16>
    %1074 = arith.extf %1073 : vector<128x32xbf16> to vector<128x32xf32>
    %cst_359 = arith.constant dense<0.000000e+00> : vector<64x32xf32>
    %1075 = tpu.matmul %1072, %1074, %cst_359 {dimension_numbers = #tpu.dot_dimension_numbers<[1], [0], [0], [1], [0, 0, 1, 1], [], []>} : vector<64x128xf32>, vector<128x32xf32>, vector<64x32xf32> -> vector<64x32xf32>
    %c0_360 = arith.constant 0 : index
    %c0_361 = arith.constant 0 : index
    %1076 = vector.load %arg13[%c0_360, %c0_361] : memref<1x32xbf16, #tpu.memory_space<vmem>>, vector<1x32xbf16>
    %1077 = arith.extf %1076 : vector<1x32xbf16> to vector<1x32xf32>
    %1078 = vector.broadcast %1077 : vector<1x32xf32> to vector<64x32xf32>
    %1079 = arith.addf %1075, %1078 : vector<64x32xf32>
    %1080 = arith.addf %1079, %2 : vector<64x32xf32>
    %1081 = arith.truncf %1080 : vector<64x32xf32> to vector<64x32xbf16>
    %c0_362 = arith.constant 0 : index
    %c0_363 = arith.constant 0 : index
    %c0_364 = arith.constant 0 : index
    %1082 = vector.load %arg14[%c0_362, %c0_363, %c0_364] : memref<1x64x32xbf16, #tpu.memory_space<vmem>>, vector<1x64x32xbf16>
    %1083 = vector.shape_cast %1082 : vector<1x64x32xbf16> to vector<64x32xbf16>
    %1084 = vector.shape_cast %1081 : vector<64x32xbf16> to vector<1x64x32xbf16>
    tpu.vector_store %arg14[%c0_362, %c0_363, %c0_364], %1084 {strides = array<i32>} : memref<1x64x32xbf16, #tpu.memory_space<vmem>>, vector<1x64x32xbf16>,
    return
  }
  func.func @transform_0(%arg0: i32) -> (i32, i32, i32) {
    %c0_i32 = arith.constant 0 : i32
    %c0_i32_0 = arith.constant 0 : i32
    %c0_i32_1 = arith.constant 0 : i32
    return %arg0, %c0_i32, %c0_i32_0 : i32, i32, i32
  }
  func.func @transform_1(%arg0: i32) -> (i32, i32) {
    %c0_i32 = arith.constant 0 : i32
    %c0_i32_0 = arith.constant 0 : i32
    %c0_i32_1 = arith.constant 0 : i32
    return %c0_i32, %c0_i32_0 : i32, i32
  }
  func.func @transform_2(%arg0: i32) -> (i32, i32) {
    %c0_i32 = arith.constant 0 : i32
    %c0_i32_0 = arith.constant 0 : i32
    %c0_i32_1 = arith.constant 0 : i32
    return %c0_i32, %c0_i32_0 : i32, i32
  }
  func.func @transform_3(%arg0: i32) -> (i32, i32) {
    %c0_i32 = arith.constant 0 : i32
    %c0_i32_0 = arith.constant 0 : i32
    %c0_i32_1 = arith.constant 0 : i32
    return %c0_i32, %c0_i32_0 : i32, i32
  }
  func.func @transform_4(%arg0: i32) -> (i32, i32) {
    %c0_i32 = arith.constant 0 : i32
    %c0_i32_0 = arith.constant 0 : i32
    %c0_i32_1 = arith.constant 0 : i32
    return %c0_i32, %c0_i32_0 : i32, i32
  }
  func.func @transform_5(%arg0: i32) -> (i32, i32) {
    %c0_i32 = arith.constant 0 : i32
    %c0_i32_0 = arith.constant 0 : i32
    %c0_i32_1 = arith.constant 0 : i32
    return %c0_i32, %c0_i32_0 : i32, i32
  }
  func.func @transform_6(%arg0: i32) -> (i32, i32) {
    %c0_i32 = arith.constant 0 : i32
    %c0_i32_0 = arith.constant 0 : i32
    %c0_i32_1 = arith.constant 0 : i32
    return %c0_i32, %c0_i32_0 : i32, i32
  }
  func.func @transform_7(%arg0: i32) -> (i32, i32) {
    %c0_i32 = arith.constant 0 : i32
    %c0_i32_0 = arith.constant 0 : i32
    %c0_i32_1 = arith.constant 0 : i32
    return %c0_i32, %c0_i32_0 : i32, i32
  }
  func.func @transform_8(%arg0: i32) -> (i32, i32) {
    %c0_i32 = arith.constant 0 : i32
    %c0_i32_0 = arith.constant 0 : i32
    %c0_i32_1 = arith.constant 0 : i32
    return %c0_i32, %c0_i32_0 : i32, i32
  }
  func.func @transform_9(%arg0: i32) -> (i32, i32) {
    %c0_i32 = arith.constant 0 : i32
    %c0_i32_0 = arith.constant 0 : i32
    %c0_i32_1 = arith.constant 0 : i32
    return %c0_i32, %c0_i32_0 : i32, i32
  }
  func.func @transform_10(%arg0: i32) -> (i32, i32) {
    %c0_i32 = arith.constant 0 : i32
    %c0_i32_0 = arith.constant 0 : i32
    %c0_i32_1 = arith.constant 0 : i32
    return %c0_i32, %c0_i32_0 : i32, i32
  }
  func.func @transform_11(%arg0: i32) -> (i32, i32) {
    %c0_i32 = arith.constant 0 : i32
    %c0_i32_0 = arith.constant 0 : i32
    %c0_i32_1 = arith.constant 0 : i32
    return %c0_i32, %c0_i32_0 : i32, i32
  }
  func.func @transform_12(%arg0: i32) -> (i32, i32) {
    %c0_i32 = arith.constant 0 : i32
    %c0_i32_0 = arith.constant 0 : i32
    %c0_i32_1 = arith.constant 0 : i32
    return %c0_i32, %c0_i32_0 : i32, i32
  }
  func.func @transform_13(%arg0: i32) -> (i32, i32, i32) {
    %c0_i32 = arith.constant 0 : i32
    %c0_i32_0 = arith.constant 0 : i32
    %c0_i32_1 = arith.constant 0 : i32
    return %arg0, %c0_i32, %c0_i32_0 : i32, i32, i32
  }
}

</mosaic_0001>

<bundles_post_ra>
// kernel: tpu_custom_call.1
= control target key start
LH: loop header
LB: loop body
LE: loop exit
PB: predicated region body
PF: predicated region fallthrough
CT: control target
= control target key end

     0   :  { %7 = vsyncpa [#allocation3], 0  ;;  %s633_s0 = inlined_call_operand.hbm [shape: f32[16,128], index: 0, kind: input, shape index: {}]   ;;  %s634_s1 = inlined_call_operand.hbm [shape: f32[8,128], index: 1, kind: input, shape index: {}]   ;;  %s635_s2 = inlined_call_operand.hbm [shape: f32[16,128], index: 2, kind: output, shape index: {}]  }
   0x1   :  { %9 = vsyncpa [#allocation3 + $0x1], 0 }
   0x2   :  { %10 = vsyncpa [#allocation6], 0 }
   0x3   :  { %11 = vsyncpa [#allocation4], 0 }
   0x4   :  { %13 = vsyncpa [#allocation4 + $0x1], 0  ;;  %s495_s9 = smov 0   ;;  %s497_s10 = smov 0  }
   0x5   :  { %s499_s11 = smov 0   ;;  %s501_s12 = smov 0  }
   0x6 LB: > { %s516_s13 = sadd.s32 4294967295, %s477_s12   ;;  %s276_s14 = sadd.s32 4294967294, %s477_s12   ;;  %s477_s12 = sphi %s501_s12, %s645_s12   ;;  %s473_s11 = sphi %s499_s11, %s644_s11   ;;  %s469_s10 = sphi %s497_s10, %s643_s10   ;;  %s465_s9 = sphi %s495_s9, %s642_s9  }
   0x7   : > { %p39_p0 = scmp.ne.s32.totalorder %s469_s10, %s465_s9  ;;  %p40_p1 = scmp.eq.s32.totalorder %s516_s13, 0 }
   0x8   : > { %p84_p2 = scmp.eq.s32.totalorder %s516_s13, 1  ;;  %p90_p3 = scmp.eq.s32.totalorder %s276_s14, 1 }
   0x9   : > { %p525_p4 = por %p40_p1, %p39_p0  ;;  %p277_p5 = scmp.ge.s32.totalorder %s477_s12, 1 }
   0xa   : > { %p530_p6 = por %p90_p3, %p39_p0  ;;  %p97_p7 = scmp.lt.s32.totalorder %s477_s12, 3 }
   0xb   : > { %s109_s19 = sshll.u32 %s634_s1, 4  ;;  %s479_s21 = smov [#allocation5]   ;;  %s110_s19 = int_to_ptr.hbm [resolvable:$true] %s109_s19 }
   0xc   : > { %p538_p8 = pnand %p277_p5, %p97_p7  ;;  %s111_s22 = sshll.u32 %s479_s21, 4  ;;  %s112_s22 = int_to_ptr.vmem [resolvable:$true] %s111_s22 }
   0xd   : > { %s548_s23 = sadd.s32 1, %s477_s12   ;;  %s26_s24 = sadd.s32 1, %s473_s11 }
   0xe   : > { %p298_p10 = pneg %p538_p8  ;;  %s23_s25 = ssub.s32 %s477_s12, %s548_s23 }
   0xf   : > { %p24_p12 = scmp.eq.s32.totalorder %s23_s25, 0  ;;  %p33_p13 = scmp.ne.s32.totalorder %s473_s11, %s469_s10 }
  0x10   : > { %p299_p11 = pnand %p298_p10, %p40_p1  ;;  %p34_p0 = scmp.eq.s32.totalorder %s477_s12, 0 }
  0x11   : > { %s557_s26 = scalar_select %p24_p12, %s473_s11, %s26_s24  }
  0x12   : > { %301 = dma.hbm_to_vmem [thread:$0]  (!%p299_p11), %s110_s19, 128, %s112_s22, [#allocation6]  }
  0x13   : > { %p561_p3 = por %p84_p2, %p33_p13  ;;  %p311_p5 = scmp.lt.s32.totalorder %s477_s12, 2 }
  0x14   : > { %s122_s28 = sand.u32 1, %s473_s11   ;;  %s281_s29 = sshll.u32 %s477_s12, 3 }
  0x15   : > { %p35_p7 = por %p34_p0, %p33_p13  ;;  %s280_s30 = sshll.u32 %s122_s28, 3 }
  0x16   : > { %s130_s5 = scalar_lea.hbm %s633_s0, %s281_s29  ;;  %s126_s7 = scalar_lea.vmem [#allocation2], %s280_s30 }
  0x17   : > { %s132_s6 = sshll.u32 %s130_s5, 4  ;;  %s134_s8 = sshll.u32 %s126_s7, 4  ;;  %s133_s6 = int_to_ptr.hbm [resolvable:$true] %s132_s6  ;;  %s135_s8 = int_to_ptr.vmem [resolvable:$true] %s134_s8 }
  0x18   : > { %p571_p10 = pnand %p311_p5, %p35_p7  ;;  %s123_s17 = scalar_lea.sflag [#allocation3], %s122_s28 }
  0x19   : > { %s377_s18 = sshra.s32 %s133_s6, 4  ;;  %s384_s24 = scalar_lea.hbm %s633_s0, 16  ;;  %s378_s18 = int_to_ptr.hbm [resolvable:$true] %s377_s18 }
  0x1a   : > { %s379_s19 = scalar_lea.hbm %s378_s18, 8  ;;  %p381_p11 = pneg %p571_p10 }
  0x1b   : > { %p380_p2 = scmp.ne.s32.totalorder %s378_s18, %s379_s19  ;;  %p385_p0 = scmp.lt.s32.totalorder %s378_s18, %s633_s0 }
  0x1c   : > { %p386_p5 = scmp.lt.s32.totalorder %s384_s24, %s379_s19 }
  0x1d   : > { %p382_p12 = pnand %p381_p11, %p380_p2 }
  0x1e   : > { %p387_p7 = por %p386_p5, %p385_p0 }
  0x1f   : > { %p383_p13 = pneg %p382_p12 }
  0x21   : > { %p388_p9 = pnand %p387_p7, %p383_p13 }
  0x23   : > { %391 = shalt.err (!%p388_p9)
}
  0x24   : > { %305 = dma.hbm_to_vmem [thread:$0]  (!%p571_p10), %s133_s6, 128, %s135_s8, %s123_s17  }
  0x25   : > { %143 = sbr.rel (%p538_p8) target bundleno = 60 (0x3c), region = 28  ;;  %s588_s28 = sand.u32 (!%p538_p8), 1, %s469_s10  }
  0x26   : > { %s283_s30 = sshll.u32 (!%p538_p8), %s588_s28, 3  ;;  %s146_s3 = scalar_lea.sflag (!%p538_p8), [#allocation3], %s588_s28 }
  0x27   : > { %s149_s4 = scalar_lea.vmem (!%p538_p8), [#allocation2], %s283_s30 }
  0x2a   : > { %452 = dma.done.wait (%p525_p4), %s146_s3, 128  }
  0x2b   : > { %454 = vsyncadd (%p525_p4), %s146_s3, 4294967168 }
  0x2c   : > { %456 = dma.done.wait (%p40_p1), [#allocation6], 128  }
  0x2d   : > { %458 = vsyncadd (%p40_p1), [#allocation6], 4294967168  ;;  %s287_s20 = sshll.u32 %s516_s13, 3  ;;  %s175_s8 = scalar_lea.vmem [#allocation7], %s283_s30  ;;  %v176_v0 = vld [vmem:[%s149_s4] sm:$0xff]  ;;  %v177_v1 = vld [vmem:[#allocation5] sm:$0xff] }
  0x2e   : > { %s191_s7 = scalar_lea.hbm %s635_s2, %s287_s20  ;;  %s193_s14 = sshll.u32 %s175_s8, 4  ;;  %v178_v2 = vadd.f32 %v177_v1, %v176_v0  ;;  %s194_s14 = int_to_ptr.vmem [resolvable:$true] %s193_s14 }
  0x2f   : > { %s195_s17 = sshll.u32 %s191_s7, 4  ;;  %s181_s15 = scalar_lea.sflag [#allocation4], %s588_s28  ;;  %s196_s17 = int_to_ptr.hbm [resolvable:$true] %s195_s17 }
  0x30   : > { %179 = vst [vmem:[%s175_s8] sm:$0xff] %v178_v2  ;;  %s421_s18 = sshra.s32 %s196_s17, 4  ;;  %s427_s22 = scalar_lea.hbm %s635_s2, 16  ;;  %s422_s18 = int_to_ptr.hbm [resolvable:$true] %s421_s18 }
  0x31   : > { %s423_s19 = scalar_lea.hbm %s422_s18, 8  ;;  %p428_p9 = scmp.lt.s32.totalorder %s422_s18, %s635_s2 }
  0x32   : > { %p424_p1 = scmp.ne.s32.totalorder %s422_s18, %s423_s19  ;;  %p429_p10 = scmp.lt.s32.totalorder %s427_s22, %s423_s19 }
  0x34   : > { %p425_p4 = pnand %p424_p1, %p561_p3  ;;  %p430_p2 = por %p429_p10, %p428_p9 }
  0x36   : > { %p426_p8 = pneg %p425_p4 }
  0x38   : > { %p431_p11 = pnand %p430_p2, %p426_p8 }
  0x3a   : > { %434 = shalt.err (!%p431_p11)
}
  0x3b   : > { %296 = dma.vmem_to_hbm [thread:$0]  (%p561_p3), %s194_s14, 128, %s196_s17, %s181_s15  }
  0x3c PF: > { %s207_s29 = sand.u32 1, %s465_s9   ;;  %p641_p12 = scmp.ge.s32.totalorder %s477_s12, 2 }
  0x3d   : > { %s208_s28 = scalar_lea.sflag [#allocation4], %s207_s29 }
  0x3e   : > { %p307_p13 = pnand %p641_p12, %p530_p6 }
  0x40   : > { %p308_p0 = pneg %p307_p13 }
  0x42   : > { %460 = dma.done.wait (%p308_p0), %s208_s28, 128  }
  0x43   : > { %462 = vsyncadd (%p308_p0), %s208_s28, 4294967168  ;;  %p16_p5 = scmp.ge.s32.totalorder %s548_s23, 4   ;;  %s642_s9 = smov %s469_s10 }
  0x44   : > { %s643_s10 = smov %s473_s11  ;;  %s644_s11 = smov %s557_s26 }
  0x45   : > { %s645_s12 = smov %s548_s23  ;;  %18 = sbr.rel (!%p16_p5) target bundleno = 6 (0x6), region = 77 }
  0x4a   :  { %214 = vsyncpa [#allocation3], 1 }
  0x4b   :  { %216 = vsyncpa [#allocation3 + $0x1], 1 }
  0x4c   :  { %217 = vsyncpa [#allocation6], 1 }
  0x4d   :  { %218 = vsyncpa [#allocation4], 1 }
  0x4e   :  { %220 = vsyncpa [#allocation4 + $0x1], 1 }

// kernel: tpu_custom_call.1
= control target key start
LH: loop header
LB: loop body
LE: loop exit
PB: predicated region body
PF: predicated region fallthrough
CT: control target
= control target key end

     0   :  { %s3865_s25 = smov 0   ;;  %s7602_s0 = inlined_call_operand.vmem [shape: bf16[2,64,32], index: 0, kind: input, shape index: {}]   ;;  %s7603_s1 = inlined_call_operand.vmem [shape: s32[64,1], index: 1, kind: input, shape index: {}]   ;;  %s7604_s2 = inlined_call_operand.vmem [shape: s32[64,1], index: 2, kind: input, shape index: {}]   ;;  %s7605_s3 = inlined_call_operand.vmem [shape: bf16[49,32], index: 3, kind: input, shape index: {}]   ;;  %s7606_s4 = inlined_call_operand.vmem [shape: bf16[1,32], index: 4, kind: input, shape index: {}]   ;;  %s7607_s5 = inlined_call_operand.vmem [shape: bf16[1,32], index: 5, kind: input, shape index: {}]   ;;  %s7608_s6 = inlined_call_operand.vmem [shape: bf16[1,32], index: 6, kind: input, shape index: {}]   ;;  %s7609_s7 = inlined_call_operand.vmem [shape: bf16[32,128], index: 7, kind: input, shape index: {}]   ;;  %s7610_s8 = inlined_call_operand.vmem [shape: bf16[1,128], index: 8, kind: input, shape index: {}]   ;;  %s7611_s9 = inlined_call_operand.vmem [shape: bf16[1,128], index: 9, kind: input, shape index: {}]   ;;  %s7612_s10 = inlined_call_operand.vmem [shape: bf16[1,128], index: 10, kind: input, shape index: {}]   ;;  %s7613_s11 = inlined_call_operand.vmem [shape: bf16[128,32], index: 11, kind: input, shape index: {}]   ;;  %s7614_s12 = inlined_call_operand.vmem [shape: bf16[1,32], index: 12, kind: input, shape index: {}]   ;;  %s7615_s13 = inlined_call_operand.vmem [shape: bf16[2,64,32], index: 13, kind: output, shape index: {}]  }
   0x1 LB: > { %s3586_s26 = sadd.s32 4294967295, %s3790_s25   ;;  %p3590_p0 = scmp.ge.s32.totalorder %s3790_s25, 1  ;;  %s3790_s25 = sphi %s3865_s25, %s23_s25  }
   0x2   : > { %p387_p1 = scmp.lt.s32.totalorder %s3790_s25, 3 }
   0x4   : > { %p388_p2 = pnand %p3590_p0, %p387_p1 }
   0x6   : > { %391 = sbr.rel (%p388_p2) target bundleno = 1391 (0x56f), region = 72 }
   0xb   : > { %v3876_v0 = vld [vmem:[%s7604_s2 + $0x20] sm:$0xff]  ;;  %v3881_v1 = vld [vmem:[%s7604_s2 + $0x10] sm:$0xff]  ;;  %v7616_v3 = vmov 0   ;;  %v3896_v7 = vld [vmem:[%s7604_s2 + $0x28] sm:$0xff]  ;;  %p3980_p3 = scmp.lt.s32.totalorder %s3586_s26, 1 }
   0xc   : > { %v3886_v2 = vld [vmem:[%s7604_s2] sm:$0xff]  ;;  %3737 = vset.pattern.permute.xlu2 %v7616_v3  ;;  %3736 = vset.pattern.permute.xlu1 %v7616_v3  ;;  %v542_v4 = vadd.s32 4294967293, %v3876_v0  ;;  %v540_v5 = vadd.s32 4294967293, %v3881_v1  ;;  %v3901_v8 = vld [vmem:[%s7604_s2 + $0x18] sm:$0xff]  ;;  %v3906_v9 = vld [vmem:[%s7604_s2 + $0x8] sm:$0xff]  ;;  %v543_v10 = vadd.s32 4294967293, %v3896_v7 }
   0xd   : > { %v538_v6 = vadd.s32 4294967293, %v3886_v2  ;;  %3735 = vset.pattern.permute.xlu0 %v7616_v3  ;;  %v541_v11 = vadd.s32 4294967293, %v3901_v8  ;;  %v539_v12 = vadd.s32 4294967293, %v3906_v9  ;;  %v3918_v16 = vld [vmem:[%s7604_s2 + $0x38] sm:$0xff]  ;;  %v3923_v17 = vld [vmem:[%s7604_s2 + $0x30] sm:$0xff]  ;;  %v652_v18 = vadd.s32 4294967294, %v3886_v2 }
   0xe   : > { %vm550_vm0 = vcmp.ge.s32.totalorder %v542_v4, 0  ;;  %vm558_vm1 = vcmp.lt.s32.totalorder %v542_v4, 8  ;;  %vm548_vm2 = vcmp.ge.s32.totalorder %v540_v5, 0  ;;  %vm556_vm3 = vcmp.lt.s32.totalorder %v540_v5, 8  ;;  %v3976_v60 = vld [vmem:[%s7603_s1] sm:$0xff]  ;;  %s8787_s26 = smov (!%p3980_p3, %s3586_s26), 1 }
   0xf   : > { %vm566_vm4 = vmand %vm550_vm0, %vm558_vm1  ;;  %vm546_vm5 = vcmp.ge.s32.totalorder %v538_v6, 0  ;;  %vm554_vm6 = vcmp.lt.s32.totalorder %v538_v6, 8  ;;  %vm551_vm8 = vcmp.ge.s32.totalorder %v543_v10, 0  ;;  %vm559_vm9 = vcmp.lt.s32.totalorder %v543_v10, 8  ;;  %7928 = vst [vmem:[#allocation2_spill] sm:$0xff] %v3976_v60  ;;  %s3605_s14 = sshll.u32 %s8787_s26, 5 }
  0x10   : > { %v574_v13 = vsel %vm566_vm4, 1, %v7616_v3  ;;  %vm564_vm7 = vmand %vm548_vm2, %vm556_vm3  ;;  %vm549_vm11 = vcmp.ge.s32.totalorder %v541_v11, 0  ;;  %vm557_vm12 = vcmp.lt.s32.totalorder %v541_v11, 8  ;;  %vm547_vm13 = vcmp.ge.s32.totalorder %v539_v12, 0  ;;  %s435_s17 = scalar_lea.vmem %s7602_s0, %s3605_s14  ;;  %s7574_s18 = scalar_lea.vmem %s7615_s13, %s3605_s14 }
  0x11   : > { %591 = vperm.xlu2 %3737, %v574_v13   ;;  %v572_v14 = vsel %vm564_vm7, 1, %v7616_v3  ;;  %vm562_vm10 = vmand %vm546_vm5, %vm554_vm6  ;;  %vm555_vm14 = vcmp.lt.s32.totalorder %v539_v12, 8  ;;  %v545_v19 = vadd.s32 4294967293, %v3918_v16  ;;  %v544_v21 = vadd.s32 4294967293, %v3923_v17 }
  0x12   : > { %585 = vperm.xlu1 %3736, %v572_v14   ;;  %v570_v15 = vsel %vm562_vm10, 1, %v7616_v3  ;;  %vm567_vm15 = vmand %vm551_vm8, %vm559_vm9  ;;  %vm660_vm2 = vcmp.ge.s32.totalorder %v652_v18, 0  ;;  %vm668_vm3 = vcmp.lt.s32.totalorder %v652_v18, 8  ;;  %v655_v24 = vadd.s32 4294967294, %v3901_v8  ;;  %v3678_v18 = vld [vmem:[%s7605_s3 + $0x8] sm:$0xff]  }
  0x13   : > { %579 = vperm.xlu0 %3735, %v570_v15   ;;  %vm565_vm0 = vmand %vm549_vm11, %vm557_vm12  ;;  %v575_v20 = vsel %vm567_vm15, 1, %v7616_v3  ;;  %vm553_vm4 = vcmp.ge.s32.totalorder %v545_v19, 0  ;;  %vm561_vm5 = vcmp.lt.s32.totalorder %v545_v19, 8  ;;  %vm552_vm6 = vcmp.ge.s32.totalorder %v544_v21, 0  ;;  %v3608_v19 = vld [vmem:[%s435_s17] sm:$0xff]  }
  0x14   : > { %vm563_vm1 = vmand %vm547_vm13, %vm555_vm14  ;;  %v573_v22 = vsel %vm565_vm0, 1, %v7616_v3  ;;  %vm560_vm7 = vcmp.lt.s32.totalorder %v544_v21, 8  ;;  %v654_v25 = vadd.s32 4294967294, %v3881_v1  ;;  %v653_v27 = vadd.s32 4294967294, %v3906_v9 }
  0x15   : > { %v571_v23 = vsel %vm563_vm1, 1, %v7616_v3  ;;  %vm676_vm8 = vmand %vm660_vm2, %vm668_vm3  ;;  %vm663_vm11 = vcmp.ge.s32.totalorder %v655_v24, 0  ;;  %vm671_vm12 = vcmp.lt.s32.totalorder %v655_v24, 8  ;;  %v658_v30 = vadd.s32 4294967294, %v3923_v17  ;;  %v3679_v24 = vld [vmem:[%s7605_s3 + $0x10] sm:$0xff]  }
  0x16   : > { %vm569_vm9 = vmand %vm553_vm4, %vm561_vm5  ;;  %v684_v26 = vsel %vm676_vm8, 1, %v7616_v3  ;;  %vm662_vm13 = vcmp.ge.s32.totalorder %v654_v25, 0  ;;  %vm670_vm14 = vcmp.lt.s32.totalorder %v654_v25, 8  ;;  %vm661_vm15 = vcmp.ge.s32.totalorder %v653_v27, 0  ;;  %v3675_v25 = vld [vmem:[%s435_s17 + $0x8] sm:$0xff]  }
  0x17   : > { %vm568_vm10 = vmand %vm552_vm6, %vm560_vm7  ;;  %v577_v28 = vsel %vm569_vm9, 1, %v7616_v3  ;;  %vm669_vm0 = vcmp.lt.s32.totalorder %v653_v27, 8  ;;  %v657_v31 = vadd.s32 4294967294, %v3896_v7  ;;  %v656_v33 = vadd.s32 4294967294, %v3876_v0 }
  0x18   : > { %v576_v29 = vsel %vm568_vm10, 1, %v7616_v3  ;;  %vm679_vm1 = vmand %vm663_vm11, %vm671_vm12  ;;  %vm666_vm4 = vcmp.ge.s32.totalorder %v658_v30, 0  ;;  %vm674_vm5 = vcmp.lt.s32.totalorder %v658_v30, 8  ;;  %v767_v36 = vadd.s32 4294967295, %v3906_v9  ;;  %v3676_v30 = vld [vmem:[%s435_s17 + $0x10] sm:$0xff]  }
  0x19   : > { %594 = vperm.xlu2 %3737, %v575_v20   ;;  %vm678_vm2 = vmand %vm662_vm13, %vm670_vm14  ;;  %v687_v32 = vsel %vm679_vm1, 1, %v7616_v3  ;;  %vm665_vm6 = vcmp.ge.s32.totalorder %v657_v31, 0  ;;  %vm673_vm7 = vcmp.lt.s32.totalorder %v657_v31, 8  ;;  %vm664_vm8 = vcmp.ge.s32.totalorder %v656_v33, 0 }
  0x1a   : > { %588 = vperm.xlu1 %3736, %v573_v22   ;;  %vm677_vm3 = vmand %vm661_vm15, %vm669_vm0  ;;  %v686_v34 = vsel %vm678_vm2, 1, %v7616_v3  ;;  %vm672_vm9 = vcmp.lt.s32.totalorder %v656_v33, 8  ;;  %v766_v37 = vadd.s32 4294967295, %v3886_v2  ;;  %v659_v39 = vadd.s32 4294967294, %v3918_v16 }
  0x1b   : > { %582 = vperm.xlu0 %3735, %v571_v23   ;;  %v685_v35 = vsel %vm677_vm3, 1, %v7616_v3  ;;  %vm682_vm10 = vmand %vm666_vm4, %vm674_vm5  ;;  %vm775_vm13 = vcmp.ge.s32.totalorder %v767_v36, 0  ;;  %vm783_vm14 = vcmp.lt.s32.totalorder %v767_v36, 8  ;;  %v770_v42 = vadd.s32 4294967295, %v3876_v0 }
  0x1c   : > { %vm681_vm11 = vmand %vm665_vm6, %vm673_vm7  ;;  %v690_v38 = vsel %vm682_vm10, 1, %v7616_v3  ;;  %vm774_vm15 = vcmp.ge.s32.totalorder %v766_v37, 0  ;;  %vm782_vm0 = vcmp.lt.s32.totalorder %v766_v37, 8  ;;  %vm667_vm1 = vcmp.ge.s32.totalorder %v659_v39, 0 }
  0x1d   : > { %vm680_vm12 = vmand %vm664_vm8, %vm672_vm9  ;;  %v689_v40 = vsel %vm681_vm11, 1, %v7616_v3  ;;  %vm675_vm2 = vcmp.lt.s32.totalorder %v659_v39, 8  ;;  %v769_v43 = vadd.s32 4294967295, %v3901_v8  ;;  %v768_v45 = vadd.s32 4294967295, %v3881_v1 }
  0x1e   : > { %v688_v41 = vsel %vm680_vm12, 1, %v7616_v3  ;;  %vm791_vm3 = vmand %vm775_vm13, %vm783_vm14  ;;  %vm778_vm6 = vcmp.ge.s32.totalorder %v770_v42, 0  ;;  %vm786_vm7 = vcmp.lt.s32.totalorder %v770_v42, 8  ;;  %v773_v48 = vadd.s32 4294967295, %v3918_v16  ;;  %v3624_v16 = vld [vmem:[%s7605_s3] sm:$0xff]  }
  0x1f   : > { %vm790_vm4 = vmand %vm774_vm15, %vm782_vm0  ;;  %v799_v44 = vsel %vm791_vm3, 1, %v7616_v3  ;;  %vm777_vm8 = vcmp.ge.s32.totalorder %v769_v43, 0  ;;  %vm785_vm9 = vcmp.lt.s32.totalorder %v769_v43, 8  ;;  %vm776_vm10 = vcmp.ge.s32.totalorder %v768_v45, 0 }
  0x20   : > { %vm683_vm5 = vmand %vm667_vm1, %vm675_vm2  ;;  %v798_v46 = vsel %vm790_vm4, 1, %v7616_v3  ;;  %vm784_vm11 = vcmp.lt.s32.totalorder %v768_v45, 8  ;;  %v772_v49 = vadd.s32 4294967295, %v3923_v17  ;;  %v771_v51 = vadd.s32 4294967295, %v3896_v7 }
  0x21   : > { %693 = vperm.xlu2 %3737, %v684_v26   ;;  %v691_v47 = vsel %vm683_vm5, 1, %v7616_v3  ;;  %vm794_vm12 = vmand %vm778_vm6, %vm786_vm7  ;;  %vm781_vm15 = vcmp.ge.s32.totalorder %v773_v48, 0  ;;  %vm789_vm0 = vcmp.lt.s32.totalorder %v773_v48, 8  ;;  %v1083_v57 = vadd.s32 2, %v3886_v2 }
  0x22   : > { %600 = vperm.xlu1 %3736, %v577_v28   ;;  %vm793_vm13 = vmand %vm777_vm8, %vm785_vm9  ;;  %v802_v50 = vsel %vm794_vm12, 1, %v7616_v3  ;;  %vm780_vm1 = vcmp.ge.s32.totalorder %v772_v49, 0  ;;  %vm788_vm2 = vcmp.lt.s32.totalorder %v772_v49, 8  ;;  %vm779_vm3 = vcmp.ge.s32.totalorder %v771_v51, 0 }
  0x23   : > { %597 = vperm.xlu0 %3735, %v576_v29   ;;  %vm792_vm14 = vmand %vm776_vm10, %vm784_vm11  ;;  %v801_v52 = vsel %vm793_vm13, 1, %v7616_v3  ;;  %vm787_vm4 = vcmp.lt.s32.totalorder %v771_v51, 8  ;;  %vm865_vm8 = vcmp.ge.s32.totalorder %v3881_v1, 0  ;;  %vm873_vm9 = vcmp.lt.s32.totalorder %v3881_v1, 8 }
  0x24   : > { %v800_v53 = vsel %vm792_vm14, 1, %v7616_v3  ;;  %vm797_vm5 = vmand %vm781_vm15, %vm789_vm0  ;;  %vm864_vm10 = vcmp.ge.s32.totalorder %v3906_v9, 0  ;;  %vm872_vm11 = vcmp.lt.s32.totalorder %v3906_v9, 8  ;;  %vm863_vm12 = vcmp.ge.s32.totalorder %v3886_v2, 0 }
  0x25   : > { %vm796_vm6 = vmand %vm780_vm1, %vm788_vm2  ;;  %v805_v54 = vsel %vm797_vm5, 1, %v7616_v3  ;;  %vm871_vm13 = vcmp.lt.s32.totalorder %v3886_v2, 8  ;;  %v969_v58 = vadd.s32 1, %v3886_v2  ;;  %v970_v62 = vadd.s32 1, %v3906_v9 }
  0x26   : > { %vm795_vm7 = vmand %vm779_vm3, %vm787_vm4  ;;  %v804_v55 = vsel %vm796_vm6, 1, %v7616_v3  ;;  %vm1091_vm1 = vcmp.ge.s32.totalorder %v1083_v57, 0  ;;  %vm1099_vm2 = vcmp.lt.s32.totalorder %v1083_v57, 8  ;;  %v1197_v0 = vadd.s32 3, %v3886_v2 }
  0x27   : > { %v803_v56 = vsel %vm795_vm7, 1, %v7616_v3  ;;  %vm881_vm14 = vmand %vm865_vm8, %vm873_vm9  ;;  %vm977_vm3 = vcmp.ge.s32.totalorder %v969_v58, 0  ;;  %vm985_vm4 = vcmp.lt.s32.totalorder %v969_v58, 8  ;;  %v487_v4 = vadd.s32 4294967293, %v3976_v60 }
  0x28   : > { %vm880_vm15 = vmand %vm864_vm10, %vm872_vm11  ;;  %v889_v59 = vsel %vm881_vm14, 1, %v7616_v3  ;;  %vm866_vm5 = vcmp.ge.s32.totalorder %v3901_v8, 0  ;;  %vm874_vm6 = vcmp.lt.s32.totalorder %v3901_v8, 8  ;;  %v1084_v5 = vadd.s32 2, %v3906_v9 }
  0x29   : > { %702 = vperm.xlu2 %3737, %v687_v32   ;;  %vm879_vm0 = vmand %vm863_vm12, %vm871_vm13  ;;  %v888_v61 = vsel %vm880_vm15, 1, %v7616_v3  ;;  %vm978_vm8 = vcmp.ge.s32.totalorder %v970_v62, 0  ;;  %vm986_vm9 = vcmp.lt.s32.totalorder %v970_v62, 8  ;;  %v1350_v2 = vadd.s32 4294967294, %v3976_v60 }
  0x2a   : > { %699 = vperm.xlu1 %3736, %v686_v34   ;;  %v887_v63 = vsel %vm879_vm0, 1, %v7616_v3  ;;  %vm1107_vm7 = vmand %vm1091_vm1, %vm1099_vm2  ;;  %vm1205_vm11 = vcmp.ge.s32.totalorder %v1197_v0, 0  ;;  %vm1213_vm12 = vcmp.lt.s32.totalorder %v1197_v0, 8  ;;  %v1613_v6 = vadd.s32 4294967295, %v3976_v60 }
  0x2b   : > { %696 = vperm.xlu0 %3735, %v685_v35   ;;  %vm993_vm10 = vmand %vm977_vm3, %vm985_vm4  ;;  %vm495_vm14 = vcmp.ge.s32.totalorder %v487_v4, 0  ;;  %vm503_vm15 = vcmp.lt.s32.totalorder %v487_v4, 8  ;;  %v1115_v7 = vsel %vm1107_vm7, 1, %v7616_v3  ;;  %vm1092_vm1 = vcmp.ge.s32.totalorder %v1084_v5, 0  ;;  %v3677_v35 = vld [vmem:[%s435_s17 + $0x18] sm:$0xff]  }
  0x2c   : > { %vm882_vm13 = vmand %vm866_vm5, %vm874_vm6  ;;  %vm1100_vm2 = vcmp.lt.s32.totalorder %v1084_v5, 8  ;;  %v1001_v11 = vsel %vm993_vm10, 1, %v7616_v3  ;;  %vm1358_vm4 = vcmp.ge.s32.totalorder %v1350_v2, 0  ;;  %vm1366_vm5 = vcmp.lt.s32.totalorder %v1350_v2, 8 }
  0x2d   : > { %vm4001_vm0 = vmand %vm978_vm8, %vm986_vm9  ;;  %v890_v13 = vsel %vm882_vm13, 1, %v7616_v3  ;;  %vm1621_vm7 = vcmp.ge.s32.totalorder %v1613_v6, 0  ;;  %vm1629_vm8 = vcmp.lt.s32.totalorder %v1613_v6, 8  ;;  %v527_v17 = vlaneseq }
  0x2e   : > { %vm4007_vm3 = vmand %vm1205_vm11, %vm1213_vm12  ;;  %v1002_v20 = vsel %vm4001_vm0, 1, %v7616_v3  ;;  %v4040_v23 = vunpack.c.l.bf16 %v3624_v16  ;;  %v4050_v29 = vunpack.c.h.bf16 %v3624_v16  ;;  %v4052_v31 = vunpack.c.l.bf16 %v3678_v18 }
  0x2f   : > { %vm4012_vm6 = vmand %vm495_vm14, %vm503_vm15  ;;  %v1229_v21 = vsel %vm4007_vm3, 1, %v7616_v3  ;;  %v4054_v32 = vunpack.c.h.bf16 %v3678_v18  ;;  %v4056_v33 = vshrl.u32 %v527_v17, 7  ;;  %v4058_v34 = vunpack.c.l.bf16 %v3608_v19 }
  0x30   : > { %vm4016_vm9 = vmand %vm1092_vm1, %vm1100_vm2  ;;  %v1294_v22 = vsel %vm4012_vm6, 1, %v7616_v3  ;;  %7938 = vst [vmem:[#allocation3_spill] sm:$0xff] %v4040_v23  ;;  %v4060_v36 = vunpack.c.l.bf16 %v3679_v24  ;;  %v4062_v37 = vunpack.c.h.bf16 %v3679_v24  ;;  %v4066_v39 = vunpack.c.h.bf16 %v3675_v25 }
  0x31   : > { %711 = vperm.xlu2 %3737, %v690_v38   ;;  %vm1374_vm10 = vmand %vm1358_vm4, %vm1366_vm5  ;;  %v1116_v26 = vsel %vm4016_vm9, 1, %v7616_v3  ;;  %7939 = vst [vmem:[#allocation4_spill] sm:$0xff] %v4050_v29  ;;  %v4064_v38 = vunpack.c.l.bf16 %v3675_v25  ;;  %v4073_v42 = vunpack.c.l.bf16 %v3676_v30  ;;  %v4075_v43 = vunpack.c.h.bf16 %v3676_v30 }
  0x32   : > { %708 = vperm.xlu1 %3736, %v689_v40   ;;  %vm1637_vm11 = vmand %vm1621_vm7, %vm1629_vm8  ;;  %v1557_v27 = vsel %vm1374_vm10, 1, %v7616_v3  ;;  %7940 = vst [vmem:[#allocation5_spill] sm:$0xff] %v4052_v31  ;;  %v4069_v40 = vperm.slane %v4040_v23, 0  ;;  %v4080_v45 = vunpack.c.l.bf16 %v3677_v35  ;;  %vm529_vm12 = vcmp.lt.s32.totalorder %v4056_v33, 3 }
  0x33   : > { %705 = vperm.xlu0 %3735, %v688_v41   ;;  %v1820_v28 = vsel %vm1637_vm11, 1, %v7616_v3  ;;  %7941 = vst [vmem:[#allocation6_spill] sm:$0xff] %v4054_v32  ;;  %v4071_v41 = vunpack.c.h.bf16 %v3608_v19  ;;  %v4087_v48 = vperm.slane %v4050_v29, 6  ;;  %v4090_v49 = vperm.slane %v4052_v31, 5 }
  0x34   : > { %7942 = vst [vmem:[#allocation7_spill] sm:$0xff] %v4058_v34  ;;  %v524_v51 = vrot.slane %v4064_v38, 5  ;;  %vm1876_vm13 = vcmp.ge.s32.totalorder %v3976_v60, 0  ;;  %vm7665_vm14 = vcmp.lt.s32.totalorder %v3976_v60, 8  ;;  %v1198_v57 = vadd.s32 3, %v3906_v9 }
  0x35   : > { %7943 = vst [vmem:[#allocation8_spill] sm:$0xff] %v4060_v36  ;;  %v520_v58 = vrot.slane %v4080_v45, 5  ;;  %v4112_v62 = vperm.slane %v4060_v36, 3  ;;  %vm4116_vm1 = vmand %vm1876_vm13, %vm7665_vm14  ;;  %v971_v0 = vadd.s32 1, %v3881_v1  ;;  %v4123_v4 = vperm.slane %v4062_v37, 2 }
  0x36   : > { %7944 = vst [vmem:[#allocation9_spill] sm:$0xff] %v4062_v37  ;;  %vm1206_vm2 = vcmp.ge.s32.totalorder %v1198_v57, 0  ;;  %vm1214_vm3 = vcmp.lt.s32.totalorder %v1198_v57, 8  ;;  %v2075_v14 = vsel %vm4116_vm1, 1, %v7616_v3 }
  0x37   : > { %7945 = vst [vmem:[#allocation10_spill] sm:$0xff] %v4064_v38  ;;  %vm979_vm7 = vcmp.ge.s32.totalorder %v971_v0, 0  ;;  %vm987_vm8 = vcmp.lt.s32.totalorder %v971_v0, 8  ;;  %vm4162_vm10 = vmand %vm1206_vm2, %vm1214_vm3  ;;  %vm643_vm2 = vcmp.lt.s32.totalorder %v4056_v33, 2 }
  0x38   : > { %7946 = vst [vmem:[#allocation11_spill] sm:$0xff] %v4066_v39 }
  0x39   : > { %810 = vperm.xlu2 %3737, %v799_v44   ;;  %7947 = vst [vmem:[#allocation12_spill] sm:$0xff] %v4071_v41  ;;  %v4078_v44 = vperm.slane %v4040_v23, 7 }
  0x3a   : > { %807 = vperm.xlu1 %3736, %v798_v46   ;;  %7948 = vst [vmem:[#allocation13_spill] sm:$0xff] %v4073_v42  ;;  %v4082_v46 = vunpack.c.h.bf16 %v3677_v35  ;;  %v1230_v35 = vsel %vm4162_vm10, 1, %v7616_v3 }
  0x3b   : > { %714 = vperm.xlu0 %3735, %v691_v47   ;;  %7949 = vst [vmem:[#allocation14_spill] sm:$0xff] %v4075_v43  ;;  %v2131_v47 = vadd.s32 1, %v3976_v60 }
  0x3c   : > { %7950 = vst [vmem:[#allocation15_spill] sm:$0xff] %v4080_v45  ;;  %v637_v0 = vrot.slane %v4082_v46, 6 }
  0x3d   : > { %7951 = vst [vmem:[#allocation16_spill] sm:$0xff] %v4082_v46  ;;  %vm2139_vm15 = vcmp.ge.s32.totalorder %v2131_v47, 0  ;;  %vm2147_vm0 = vcmp.lt.s32.totalorder %v2131_v47, 8 }
  0x3e   : > { %vm2155_vm4 = vmand %vm2139_vm15, %vm2147_vm0 }
  0x3f   : > { %v2338_v17 = vsel %vm2155_vm4, 1, %v7616_v3  ;;  %vm995_vm0 = vmand %vm979_vm7, %vm987_vm8 }
  0x40   : > { %v1003_v57 = vsel %vm995_vm0, 1, %v7616_v3 }
  0x41   : > { %819 = vperm.xlu2 %3737, %v802_v50   ;;  %v522_v50 = vrot.slane %v4058_v34, 5 }
  0x42   : > { %816 = vperm.xlu1 %3736, %v801_v52   ;;  %v525_v52 = vrot.slane %v4066_v39, 5 }
  0x43   : > { %813 = vperm.xlu0 %3735, %v800_v53   ;;  %v4100_v53 = vld [vmem:[%s7603_s1 + $0x8] sm:$0xff] }
  0x44   : > { %7952 = vst [vmem:[#allocation17_spill] sm:$0xff] %v4100_v53  ;;  %v488_v9 = vadd.s32 4294967293, %v4100_v53  ;;  %v4131_v2 = vsel %vm529_vm12, %v524_v51, %v525_v52  ;;  %v1351_v6 = vadd.s32 4294967294, %v4100_v53 }
  0x46   : > { %vm496_vm5 = vcmp.ge.s32.totalorder %v488_v9, 0  ;;  %vm504_vm6 = vcmp.lt.s32.totalorder %v488_v9, 8  ;;  %vm1359_vm11 = vcmp.ge.s32.totalorder %v1351_v6, 0  ;;  %vm1367_vm13 = vcmp.lt.s32.totalorder %v1351_v6, 8 }
  0x47   : > { %vm512_vm15 = vmand %vm496_vm5, %vm504_vm6 }
  0x48   : > { %vm1375_vm1 = vmand %vm1359_vm11, %vm1367_vm13 }
  0x49   : > { %828 = vperm.xlu2 %3737, %v805_v54   ;;  %v519_v54 = vrot.slane %v4075_v43, 5  ;;  %v1558_v9 = vsel %vm1375_vm1, 1, %v7616_v3 }
  0x4a   : > { %825 = vperm.xlu1 %3736, %v804_v55   ;;  %v523_v55 = vrot.slane %v4071_v41, 5 }
  0x4b   : > { %822 = vperm.xlu0 %3735, %v803_v56   ;;  %v526_v56 = vrot.slane %v4073_v42, 5  ;;  %v4152_v12 = vsel %vm529_vm12, %v519_v54, %v520_v58 }
  0x4c   : > { %v4142_v10 = vsel %vm529_vm12, %v522_v50, %v523_v55 }
  0x4d   : > { %v4127_v5 = vsel %vm529_vm12, %v525_v52, %v526_v56 }
  0x51   : > { %902 = vperm.xlu2 %3737, %v889_v59   ;;  %v521_v59 = vrot.slane %v4082_v46, 5 }
  0x52   : > { %899 = vperm.xlu1 %3736, %v888_v61   ;;  %v4109_v61 = vperm.slane %v4054_v32, 4 }
  0x53   : > { %896 = vperm.xlu0 %3735, %v887_v63  }
  0x59   : > { %1124 = vperm.xlu2 %3737, %v1115_v7   ;;  %v4136_v7 = vsel %vm529_vm12, %v523_v55, %v524_v51  ;;  %v4216_v55 = vsel %vm529_vm12, %v521_v59, %v522_v50  ;;  %v1614_v50 = vadd.s32 4294967295, %v4100_v53 }
  0x5a   : > { %1010 = vperm.xlu1 %3736, %v1001_v11   ;;  %v4148_v11 = vsel %vm529_vm12, %v520_v58, %v521_v59  ;;  %v635_v58 = vrot.slane %v4075_v43, 6  ;;  %v2394_v59 = vadd.s32 2, %v3976_v60 }
  0x5b   : > { %905 = vperm.xlu0 %3735, %v890_v13   ;;  %v4156_v13 = vsel %vm529_vm12, %v526_v56, %v519_v54  ;;  %v1085_v54 = vadd.s32 2, %v3881_v1  ;;  %v1295_v56 = vsel %vm512_vm15, 1, %v7616_v3  ;;  %vm1622_vm5 = vcmp.ge.s32.totalorder %v1614_v50, 0 }
  0x5c   : > { %vm1630_vm6 = vcmp.lt.s32.totalorder %v1614_v50, 8  ;;  %vm2402_vm7 = vcmp.ge.s32.totalorder %v2394_v59, 0  ;;  %vm2410_vm8 = vcmp.lt.s32.totalorder %v2394_v59, 8  ;;  %v4277_v3 = vperm.slane %v4054_v32, 5  ;;  %v4314_v59 = vld [vmem:[%s7603_s1 + $0x10] sm:$0xff] }
  0x5d   : > { %vm1093_vm3 = vcmp.ge.s32.totalorder %v1085_v54, 0  ;;  %vm1101_vm4 = vcmp.lt.s32.totalorder %v1085_v54, 8  ;;  %vm1638_vm10 = vmand %vm1622_vm5, %vm1630_vm6  ;;  %v2657_v54 = vadd.s32 3, %v3976_v60  ;;  %7977 = vst [vmem:[#allocation34_spill] sm:$0xff] %v4314_v59 }
  0x5e   : > { %7973 = vst [vmem:[#allocation32_spill] sm:$0xff] %v4277_v3  ;;  %vm2418_vm11 = vmand %vm2402_vm7, %vm2410_vm8 }
  0x5f   : > { %vm2665_vm0 = vcmp.ge.s32.totalorder %v2657_v54, 0  ;;  %vm2673_vm1 = vcmp.lt.s32.totalorder %v2657_v54, 8 }
  0x60   : > { %vm4347_vm8 = vmand %vm2665_vm0, %vm2673_vm1 }
  0x61   : > { %1303 = vperm.xlu2 %3737, %v1294_v22  }
  0x62   : > { %1013 = vperm.xlu1 %3736, %v1002_v20  }
  0x63   : > { %1238 = vperm.xlu0 %3735, %v1229_v21  }
  0x69   : > { %1829 = vperm.xlu2 %3737, %v1820_v28  }
  0x6a   : > { %1127 = vperm.xlu1 %3736, %v1116_v26  }
  0x6b   : > { %1566 = vperm.xlu0 %3735, %v1557_v27   ;;  %v592_v15 = vpop.permute.xlu2 %591 }
  0x6c   : > { %vm606_vm9 = vcmp.eq.s32.totalorder %v592_v15, 1 }
  0x6d   : > { %v614_v18 = vsel %vm606_vm9, %v4142_v10, 0.0  ;;  %v1386_v19 = vsel %vm606_vm9, %v4136_v7, 0.0  ;;  %v1649_v20 = vsel %vm606_vm9, %v4131_v2, 0.0  ;;  %v1904_v21 = vsel %vm606_vm9, %v4127_v5, 0.0 }
  0x6e   : > { %v4176_v22 = vmul.f32 %v4069_v40, %v614_v18  ;;  %v4179_v24 = vmul.f32 %v4078_v44, %v1386_v19  ;;  %v4182_v25 = vmul.f32 %v4087_v48, %v1649_v20  ;;  %v4185_v26 = vmul.f32 %v4090_v49, %v1904_v21 }
  0x6f   : > { %v2167_v27 = vsel %vm606_vm9, %v4156_v13, 0.0  ;;  %v2430_v28 = vsel %vm606_vm9, %v4152_v12, 0.0  ;;  %v2693_v30 = vsel %vm606_vm9, %v4148_v11, 0.0  ;;  %vm4268_vm9 = vmand %vm1093_vm3, %vm1101_vm4  ;;  %vm1877_vm3 = vcmp.ge.s32.totalorder %v4100_v53, 0 }
  0x70   : > { %7957 = vst [vmem:[#allocation18_spill] sm:$0xff] %v4176_v22  ;;  %v4201_v47 = vmul.f32 %v4109_v61, %v2167_v27  ;;  %v4204_v51 = vmul.f32 %v4112_v62, %v2430_v28  ;;  %v4207_v52 = vmul.f32 %v4123_v4, %v2693_v30  ;;  %vm7656_vm4 = vcmp.lt.s32.totalorder %v4100_v53, 8 }
  0x71   : > { %7958 = vst [vmem:[#allocation19_spill] sm:$0xff] %v4179_v24  ;;  %2347 = vperm.xlu2 %3737, %v2338_v17  }
  0x72   : > { %7959 = vst [vmem:[#allocation20_spill] sm:$0xff] %v4182_v25  ;;  %2084 = vperm.xlu1 %3736, %v2075_v14  }
  0x73   : > { %7960 = vst [vmem:[#allocation21_spill] sm:$0xff] %v4185_v26  ;;  %1241 = vperm.xlu0 %3735, %v1230_v35   ;;  %v595_v63 = vpop.permute.xlu2 %594 }
  0x74   : > { %7961 = vst [vmem:[#allocation22_spill] sm:$0xff] %v4201_v47  ;;  %vm607_vm12 = vcmp.eq.s32.totalorder %v595_v63, 1 }
  0x75   : > { %7962 = vst [vmem:[#allocation23_spill] sm:$0xff] %v4204_v51  ;;  %v615_v14 = vsel %vm607_vm12, %v4136_v7, 0.0  ;;  %v1387_v15 = vsel %vm607_vm12, %v4131_v2, 0.0  ;;  %v1650_v16 = vsel %vm607_vm12, %v4127_v5, 0.0  ;;  %v1905_v17 = vsel %vm607_vm12, %v4156_v13, 0.0 }
  0x76   : > { %7963 = vst [vmem:[#allocation24_spill] sm:$0xff] %v4207_v52  ;;  %v4232_v18 = vmul.f32 %v4069_v40, %v615_v14  ;;  %v4235_v19 = vmul.f32 %v4078_v44, %v1387_v15  ;;  %v4238_v20 = vmul.f32 %v4087_v48, %v1650_v16  ;;  %v4241_v21 = vmul.f32 %v4090_v49, %v1905_v17 }
  0x77   : > { %v2168_v27 = vsel %vm607_vm12, %v4152_v12, 0.0  ;;  %v2431_v28 = vsel %vm607_vm12, %v4148_v11, 0.0  ;;  %v2694_v30 = vsel %vm607_vm12, %v4216_v55, 0.0  ;;  %v636_v15 = vrot.slane %v4080_v45, 6 }
  0x78   : > { %7964 = vst [vmem:[#allocation25_spill] sm:$0xff] %v4232_v18  ;;  %v4247_v35 = vmul.f32 %v4109_v61, %v2168_v27  ;;  %v4250_v63 = vmul.f32 %v4112_v62, %v2431_v28  ;;  %v4253_v14 = vmul.f32 %v4123_v4, %v2694_v30  ;;  %v4258_v17 = vperm.slane %v4040_v23, 1 }
  0x79   : > { %7965 = vst [vmem:[#allocation26_spill] sm:$0xff] %v4235_v19  ;;  %1569 = vperm.xlu2 %3737, %v1558_v9   ;;  %v4261_v27 = vperm.slane %v4050_v29, 0  ;;  %v4264_v28 = vperm.slane %v4050_v29, 7  ;;  %v1199_v30 = vadd.s32 3, %v3881_v1  ;;  %v4280_v16 = vperm.slane %v4060_v36, 4 }
  0x7a   : > { %7966 = vst [vmem:[#allocation27_spill] sm:$0xff] %v4238_v20  ;;  %1306 = vperm.xlu1 %3736, %v1295_v56   ;;  %v4274_v56 = vperm.slane %v4052_v31, 6  ;;  %v640_v1 = vrot.slane %v4064_v38, 6  ;;  %v4298_v50 = vsel %vm643_vm2, %v636_v15, %v637_v0  ;;  %v4302_v60 = vsel %vm643_vm2, %v635_v58, %v636_v15 }
  0x7b   : > { %7967 = vst [vmem:[#allocation28_spill] sm:$0xff] %v4241_v21  ;;  %1016 = vperm.xlu0 %3735, %v1003_v57   ;;  %v694_v6 = vpop.permute.xlu2 %693  ;;  %v641_v57 = vrot.slane %v4066_v39, 6  ;;  %v7976_v20 = vrot.slane %v4073_v42, 6  ;;  %vm1207_vm13 = vcmp.ge.s32.totalorder %v1199_v30, 0  ;;  %vm1215_vm15 = vcmp.lt.s32.totalorder %v1199_v30, 8 }
  0x7c   : > { %7968 = vst [vmem:[#allocation29_spill] sm:$0xff] %v4247_v35  ;;  %v7978_v35 = vmov 0   ;;  %v2132_v15 = vadd.s32 1, %v4100_v53  ;;  %vm716_vm12 = vcmp.eq.s32.totalorder %v694_v6, 1  ;;  %v7980_v30 = vrot.slane %v4058_v34, 6  ;;  %vm4335_vm5 = vmand %vm1207_vm13, %vm1215_vm15 }
  0x7d   : > { %7969 = vst [vmem:[#allocation30_spill] sm:$0xff] %v4250_v63  ;;  %v7975_v63 = vrot.slane %v4058_v34, 6  ;;  %v4308_v51 = vsel %vm643_vm2, %v7976_v20, %v635_v58  ;;  %v1117_v19 = vsel %vm4268_vm9, 1, %v7978_v35  ;;  %v2601_v58 = vsel %vm2418_vm11, 1, %v7978_v35  ;;  %vm4363_vm11 = vmand %vm1877_vm3, %vm7656_vm4 }
  0x7e   : > { %7970 = vst [vmem:[#allocation31_spill] sm:$0xff] %v4253_v14  ;;  %v639_v14 = vrot.slane %v4071_v41, 6  ;;  %v4340_v52 = vperm.slane %v4062_v37, 3  ;;  %v4344_v26 = vsel %vm643_vm2, %v640_v1, %v641_v57  ;;  %vm2140_vm9 = vcmp.ge.s32.totalorder %v2132_v15, 0 }
  0x7f   : > { %7974 = vst [vmem:[#allocation33_spill] sm:$0xff] %v4280_v16  ;;  %v4292_v21 = vsel %vm643_vm2, %v637_v0, %v7975_v63  ;;  %v972_v63 = vadd.s32 1, %v3901_v8  ;;  %v1821_v0 = vsel %vm1638_vm10, 1, %v7978_v35  ;;  %v489_v8 = vadd.s32 4294967293, %v4314_v59 }
  0x80   : > { %v4327_v20 = vsel %vm643_vm2, %v639_v14, %v640_v1  ;;  %v4333_v9 = vsel %vm643_vm2, %v7980_v30, %v639_v14  ;;  %7983 = vst [vmem:[#allocation36_spill] sm:$0xff] %v4340_v52  ;;  %vm2148_vm10 = vcmp.lt.s32.totalorder %v2132_v15, 8  ;;  %v724_v14 = vsel %vm716_vm12, %v4308_v51, 0.0 }
  0x81   : > { %7979 = vst [vmem:[#allocation35_spill] sm:$0xff] %v4327_v20  ;;  %1832 = vperm.xlu2 %3737, %v1821_v0   ;;  %vm980_vm6 = vcmp.ge.s32.totalorder %v972_v63, 0  ;;  %vm988_vm7 = vcmp.lt.s32.totalorder %v972_v63, 8  ;;  %v1407_v0 = vsel %vm716_vm12, %v4302_v60, 0.0  ;;  %v1670_v30 = vsel %vm716_vm12, %v4298_v50, 0.0  ;;  %vm2156_vm1 = vmand %vm2140_vm9, %vm2148_vm10 }
  0x82   : > { %1130 = vperm.xlu1 %3736, %v1117_v19   ;;  %v1925_v1 = vsel %vm716_vm12, %v4292_v21, 0.0  ;;  %v2188_v54 = vsel %vm716_vm12, %v4333_v9, 0.0  ;;  %v2451_v47 = vsel %vm716_vm12, %v4327_v20, 0.0  ;;  %vm4375_vm13 = vmand %vm980_vm6, %vm988_vm7  ;;  %vm497_vm15 = vcmp.ge.s32.totalorder %v489_v8, 0 }
  0x83   : > { %2610 = vperm.xlu0 %3735, %v2601_v58   ;;  %v4371_v24 = vpop.permute.xlu2 %702  ;;  %vm505_vm0 = vcmp.lt.s32.totalorder %v489_v8, 8  ;;  %v2714_v37 = vsel %vm716_vm12, %v4344_v26, 0.0  ;;  %v7990_v36 = vrot.slane %v4073_v42, 6  ;;  %v1231_v63 = vsel %vm4335_vm5, 1, %v7978_v35 }
  0x84   : > { %v586_v22 = vpop.permute.xlu1 %585  ;;  %v2864_v59 = vsel %vm4347_vm8, 1, %v7978_v35  ;;  %v4398_v6 = vmul.f32 %v4258_v17, %v724_v14  ;;  %v4401_v53 = vmul.f32 %v4261_v27, %v1407_v0  ;;  %v2076_v18 = vsel %vm4363_vm11, 1, %v7978_v35 }
  0x85   : > { %v4385_v32 = vsel %vm643_vm2, %v641_v57, %v7990_v36  ;;  %v4387_v23 = vpop.permute.xlu0 %579  ;;  %v1679_v36 = vmul.f32 %v4264_v28, %v1670_v30  ;;  %v4408_v57 = vmul.f32 %v4274_v56, %v1925_v1  ;;  %v2197_v25 = vmul.f32 %v4277_v3, %v2188_v54  ;;  %vm513_vm2 = vmand %vm497_vm15, %vm505_vm0 }
  0x86   : > { %7991 = vst [vmem:[#allocation37_spill] sm:$0xff] %v4398_v6  ;;  %v4412_v15 = vmul.f32 %v4280_v16, %v2451_v47  ;;  %v1004_v14 = vsel %vm4375_vm13, 1, %v7978_v35  ;;  %v4420_v0 = vmul.f32 %v4340_v52, %v2714_v37  ;;  %vm604_vm12 = vcmp.eq.s32.totalorder %v586_v22, 1 }
  0x87   : > { %7992 = vst [vmem:[#allocation38_spill] sm:$0xff] %v4401_v53  ;;  %v2339_v30 = vsel %vm2156_vm1, 1, %v7978_v35  ;;  %v4424_v1 = vperm.slane %v4050_v29, 1  ;;  %vm719_vm3 = vcmp.eq.s32.totalorder %v4371_v24, 1  ;;  %v4428_v47 = vperm.slane %v4052_v31, 0 }
  0x88   : > { %7993 = vst [vmem:[#allocation39_spill] sm:$0xff] %v4408_v57  ;;  %v1296_v37 = vsel %vm513_vm2, 1, %v7978_v35  ;;  %v727_v58 = vsel %vm719_vm3, %v4292_v21, 0.0  ;;  %vm602_vm5 = vcmp.eq.s32.totalorder %v4387_v23, 1  ;;  %vm757_vm6 = vcmp.lt.s32.totalorder %v4056_v33, 1 }
  0x89   : > { %7994 = vst [vmem:[#allocation40_spill] sm:$0xff] %v4412_v15  ;;  %2087 = vperm.xlu2 %3737, %v2076_v18   ;;  %v612_v15 = vsel %vm604_vm12, %v4148_v11, 0.0  ;;  %v1384_v18 = vsel %vm604_vm12, %v4216_v55, 0.0  ;;  %v1410_v19 = vsel %vm719_vm3, %v4333_v9, 0.0  ;;  %v1673_v54 = vsel %vm719_vm3, %v4327_v20, 0.0 }
  0x8a   : > { %7995 = vst [vmem:[#allocation41_spill] sm:$0xff] %v4420_v0  ;;  %1244 = vperm.xlu1 %3736, %v1231_v63   ;;  %v1647_v63 = vsel %vm604_vm12, %v4142_v10, 0.0  ;;  %v1645_v8 = vsel %vm602_vm5, %v4148_v11, 0.0  ;;  %v4464_v53 = vmul.f32 %v4069_v40, %v612_v15  ;;  %v4467_v0 = vmul.f32 %v4078_v44, %v1384_v18 }
  0x8b   : > { %7996 = vst [vmem:[#allocation42_spill] sm:$0xff] %v4424_v1  ;;  %2873 = vperm.xlu0 %3735, %v2864_v59   ;;  %v1902_v59 = vsel %vm604_vm12, %v4136_v7, 0.0  ;;  %v2165_v6 = vsel %vm604_vm12, %v4131_v2, 0.0  ;;  %v1654_v29 = vmul.f32 %v4087_v48, %v1645_v8  ;;  %v4475_v20 = vmul.f32 %v4087_v48, %v1647_v63 }
  0x8c   : > { %7997 = vst [vmem:[#allocation43_spill] sm:$0xff] %v4428_v47  ;;  %v589_v31 = vpop.permute.xlu1 %588  ;;  %v4472_v47 = vpop.permute.xlu2 %711  ;;  %v2428_v1 = vsel %vm604_vm12, %v4127_v5, 0.0  ;;  %v2691_v15 = vsel %vm604_vm12, %v4156_v13, 0.0  ;;  %v2163_v18 = vsel %vm602_vm5, %v4142_v10, 0.0  ;;  %v1928_v8 = vsel %vm719_vm3, %v4344_v26, 0.0 }
  0x8d   : > { %v4461_v57 = vpop.permute.xlu0 %582  ;;  %7998 = vst [vmem:[#allocation44_spill] sm:$0xff] %v4464_v53  ;;  %v4490_v53 = vadd.f32 %v1679_v36, %v1654_v29  ;;  %v2172_v63 = vmul.f32 %v4109_v61, %v2163_v18  ;;  %v4497_v22 = vmul.f32 %v4258_v17, %v727_v58  ;;  %v2191_v43 = vsel %vm719_vm3, %v4385_v32, 0.0 }
  0x8e   : > { %7999 = vst [vmem:[#allocation45_spill] sm:$0xff] %v4467_v0  ;;  %v4485_v0 = vmul.f32 %v4090_v49, %v1902_v59  ;;  %vm722_vm7 = vcmp.eq.s32.totalorder %v4472_v47, 1  ;;  %v4504_v59 = vmul.f32 %v4112_v62, %v2428_v1  ;;  %v4507_v29 = vmul.f32 %v4123_v4, %v2691_v15 }
  0x8f   : > { %8000 = vst [vmem:[#allocation46_spill] sm:$0xff] %v4475_v20  ;;  %v4494_v20 = vmul.f32 %v4109_v61, %v2165_v6  ;;  %v4510_v36 = vmul.f32 %v4261_v27, %v1410_v19  ;;  %v4512_v6 = vadd.f32 %v2197_v25, %v2172_v63  ;;  %v4515_v58 = vmul.f32 %v4264_v28, %v1673_v54 }
  0x90   : > { %8001 = vst [vmem:[#allocation47_spill] sm:$0xff] %v4485_v0  ;;  %v4518_v18 = vmul.f32 %v4274_v56, %v1928_v8  ;;  %v2454_v1 = vsel %vm719_vm3, %v4308_v51, 0.0  ;;  %vm605_vm8 = vcmp.eq.s32.totalorder %v589_v31, 1  ;;  %v2717_v25 = vsel %vm719_vm3, %v4302_v60, 0.0 }
  0x91   : > { %8002 = vst [vmem:[#allocation48_spill] sm:$0xff] %v4490_v53  ;;  %1309 = vperm.xlu2 %3737, %v1296_v37   ;;  %v4524_v37 = vmul.f32 %v4277_v3, %v2191_v43  ;;  %v730_v19 = vsel %vm722_vm7, %v4344_v26, 0.0  ;;  %v1382_v54 = vsel %vm602_vm5, %v4152_v12, 0.0  ;;  %v1900_v43 = vsel %vm602_vm5, %v4216_v55, 0.0 }
  0x92   : > { %8003 = vst [vmem:[#allocation49_spill] sm:$0xff] %v4494_v20  ;;  %1019 = vperm.xlu1 %3736, %v1004_v14   ;;  %v610_v14 = vsel %vm602_vm5, %v4156_v13, 0.0  ;;  %v2426_v24 = vsel %vm602_vm5, %v4136_v7, 0.0  ;;  %v2689_v15 = vsel %vm602_vm5, %v4131_v2, 0.0  ;;  %v613_v8 = vsel %vm605_vm8, %v4216_v55, 0.0 }
  0x93   : > { %8004 = vst [vmem:[#allocation50_spill] sm:$0xff] %v4497_v22  ;;  %2350 = vperm.xlu0 %3735, %v2339_v30   ;;  %v1413_v30 = vsel %vm722_vm7, %v4385_v32, 0.0  ;;  %v1385_v63 = vsel %vm605_vm8, %v4142_v10, 0.0  ;;  %v8014_v23 = vrot.slane %v4073_v42, 7  ;;  %v4575_v20 = vmul.f32 %v4069_v40, %v610_v14 }
  0x94   : > { %8005 = vst [vmem:[#allocation51_spill] sm:$0xff] %v4504_v59  ;;  %v8015_v59 = vrot.slane %v4066_v39, 7  ;;  %v4587_v0 = vmul.f32 %v4123_v4, %v2689_v15  ;;  %v2692_v15 = vsel %vm605_vm8, %v4152_v12, 0.0  ;;  %vm603_vm10 = vcmp.eq.s32.totalorder %v4461_v57, 1 }
  0x95   : > { %8006 = vst [vmem:[#allocation52_spill] sm:$0xff] %v4507_v29  ;;  %v1903_v29 = vsel %vm605_vm8, %v4131_v2, 0.0  ;;  %v4572_v22 = vpop.permute.xlu0 %597  ;;  %v4661_v47 = vmul.f32 %v4258_v17, %v730_v19  ;;  %v8060_v57 = vrot.slane %v4058_v34, 7 }
  0x96   : > { %8007 = vst [vmem:[#allocation53_spill] sm:$0xff] %v4510_v36  ;;  %v4570_v36 = vsel %vm757_vm6, %v8015_v59, %v8014_v23  ;;  %v4590_v59 = vmul.f32 %v4069_v40, %v613_v8  ;;  %v4593_v23 = vmul.f32 %v4078_v44, %v1385_v63  ;;  %v1676_v8 = vsel %vm722_vm7, %v4308_v51, 0.0 }
  0x97   : > { %8008 = vst [vmem:[#allocation54_spill] sm:$0xff] %v4512_v6  ;;  %v2457_v63 = vsel %vm722_vm7, %v4292_v21, 0.0  ;;  %vm608_vm11 = vcmp.eq.s32.totalorder %v4572_v22, 1 }
  0x98   : > { %8009 = vst [vmem:[#allocation55_spill] sm:$0xff] %v4515_v58  ;;  %v4560_v58 = vmul.f32 %v4340_v52, %v2717_v25  ;;  %v4581_v25 = vmul.f32 %v4090_v49, %v1900_v43  ;;  %v2166_v43 = vsel %vm605_vm8, %v4127_v5, 0.0  ;;  %v4681_v19 = vmul.f32 %v4280_v16, %v2457_v63 }
  0x99   : > { %8010 = vst [vmem:[#allocation56_spill] sm:$0xff] %v4518_v18  ;;  %v4557_v18 = vmul.f32 %v4280_v16, %v2454_v1  ;;  %v4578_v1 = vmul.f32 %v4078_v44, %v1382_v54  ;;  %v4599_v54 = vmul.f32 %v4090_v49, %v1903_v29  ;;  %v2194_v29 = vsel %vm722_vm7, %v4298_v50, 0.0 }
  0x9a   : > { %8011 = vst [vmem:[#allocation57_spill] sm:$0xff] %v4524_v37  ;;  %v1648_v37 = vsel %vm605_vm8, %v4136_v7, 0.0  ;;  %v1901_v63 = vsel %vm603_vm10, %v4142_v10, 0.0 }
  0x9b   : > { %8012 = vst [vmem:[#allocation58_spill] sm:$0xff] %v4557_v18  ;;  %v4584_v18 = vmul.f32 %v4112_v62, %v2426_v24  ;;  %v4596_v14 = vmul.f32 %v4087_v48, %v1648_v37  ;;  %v2429_v24 = vsel %vm605_vm8, %v4156_v13, 0.0  ;;  %v1931_v37 = vsel %vm722_vm7, %v4302_v60, 0.0 }
  0x9c   : > { %8013 = vst [vmem:[#allocation59_spill] sm:$0xff] %v4560_v58  ;;  %v601_v58 = vpop.permute.xlu1 %600 }
  0x9d   : > { %8016 = vst [vmem:[#allocation60_spill] sm:$0xff] %v4570_v36  ;;  %vm609_vm9 = vcmp.eq.s32.totalorder %v601_v58, 1 }
  0x9e   : > { %8017 = vst [vmem:[#allocation61_spill] sm:$0xff] %v4581_v25  ;;  %v617_v31 = vsel %vm609_vm9, %v4127_v5, 0.0  ;;  %v1907_v58 = vsel %vm609_vm9, %v4148_v11, 0.0  ;;  %v2170_v6 = vsel %vm609_vm9, %v4216_v55, 0.0  ;;  %v2433_v25 = vsel %vm609_vm9, %v4142_v10, 0.0 }
  0x9f   : > { %8018 = vst [vmem:[#allocation62_spill] sm:$0xff] %v4584_v18  ;;  %v4633_v18 = vmul.f32 %v4090_v49, %v1907_v58  ;;  %v2696_v53 = vsel %vm609_vm9, %v4136_v7, 0.0  ;;  %v4651_v58 = vmul.f32 %v4109_v61, %v2166_v43  ;;  %v4672_v43 = vpop.permute.xlu0 %696 }
  0xa0   : > { %8019 = vst [vmem:[#allocation63_spill] sm:$0xff] %v4587_v0 }
  0xa1   : > { %8020 = vst [vmem:[#allocation64_spill] sm:$0xff] %v4590_v59 }
  0xa2   : > { %8021 = vst [vmem:[#allocation65_spill] sm:$0xff] %v4593_v23  ;;  %v4623_v23 = vmul.f32 %v4069_v40, %v617_v31  ;;  %v2720_v31 = vsel %vm722_vm7, %v4333_v9, 0.0 }
  0xa3   : > { %8022 = vst [vmem:[#allocation66_spill] sm:$0xff] %v4596_v14  ;;  %v1652_v14 = vsel %vm609_vm9, %v4152_v12, 0.0 }
  0xa4   : > { %8023 = vst [vmem:[#allocation67_spill] sm:$0xff] %v4599_v54  ;;  %v1389_v54 = vsel %vm609_vm9, %v4156_v13, 0.0  ;;  %v4629_v0 = vmul.f32 %v4087_v48, %v1652_v14  ;;  %v4645_v14 = vmul.f32 %v4112_v62, %v2433_v25  ;;  %v4669_v25 = vpop.permute.xlu2 %810 }
  0xa5   : > { %8024 = vst [vmem:[#allocation68_spill] sm:$0xff] %v4623_v23  ;;  %v4626_v59 = vmul.f32 %v4078_v44, %v1389_v54  ;;  %v4642_v54 = vmul.f32 %v4109_v61, %v2170_v6  ;;  %v4657_v23 = vmul.f32 %v4123_v4, %v2692_v15  ;;  %v4664_v6 = vmul.f32 %v4261_v27, %v1413_v30 }
  0xa6   : > { %8026 = vst [vmem:[#allocation70_spill] sm:$0xff] %v4629_v0  ;;  %v4648_v0 = vmul.f32 %v4123_v4, %v2696_v53  ;;  %v4667_v53 = vmul.f32 %v4264_v28, %v1676_v8  ;;  %v4678_v15 = vmul.f32 %v4277_v3, %v2194_v29  ;;  %v4684_v30 = vmul.f32 %v4340_v52, %v2720_v31  ;;  %v8041_v29 = vld [vmem:[#allocation17_spill] sm:$0xff] }
  0xa7   : > { %8025 = vst [vmem:[#allocation69_spill] sm:$0xff] %v4626_v59  ;;  %v611_v8 = vsel %vm603_vm10, %v4152_v12, 0.0  ;;  %v616_v31 = vsel %vm608_vm11, %v4131_v2, 0.0  ;;  %vm831_vm3 = vcmp.eq.s32.totalorder %v4669_v25, 1 }
  0xa8   : > { %8027 = vst [vmem:[#allocation71_spill] sm:$0xff] %v4633_v18  ;;  %v4654_v18 = vmul.f32 %v4112_v62, %v2429_v24  ;;  %v4675_v24 = vmul.f32 %v4274_v56, %v1931_v37  ;;  %v1646_v37 = vsel %vm603_vm10, %v4216_v55, 0.0  ;;  %v4709_v59 = vmul.f32 %v4069_v40, %v616_v31 }
  0xa9   : > { %8028 = vst [vmem:[#allocation72_spill] sm:$0xff] %v4642_v54  ;;  %v2395_v54 = vadd.s32 2, %v8041_v29  ;;  %v2432_v31 = vsel %vm608_vm11, %v4216_v55, 0.0  ;;  %v8049_v55 = vld [vmem:[#allocation34_spill] sm:$0xff] }
  0xaa   : > { %8029 = vst [vmem:[#allocation73_spill] sm:$0xff] %v4645_v14  ;;  %v1383_v14 = vsel %vm603_vm10, %v4148_v11, 0.0 }
  0xab   : > { %8030 = vst [vmem:[#allocation74_spill] sm:$0xff] %v4648_v0  ;;  %v1388_v0 = vsel %vm608_vm11, %v4127_v5, 0.0  ;;  %vm2403_vm13 = vcmp.ge.s32.totalorder %v2395_v54, 0  ;;  %vm2411_vm15 = vcmp.lt.s32.totalorder %v2395_v54, 8 }
  0xac   : > { %8031 = vst [vmem:[#allocation75_spill] sm:$0xff] %v4651_v58  ;;  %vm2419_vm0 = vmand %vm2403_vm13, %vm2411_vm15 }
  0xad   : > { %8032 = vst [vmem:[#allocation76_spill] sm:$0xff] %v4654_v18  ;;  %v1906_v18 = vsel %vm608_vm11, %v4152_v12, 0.0  ;;  %v4738_v12 = vmul.f32 %v4112_v62, %v2432_v31  ;;  %v1655_v31 = vmul.f32 %v4087_v48, %v1646_v37  ;;  %v2602_v54 = vsel %vm2419_vm0, 1, %v7978_v35 }
  0xae   : > { %8033 = vst [vmem:[#allocation77_spill] sm:$0xff] %v4657_v23  ;;  %2613 = vperm.xlu1 %3736, %v2602_v54   ;;  %v8054_v37 = vrot.slane %v4064_v38, 7  ;;  %v8057_v54 = vrot.slane %v4071_v41, 7 }
  0xaf   : > { %8034 = vst [vmem:[#allocation78_spill] sm:$0xff] %v4661_v47 }
  0xb0   : > { %8035 = vst [vmem:[#allocation79_spill] sm:$0xff] %v4664_v6  ;;  %v4909_v6 = vld [vmem:[%s7604_s2 + $0x30] sm:$0xff] }
  0xb1   : > { %8036 = vst [vmem:[#allocation80_spill] sm:$0xff] %v4667_v53  ;;  %vm869_vm15 = vcmp.ge.s32.totalorder %v4909_v6, 0  ;;  %vm877_vm0 = vcmp.lt.s32.totalorder %v4909_v6, 8 }
  0xb2   : > { %8037 = vst [vmem:[#allocation81_spill] sm:$0xff] %v4675_v24 }
  0xb3   : > { %8038 = vst [vmem:[#allocation82_spill] sm:$0xff] %v4678_v15  ;;  %v4721_v15 = vmul.f32 %v4090_v49, %v1906_v18 }
  0xb4   : > { %8039 = vst [vmem:[#allocation83_spill] sm:$0xff] %v4681_v19  ;;  %v1651_v19 = vsel %vm608_vm11, %v4156_v13, 0.0  ;;  %v2169_v13 = vsel %vm608_vm11, %v4148_v11, 0.0  ;;  %v4744_v11 = vmul.f32 %v4069_v40, %v611_v8  ;;  %v2164_v40 = vsel %vm603_vm10, %v4136_v7, 0.0  ;;  %v820_v7 = vpop.permute.xlu2 %819 }
  0xb5   : > { %8040 = vst [vmem:[#allocation84_spill] sm:$0xff] %v4684_v30  ;;  %v4712_v30 = vmul.f32 %v4078_v44, %v1388_v0  ;;  %v4715_v24 = vmul.f32 %v4087_v48, %v1651_v19  ;;  %v2695_v0 = vsel %vm608_vm11, %v4142_v10, 0.0  ;;  %v4732_v19 = vpop.permute.xlu1 %699  ;;  %v4735_v23 = vmul.f32 %v4109_v61, %v2169_v13  ;;  %v4750_v10 = vld [vmem:[%s7604_s2 + $0x18] sm:$0xff] }
  0xb6   : > { %8042 = vst [vmem:[#allocation85_spill] sm:$0xff] %v4709_v59  ;;  %v4741_v18 = vmul.f32 %v4123_v4, %v2695_v0  ;;  %v1086_v22 = vadd.s32 2, %v4750_v10  ;;  %v4754_v13 = vmul.f32 %v4078_v44, %v1383_v14  ;;  %v4758_v0 = vmul.f32 %v4090_v49, %v1901_v63 }
  0xb7   : > { %8043 = vst [vmem:[#allocation86_spill] sm:$0xff] %v4712_v30  ;;  %v2427_v44 = vsel %vm603_vm10, %v4131_v2, 0.0  ;;  %v8051_v14 = vrot.slane %v4082_v46, 7  ;;  %v8052_v48 = vrot.slane %v4080_v45, 7  ;;  %v2690_v2 = vsel %vm603_vm10, %v4127_v5, 0.0 }
  0xb8   : > { %8044 = vst [vmem:[#allocation87_spill] sm:$0xff] %v4715_v24  ;;  %vm1094_vm12 = vcmp.ge.s32.totalorder %v1086_v22, 0  ;;  %vm1102_vm7 = vcmp.lt.s32.totalorder %v1086_v22, 8  ;;  %v8053_v8 = vrot.slane %v4066_v39, 7  ;;  %v8059_v5 = vmov %v8057_v54 }
  0xb9   : > { %8045 = vst [vmem:[#allocation88_spill] sm:$0xff] %v4721_v15  ;;  %v1352_v15 = vadd.s32 4294967294, %v8049_v55  ;;  %v4773_v49 = vsel %vm757_vm6, %v8052_v48, %v8051_v14  ;;  %v8056_v14 = vmov %v8054_v37  ;;  %vm1110_vm8 = vmand %vm1094_vm12, %vm1102_vm7  ;;  %vm834_vm9 = vcmp.eq.s32.totalorder %v820_v7, 1 }
  0xba   : > { %8046 = vst [vmem:[#allocation89_spill] sm:$0xff] %v4735_v23  ;;  %v4787_v63 = vsel %vm757_vm6, %v8054_v37, %v8053_v8  ;;  %v4795_v22 = vsel %vm757_vm6, %v8057_v54, %v8056_v14  ;;  %v8062_v8 = vmov %v8060_v57  ;;  %v8063_v37 = vrot.slane %v4082_v46, 7  ;;  %v8065_v54 = vld [vmem:[#allocation14_spill] sm:$0xff] }
  0xbb   : > { %8047 = vst [vmem:[#allocation90_spill] sm:$0xff] %v4738_v12  ;;  %vm1360_vm1 = vcmp.ge.s32.totalorder %v1352_v15, 0  ;;  %vm1368_vm2 = vcmp.lt.s32.totalorder %v1352_v15, 8  ;;  %v4776_v15 = vpop.permute.xlu0 %705  ;;  %v4804_v12 = vsel %vm757_vm6, %v8060_v57, %v8059_v5  ;;  %v8064_v14 = vrot.slane %v4080_v45, 7 }
  0xbc   : > { %8048 = vst [vmem:[#allocation91_spill] sm:$0xff] %v4741_v18  ;;  %vm1376_vm5 = vmand %vm1360_vm1, %vm1368_vm2  ;;  %v4812_v18 = vsel %vm757_vm6, %v8063_v37, %v8062_v8  ;;  %v8066_v23 = vrot.slane %v8065_v54, 7  ;;  %v1118_v5 = vsel %vm1110_vm8, 1, %v7978_v35  ;;  %v1433_v57 = vsel %vm831_vm3, %v4773_v49, 0.0 }
  0xbd   : > { %8050 = vst [vmem:[#allocation92_spill] sm:$0xff] %v4754_v13  ;;  %v1559_v48 = vsel %vm1376_vm5, 1, %v7978_v35  ;;  %1133 = vperm.xlu2 %3737, %v1118_v5   ;;  %v8069_v8 = vrot.slane %v4073_v42, 7  ;;  %vm717_vm10 = vcmp.eq.s32.totalorder %v4672_v43, 1  ;;  %v4845_v5 = vsel %vm834_vm9, %v4570_v36, 0.0  ;;  %vm885_vm8 = vmand %vm869_vm15, %vm877_vm0  ;;  %v5058_v43 = vld [vmem:[%s7604_s2 + $0x20] sm:$0xff] }
  0xbe   : > { %8055 = vst [vmem:[#allocation93_spill] sm:$0xff] %v4787_v63  ;;  %v4820_v58 = vsel %vm757_vm6, %v8066_v23, %v8064_v14  ;;  %1572 = vperm.xlu0 %3735, %v1559_v48   ;;  %v8068_v47 = vmov %v8066_v23  ;;  %v4836_v23 = vsel %vm834_vm9, %v4804_v12, 0.0  ;;  %v4839_v48 = vsel %vm834_vm9, %v4795_v22, 0.0 }
  0xbf   : > { %8058 = vst [vmem:[#allocation94_spill] sm:$0xff] %v4795_v22  ;;  %v4832_v37 = vsel %vm757_vm6, %v8069_v8, %v8068_v47  ;;  %v4842_v14 = vsel %vm834_vm9, %v4787_v63, 0.0  ;;  %v1696_v47 = vsel %vm831_vm3, %v4812_v18, 0.0  ;;  %v4854_v8 = vsel %vm834_vm9, %v4820_v58, 0.0 }
  0xc0   : > { %8061 = vst [vmem:[#allocation95_spill] sm:$0xff] %v4804_v12  ;;  %v4851_v7 = vsel %vm834_vm9, %v4832_v37, 0.0  ;;  %vm718_vm6 = vcmp.eq.s32.totalorder %v4732_v19, 1  ;;  %v4872_v59 = vmul.f32 %v4123_v4, %v2690_v2  ;;  %v4894_v4 = vsel %vm831_vm3, %v4795_v22, 0.0 }
  0xc1   : > { %8067 = vst [vmem:[#allocation96_spill] sm:$0xff] %v4820_v58  ;;  %v2658_v2 = vadd.s32 3, %v8041_v29  ;;  %v726_v24 = vsel %vm718_vm6, %v4298_v50, 0.0  ;;  %v829_v29 = vpop.permute.xlu2 %828  ;;  %vm867_vm0 = vcmp.ge.s32.totalorder %v5058_v43, 0 }
  0xc2   : > { %8070 = vst [vmem:[#allocation97_spill] sm:$0xff] %v4832_v37  ;;  %v4947_v39 = vmul.f32 %v4258_v17, %v726_v24  ;;  %v2453_v24 = vsel %vm718_vm6, %v4385_v32, 0.0 }
  0xc3   : > { %8071 = vst [vmem:[#allocation98_spill] sm:$0xff] %v4836_v23  ;;  %v4857_v23 = vsel %vm834_vm9, %v4773_v49, 0.0  ;;  %vm2666_vm11 = vcmp.ge.s32.totalorder %v2658_v2, 0  ;;  %vm2674_vm13 = vcmp.lt.s32.totalorder %v2658_v2, 8  ;;  %v4913_v30 = vpop.permute.xlu0 %714  ;;  %vm837_vm9 = vcmp.eq.s32.totalorder %v829_v29, 1 }
  0xc4   : > { %8072 = vst [vmem:[#allocation99_spill] sm:$0xff] %v4839_v48  ;;  %v4859_v48 = vpop.permute.xlu1 %708  ;;  %vm2682_vm1 = vmand %vm2666_vm11, %vm2674_vm13  ;;  %v4987_v19 = vsel %vm837_vm9, %v4773_v49, 0.0  ;;  %vm7663_vm11 = vcmp.lt.s32.totalorder %v8049_v55, 8 }
  0xc5   : > { %8073 = vst [vmem:[#allocation100_spill] sm:$0xff] %v4842_v14  ;;  %v4862_v14 = vmul.f32 %v4109_v61, %v2164_v40  ;;  %v4882_v61 = vsel %vm831_vm3, %v4804_v12, 0.0  ;;  %v8081_v40 = vld [vmem:[#allocation42_spill] sm:$0xff]  ;;  %vm721_vm5 = vcmp.eq.s32.totalorder %v4859_v48, 1 }
  0xc6   : > { %8074 = vst [vmem:[#allocation101_spill] sm:$0xff] %v4845_v5  ;;  %v4865_v5 = vmul.f32 %v4112_v62, %v2427_v44  ;;  %v4886_v44 = vmul.f32 %v8081_v40, %v1433_v57 }
  0xc7   : > { %8075 = vst [vmem:[#allocation102_spill] sm:$0xff] %v4851_v7  ;;  %v1671_v7 = vsel %vm717_vm10, %v4292_v21, 0.0 }
  0xc8   : > { %8076 = vst [vmem:[#allocation103_spill] sm:$0xff] %v4854_v8  ;;  %v4877_v8 = vsel %vm831_vm3, %v4820_v58, 0.0  ;;  %v1680_v62 = vmul.f32 %v4264_v28, %v1671_v7  ;;  %v1409_v7 = vsel %vm718_vm6, %v4292_v21, 0.0 }
  0xc9   : > { %8077 = vst [vmem:[#allocation104_spill] sm:$0xff] %v4857_v23  ;;  %v8083_v23 = vld [vmem:[#allocation43_spill] sm:$0xff] }
  0xca   : > { %8078 = vst [vmem:[#allocation105_spill] sm:$0xff] %v4862_v14  ;;  %v4889_v53 = vmul.f32 %v8083_v23, %v1696_v47  ;;  %v4903_v57 = vadd.f32 %v1680_v62, %v1655_v31  ;;  %v1615_v47 = vadd.s32 4294967295, %v8049_v55  ;;  %v1672_v31 = vsel %vm718_vm6, %v4333_v9, 0.0  ;;  %v8088_v62 = vld [vmem:[#allocation35_spill] sm:$0xff] }
  0xcb   : > { %8079 = vst [vmem:[#allocation106_spill] sm:$0xff] %v4865_v5  ;;  %v1927_v2 = vsel %vm718_vm6, %v8088_v62, 0.0  ;;  %v1412_v5 = vsel %vm721_vm5, %v4344_v26, 0.0  ;;  %v4939_v14 = vsel %vm831_vm3, %v4570_v36, 0.0 }
  0xcc   : > { %8080 = vst [vmem:[#allocation107_spill] sm:$0xff] %v4872_v59  ;;  %vm1623_vm2 = vcmp.ge.s32.totalorder %v1615_v47, 0  ;;  %vm1631_vm12 = vcmp.lt.s32.totalorder %v1615_v47, 8  ;;  %v2865_v59 = vsel %vm2682_vm1, 1, %v7978_v35  ;;  %v4934_v47 = vsel %vm831_vm3, %v4787_v63, 0.0 }
  0xcd   : > { %8082 = vst [vmem:[#allocation108_spill] sm:$0xff] %v4886_v44  ;;  %vm1639_vm7 = vmand %vm1623_vm2, %vm1631_vm12  ;;  %2876 = vperm.xlu1 %3736, %v2865_v59   ;;  %v893_v59 = vsel %vm885_vm8, 1, %v7978_v35  ;;  %v4957_v25 = vmul.f32 %v4274_v56, %v1927_v2  ;;  %v4975_v2 = vsel %vm837_vm9, %v4570_v36, 0.0  ;;  %vm720_vm3 = vcmp.eq.s32.totalorder %v4776_v15, 1 }
  0xce   : > { %8084 = vst [vmem:[#allocation109_spill] sm:$0xff] %v4889_v53  ;;  %v1822_v42 = vsel %vm1639_vm7, 1, %v7978_v35  ;;  %v4950_v53 = vmul.f32 %v4261_v27, %v1409_v7  ;;  %v2716_v7 = vsel %vm718_vm6, %v4308_v51, 0.0  ;;  %914 = vperm.xlu2 %3737, %v893_v59   ;;  %v4991_v59 = vsel %vm837_vm9, %v4812_v18, 0.0 }
  0xcf   : > { %8085 = vst [vmem:[#allocation110_spill] sm:$0xff] %v4894_v4  ;;  %v4929_v4 = vsel %vm721_vm5, %v4385_v32, 0.0  ;;  %1835 = vperm.xlu0 %3735, %v1822_v42   ;;  %v725_v42 = vsel %vm717_vm10, %v4302_v60, 0.0  ;;  %v1674_v29 = vsel %vm720_vm3, %v4344_v26, 0.0  ;;  %v2452_v44 = vsel %vm717_vm10, %v4344_v26, 0.0 }
  0xd0   : > { %8086 = vst [vmem:[#allocation111_spill] sm:$0xff] %v4903_v57  ;;  %v5031_v57 = vpop.permute.xlu0 %813  ;;  %vm875_vm1 = vcmp.lt.s32.totalorder %v5058_v43, 8  ;;  %vm7673_vm7 = vcmp.eq.s32.totalorder %v4913_v30, 1  ;;  %v2192_v48 = vsel %vm720_vm3, %v4308_v51, 0.0  ;;  %v5135_v15 = vmul.f32 %v4264_v28, %v1674_v29 }
  0xd1   : > { %8087 = vst [vmem:[#allocation112_spill] sm:$0xff] %v4913_v30  ;;  %vm883_vm12 = vmand %vm867_vm0, %vm875_vm1  ;;  %v2133_v29 = vadd.s32 1, %v8049_v55 }
  0xd2   : > { %8089 = vst [vmem:[#allocation113_spill] sm:$0xff] %v4934_v47  ;;  %v4953_v47 = vmul.f32 %v4264_v28, %v1672_v31  ;;  %v4968_v31 = vpop.permute.xlu1 %807 }
  0xd3   : > { %8090 = vst [vmem:[#allocation114_spill] sm:$0xff] %v4939_v14  ;;  %v2190_v14 = vsel %vm718_vm6, %v4344_v26, 0.0  ;;  %vm1878_vm6 = vcmp.ge.s32.totalorder %v8049_v55, 0 }
  0xd4   : > { %8091 = vst [vmem:[#allocation115_spill] sm:$0xff] %v4947_v39  ;;  %vm1894_vm13 = vmand %vm1878_vm6, %vm7663_vm11  ;;  %v2189_v39 = vsel %vm717_vm10, %v8088_v62, 0.0 }
  0xd5   : > { %8092 = vst [vmem:[#allocation116_spill] sm:$0xff] %v4950_v53  ;;  %v4995_v53 = vsel %vm837_vm9, %v4804_v12, 0.0  ;;  %v5053_v26 = vmul.f32 %v4277_v3, %v2189_v39  ;;  %v1930_v39 = vsel %vm721_vm5, %v4308_v51, 0.0 }
  0xd6   : > { %8093 = vst [vmem:[#allocation117_spill] sm:$0xff] %v4953_v47  ;;  %v4983_v47 = vsel %vm837_vm9, %v4820_v58, 0.0 }
  0xd7   : > { %8094 = vst [vmem:[#allocation118_spill] sm:$0xff] %v4957_v25  ;;  %v4979_v25 = vsel %vm837_vm9, %v4832_v37, 0.0 }
  0xd8   : > { %8095 = vst [vmem:[#allocation119_spill] sm:$0xff] %v4975_v2  ;;  %v4999_v2 = vsel %vm837_vm9, %v4795_v22, 0.0  ;;  %vm2141_vm9 = vcmp.ge.s32.totalorder %v2133_v29, 0 }
  0xd9   : > { %8096 = vst [vmem:[#allocation120_spill] sm:$0xff] %v4979_v25  ;;  %v5026_v25 = vmul.f32 %v4340_v52, %v2716_v7  ;;  %v2077_v7 = vsel %vm1894_vm13, 1, %v7978_v35 }
  0xda   : > { %8097 = vst [vmem:[#allocation121_spill] sm:$0xff] %v4983_v47  ;;  %v5023_v47 = vmul.f32 %v4280_v16, %v2453_v24  ;;  %v729_v24 = vsel %vm721_vm5, %v8088_v62, 0.0  ;;  %2090 = vperm.xlu1 %3736, %v2077_v7   ;;  %v5077_v7 = vmul.f32 %v4261_v27, %v1412_v5  ;;  %v2719_v5 = vsel %vm721_vm5, %v4292_v21, 0.0 }
  0xdb   : > { %8098 = vst [vmem:[#allocation122_spill] sm:$0xff] %v4987_v19  ;;  %v1200_v19 = vadd.s32 3, %v4750_v10  ;;  %v5020_v10 = vmul.f32 %v4277_v3, %v2190_v14  ;;  %v2715_v14 = vsel %vm717_vm10, %v4385_v32, 0.0 }
  0xdc   : > { %8099 = vst [vmem:[#allocation123_spill] sm:$0xff] %v4991_v59  ;;  %v1408_v59 = vsel %vm717_vm10, %v4298_v50, 0.0 }
  0xdd   : > { %8100 = vst [vmem:[#allocation124_spill] sm:$0xff] %v4995_v53  ;;  %v1926_v53 = vsel %vm717_vm10, %v4333_v9, 0.0  ;;  %vm1208_vm15 = vcmp.ge.s32.totalorder %v1200_v19, 0  ;;  %vm1216_vm10 = vcmp.lt.s32.totalorder %v1200_v19, 8  ;;  %v5074_v19 = vpop.permute.xlu2 %902 }
  0xde   : > { %8101 = vst [vmem:[#allocation125_spill] sm:$0xff] %v4999_v2  ;;  %v1929_v2 = vsel %vm720_vm3, %v4385_v32, 0.0  ;;  %vm1224_vm2 = vmand %vm1208_vm15, %vm1216_vm10  ;;  %vm7674_vm8 = vcmp.eq.s32.totalorder %v5074_v19, 1 }
  0xdf   : > { %8102 = vst [vmem:[#allocation126_spill] sm:$0xff] %v5020_v10  ;;  %v5050_v10 = vmul.f32 %v4274_v56, %v1926_v53  ;;  %v5066_v53 = vmul.f32 %v4340_v52, %v2715_v14  ;;  %v1232_v14 = vsel %vm1224_vm2, 1, %v7978_v35 }
  0xe0   : > { %8103 = vst [vmem:[#allocation127_spill] sm:$0xff] %v5023_v47  ;;  %v5047_v47 = vmul.f32 %v4261_v27, %v1408_v59  ;;  %v5069_v59 = vmul.f32 %v4258_v17, %v729_v24  ;;  %v5084_v24 = vpop.permute.xlu1 %816  ;;  %1247 = vperm.xlu0 %3735, %v1232_v14  }
  0xe1   : > { %8104 = vst [vmem:[#allocation128_spill] sm:$0xff] %v5026_v25  ;;  %v5044_v25 = vmul.f32 %v4258_v17, %v725_v42  ;;  %v5063_v42 = vmul.f32 %v4280_v16, %v2452_v44  ;;  %v2193_v44 = vsel %vm721_vm5, %v4302_v60, 0.0 }
  0xe2   : > { %8105 = vst [vmem:[#allocation129_spill] sm:$0xff] %v5031_v57  ;;  %v5110_v14 = vmul.f32 %v4277_v3, %v2193_v44 }
  0xe3   : > { %8106 = vst [vmem:[#allocation130_spill] sm:$0xff] %v5047_v47  ;;  %v1411_v47 = vsel %vm720_vm3, %v8088_v62, 0.0  ;;  %v5138_v62 = vmul.f32 %v4274_v56, %v1929_v2 }
  0xe4   : > { %8107 = vst [vmem:[#allocation131_spill] sm:$0xff] %v5053_v26  ;;  %v5101_v26 = vmul.f32 %v4274_v56, %v1930_v39  ;;  %v2718_v39 = vsel %vm720_vm3, %v4298_v50, 0.0 }
  0xe5   : > { %8108 = vst [vmem:[#allocation132_spill] sm:$0xff] %v5063_v42  ;;  %v5098_v42 = vmul.f32 %v4264_v28, %v4929_v4  ;;  %v2455_v4 = vsel %vm720_vm3, %v4302_v60, 0.0 }
  0xe6   : > { %8109 = vst [vmem:[#allocation133_spill] sm:$0xff] %v5066_v53  ;;  %v891_v53 = vsel %vm883_vm12, 1, %v7978_v35 }
  0xe7   : > { %8110 = vst [vmem:[#allocation134_spill] sm:$0xff] %v5069_v59  ;;  %v2456_v59 = vsel %vm721_vm5, %v4298_v50, 0.0  ;;  %908 = vperm.xlu2 %3737, %v891_v53   ;;  %v5125_v53 = vmul.f32 %v4340_v52, %v2719_v5  ;;  %vm830_vm5 = vcmp.eq.s32.totalorder %v4968_v31, 1  ;;  %v5146_v5 = vmul.f32 %v4280_v16, %v2455_v4 }
  0xe8   : > { %8111 = vst [vmem:[#allocation135_spill] sm:$0xff] %v5074_v19  ;;  %v838_v2 = vsel %vm830_vm5, %v4832_v37, 0.0  ;;  %v973_v4 = vadd.s32 1, %v5058_v43  ;;  %v1932_v31 = vsel %vm7673_vm7, %v4298_v50, 0.0 }
  0xe9   : > { %8112 = vst [vmem:[#allocation136_spill] sm:$0xff] %v5077_v7  ;;  %v728_v7 = vsel %vm720_vm3, %v4333_v9, 0.0  ;;  %vm2149_vm3 = vcmp.lt.s32.totalorder %v2133_v29, 8  ;;  %v2213_v29 = vsel %vm830_vm5, %v4804_v12, 0.0 }
  0xea   : > { %8113 = vst [vmem:[#allocation137_spill] sm:$0xff] %v5084_v24  ;;  %v5128_v44 = vmul.f32 %v4258_v17, %v728_v7  ;;  %v5149_v7 = vmul.f32 %v4340_v52, %v2718_v39  ;;  %v1695_v39 = vsel %vm830_vm5, %v4773_v49, 0.0  ;;  %vm2157_vm6 = vmand %vm2141_vm9, %vm2149_vm3  ;;  %vm981_vm10 = vcmp.ge.s32.totalorder %v973_v4, 0 }
  0xeb   : > { %8114 = vst [vmem:[#allocation138_spill] sm:$0xff] %v5098_v42  ;;  %v5122_v42 = vmul.f32 %v4280_v16, %v2456_v59  ;;  %v5143_v59 = vpop.permute.xlu0 %822  ;;  %vm989_vm0 = vcmp.lt.s32.totalorder %v973_v4, 8  ;;  %v1677_v52 = vsel %vm7673_vm7, %v4302_v60, 0.0  ;;  %v5211_v60 = vsel %vm830_vm5, %v4795_v22, 0.0 }
  0xec   : > { %8115 = vst [vmem:[#allocation139_spill] sm:$0xff] %v5101_v26  ;;  %v731_v26 = vsel %vm7673_vm7, %v4385_v32, 0.0  ;;  %v5141_v32 = vmul.f32 %v4277_v3, %v2192_v48  ;;  %v975_v48 = vadd.s32 1, %v4909_v6  ;;  %vm997_vm2 = vmand %vm981_vm10, %vm989_vm0  ;;  %v5200_v3 = vsel %vm830_vm5, %v4812_v18, 0.0 }
  0xed   : > { %8116 = vst [vmem:[#allocation140_spill] sm:$0xff] %v5110_v14  ;;  %v5132_v14 = vmul.f32 %v4261_v27, %v1411_v47  ;;  %v5216_v4 = vsel %vm830_vm5, %v4787_v63, 0.0  ;;  %vm835_vm10 = vcmp.eq.s32.totalorder %v5143_v59, 1  ;;  %v5320_v59 = vsel %vm7673_vm7, %v4333_v9, 0.0 }
  0xee   : > { %8117 = vst [vmem:[#allocation141_spill] sm:$0xff] %v5122_v42  ;;  %v8128_v42 = vld [vmem:[#allocation6_spill] sm:$0xff]  ;;  %vm983_vm13 = vcmp.ge.s32.totalorder %v975_v48, 0  ;;  %vm991_vm15 = vcmp.lt.s32.totalorder %v975_v48, 8  ;;  %v2340_v48 = vsel %vm2157_vm6, 1, %v7978_v35  ;;  %vm7668_vm6 = vcmp.eq.s32.totalorder %v5084_v24, 1 }
  0xef   : > { %8118 = vst [vmem:[#allocation142_spill] sm:$0xff] %v5125_v53  ;;  %v8126_v53 = vld [vmem:[#allocation3_spill] sm:$0xff]  ;;  %vm999_vm1 = vmand %vm983_vm13, %vm991_vm15  ;;  %2353 = vperm.xlu1 %3736, %v2340_v48   ;;  %v5224_v48 = vmul.f32 %v4258_v17, %v731_v26  ;;  %v5337_v9 = vsel %vm7668_vm6, %v4795_v22, 0.0 }
  0xf0   : > { %8119 = vst [vmem:[#allocation143_spill] sm:$0xff] %v5128_v44  ;;  %v5152_v47 = vperm.slane %v8126_v53, 2  ;;  %v826_v44 = vpop.permute.xlu1 %825  ;;  %v1007_v16 = vsel %vm999_vm1, 1, %v7978_v35 }
  0xf1   : > { %8120 = vst [vmem:[#allocation144_spill] sm:$0xff] %v5132_v14  ;;  %v5187_v14 = vmul.f32 %v8083_v23, %v1695_v39  ;;  %1028 = vperm.xlu0 %3735, %v1007_v16   ;;  %v1005_v39 = vsel %vm997_vm2, 1, %v7978_v35  ;;  %v5221_v16 = vsel %vm7674_vm8, %v4082_v46, 0.0  ;;  %vm836_vm15 = vcmp.eq.s32.totalorder %v826_v44, 1 }
  0xf2   : > { %8121 = vst [vmem:[#allocation145_spill] sm:$0xff] %v5135_v15  ;;  %v5156_v15 = vperm.slane %v8128_v42, 6  ;;  %1022 = vperm.xlu2 %3737, %v1005_v39   ;;  %v5248_v50 = vsel %vm836_vm15, %v4832_v37, 0.0  ;;  %v5252_v26 = vsel %vm836_vm15, %v4820_v58, 0.0  ;;  %v5255_v44 = vsel %vm836_vm15, %v4773_v49, 0.0 }
  0xf3   : > { %8122 = vst [vmem:[#allocation146_spill] sm:$0xff] %v5138_v62  ;;  %v5175_v62 = vmul.f32 %v5152_v47, %v838_v2  ;;  %v1414_v2 = vsel %vm7673_vm7, %v4308_v51, 0.0  ;;  %v1089_v51 = vadd.s32 2, %v4909_v6  ;;  %v5235_v19 = vpop.permute.xlu0 %896  ;;  %v5261_v39 = vsel %vm836_vm15, %v4804_v12, 0.0 }
  0xf4   : > { %8123 = vst [vmem:[#allocation147_spill] sm:$0xff] %v5141_v32  ;;  %v5180_v32 = vsel %vm830_vm5, %v4820_v58, 0.0  ;;  %v5206_v13 = vmul.f32 %v5156_v15, %v2213_v29  ;;  %v5227_v29 = vmul.f32 %v4261_v27, %v1414_v2  ;;  %v5242_v27 = vsel %vm836_vm15, %v4787_v63, 0.0 }
  0xf5   : > { %8124 = vst [vmem:[#allocation148_spill] sm:$0xff] %v5146_v5  ;;  %v5167_v5 = vpop.permute.xlu2 %1124  ;;  %vm1097_vm9 = vcmp.ge.s32.totalorder %v1089_v51, 0  ;;  %vm1105_vm3 = vcmp.lt.s32.totalorder %v1089_v51, 8  ;;  %v5258_v2 = vsel %vm836_vm15, %v4812_v18, 0.0  ;;  %v5266_v51 = vsel %vm835_vm10, %v4795_v22, 0.0 }
  0xf6   : > { %8125 = vst [vmem:[#allocation149_spill] sm:$0xff] %v5149_v7  ;;  %v5172_v7 = vld [vmem:[%s7603_s1 + $0x18] sm:$0xff]  ;;  %vm1113_vm0 = vmand %vm1097_vm9, %vm1105_vm3  ;;  %vm1074_vm8 = vcmp.lt.s32.totalorder %v4056_v33, 6 }
  0xf7   : > { %8127 = vst [vmem:[#allocation3_spill] sm:$0xff] %v5152_v47  ;;  %v490_v23 = vadd.s32 4294967293, %v5172_v7  ;;  %v1353_v17 = vadd.s32 4294967294, %v5172_v7 }
  0xf8   : > { %8129 = vst [vmem:[#allocation6_spill] sm:$0xff] %v5156_v15  ;;  %v5230_v15 = vmul.f32 %v4264_v28, %v1677_v52  ;;  %v5245_v28 = vsel %vm836_vm15, %v4570_v36, 0.0 }
  0xf9   : > { %8130 = vst [vmem:[#allocation150_spill] sm:$0xff] %v5167_v5  ;;  %vm498_vm12 = vcmp.ge.s32.totalorder %v490_v23, 0  ;;  %vm506_vm5 = vcmp.lt.s32.totalorder %v490_v23, 8  ;;  %v1121_v23 = vsel %vm1113_vm0, 1, %v7978_v35  ;;  %vm1361_vm1 = vcmp.ge.s32.totalorder %v1353_v17, 0 }
  0xfa   : > { %8131 = vst [vmem:[#allocation151_spill] sm:$0xff] %v5172_v7  ;;  %vm514_vm13 = vmand %vm498_vm12, %vm506_vm5  ;;  %vm1369_vm2 = vcmp.lt.s32.totalorder %v1353_v17, 8  ;;  %1142 = vperm.xlu0 %3735, %v1121_v23   ;;  %v5289_v23 = vmul.f32 %v4274_v56, %v1932_v31  ;;  %v1435_v56 = vsel %vm7668_vm6, %v4804_v12, 0.0  ;;  %v1087_v31 = vadd.s32 2, %v5058_v43 }
  0xfb   : > { %8132 = vst [vmem:[#allocation152_spill] sm:$0xff] %v5206_v13  ;;  %v1297_v52 = vsel %vm514_vm13, 1, %v7978_v35  ;;  %vm1377_vm12 = vmand %vm1361_vm1, %vm1369_vm2  ;;  %vm7675_vm5 = vcmp.eq.s32.totalorder %v5031_v57, 1 }
  0xfc   : > { %8133 = vst [vmem:[#allocation153_spill] sm:$0xff] %v5211_v60  ;;  %1312 = vperm.xlu1 %3736, %v1297_v52   ;;  %v1560_v52 = vsel %vm1377_vm12, 1, %v7978_v35  ;;  %vm1095_vm9 = vcmp.ge.s32.totalorder %v1087_v31, 0  ;;  %vm1103_vm3 = vcmp.lt.s32.totalorder %v1087_v31, 8  ;;  %v5342_v31 = vsel %vm7668_vm6, %v4787_v63, 0.0 }
  0xfd   : > { %8134 = vst [vmem:[#allocation154_spill] sm:$0xff] %v5216_v4  ;;  %v5268_v17 = vpop.permute.xlu2 %1303  ;;  %1575 = vperm.xlu2 %3737, %v1560_v52   ;;  %v2396_v52 = vadd.s32 2, %v8049_v55  ;;  %v7686_v60 = vrot.slane %v8065_v54, 1 }
  0xfe   : > { %8135 = vst [vmem:[#allocation155_spill] sm:$0xff] %v5221_v16  ;;  %v5480_v16 = vperm.slane %v8126_v53, 6 }
  0xff   : > { %8136 = vst [vmem:[#allocation156_spill] sm:$0xff] %v5224_v48  ;;  %v5284_v48 = vsel %vm835_vm10, %v4832_v37, 0.0  ;;  %vm2404_vm13 = vcmp.ge.s32.totalorder %v2396_v52, 0  ;;  %vm2412_vm15 = vcmp.lt.s32.totalorder %v2396_v52, 8 }
 0x100   : > { %8137 = vst [vmem:[#allocation157_spill] sm:$0xff] %v5227_v29  ;;  %v5294_v29 = vsel %vm835_vm10, %v4820_v58, 0.0  ;;  %vm2420_vm12 = vmand %vm2404_vm13, %vm2412_vm15 }
 0x101   : > { %8138 = vst [vmem:[#allocation158_spill] sm:$0xff] %v5230_v15  ;;  %v5274_v15 = vsel %vm835_vm10, %v4787_v63, 0.0  ;;  %v2603_v52 = vsel %vm2420_vm12, 1, %v7978_v35 }
 0x102   : > { %8139 = vst [vmem:[#allocation159_spill] sm:$0xff] %v5235_v19  ;;  %2616 = vperm.xlu0 %3735, %v2603_v52  }
 0x103   : > { %8140 = vst [vmem:[#allocation160_spill] sm:$0xff] %v5242_v27 }
 0x104   : > { %8141 = vst [vmem:[#allocation161_spill] sm:$0xff] %v5245_v28 }
 0x105   : > { %8142 = vst [vmem:[#allocation162_spill] sm:$0xff] %v5248_v50  ;;  %v5367_v58 = vpop.permute.xlu2 %1829 }
 0x106   : > { %8143 = vst [vmem:[#allocation163_spill] sm:$0xff] %v5252_v26  ;;  %v2659_v26 = vadd.s32 3, %v8049_v55 }
 0x107   : > { %8144 = vst [vmem:[#allocation164_spill] sm:$0xff] %v5255_v44 }
 0x108   : > { %8145 = vst [vmem:[#allocation165_spill] sm:$0xff] %v5258_v2  ;;  %v5279_v2 = vsel %vm835_vm10, %v4570_v36, 0.0  ;;  %vm2667_vm15 = vcmp.ge.s32.totalorder %v2659_v26, 0 }
 0x109   : > { %8146 = vst [vmem:[#allocation166_spill] sm:$0xff] %v5261_v39 }
 0x10a   : > { %8147 = vst [vmem:[#allocation167_spill] sm:$0xff] %v5266_v51  ;;  %v5286_v51 = vpop.permute.xlu1 %899 }
 0x10b   : > { %8148 = vst [vmem:[#allocation168_spill] sm:$0xff] %v5274_v15  ;;  %vm7676_vm2 = vcmp.eq.s32.totalorder %v5286_v51, 1  ;;  %v1616_v15 = vadd.s32 4294967295, %v5172_v7 }
 0x10c   : > { %8149 = vst [vmem:[#allocation169_spill] sm:$0xff] %v5279_v2  ;;  %v5299_v2 = vsel %vm835_vm10, %v4773_v49, 0.0 }
 0x10d   : > { %8150 = vst [vmem:[#allocation170_spill] sm:$0xff] %v5284_v48  ;;  %v5304_v48 = vsel %vm835_vm10, %v4812_v18, 0.0  ;;  %vm1111_vm10 = vmand %vm1095_vm9, %vm1103_vm3  ;;  %vm7723_vm3 = vcmp.eq.s32.totalorder %v5235_v19, 1  ;;  %vm1632_vm4 = vcmp.lt.s32.totalorder %v1616_v15, 8 }
 0x10e   : > { %8151 = vst [vmem:[#allocation171_spill] sm:$0xff] %v5289_v23  ;;  %v1203_v23 = vadd.s32 3, %v4909_v6  ;;  %v5329_v6 = vmul.f32 %v8081_v40, %v1435_v56  ;;  %v5347_v56 = vsel %vm7675_vm5, %v4773_v49, 0.0  ;;  %v1721_v49 = vsel %vm7676_vm2, %v4058_v34, 0.0 }
 0x10f   : > { %8152 = vst [vmem:[#allocation172_spill] sm:$0xff] %v5294_v29  ;;  %v5315_v29 = vsel %vm7673_vm7, %v4292_v21, 0.0  ;;  %v5332_v21 = vpop.permute.xlu0 %905  ;;  %v1720_v55 = vsel %vm7723_vm3, %v4082_v46, 0.0 }
 0x110   : > { %8153 = vst [vmem:[#allocation173_spill] sm:$0xff] %v5299_v2  ;;  %vm1211_vm0 = vcmp.ge.s32.totalorder %v1203_v23, 0  ;;  %vm1219_vm1 = vcmp.lt.s32.totalorder %v1203_v23, 8  ;;  %v1119_v23 = vsel %vm1111_vm10, 1, %v7978_v35  ;;  %v8163_v2 = vld [vmem:[#allocation5_spill] sm:$0xff]  ;;  %vm2675_vm10 = vcmp.lt.s32.totalorder %v2659_v26, 8 }
 0x111   : > { %8154 = vst [vmem:[#allocation174_spill] sm:$0xff] %v5304_v48  ;;  %v5325_v48 = vsel %vm7668_vm6, %v4812_v18, 0.0  ;;  %1136 = vperm.xlu1 %3736, %v1119_v23   ;;  %vm1227_vm9 = vmand %vm1211_vm0, %vm1219_vm1  ;;  %v5352_v39 = vperm.slane %v8163_v2, 1  ;;  %v5364_v23 = vld [vmem:[%s7604_s2 + $0x38] sm:$0xff]  ;;  %vm7702_vm1 = vcmp.lt.s32.totalorder %v4056_v33, 7  ;;  %v5383_v26 = vsel %vm7676_vm2, %v4082_v46, 0.0 }
 0x112   : > { %8155 = vst [vmem:[#allocation175_spill] sm:$0xff] %v5315_v29  ;;  %v1235_v44 = vsel %vm1227_vm9, 1, %v7978_v35  ;;  %vm870_vm13 = vcmp.ge.s32.totalorder %v5364_v23, 0  ;;  %vm878_vm0 = vcmp.lt.s32.totalorder %v5364_v23, 8  ;;  %vm2683_vm12 = vmand %vm2667_vm15, %vm2675_vm10  ;;  %vm1624_vm9 = vcmp.ge.s32.totalorder %v1616_v15, 0  ;;  %v5371_v52 = vpop.permute.xlu1 %1010 }
 0x113   : > { %8156 = vst [vmem:[#allocation176_spill] sm:$0xff] %v5320_v59  ;;  %1256 = vperm.xlu2 %3737, %v1235_v44   ;;  %v5378_v44 = vsel %vm7675_vm5, %v4812_v18, 0.0  ;;  %v5386_v27 = vmul.f32 %v5352_v39, %v1721_v49  ;;  %v5389_v15 = vperm.slane %v8128_v42, 7  ;;  %vm1640_vm15 = vmand %vm1624_vm9, %vm1632_vm4  ;;  %v2866_v24 = vsel %vm2683_vm12, 1, %v7978_v35 }
 0x114   : > { %8157 = vst [vmem:[#allocation177_spill] sm:$0xff] %v5325_v48  ;;  %vm886_vm10 = vmand %vm870_vm13, %vm878_vm0  ;;  %v2238_v59 = vsel %vm7723_vm3, %v4071_v41, 0.0  ;;  %v1823_v50 = vsel %vm1640_vm15, 1, %v7978_v35  ;;  %v8170_v29 = vrot.slane %v4058_v34, 1  ;;  %vm7703_vm4 = vcmp.eq.s32.totalorder %v5371_v52, 1 }
 0x115   : > { %8158 = vst [vmem:[#allocation178_spill] sm:$0xff] %v5329_v6  ;;  %v894_v18 = vsel %vm886_vm10, 1, %v7978_v35  ;;  %vm1879_vm13 = vcmp.ge.s32.totalorder %v5172_v7, 0  ;;  %vm7664_vm0 = vcmp.lt.s32.totalorder %v5172_v7, 8  ;;  %v1201_v49 = vadd.s32 3, %v5058_v43  ;;  %v5434_v43 = vld [vmem:[%s7604_s2 + $0x28] sm:$0xff]  ;;  %1838 = vperm.xlu0 %3735, %v1823_v50  }
 0x116   : > { %8159 = vst [vmem:[#allocation179_spill] sm:$0xff] %v5332_v21  ;;  %vm1895_vm12 = vmand %vm1879_vm13, %vm7664_vm0  ;;  %vm868_vm9 = vcmp.ge.s32.totalorder %v5434_v43, 0  ;;  %vm876_vm15 = vcmp.lt.s32.totalorder %v5434_v43, 8  ;;  %v5441_v6 = vmul.f32 %v5389_v15, %v2238_v59  ;;  %vm1147_vm0 = vcmp.eq.s32.totalorder %v5167_v5, 1 }
 0x117   : > { %8160 = vst [vmem:[#allocation180_spill] sm:$0xff] %v5337_v9  ;;  %v5421_v9 = vld [vmem:[%s7603_s1 + $0x30] sm:$0xff]  ;;  %v5438_v28 = vpop.permute.xlu0 %1238  ;;  %vm1209_vm10 = vcmp.ge.s32.totalorder %v1201_v49, 0  ;;  %vm1217_vm13 = vcmp.lt.s32.totalorder %v1201_v49, 8  ;;  %vm884_vm11 = vmand %vm868_vm9, %vm876_vm15  ;;  %v2078_v50 = vsel %vm1895_vm12, 1, %v7978_v35  ;;  %v976_v49 = vadd.s32 1, %v5364_v23 }
 0x118   : > { %8161 = vst [vmem:[#allocation181_spill] sm:$0xff] %v5342_v31  ;;  %v8171_v31 = vrot.slane %v4082_v46, 1  ;;  %vm1225_vm14 = vmand %vm1209_vm10, %vm1217_vm13  ;;  %v892_v48 = vsel %vm884_vm11, 1, %v7978_v35  ;;  %v493_v36 = vadd.s32 4294967293, %v5421_v9  ;;  %vm1261_vm6 = vcmp.eq.s32.totalorder %v5438_v28, 1 }
 0x119   : > { %8162 = vst [vmem:[#allocation182_spill] sm:$0xff] %v5347_v56  ;;  %2879 = vperm.xlu1 %3736, %v2866_v24   ;;  %v8178_v24 = vrot.slane %v4071_v41, 1  ;;  %v5470_v21 = vperm.slane %v8126_v53, 4  ;;  %vm984_vm12 = vcmp.ge.s32.totalorder %v976_v49, 0  ;;  %vm992_vm10 = vcmp.lt.s32.totalorder %v976_v49, 8 }
 0x11a   : > { %8164 = vst [vmem:[#allocation5_spill] sm:$0xff] %v5352_v39  ;;  %v5411_v30 = vsel %vm7702_vm1, %v8171_v31, %v8170_v29  ;;  %v927_v29 = vsel %vm7723_vm3, %v8065_v54, 0.0  ;;  %v5427_v31 = vmul.f32 %v5352_v39, %v1720_v55  ;;  %v8177_v55 = vrot.slane %v4064_v38, 1  ;;  %vm1000_vm7 = vmand %vm984_vm12, %vm992_vm10  ;;  %v5488_v56 = vpop.permute.xlu1 %1013 }
 0x11b   : > { %8165 = vst [vmem:[#allocation183_spill] sm:$0xff] %v5364_v23  ;;  %917 = vperm.xlu2 %3737, %v894_v18   ;;  %v5455_v59 = vsel %vm7703_vm4, %v5411_v30, 0.0  ;;  %v1356_v18 = vadd.s32 4294967294, %v5421_v9  ;;  %vm501_vm9 = vcmp.ge.s32.totalorder %v493_v36, 0  ;;  %vm509_vm15 = vcmp.lt.s32.totalorder %v493_v36, 8 }
 0x11c   : > { %8166 = vst [vmem:[#allocation184_spill] sm:$0xff] %v5378_v44  ;;  %v5449_v37 = vsel %vm7702_vm1, %v8178_v24, %v8177_v55  ;;  %v1233_v55 = vsel %vm1225_vm14, 1, %v7978_v35  ;;  %v5464_v24 = vpop.permute.xlu2 %2347  ;;  %v5467_v39 = vperm.slane %v8126_v53, 3  ;;  %vm517_vm11 = vmand %vm501_vm9, %vm509_vm15  ;;  %v5475_v44 = vperm.slane %v8126_v53, 5  ;;  %v8190_v53 = vld [vmem:[#allocation37_spill] sm:$0xff] }
 0x11d   : > { %8167 = vst [vmem:[#allocation185_spill] sm:$0xff] %v5383_v26  ;;  %vm1364_vm14 = vcmp.ge.s32.totalorder %v1356_v18, 0  ;;  %vm1372_vm13 = vcmp.lt.s32.totalorder %v1356_v18, 8  ;;  %v1300_v63 = vsel %vm517_vm11, 1, %v7978_v35  ;;  %vm7724_vm5 = vcmp.lt.s32.totalorder %v4056_v33, 5  ;;  %1250 = vperm.xlu0 %3735, %v1233_v55  }
 0x11e   : > { %8168 = vst [vmem:[#allocation186_spill] sm:$0xff] %v5386_v27  ;;  %v1008_v36 = vsel %vm1000_vm7, 1, %v7978_v35  ;;  %vm1380_vm2 = vmand %vm1364_vm14, %vm1372_vm13  ;;  %v741_v57 = vadd.f32 %v8190_v53, %v4575_v20  ;;  %v936_v12 = vmul.f32 %v5467_v39, %v927_v29  ;;  %v1067_v27 = vrot.slane %v4080_v45, 2 }
 0x11f   : > { %8169 = vst [vmem:[#allocation187_spill] sm:$0xff] %v5389_v15  ;;  %v8185_v15 = vld [vmem:[#allocation4_spill] sm:$0xff]  ;;  %v1563_v22 = vsel %vm1380_vm2, 1, %v7978_v35  ;;  %v8191_v20 = vrot.slane %v4082_v46, 1  ;;  %vm1326_vm7 = vcmp.eq.s32.totalorder %v5268_v17, 1  ;;  %v1567_v26 = vpop.permute.xlu0 %1566  ;;  %v5610_v17 = vperm.slane %v8128_v42, 0 }
 0x120   : > { %8172 = vst [vmem:[#allocation188_spill] sm:$0xff] %v5411_v30  ;;  %v5483_v49 = vperm.slane %v8185_v15, 2  ;;  %v5486_v18 = vperm.slane %v8185_v15, 3  ;;  %v5492_v4 = vperm.slane %v8185_v15, 4  ;;  %v855_v13 = vadd.f32 %v5175_v62, %v741_v57 }
 0x121   : > { %8173 = vst [vmem:[#allocation189_spill] sm:$0xff] %v5421_v9  ;;  %2093 = vperm.xlu1 %3736, %v2078_v50   ;;  %v953_v50 = vrot.slane %v4080_v45, 1  ;;  %v7697_v30 = vrot.slane %v8065_v54, 3  ;;  %v1181_v57 = vrot.slane %v4080_v45, 3  ;;  %v7693_v62 = vrot.slane %v4082_v46, 3 }
 0x122   : > { %8174 = vst [vmem:[#allocation190_spill] sm:$0xff] %v5434_v43  ;;  %vm1589_vm2 = vcmp.eq.s32.totalorder %v1567_v26, 1  ;;  %v8215_v26 = vrot.slane %v4082_v46, 2 }
 0x123   : > { %8175 = vst [vmem:[#allocation191_spill] sm:$0xff] %v5438_v28  ;;  %911 = vperm.xlu2 %3737, %v892_v48   ;;  %v5511_v29 = vsel %vm7702_vm1, %v953_v50, %v8191_v20  ;;  %v5517_v55 = vsel %vm7702_vm1, %v7686_v60, %v953_v50  ;;  %v944_v48 = vadd.f32 %v936_v12, %v855_v13 }
 0x124   : > { %8176 = vst [vmem:[#allocation192_spill] sm:$0xff] %v5441_v6  ;;  %v7688_v6 = vrot.slane %v8065_v54, 2  ;;  %v1041_v53 = vsel %vm7703_vm4, %v5517_v55, 0.0  ;;  %v5545_v13 = vsel %vm7724_vm5, %v1181_v57, %v7693_v62  ;;  %v1441_v62 = vmul.f32 %v8081_v40, %v5180_v32 }
 0x125   : > { %8179 = vst [vmem:[#allocation193_spill] sm:$0xff] %v5449_v37  ;;  %v1050_v60 = vmul.f32 %v5470_v21, %v1041_v53  ;;  %1031 = vperm.xlu0 %3735, %v1008_v36   ;;  %v974_v40 = vadd.s32 1, %v5434_v43  ;;  %v5594_v36 = vperm.slane %v8163_v2, 2 }
 0x126   : > { %8180 = vst [vmem:[#allocation194_spill] sm:$0xff] %v5464_v24  ;;  %v5495_v24 = vperm.slane %v8185_v15, 5  ;;  %v7687_v15 = vrot.slane %v4082_v46, 2  ;;  %v5535_v50 = vsel %vm1074_vm8, %v7688_v6, %v1067_v27 }
 0x127   : > { %8181 = vst [vmem:[#allocation195_spill] sm:$0xff] %v5467_v39  ;;  %v1155_v12 = vsel %vm1147_vm0, %v5535_v50, 0.0  ;;  %v1058_v54 = vadd.f32 %v1050_v60, %v944_v48  ;;  %v8200_v60 = vrot.slane %v4071_v41, 1  ;;  %vm982_vm9 = vcmp.ge.s32.totalorder %v974_v40, 0 }
 0x128   : > { %8182 = vst [vmem:[#allocation196_spill] sm:$0xff] %v5470_v21  ;;  %v5529_v20 = vsel %vm1074_vm8, %v1067_v27, %v7687_v15  ;;  %v5551_v15 = vsel %vm7724_vm5, %v7697_v30, %v1181_v57  ;;  %v5553_v27 = vpop.permute.xlu2 %1569  ;;  %v1164_v53 = vmul.f32 %v5475_v44, %v1155_v12  ;;  %v1457_v57 = vsel %vm7723_vm3, %v4080_v45, 0.0 }
 0x129   : > { %8183 = vst [vmem:[#allocation197_spill] sm:$0xff] %v5475_v44  ;;  %v1269_v6 = vsel %vm1261_vm6, %v5551_v15, 0.0  ;;  %v1482_v12 = vsel %vm7703_vm4, %v5511_v29, 0.0  ;;  %1321 = vperm.xlu1 %3736, %v1300_v63   ;;  %v1507_v32 = vsel %vm1147_vm0, %v5529_v20, 0.0  ;;  %vm990_vm15 = vcmp.lt.s32.totalorder %v974_v40, 8 }
 0x12a   : > { %8184 = vst [vmem:[#allocation198_spill] sm:$0xff] %v5480_v16  ;;  %v1278_v21 = vmul.f32 %v5480_v16, %v1269_v6  ;;  %v8201_v6 = vrot.slane %v4058_v34, 1  ;;  %v1516_v63 = vmul.f32 %v5492_v4, %v1507_v32  ;;  %vm998_vm11 = vmand %vm982_vm9, %vm990_vm15  ;;  %v5603_v32 = vperm.slane %v8163_v2, 4 }
 0x12b   : > { %8186 = vst [vmem:[#allocation4_spill] sm:$0xff] %v5483_v49  ;;  %1584 = vperm.xlu2 %3737, %v1563_v22   ;;  %v5597_v22 = vperm.slane %v8163_v2, 3 }
 0x12c   : > { %8187 = vst [vmem:[#allocation199_spill] sm:$0xff] %v5486_v18  ;;  %v5581_v48 = vsel %vm7702_vm1, %v8201_v6, %v8200_v60  ;;  %v2134_v60 = vadd.s32 1, %v5172_v7 }
 0x12d   : > { %8188 = vst [vmem:[#allocation200_spill] sm:$0xff] %v5492_v4 }
 0x12e   : > { %8189 = vst [vmem:[#allocation201_spill] sm:$0xff] %v5495_v24  ;;  %vm2142_vm12 = vcmp.ge.s32.totalorder %v2134_v60, 0  ;;  %vm2150_vm10 = vcmp.lt.s32.totalorder %v2134_v60, 8  ;;  %v1070_v60 = vrot.slane %v4071_v41, 2 }
 0x12f   : > { %8192 = vst [vmem:[#allocation37_spill] sm:$0xff] %v5511_v29  ;;  %vm2158_vm13 = vmand %vm2142_vm12, %vm2150_vm10 }
 0x130   : > { %8193 = vst [vmem:[#allocation202_spill] sm:$0xff] %v5517_v55  ;;  %v2341_v40 = vsel %vm2158_vm13, 1, %v7978_v35 }
 0x131   : > { %8194 = vst [vmem:[#allocation203_spill] sm:$0xff] %v5529_v20  ;;  %2356 = vperm.xlu0 %3735, %v2341_v40   ;;  %v8212_v40 = vld [vmem:[#allocation61_spill] sm:$0xff] }
 0x132   : > { %8195 = vst [vmem:[#allocation204_spill] sm:$0xff] %v5535_v50  ;;  %v8199_v50 = vld [vmem:[#allocation38_spill] sm:$0xff] }
 0x133   : > { %8196 = vst [vmem:[#allocation205_spill] sm:$0xff] %v5545_v13  ;;  %v1424_v55 = vadd.f32 %v8199_v50, %v4578_v1  ;;  %v1491_v1 = vmul.f32 %v5486_v18, %v1482_v12  ;;  %v1172_v50 = vadd.f32 %v1164_v53, %v1058_v54  ;;  %v1090_v54 = vadd.s32 2, %v5364_v23  ;;  %v8213_v23 = vld [vmem:[#allocation39_spill] sm:$0xff] }
 0x134   : > { %8197 = vst [vmem:[#allocation206_spill] sm:$0xff] %v5551_v15  ;;  %v1466_v15 = vmul.f32 %v5483_v49, %v1457_v57  ;;  %v1942_v7 = vadd.f32 %v8213_v23, %v8212_v40  ;;  %v8218_v23 = vrot.slane %v4082_v46, 3  ;;  %v5676_v46 = vpop.permute.xlu0 %1241 }
 0x135   : > { %8198 = vst [vmem:[#allocation207_spill] sm:$0xff] %v5553_v27  ;;  %v1449_v30 = vadd.f32 %v1441_v62, %v1424_v55  ;;  %v1532_v55 = vsel %vm1261_vm6, %v5545_v13, 0.0  ;;  %v5587_v62 = vpop.permute.xlu1 %1127  ;;  %v1286_v27 = vadd.f32 %v1278_v21, %v1172_v50  ;;  %vm1098_vm14 = vcmp.ge.s32.totalorder %v1090_v54, 0  ;;  %v5616_v50 = vpop.permute.xlu2 %1832 }
 0x136   : > { %8202 = vst [vmem:[#allocation38_spill] sm:$0xff] %v5581_v48  ;;  %v1541_v12 = vmul.f32 %v5495_v24, %v1532_v55  ;;  %vm1106_vm1 = vcmp.lt.s32.totalorder %v1090_v54, 8  ;;  %v5620_v55 = vperm.slane %v8128_v42, 2  ;;  %v1183_v54 = vrot.slane %v4058_v34, 3 }
 0x137   : > { %v1474_v57 = vadd.f32 %v1466_v15, %v1449_v30  ;;  %8203 = vst [vmem:[#allocation208_spill] sm:$0xff] %v5594_v36  ;;  %v1334_v30 = vsel %vm1326_vm7, %v1286_v27, 0.0  ;;  %v1006_v15 = vsel %vm998_vm11, 1, %v7978_v35  ;;  %vm1114_vm4 = vmand %vm1098_vm14, %vm1106_vm1  ;;  %v5613_v27 = vperm.slane %v8128_v42, 1 }
 0x138   : > { %8204 = vst [vmem:[#allocation209_spill] sm:$0xff] %v5597_v22  ;;  %vm1034_vm7 = vcmp.eq.s32.totalorder %v5488_v56, 1  ;;  %1025 = vperm.xlu1 %3736, %v1006_v15   ;;  %vm1148_vm1 = vcmp.eq.s32.totalorder %v5587_v62, 1  ;;  %vm7743_vm15 = vcmp.eq.s32.totalorder %v5676_v46, 1  ;;  %vm8221_vm11 = vcmp.eq.s32.totalorder %v5286_v51, 1 }
 0x139   : > { %v1499_v53 = vadd.f32 %v1491_v1, %v1474_v57  ;;  %8205 = vst [vmem:[#allocation210_spill] sm:$0xff] %v5603_v32  ;;  %v5607_v1 = vperm.slane %v8163_v2, 7  ;;  %v5623_v2 = vperm.slane %v8128_v42, 3  ;;  %v1069_v57 = vrot.slane %v4058_v34, 2  ;;  %vm8225_vm10 = vmmov %vm8221_vm11 }
 0x13a   : > { %8207 = vst [vmem:[#allocation212_spill] sm:$0xff] %v5610_v17  ;;  %v1754_v42 = vmul.f32 %v5594_v36, %v5455_v59 }
 0x13b   : > { %v1524_v21 = vadd.f32 %v1516_v63, %v1499_v53  ;;  %8206 = vst [vmem:[#allocation211_spill] sm:$0xff] %v5607_v1  ;;  %v1122_v63 = vsel %vm1114_vm4, 1, %v7978_v35  ;;  %vm1852_vm4 = vcmp.eq.s32.totalorder %v5367_v58, 1  ;;  %v5640_v24 = vsel %vm1074_vm8, %v1069_v57, %v1070_v60 }
 0x13c   : > { %8208 = vst [vmem:[#allocation213_spill] sm:$0xff] %v5613_v27  ;;  %1145 = vperm.xlu2 %3737, %v1122_v63  }
 0x13d   : > { %v1549_v6 = vadd.f32 %v1541_v12, %v1524_v21  ;;  %8209 = vst [vmem:[#allocation214_spill] sm:$0xff] %v5620_v55  ;;  %v1184_v12 = vrot.slane %v4071_v41, 3  ;;  %v8211_v21 = vld [vmem:[#allocation48_spill] sm:$0xff]  ;;  %v2085_v59 = vpop.permute.xlu1 %2084  ;;  %v2088_v28 = vpop.permute.xlu2 %2087 }
 0x13e   : > { %8210 = vst [vmem:[#allocation215_spill] sm:$0xff] %v5623_v2  ;;  %v1712_v15 = vadd.f32 %v5187_v14, %v8211_v21  ;;  %vm2107_vm9 = vcmp.eq.s32.totalorder %v2085_v59, 1  ;;  %vm2108_vm12 = vcmp.eq.s32.totalorder %v2088_v28, 1  ;;  %v1042_v59 = vsel %vm1034_vm7, %v5511_v29, 0.0  ;;  %v8240_v29 = vld [vmem:[#allocation151_spill] sm:$0xff] }
 0x13f   : > { %v1597_v53 = vsel %vm1589_vm2, %v1549_v6, 0.0  ;;  %8214 = vst [vmem:[#allocation48_spill] sm:$0xff] %v5640_v24  ;;  %v5646_v6 = vsel %vm1074_vm8, %v8215_v26, %v1069_v57  ;;  %v5650_v14 = vsel %vm7724_vm5, %v1183_v54, %v1184_v12  ;;  %v1959_v57 = vmul.f32 %v5607_v1, %v5200_v3 }
 0x140   : > { %v1605_v43 = vadd.f32 %v1597_v53, %v1334_v30  ;;  %8216 = vst [vmem:[#allocation61_spill] sm:$0xff] %v5646_v6  ;;  %v5656_v30 = vsel %vm7724_vm5, %v8218_v23, %v1183_v54  ;;  %v1737_v63 = vadd.f32 %v5427_v31, %v1712_v15  ;;  %v1770_v53 = vsel %vm1147_vm0, %v5646_v6, 0.0 }
 0x141   : > { %8217 = vst [vmem:[#allocation39_spill] sm:$0xff] %v5650_v14  ;;  %v1779_v21 = vmul.f32 %v5597_v22, %v1770_v53  ;;  %v1795_v40 = vsel %vm1261_vm6, %v5656_v30, 0.0  ;;  %v1975_v54 = vsel %vm7723_vm3, %v4058_v34, 0.0  ;;  %vm8220_vm2 = vcmp.eq.s32.totalorder %v5371_v52, 1 }
 0x142   : > { %8219 = vst [vmem:[#allocation216_spill] sm:$0xff] %v5656_v30  ;;  %v2000_v31 = vsel %vm8220_vm2, %v5581_v48, 0.0  ;;  %v1762_v15 = vadd.f32 %v1754_v42, %v1737_v63  ;;  %v1804_v26 = vmul.f32 %v5603_v32, %v1795_v40  ;;  %v1967_v23 = vadd.f32 %v1959_v57, %v1942_v7 }
 0x143   : > { %v1984_v3 = vmul.f32 %v5610_v17, %v1975_v54  ;;  %v2009_v53 = vmul.f32 %v5613_v27, %v2000_v31  ;;  %v2025_v22 = vsel %vm1147_vm0, %v5640_v24, 0.0  ;;  %v2050_v34 = vsel %vm1261_vm6, %v5650_v14, 0.0 }
 0x144   : > { %v1787_v19 = vadd.f32 %v1779_v21, %v1762_v15  ;;  %v2034_v63 = vmul.f32 %v5620_v55, %v2025_v22  ;;  %v2059_v7 = vmul.f32 %v5623_v2, %v2050_v34  ;;  %v7726_v57 = vrot.slane %v4064_v38, 2 }
 0x145   : > { %v1992_v42 = vadd.f32 %v1984_v3, %v1967_v23  ;;  %v7725_v40 = vrot.slane %v4064_v38, 3  ;;  %v1943_v54 = vadd.f32 %v5050_v10, %v4758_v0  ;;  %v1960_v21 = vmul.f32 %v5607_v1, %v4882_v61  ;;  %v5719_v23 = vld [vmem:[%s7603_s1 + $0x20] sm:$0xff] }
 0x146   : > { %v1812_v31 = vadd.f32 %v1804_v26, %v1787_v19  ;;  %v1976_v22 = vsel %vm8221_vm11, %v4071_v41, 0.0  ;;  %v5701_v34 = vsel %vm1074_vm8, %v1070_v60, %v7726_v57  ;;  %v2001_v61 = vsel %vm1034_vm7, %v5449_v37, 0.0  ;;  %8224 = vst [vmem:[#allocation219_spill] sm:$0xff] %v5719_v23 }
 0x147   : > { %v2017_v5 = vadd.f32 %v2009_v53, %v1992_v42  ;;  %8222 = vst [vmem:[#allocation217_spill] sm:$0xff] %v5701_v34  ;;  %v5707_v0 = vsel %vm7724_vm5, %v1184_v12, %v7725_v40  ;;  %v1985_v10 = vmul.f32 %v5610_v17, %v1976_v22  ;;  %v1968_v26 = vadd.f32 %v1960_v21, %v1943_v54  ;;  %v8241_v17 = vld [vmem:[#allocation183_spill] sm:$0xff] }
 0x148   : > { %8223 = vst [vmem:[#allocation218_spill] sm:$0xff] %v5707_v0  ;;  %v1860_v19 = vsel %vm1852_vm4, %v1812_v31, 0.0  ;;  %v2010_v60 = vmul.f32 %v5613_v27, %v2001_v61  ;;  %v2026_v3 = vsel %vm1148_vm1, %v5701_v34, 0.0  ;;  %v2051_v53 = vsel %vm7743_vm15, %v5707_v0, 0.0 }
 0x149   : > { %v2042_v15 = vadd.f32 %v2034_v63, %v2017_v5  ;;  %v1868_v12 = vadd.f32 %v1860_v19, %v1605_v43  ;;  %v1993_v5 = vadd.f32 %v1985_v10, %v1968_v26  ;;  %v2035_v42 = vmul.f32 %v5620_v55, %v2026_v3 }
 0x14a   : > { %v2060_v63 = vmul.f32 %v5623_v2, %v2051_v53  ;;  %v1354_v54 = vadd.s32 4294967294, %v5719_v23  ;;  %v491_v31 = vadd.s32 4294967293, %v5719_v23  ;;  %v1619_v43 = vadd.s32 4294967295, %v5421_v9 }
 0x14b   : > { %v2067_v58 = vadd.f32 %v2059_v7, %v2042_v15  ;;  %v742_v21 = vadd.f32 %v5044_v25, %v4744_v11  ;;  %v2018_v61 = vadd.f32 %v2010_v60, %v1993_v5  ;;  %v848_v7 = vmul.f32 %v5152_v47, %v4877_v8  ;;  %v1307_v5 = vpop.permute.xlu1 %1306 }
 0x14c   : > { %v928_v10 = vsel %vm8225_vm10, %v4080_v45, 0.0  ;;  %vm1362_vm14 = vcmp.ge.s32.totalorder %v1354_v54, 0  ;;  %vm1370_vm13 = vcmp.lt.s32.totalorder %v1354_v54, 8  ;;  %vm499_vm4 = vcmp.ge.s32.totalorder %v491_v31, 0 }
 0x14d   : > { %v2115_v22 = vsel %vm2107_vm9, %v2067_v58, 0.0  ;;  %v2043_v15 = vadd.f32 %v2035_v42, %v2018_v61  ;;  %vm1378_vm2 = vmand %vm1362_vm14, %vm1370_vm13  ;;  %vm507_vm11 = vcmp.lt.s32.totalorder %v491_v31, 8  ;;  %vm1627_vm3 = vcmp.ge.s32.totalorder %v1619_v43, 0  ;;  %v8228_v61 = vld [vmem:[#allocation130_spill] sm:$0xff] }
 0x14e   : > { %v5740_v19 = vadd.f32 %v2115_v22, %v1868_v12  ;;  %vm1635_vm5 = vcmp.lt.s32.totalorder %v1619_v43, 8  ;;  %v1561_v11 = vsel %vm1378_vm2, 1, %v7978_v35  ;;  %vm515_vm9 = vmand %vm499_vm4, %vm507_vm11  ;;  %v856_v25 = vadd.f32 %v848_v7, %v742_v21  ;;  %v8226_v12 = vld [vmem:[#allocation196_spill] sm:$0xff] }
 0x14f   : > { %v937_v8 = vmul.f32 %v5467_v39, %v928_v10  ;;  %v2068_v26 = vadd.f32 %v2060_v63, %v2043_v15  ;;  %1578 = vperm.xlu1 %3736, %v1561_v11   ;;  %v1298_v60 = vsel %vm515_vm9, 1, %v7978_v35  ;;  %vm1643_vm10 = vmand %vm1627_vm3, %vm1635_vm5  ;;  %v1051_v3 = vmul.f32 %v8226_v12, %v1042_v59  ;;  %v8227_v22 = vld [vmem:[#allocation92_spill] sm:$0xff]  ;;  %v8229_v15 = vld [vmem:[#allocation185_spill] sm:$0xff] }
 0x150   : > { %v1156_v53 = vsel %vm1148_vm1, %v5529_v20, 0.0  ;;  %1315 = vperm.xlu0 %3735, %v1298_v60   ;;  %v1826_v58 = vsel %vm1643_vm10, 1, %v7978_v35  ;;  %v1270_v63 = vsel %vm7743_vm15, %v5545_v13, 0.0  ;;  %v1746_v31 = vsel %vm1034_vm7, %v5581_v48, 0.0  ;;  %v8237_v13 = vld [vmem:[#allocation209_spill] sm:$0xff] }
 0x151   : > { %v945_v42 = vadd.f32 %v937_v8, %v856_v25  ;;  %v1165_v54 = vmul.f32 %v5475_v44, %v1156_v53  ;;  %v5761_v43 = vsel %vm2108_vm12, %v2068_v26, 0.0  ;;  %1847 = vperm.xlu2 %3737, %v1826_v58   ;;  %v1279_v21 = vmul.f32 %v5480_v16, %v1270_v63  ;;  %v8230_v25 = vld [vmem:[#allocation188_spill] sm:$0xff]  ;;  %v8233_v53 = vld [vmem:[#allocation207_spill] sm:$0xff] }
 0x152   : > { %v1425_v7 = vadd.f32 %v8228_v61, %v8227_v22  ;;  %v1467_v11 = vmul.f32 %v5483_v49, %v8229_v15  ;;  %v1483_v8 = vsel %vm1034_vm7, %v8230_v25, 0.0  ;;  %v1508_v28 = vsel %vm1148_vm1, %v5646_v6, 0.0  ;;  %v8232_v26 = vld [vmem:[#allocation108_spill] sm:$0xff]  ;;  %v8234_v63 = vld [vmem:[#allocation111_spill] sm:$0xff]  ;;  %v8235_v22 = vld [vmem:[#allocation109_spill] sm:$0xff] }
 0x153   : > { %v1059_v10 = vadd.f32 %v1051_v3, %v945_v42  ;;  %vm8231_vm5 = vcmp.eq.s32.totalorder %v5371_v52, 1  ;;  %vm1327_vm3 = vcmp.eq.s32.totalorder %v1307_v5, 1  ;;  %v1492_v3 = vmul.f32 %v5486_v18, %v1483_v8  ;;  %v8236_v8 = vld [vmem:[#allocation186_spill] sm:$0xff]  ;;  %v8242_v5 = vld [vmem:[#allocation8_spill] sm:$0xff]  ;;  %v479_v18 = vld [vmem:[%s7605_s3 + $0x18] sm:$0x1] }
 0x154   : > { %v5777_v59 = vsel %vm8231_vm5, %v5449_v37, 0.0  ;;  %v1450_v60 = vadd.f32 %v8232_v26, %v1425_v7  ;;  %vm1590_vm12 = vcmp.eq.s32.totalorder %v8233_v53, 1  ;;  %v1533_v42 = vsel %vm7743_vm15, %v5656_v30, 0.0  ;;  %v8271_v37 = vld [vmem:[#allocation40_spill] sm:$0xff] }
 0x155   : > { %v1173_v58 = vadd.f32 %v1165_v54, %v1059_v10  ;;  %v1713_v61 = vadd.f32 %v8235_v22, %v8234_v63  ;;  %v1755_v15 = vmul.f32 %v5594_v36, %v1746_v31  ;;  %v1517_v57 = vmul.f32 %v5492_v4, %v1508_v28  ;;  %v8238_v31 = vld [vmem:[#allocation201_spill] sm:$0xff]  ;;  %v8239_v28 = vld [vmem:[#allocation190_spill] sm:$0xff] }
 0x156   : > { %v1475_v40 = vadd.f32 %v1467_v11, %v1450_v60  ;;  %v1771_v7 = vsel %vm1148_vm1, %v5640_v24, 0.0  ;;  %v1796_v54 = vsel %vm7743_vm15, %v5650_v14, 0.0  ;;  %vm1853_vm14 = vcmp.eq.s32.totalorder %v5616_v50, 1  ;;  %v5799_v60 = vpop.permute.xlu0 %1016  ;;  %v8273_v14 = vld [vmem:[#allocation159_spill] sm:$0xff] }
 0x157   : > { %v1287_v10 = vadd.f32 %v1279_v21, %v1173_v58  ;;  %v1738_v26 = vadd.f32 %v8236_v8, %v1713_v61  ;;  %v1780_v63 = vmul.f32 %v8237_v13, %v1771_v7  ;;  %v1542_v11 = vmul.f32 %v8238_v31, %v1533_v42  ;;  %v8269_v13 = vld [vmem:[#allocation192_spill] sm:$0xff]  ;;  %v8272_v31 = vld [vmem:[#allocation153_spill] sm:$0xff] }
 0x158   : > { %v1500_v22 = vadd.f32 %v1492_v3, %v1475_v40  ;;  %v1088_v20 = vadd.s32 2, %v8239_v28  ;;  %v2397_v45 = vadd.s32 2, %v8240_v29  ;;  %v1805_v27 = vmul.f32 %v5603_v32, %v1796_v54 }
 0x159   : > { %v1335_v2 = vsel %vm1327_vm3, %v1287_v10, 0.0  ;;  %v1763_v55 = vadd.f32 %v1755_v15, %v1738_v26  ;;  %v1204_v21 = vadd.s32 3, %v8241_v17  ;;  %v5808_v61 = vperm.slane %v8242_v5, 0  ;;  %v8249_v26 = vld [vmem:[#allocation9_spill] sm:$0xff] }
 0x15a   : > { %v1525_v58 = vadd.f32 %v1517_v57, %v1500_v22  ;;  %vm1096_vm13 = vcmp.ge.s32.totalorder %v1088_v20, 0  ;;  %vm1104_vm4 = vcmp.lt.s32.totalorder %v1088_v20, 8  ;;  %vm2405_vm2 = vcmp.ge.s32.totalorder %v2397_v45, 0  ;;  %v5837_v22 = vpop.permute.xlu1 %1130 }
 0x15b   : > { %v1788_v40 = vadd.f32 %v1780_v63, %v1763_v55  ;;  %vm1112_vm11 = vmand %vm1096_vm13, %vm1104_vm4  ;;  %vm2413_vm9 = vcmp.lt.s32.totalorder %v2397_v45, 8  ;;  %vm1212_vm10 = vcmp.ge.s32.totalorder %v1204_v21, 0  ;;  %vm1220_vm5 = vcmp.lt.s32.totalorder %v1204_v21, 8  ;;  %8243 = vst [vmem:[#allocation92_spill] sm:$0xff] %v5808_v61 }
 0x15c   : > { %v1550_v3 = vadd.f32 %v1542_v11, %v1525_v58  ;;  %v1120_v42 = vsel %vm1112_vm11, 1, %v7978_v35  ;;  %vm2421_vm15 = vmand %vm2405_vm2, %vm2413_vm9  ;;  %v5811_v15 = vperm.slane %v8242_v5, 1  ;;  %v5815_v55 = vperm.slane %v8242_v5, 2  ;;  %v8252_v11 = vld [vmem:[#allocation11_spill] sm:$0xff] }
 0x15d   : > { %v1813_v17 = vadd.f32 %v1805_v27, %v1788_v40  ;;  %1139 = vperm.xlu1 %3736, %v1120_v42   ;;  %v2604_v20 = vsel %vm2421_vm15, 1, %v7978_v35  ;;  %vm1228_vm3 = vmand %vm1212_vm10, %vm1220_vm5  ;;  %v5818_v45 = vperm.slane %v8242_v5, 5  ;;  %v5824_v54 = vperm.slane %v8242_v5, 6 }
 0x15e   : > { %8244 = vst [vmem:[#allocation130_spill] sm:$0xff] %v5811_v15  ;;  %v1598_v57 = vsel %vm1590_vm12, %v1550_v3, 0.0  ;;  %2619 = vperm.xlu0 %3735, %v2604_v20   ;;  %v1236_v7 = vsel %vm1228_vm3, 1, %v7978_v35  ;;  %v5827_v27 = vperm.slane %v8242_v5, 7  ;;  %v5832_v63 = vperm.slane %v8249_v26, 0  ;;  %v8253_v3 = vld [vmem:[#allocation54_spill] sm:$0xff]  ;;  %v5846_v5 = vpop.permute.xlu2 %1309  ;;  %v5856_v21 = vpop.permute.xlu0 %2610 }
 0x15f   : > { %8245 = vst [vmem:[#allocation185_spill] sm:$0xff] %v5815_v55  ;;  %v1606_v10 = vadd.f32 %v1598_v57, %v1335_v2  ;;  %v1861_v8 = vsel %vm1853_vm14, %v1813_v17, 0.0  ;;  %1259 = vperm.xlu2 %3737, %v1236_v7   ;;  %v5835_v53 = vperm.slane %v8249_v26, 1  ;;  %v8254_v2 = vld [vmem:[#allocation152_spill] sm:$0xff]  ;;  %v2272_v17 = vmul.f32 %v5808_v61, %v5777_v59 }
 0x160   : > { %8246 = vst [vmem:[#allocation108_spill] sm:$0xff] %v5818_v45  ;;  %v2230_v42 = vadd.f32 %v8254_v2, %v8253_v3  ;;  %v2288_v57 = vsel %vm1147_vm0, %v5701_v34, 0.0  ;;  %v2313_v58 = vsel %vm1261_vm6, %v5707_v0, 0.0  ;;  %v8258_v40 = vrot.slane %v8252_v11, 1  ;;  %v8270_v34 = vld [vmem:[#allocation62_spill] sm:$0xff] }
 0x161   : > { %8247 = vst [vmem:[#allocation207_spill] sm:$0xff] %v5824_v54  ;;  %v5844_v50 = vadd.f32 %v1861_v8, %v1606_v10  ;;  %v8259_v10 = vrot.slane %v4064_v38, 1  ;;  %vm8260_vm15 = vcmp.lt.s32.totalorder %v4056_v33, 7  ;;  %v8262_v59 = vrot.slane %v8252_v11, 2 }
 0x162   : > { %8248 = vst [vmem:[#allocation111_spill] sm:$0xff] %v5827_v27  ;;  %v8263_v3 = vrot.slane %v4064_v38, 2  ;;  %v8265_v1 = vrot.slane %v8252_v11, 3  ;;  %v8266_v32 = vrot.slane %v4064_v38, 3  ;;  %vm8267_vm12 = vcmp.lt.s32.totalorder %v4056_v33, 5 }
 0x163   : > { %8250 = vst [vmem:[#allocation109_spill] sm:$0xff] %v5832_v63  ;;  %v5864_v8 = vsel %vm8260_vm15, %v8259_v10, %v8258_v40  ;;  %v2255_v36 = vadd.f32 %v8269_v13, %v2230_v42  ;;  %v2297_v40 = vmul.f32 %v5811_v15, %v2288_v57  ;;  %v2322_v10 = vmul.f32 %v5815_v55, %v2313_v58  ;;  %v8277_v58 = vld [vmem:[#allocation129_spill] sm:$0xff]  ;;  %v8280_v42 = vld [vmem:[#allocation194_spill] sm:$0xff] }
 0x164   : > { %8251 = vst [vmem:[#allocation186_spill] sm:$0xff] %v5835_v53  ;;  %v5872_v2 = vsel %vm1074_vm8, %v8263_v3, %v8262_v59  ;;  %v5880_v0 = vsel %vm8267_vm12, %v8266_v32, %v8265_v1  ;;  %v2468_v41 = vadd.f32 %v8271_v37, %v8270_v34  ;;  %v2485_v59 = vmul.f32 %v5818_v45, %v8272_v31  ;;  %v8276_v1 = vld [vmem:[#allocation95_spill] sm:$0xff] }
 0x165   : > { %8255 = vst [vmem:[#allocation190_spill] sm:$0xff] %v5846_v5  ;;  %v2280_v3 = vadd.f32 %v2272_v17, %v2255_v36  ;;  %vm8274_vm14 = vcmp.eq.s32.totalorder %v8273_v14, 1  ;;  %vm8275_vm13 = vcmp.eq.s32.totalorder %v5371_v52, 1  ;;  %v2551_v13 = vsel %vm1147_vm0, %v5872_v2, 0.0 }
 0x166   : > { %8261 = vst [vmem:[#allocation183_spill] sm:$0xff] %v5864_v8  ;;  %v2501_v4 = vsel %vm8274_vm14, %v4064_v38, 0.0  ;;  %v2526_v32 = vsel %vm8275_vm13, %v5864_v8, 0.0  ;;  %vm8278_vm4 = vcmp.eq.s32.totalorder %v8277_v58, 1  ;;  %v2493_v34 = vadd.f32 %v2485_v59, %v2468_v41 }
 0x167   : > { %8264 = vst [vmem:[#allocation8_spill] sm:$0xff] %v5872_v2  ;;  %v5901_v37 = vsel %vm8278_vm4, %v8276_v1, 0.0  ;;  %v2510_v36 = vmul.f32 %v5824_v54, %v2501_v4  ;;  %v2535_v31 = vmul.f32 %v5827_v27, %v2526_v32  ;;  %vm2370_vm2 = vcmp.eq.s32.totalorder %v8280_v42, 1 }
 0x168   : > { %8268 = vst [vmem:[#allocation9_spill] sm:$0xff] %v5880_v0  ;;  %v2305_v17 = vadd.f32 %v2297_v40, %v2280_v3  ;;  %v2560_v57 = vmul.f32 %v5832_v63, %v2551_v13  ;;  %v2576_v5 = vsel %vm1261_vm6, %v5880_v0, 0.0  ;;  %vm2633_vm11 = vcmp.eq.s32.totalorder %v5856_v21, 1 }
 0x169   : > { %8279 = vst [vmem:[#allocation54_spill] sm:$0xff] %v5901_v37  ;;  %v2518_v1 = vadd.f32 %v2510_v36, %v2493_v34  ;;  %vm1882_vm9 = vcmp.ge.s32.totalorder %v5421_v9, 0  ;;  %vm7785_vm10 = vcmp.lt.s32.totalorder %v5421_v9, 8  ;;  %v2585_v4 = vmul.f32 %v5835_v53, %v2576_v5  ;;  %v5927_v5 = vpop.permute.xlu1 %1244  ;;  %v8289_v37 = vld [vmem:[#allocation41_spill] sm:$0xff] }
 0x16a   : > { %v2330_v41 = vadd.f32 %v2322_v10, %v2305_v17  ;;  %vm1898_vm5 = vmand %vm1882_vm9, %vm7785_vm10  ;;  %v1617_v40 = vadd.s32 4294967295, %v5719_v23  ;;  %v2660_v59 = vadd.s32 3, %v8240_v29  ;;  %v486_v13 = vunpack.c.l.bf16 %v479_v18  ;;  %v5930_v29 = vpop.permute.xlu2 %1133 }
 0x16b   : > { %v2543_v3 = vadd.f32 %v2535_v31, %v2518_v1  ;;  %v2081_v32 = vsel %vm1898_vm5, 1, %v7978_v35  ;;  %v5923_v34 = vperm.slane %v8249_v26, 4  ;;  %8282 = vst [vmem:[#allocation150_spill] sm:$0xff] %v5930_v29  ;;  %v5933_v18 = vperm.slane %v8249_v26, 5  ;;  %v8288_v29 = vld [vmem:[#allocation63_spill] sm:$0xff] }
 0x16c   : > { %v2378_v36 = vsel %vm2370_vm2, %v2330_v41, 0.0  ;;  %2102 = vperm.xlu1 %3736, %v2081_v32   ;;  %vm1625_vm3 = vcmp.ge.s32.totalorder %v1617_v40, 0  ;;  %vm1633_vm15 = vcmp.lt.s32.totalorder %v1617_v40, 8  ;;  %vm2668_vm12 = vcmp.ge.s32.totalorder %v2660_v59, 0 }
 0x16d   : > { %8281 = vst [vmem:[#allocation152_spill] sm:$0xff] %v5923_v34  ;;  %v2386_v10 = vadd.f32 %v2378_v36, %v5740_v19  ;;  %v2568_v17 = vadd.f32 %v2560_v57, %v2543_v3  ;;  %vm1641_vm14 = vmand %vm1625_vm3, %vm1633_vm15  ;;  %vm2676_vm13 = vcmp.lt.s32.totalorder %v2660_v59, 8  ;;  %v5937_v42 = vperm.slane %v8249_v26, 6  ;;  %v5944_v19 = vpop.permute.xlu0 %2873  ;;  %v8287_v59 = vld [vmem:[#allocation13_spill] sm:$0xff] }
 0x16e   : > { %8283 = vst [vmem:[#allocation191_spill] sm:$0xff] %v5933_v18  ;;  %v1824_v31 = vsel %vm1641_vm14, 1, %v7978_v35  ;;  %vm2684_vm4 = vmand %vm2668_vm12, %vm2676_vm13  ;;  %v5940_v1 = vperm.slane %v8249_v26, 7  ;;  %v5942_v41 = vperm.slane %v486_v13, 0  ;;  %v7769_v3 = vrot.slane %v8287_v59, 1  ;;  %v8290_v26 = vld [vmem:[#allocation154_spill] sm:$0xff] }
 0x16f   : > { %8284 = vst [vmem:[#allocation192_spill] sm:$0xff] %v5937_v42  ;;  %v2593_v57 = vadd.f32 %v2585_v4, %v2568_v17  ;;  %1841 = vperm.xlu0 %3735, %v1824_v31   ;;  %v2867_v40 = vsel %vm2684_vm4, 1, %v7978_v35  ;;  %v7773_v32 = vrot.slane %v8287_v59, 2  ;;  %v7772_v36 = vrot.slane %v8287_v59, 3 }
 0x170   : > { %8285 = vst [vmem:[#allocation62_spill] sm:$0xff] %v5940_v1  ;;  %2882 = vperm.xlu2 %3737, %v2867_v40   ;;  %v2731_v49 = vadd.f32 %v8289_v37, %v8288_v29  ;;  %v2748_v13 = vmul.f32 %v5923_v34, %v8290_v26  ;;  %vm8291_vm2 = vcmp.eq.s32.totalorder %v8273_v14, 1  ;;  %v8292_v31 = vrot.slane %v8252_v11, 1  ;;  %v8301_v34 = vld [vmem:[#allocation94_spill] sm:$0xff] }
 0x171   : > { %8286 = vst [vmem:[#allocation40_spill] sm:$0xff] %v5942_v41  ;;  %v2764_v4 = vsel %vm8291_vm2, %v8252_v11, 0.0  ;;  %v2641_v17 = vsel %vm2633_vm11, %v2593_v57, 0.0  ;;  %vm8293_vm9 = vcmp.lt.s32.totalorder %v4056_v33, 7  ;;  %v8295_v29 = vrot.slane %v8252_v11, 2 }
 0x172   : > { %v5965_v40 = vsel %vm8293_vm9, %v8292_v31, %v7769_v3  ;;  %v2773_v14 = vmul.f32 %v5933_v18, %v2764_v4  ;;  %v2649_v21 = vadd.f32 %v2641_v17, %v2386_v10  ;;  %v8297_v57 = vrot.slane %v8252_v11, 3 }
 0x173   : > { %8294 = vst [vmem:[#allocation153_spill] sm:$0xff] %v5965_v40  ;;  %v5973_v37 = vsel %vm1074_vm8, %v8295_v29, %v7773_v32  ;;  %vm8298_vm11 = vcmp.lt.s32.totalorder %v4056_v33, 5  ;;  %v2756_v31 = vadd.f32 %v2748_v13, %v2731_v49  ;;  %vm8300_vm5 = vcmp.eq.s32.totalorder %v5371_v52, 1  ;;  %v8303_v49 = vld [vmem:[#allocation182_spill] sm:$0xff]  ;;  %v6020_v32 = vpop.permute.xlu2 %914 }
 0x174   : > { %8296 = vst [vmem:[#allocation159_spill] sm:$0xff] %v5973_v37  ;;  %v5982_v26 = vsel %vm8298_vm11, %v8297_v57, %v7772_v36  ;;  %v2789_v3 = vsel %vm8300_vm5, %v5965_v40, 0.0  ;;  %vm8302_vm3 = vcmp.eq.s32.totalorder %v8277_v58, 1  ;;  %v2814_v4 = vsel %vm1147_vm0, %v5973_v37, 0.0 }
 0x175   : > { %8299 = vst [vmem:[#allocation95_spill] sm:$0xff] %v5982_v26  ;;  %v5990_v29 = vsel %vm8302_vm3, %v8301_v34, 0.0  ;;  %v2798_v10 = vmul.f32 %v5937_v42, %v2789_v3  ;;  %v2839_v17 = vsel %vm1261_vm6, %v5982_v26, 0.0  ;;  %v6001_v13 = vmul.f32 %v5152_v47, %v8303_v49  ;;  %v6012_v49 = vpop.permute.xlu1 %1019  ;;  %v8309_v47 = vld [vmem:[#allocation6_spill] sm:$0xff] }
 0x176   : > { %v2781_v52 = vadd.f32 %v2773_v14, %v2756_v31  ;;  %v2823_v57 = vmul.f32 %v5940_v1, %v2814_v4  ;;  %vm2896_vm15 = vcmp.eq.s32.totalorder %v5944_v19, 1  ;;  %vm1880_vm12 = vcmp.ge.s32.totalorder %v5719_v23, 0  ;;  %8304 = vst [vmem:[#allocation129_spill] sm:$0xff] %v6012_v49  ;;  %v8305_v31 = vld [vmem:[#allocation105_spill] sm:$0xff]  ;;  %v8306_v4 = vld [vmem:[#allocation131_spill] sm:$0xff] }
 0x177   : > { %vm7784_vm14 = vcmp.lt.s32.totalorder %v5719_v23, 8  ;;  %v1202_v20 = vadd.s32 3, %v8239_v28  ;;  %v2137_v34 = vadd.s32 1, %v5421_v9  ;;  %v2848_v7 = vmul.f32 %v5942_v41, %v2839_v17  ;;  %8307 = vst [vmem:[#allocation194_spill] sm:$0xff] %v6020_v32  ;;  %v6023_v17 = vpop.permute.xlu0 %2350 }
 0x178   : > { %v2806_v3 = vadd.f32 %v2798_v10, %v2781_v52  ;;  %vm1896_vm6 = vmand %vm1880_vm12, %vm7784_vm14  ;;  %v6016_v14 = vadd.f32 %v5761_v43, %v5844_v50  ;;  %v2206_v36 = vadd.f32 %v8306_v4, %v8305_v31  ;;  %v8308_v52 = vld [vmem:[#allocation110_spill] sm:$0xff]  ;;  %vm8310_vm11 = vcmp.eq.s32.totalorder %v5286_v51, 1 }
 0x179   : > { %v2079_v28 = vsel %vm1896_vm6, 1, %v7978_v35  ;;  %vm1210_vm0 = vcmp.ge.s32.totalorder %v1202_v20, 0  ;;  %vm1218_vm13 = vcmp.lt.s32.totalorder %v1202_v20, 8  ;;  %vm2145_vm4 = vcmp.ge.s32.totalorder %v2137_v34, 0  ;;  %v8311_v20 = vld [vmem:[#allocation187_spill] sm:$0xff] }
 0x17a   : > { %v2831_v10 = vadd.f32 %v2823_v57, %v2806_v3  ;;  %2096 = vperm.xlu1 %3736, %v2079_v28   ;;  %vm1226_vm2 = vmand %vm1210_vm0, %vm1218_vm13  ;;  %vm2153_vm9 = vcmp.lt.s32.totalorder %v2137_v34, 8  ;;  %v2223_v43 = vmul.f32 %v8309_v47, %v8308_v52  ;;  %v2239_v50 = vsel %vm8310_vm11, %v4064_v38, 0.0  ;;  %v6042_v3 = vld [vmem:[%s7603_s1 + $0x38] sm:$0xff] }
 0x17b   : > { %vm1035_vm5 = vcmp.eq.s32.totalorder %v5799_v60, 1  ;;  %v1234_v31 = vsel %vm1226_vm2, 1, %v7978_v35  ;;  %vm2161_vm3 = vmand %vm2145_vm4, %vm2153_vm9  ;;  %v2248_v4 = vmul.f32 %v8311_v20, %v2239_v50  ;;  %v2264_v57 = vsel %vm1034_vm7, %v5864_v8, 0.0  ;;  %8312 = vst [vmem:[#allocation63_spill] sm:$0xff] %v6042_v3 }
 0x17c   : > { %v2289_v34 = vsel %vm1148_vm1, %v5872_v2, 0.0  ;;  %v2856_v28 = vadd.f32 %v2848_v7, %v2831_v10  ;;  %1253 = vperm.xlu0 %3735, %v1234_v31   ;;  %v2344_v52 = vsel %vm2161_vm3, 1, %v7978_v35  ;;  %v2231_v32 = vadd.f32 %v2223_v43, %v2206_v36 }
 0x17d   : > { %v2273_v50 = vmul.f32 %v5808_v61, %v2264_v57  ;;  %vm1149_vm12 = vcmp.eq.s32.totalorder %v5837_v22, 1  ;;  %vm7819_vm6 = vcmp.eq.s32.totalorder %v5927_v5, 1  ;;  %2365 = vperm.xlu2 %3737, %v2344_v52   ;;  %v2298_v49 = vmul.f32 %v5811_v15, %v2289_v34  ;;  %v8315_v52 = vld [vmem:[#allocation106_spill] sm:$0xff]  ;;  %v8316_v15 = vld [vmem:[#allocation132_spill] sm:$0xff] }
 0x17e   : > { %vm8313_vm0 = vcmp.eq.s32.totalorder %v5676_v46, 1  ;;  %vm2371_vm13 = vcmp.eq.s32.totalorder %v6023_v17, 1  ;;  %v2904_v7 = vsel %vm2896_vm15, %v2856_v28, 0.0  ;;  %v2256_v10 = vadd.f32 %v2248_v4, %v2231_v32  ;;  %v6069_v28 = vpop.permute.xlu2 %908 }
 0x17f   : > { %v2314_v20 = vsel %vm8313_vm0, %v5880_v0, 0.0  ;;  %v1357_v43 = vadd.s32 4294967294, %v6042_v3  ;;  %v6057_v31 = vadd.f32 %v2904_v7, %v2649_v21  ;;  %v494_v57 = vadd.s32 4294967293, %v6042_v3  ;;  %v8317_v0 = vld [vmem:[#allocation113_spill] sm:$0xff]  ;;  %8319 = vst [vmem:[#allocation154_spill] sm:$0xff] %v6069_v28 }
 0x180   : > { %v2323_v36 = vmul.f32 %v5815_v55, %v2314_v20  ;;  %v2135_v34 = vadd.s32 1, %v5719_v23  ;;  %v2469_v61 = vadd.f32 %v8316_v15, %v8315_v52  ;;  %v2281_v47 = vadd.f32 %v2273_v50, %v2256_v10  ;;  %v2614_v20 = vpop.permute.xlu1 %2613  ;;  %v6085_v52 = vpop.permute.xlu0 %1572 }
 0x181   : > { %8314 = vst [vmem:[#allocation41_spill] sm:$0xff] %v6057_v31  ;;  %vm1365_vm4 = vcmp.ge.s32.totalorder %v1357_v43, 0  ;;  %vm1373_vm2 = vcmp.lt.s32.totalorder %v1357_v43, 8  ;;  %v2486_v19 = vmul.f32 %v5818_v45, %v8317_v0  ;;  %vm502_vm9 = vcmp.ge.s32.totalorder %v494_v57, 0 }
 0x182   : > { %vm1381_vm15 = vmand %vm1365_vm4, %vm1373_vm2  ;;  %vm510_vm11 = vcmp.lt.s32.totalorder %v494_v57, 8  ;;  %vm2143_vm3 = vcmp.ge.s32.totalorder %v2135_v34, 0  ;;  %vm2151_vm0 = vcmp.lt.s32.totalorder %v2135_v34, 8  ;;  %v2306_v32 = vadd.f32 %v2298_v49, %v2281_v47 }
 0x183   : > { %v1564_v21 = vsel %vm1381_vm15, 1, %v7978_v35  ;;  %vm518_vm14 = vmand %vm502_vm9, %vm510_vm11  ;;  %v2494_v4 = vadd.f32 %v2486_v19, %v2469_v61  ;;  %vm8318_vm10 = vcmp.eq.s32.totalorder %v5286_v51, 1  ;;  %v2527_v47 = vsel %vm1034_vm7, %v5965_v40, 0.0  ;;  %v8321_v19 = vld [vmem:[#allocation44_spill] sm:$0xff] }
 0x184   : > { %v2502_v15 = vsel %vm8318_vm10, %v8252_v11, 0.0  ;;  %1587 = vperm.xlu1 %3736, %v1564_v21   ;;  %v1301_v0 = vsel %vm518_vm14, 1, %v7978_v35  ;;  %vm2159_vm4 = vmand %vm2143_vm3, %vm2151_vm0  ;;  %v2552_v61 = vsel %vm1148_vm1, %v5973_v37, 0.0  ;;  %v2331_v49 = vadd.f32 %v2323_v36, %v2306_v32  ;;  %v8322_v21 = vld [vmem:[#allocation115_spill] sm:$0xff] }
 0x185   : > { %v2511_v50 = vmul.f32 %v5824_v54, %v2502_v15  ;;  %1324 = vperm.xlu0 %3735, %v1301_v0   ;;  %v2342_v7 = vsel %vm2159_vm4, 1, %v7978_v35  ;;  %v2536_v10 = vmul.f32 %v5827_v27, %v2527_v47  ;;  %v2561_v43 = vmul.f32 %v5832_v63, %v2552_v61  ;;  %v8323_v0 = vld [vmem:[#allocation155_spill] sm:$0xff] }
 0x186   : > { %2359 = vperm.xlu2 %3737, %v2342_v7   ;;  %vm8320_vm10 = vcmp.eq.s32.totalorder %v5676_v46, 1  ;;  %vm2634_vm14 = vcmp.eq.s32.totalorder %v2614_v20, 1  ;;  %v743_v15 = vadd.f32 %v8322_v21, %v8321_v19  ;;  %v2379_v36 = vsel %vm2371_vm13, %v2331_v49, 0.0  ;;  %v8325_v19 = vld [vmem:[#allocation116_spill] sm:$0xff]  ;;  %v8339_v20 = vld [vmem:[#allocation14_spill] sm:$0xff] }
 0x187   : > { %v2519_v57 = vadd.f32 %v2511_v50, %v2494_v4  ;;  %v2577_v34 = vsel %vm8320_vm10, %v5982_v26, 0.0  ;;  %v938_v47 = vmul.f32 %v5467_v39, %v8323_v0  ;;  %v1043_v4 = vsel %vm1035_vm5, %v8230_v25, 0.0  ;;  %v8326_v0 = vld [vmem:[#allocation184_spill] sm:$0xff]  ;;  %v8327_v25 = vld [vmem:[#allocation42_spill] sm:$0xff] }
 0x188   : > { %v2586_v32 = vmul.f32 %v5835_v53, %v2577_v34  ;;  %v2387_v50 = vadd.f32 %v2379_v36, %v6016_v14  ;;  %v857_v7 = vadd.f32 %v6001_v13, %v743_v15  ;;  %v1052_v31 = vmul.f32 %v8226_v12, %v1043_v4  ;;  %v8324_v34 = vld [vmem:[#allocation45_spill] sm:$0xff]  ;;  %v8328_v36 = vld [vmem:[#allocation7_spill] sm:$0xff] }
 0x189   : > { %v2544_v61 = vadd.f32 %v2536_v10, %v2519_v57  ;;  %v1157_v17 = vsel %vm1149_vm12, %v5646_v6, 0.0  ;;  %v1271_v49 = vsel %vm7819_vm6, %v5656_v30, 0.0  ;;  %v1426_v21 = vadd.f32 %v8325_v19, %v8324_v34  ;;  %v8329_v4 = vld [vmem:[#allocation135_spill] sm:$0xff] }
 0x18a   : > { %v1443_v28 = vmul.f32 %v8327_v25, %v8326_v0  ;;  %v946_v10 = vadd.f32 %v938_v47, %v857_v7  ;;  %v1166_v13 = vmul.f32 %v5475_v44, %v1157_v17  ;;  %v1280_v57 = vmul.f32 %v5480_v16, %v1271_v49  ;;  %v8331_v47 = vld [vmem:[#allocation4_spill] sm:$0xff]  ;;  %v8332_v7 = vld [vmem:[#allocation199_spill] sm:$0xff]  ;;  %v8334_v49 = vld [vmem:[#allocation190_spill] sm:$0xff] }
 0x18b   : > { %v2569_v14 = vadd.f32 %v2561_v43, %v2544_v61  ;;  %vm8330_vm13 = vcmp.eq.s32.totalorder %v8329_v4, 1  ;;  %v1484_v30 = vsel %vm1035_vm5, %v5581_v48, 0.0  ;;  %v1509_v34 = vsel %vm1149_vm12, %v5640_v24, 0.0  ;;  %v8336_v25 = vld [vmem:[#allocation39_spill] sm:$0xff] }
 0x18c   : > { %v1451_v15 = vadd.f32 %v1443_v28, %v1426_v21  ;;  %v1459_v6 = vsel %vm8330_vm13, %v8328_v36, 0.0  ;;  %v1060_v43 = vadd.f32 %v1052_v31, %v946_v10  ;;  %v1493_v17 = vmul.f32 %v8332_v7, %v1484_v30  ;;  %v6126_v28 = vld [vmem:[%s7603_s1 + $0x28] sm:$0xff]  ;;  %v8335_v21 = vld [vmem:[#allocation200_spill] sm:$0xff]  ;;  %v8337_v30 = vld [vmem:[#allocation201_spill] sm:$0xff]  ;;  %v6136_v10 = vpop.permute.xlu2 %1022  ;;  %v6143_v7 = vpop.permute.xlu1 %2876 }
 0x18d   : > { %v2594_v19 = vadd.f32 %v2586_v32, %v2569_v14  ;;  %v1468_v61 = vmul.f32 %v8331_v47, %v1459_v6  ;;  %8333 = vst [vmem:[#allocation94_spill] sm:$0xff] %v6126_v28  ;;  %vm1328_vm2 = vcmp.eq.s32.totalorder %v8334_v49, 1  ;;  %v1518_v0 = vmul.f32 %v8335_v21, %v1509_v34  ;;  %v8353_v49 = vld [vmem:[#allocation114_spill] sm:$0xff] }
 0x18e   : > { %v1534_v53 = vsel %vm7819_vm6, %v8336_v25, 0.0  ;;  %vm1591_vm15 = vcmp.eq.s32.totalorder %v6085_v52, 1  ;;  %v1174_v6 = vadd.f32 %v1166_v13, %v1060_v43  ;;  %8338 = vst [vmem:[#allocation182_spill] sm:$0xff] %v6136_v10  ;;  %v492_v27 = vadd.s32 4294967293, %v6126_v28  ;;  %v8360_v52 = vld [vmem:[#allocation46_spill] sm:$0xff]  ;;  %v8368_v10 = vld [vmem:[#allocation217_spill] sm:$0xff] }
 0x18f   : > { %v2642_v31 = vsel %vm2634_vm14, %v2594_v19, 0.0  ;;  %v1476_v32 = vadd.f32 %v1468_v61, %v1451_v15  ;;  %v1543_v14 = vmul.f32 %v8337_v30, %v1534_v53  ;;  %v2400_v34 = vadd.s32 2, %v5421_v9 }
 0x190   : > { %v6138_v63 = vadd.f32 %v2642_v31, %v2387_v50  ;;  %v1355_v54 = vadd.s32 4294967294, %v6126_v28  ;;  %v1288_v45 = vadd.f32 %v1280_v57, %v1174_v6  ;;  %v8340_v19 = vrot.slane %v8339_v20, 1  ;;  %v6161_v57 = vpop.permute.xlu0 %1835 }
 0x191   : > { %v1501_v21 = vadd.f32 %v1493_v17, %v1476_v32  ;;  %v8341_v13 = vrot.slane %v8287_v59, 1  ;;  %vm8342_vm9 = vcmp.lt.s32.totalorder %v4056_v33, 7  ;;  %v8344_v50 = vrot.slane %v8339_v20, 2 }
 0x192   : > { %v8345_v15 = vrot.slane %v8287_v59, 2  ;;  %vm500_vm11 = vcmp.ge.s32.totalorder %v492_v27, 0  ;;  %vm508_vm3 = vcmp.lt.s32.totalorder %v492_v27, 8  ;;  %vm2408_vm0 = vcmp.ge.s32.totalorder %v2400_v34, 0  ;;  %v8351_v27 = vld [vmem:[#allocation107_spill] sm:$0xff] }
 0x193   : > { %v6151_v53 = vsel %vm8342_vm9, %v8341_v13, %v8340_v19  ;;  %vm2416_vm4 = vcmp.lt.s32.totalorder %v2400_v34, 8  ;;  %v1336_v61 = vsel %vm1328_vm2, %v1288_v45, 0.0  ;;  %v1526_v17 = vadd.f32 %v1518_v0, %v1501_v21  ;;  %vm516_vm10 = vmand %vm500_vm11, %vm508_vm3  ;;  %v8352_v34 = vld [vmem:[#allocation133_spill] sm:$0xff]  ;;  %v8354_v45 = vld [vmem:[#allocation152_spill] sm:$0xff] }
 0x194   : > { %8343 = vst [vmem:[#allocation105_spill] sm:$0xff] %v6151_v53  ;;  %v6159_v43 = vsel %vm1074_vm8, %v8345_v15, %v8344_v50  ;;  %vm1363_vm14 = vcmp.ge.s32.totalorder %v1355_v54, 0  ;;  %vm1371_vm13 = vcmp.lt.s32.totalorder %v1355_v54, 8  ;;  %v1299_v31 = vsel %vm516_vm10, 1, %v7978_v35  ;;  %vm2424_vm9 = vmand %vm2408_vm0, %vm2416_vm4 }
 0x195   : > { %8346 = vst [vmem:[#allocation131_spill] sm:$0xff] %v6159_v43  ;;  %v8347_v6 = vrot.slane %v8339_v20, 3  ;;  %v8348_v32 = vrot.slane %v8287_v59, 3  ;;  %vm8349_vm8 = vcmp.lt.s32.totalorder %v4056_v33, 5  ;;  %v2732_v13 = vadd.f32 %v8352_v34, %v8351_v27  ;;  %1318 = vperm.xlu1 %3736, %v1299_v31   ;;  %vm1379_vm2 = vmand %vm1363_vm14, %vm1371_vm13 }
 0x196   : > { %v2749_v21 = vmul.f32 %v8354_v45, %v8353_v49  ;;  %v1551_v0 = vadd.f32 %v1543_v14, %v1526_v17  ;;  %v2607_v54 = vsel %vm2424_vm9, 1, %v7978_v35  ;;  %vm8355_vm11 = vcmp.eq.s32.totalorder %v5286_v51, 1  ;;  %v8356_v17 = vld [vmem:[#allocation93_spill] sm:$0xff]  ;;  %v6228_v45 = vpop.permute.xlu1 %2090 }
 0x197   : > { %v6172_v19 = vsel %vm8349_vm8, %v8348_v32, %v8347_v6  ;;  %v2765_v50 = vsel %vm8355_vm11, %v8287_v59, 0.0  ;;  %v2790_v33 = vsel %vm1034_vm7, %v6151_v53, 0.0  ;;  %2628 = vperm.xlu0 %3735, %v2607_v54   ;;  %v1562_v15 = vsel %vm1379_vm2, 1, %v7978_v35 }
 0x198   : > { %8350 = vst [vmem:[#allocation110_spill] sm:$0xff] %v6172_v19  ;;  %v2757_v6 = vadd.f32 %v2749_v21, %v2732_v13  ;;  %v2774_v32 = vmul.f32 %v5933_v18, %v2765_v50  ;;  %v2799_v14 = vmul.f32 %v5937_v42, %v2790_v33  ;;  %vm8357_vm3 = vcmp.eq.s32.totalorder %v8277_v58, 1  ;;  %1581 = vperm.xlu2 %3737, %v1562_v15   ;;  %v8359_v21 = vld [vmem:[#allocation179_spill] sm:$0xff]  ;;  %v8362_v50 = vld [vmem:[#allocation54_spill] sm:$0xff]  ;;  %v8364_v15 = vld [vmem:[#allocation12_spill] sm:$0xff] }
 0x199   : > { %v6191_v31 = vsel %vm8357_vm3, %v8356_v17, 0.0  ;;  %v1599_v51 = vsel %vm1591_vm15, %v1551_v0, 0.0  ;;  %v2815_v56 = vsel %vm1148_vm1, %v6159_v43, 0.0  ;;  %vm8358_vm7 = vcmp.eq.s32.totalorder %v5676_v46, 1  ;;  %v8361_v0 = vld [vmem:[#allocation117_spill] sm:$0xff]  ;;  %v8363_v33 = vld [vmem:[#allocation43_spill] sm:$0xff] }
 0x19a   : > { %v2840_v27 = vsel %vm8358_vm7, %v6172_v19, 0.0  ;;  %v6201_v34 = vadd.f32 %v1599_v51, %v1336_v61  ;;  %v2782_v13 = vadd.f32 %v2774_v32, %v2757_v6  ;;  %v2824_v49 = vmul.f32 %v5940_v1, %v2815_v56  ;;  %v8366_v17 = vld [vmem:[#allocation193_spill] sm:$0xff]  ;;  %v6216_v6 = vpop.permute.xlu2 %1575  ;;  %v8371_v18 = vld [vmem:[#allocation218_spill] sm:$0xff] }
 0x19b   : > { %vm2897_vm0 = vcmp.eq.s32.totalorder %v6143_v7, 1  ;;  %vm7834_vm4 = vcmp.eq.s32.totalorder %v8359_v21, 1  ;;  %v1689_v54 = vadd.f32 %v8361_v0, %v8360_v52  ;;  %v1706_v62 = vmul.f32 %v8363_v33, %v8362_v50  ;;  %v8367_v56 = vld [vmem:[#allocation5_spill] sm:$0xff]  ;;  %v8369_v50 = vld [vmem:[#allocation208_spill] sm:$0xff] }
 0x19c   : > { %vm8365_vm1 = vcmp.eq.s32.totalorder %v8329_v4, 1  ;;  %v1747_v61 = vsel %vm1035_vm5, %v8366_v17, 0.0  ;;  %v2807_v32 = vadd.f32 %v2799_v14, %v2782_v13  ;;  %v2849_v51 = vmul.f32 %v5942_v41, %v2840_v27  ;;  %v8370_v1 = vld [vmem:[#allocation209_spill] sm:$0xff]  ;;  %v6230_v14 = vpop.permute.xlu0 %1247  ;;  %v8372_v13 = vld [vmem:[#allocation210_spill] sm:$0xff] }
 0x19d   : > { %v1722_v46 = vsel %vm8365_vm1, %v8364_v15, 0.0  ;;  %v1772_v52 = vsel %vm1149_vm12, %v8368_v10, 0.0  ;;  %v1714_v0 = vadd.f32 %v1706_v62, %v1689_v54  ;;  %v1756_v33 = vmul.f32 %v8369_v50, %v1747_v61  ;;  %v3783_v61 = vld [vmem:[%s7603_s1 + $0x30] sm:$0xff]  ;;  %v8374_v50 = vld [vmem:[#allocation118_spill] sm:$0xff] }
 0x19e   : > { %v1731_v9 = vmul.f32 %v8367_v56, %v1722_v46  ;;  %v1781_v42 = vmul.f32 %v8370_v1, %v1772_v52  ;;  %v1797_v20 = vsel %vm7819_vm6, %v8371_v18, 0.0  ;;  %v2832_v27 = vadd.f32 %v2824_v49, %v2807_v32  ;;  %v8373_v1 = vld [vmem:[#allocation47_spill] sm:$0xff] }
 0x19f   : > { %v1806_v46 = vmul.f32 %v8372_v13, %v1797_v20  ;;  %vm1854_vm15 = vcmp.eq.s32.totalorder %v6161_v57, 1  ;;  %v2398_v56 = vadd.s32 2, %v5719_v23  ;;  %v1620_v62 = vadd.s32 4294967295, %v6042_v3  ;;  %v8375_v20 = vld [vmem:[#allocation211_spill] sm:$0xff] }
 0x1a0   : > { %v1739_v54 = vadd.f32 %v1731_v9, %v1714_v0  ;;  %v2663_v52 = vadd.s32 3, %v3783_v61  ;;  %v1944_v41 = vadd.f32 %v8374_v50, %v8373_v1  ;;  %v2857_v19 = vadd.f32 %v2849_v51, %v2832_v27 }
 0x1a1   : > { %vm2406_vm10 = vcmp.ge.s32.totalorder %v2398_v56, 0  ;;  %vm2414_vm14 = vcmp.lt.s32.totalorder %v2398_v56, 8  ;;  %v1961_v49 = vmul.f32 %v8375_v20, %v5990_v29  ;;  %vm1628_vm9 = vcmp.ge.s32.totalorder %v1620_v62, 0 }
 0x1a2   : > { %v1764_v32 = vadd.f32 %v1756_v33, %v1739_v54  ;;  %vm2422_vm13 = vmand %vm2406_vm10, %vm2414_vm14  ;;  %vm1636_vm8 = vcmp.lt.s32.totalorder %v1620_v62, 8  ;;  %vm2671_vm2 = vcmp.ge.s32.totalorder %v2663_v52, 0  ;;  %v2905_v9 = vsel %vm2897_vm0, %v2857_v19, 0.0  ;;  %v8377_v19 = vld [vmem:[#allocation212_spill] sm:$0xff]  ;;  %v8380_v54 = vld [vmem:[#allocation213_spill] sm:$0xff] }
 0x1a3   : > { %v2605_v0 = vsel %vm2422_vm13, 1, %v7978_v35  ;;  %vm1644_vm11 = vmand %vm1628_vm9, %vm1636_vm8  ;;  %vm2679_vm3 = vcmp.lt.s32.totalorder %v2663_v52, 8  ;;  %v1969_v61 = vadd.f32 %v1961_v49, %v1944_v41  ;;  %v6247_v1 = vadd.f32 %v2905_v9, %v6138_v63  ;;  %v8381_v52 = vld [vmem:[#allocation9_spill] sm:$0xff] }
 0x1a4   : > { %v1789_v51 = vadd.f32 %v1781_v42, %v1764_v32  ;;  %2622 = vperm.xlu1 %3736, %v2605_v0   ;;  %v1827_v29 = vsel %vm1644_vm11, 1, %v7978_v35  ;;  %vm2687_vm7 = vmand %vm2671_vm2, %vm2679_vm3  ;;  %v1977_v33 = vsel %vm8365_vm1, %v4064_v38, 0.0  ;;  %v2002_v41 = vsel %vm1035_vm5, %v5864_v8, 0.0  ;;  %v8378_v42 = vld [vmem:[#allocation60_spill] sm:$0xff]  ;;  %v6270_v32 = vpop.permute.xlu2 %1256 }
 0x1a5   : > { %8376 = vst [vmem:[#allocation106_spill] sm:$0xff] %v6247_v1  ;;  %1850 = vperm.xlu0 %3735, %v1827_v29   ;;  %v2870_v7 = vsel %vm2687_vm7, 1, %v7978_v35  ;;  %v1986_v56 = vmul.f32 %v8377_v19, %v1977_v33  ;;  %v2027_v63 = vsel %vm1149_vm12, %v5872_v2, 0.0  ;;  %vm8379_vm0 = vcmp.eq.s32.totalorder %v8277_v58, 1  ;;  %v8382_v29 = vld [vmem:[#allocation214_spill] sm:$0xff]  ;;  %v8383_v1 = vld [vmem:[#allocation215_spill] sm:$0xff]  ;;  %vm8388_vm8 = vmmov %vm8365_vm1 }
 0x1a6   : > { %v6264_v50 = vsel %vm8379_vm0, %v8378_v42, 0.0  ;;  %v1814_v27 = vadd.f32 %v1806_v46, %v1789_v51  ;;  %2891 = vperm.xlu2 %3737, %v2870_v7   ;;  %v2011_v62 = vmul.f32 %v8380_v54, %v2002_v41  ;;  %v2052_v49 = vsel %vm7819_vm6, %v8381_v52, 0.0  ;;  %v6284_v51 = vpop.permute.xlu1 %2353  ;;  %v6286_v7 = vpop.permute.xlu0 %1028 }
 0x1a7   : > { %v6275_v9 = vsel %vm7834_vm4, %v8364_v15, 0.0  ;;  %v1994_v0 = vadd.f32 %v1986_v56, %v1969_v61  ;;  %v2036_v33 = vmul.f32 %v8382_v29, %v2027_v63  ;;  %v2061_v42 = vmul.f32 %v8383_v1, %v2052_v49  ;;  %v8384_v63 = vld [vmem:[#allocation150_spill] sm:$0xff]  ;;  %v8385_v49 = vld [vmem:[#allocation49_spill] sm:$0xff] }
 0x1a8   : > { %v1862_v46 = vsel %vm1854_vm15, %v1814_v27, 0.0  ;;  %vm2109_vm10 = vcmp.eq.s32.totalorder %v6228_v45, 1  ;;  %vm1883_vm14 = vcmp.ge.s32.totalorder %v6042_v3, 0  ;;  %vm7818_vm13 = vcmp.lt.s32.totalorder %v6042_v3, 8  ;;  %v8386_v15 = vld [vmem:[#allocation126_spill] sm:$0xff] }
 0x1a9   : > { %v1870_v41 = vadd.f32 %v1862_v46, %v6201_v34  ;;  %v2019_v61 = vadd.f32 %v2011_v62, %v1994_v0  ;;  %vm1899_vm9 = vmand %vm1883_vm14, %vm7818_vm13  ;;  %v1618_v56 = vadd.s32 4294967295, %v6126_v28  ;;  %v2661_v57 = vadd.s32 3, %v5719_v23  ;;  %v8387_v29 = vld [vmem:[#allocation6_spill] sm:$0xff]  ;;  %v8389_v46 = vld [vmem:[#allocation187_spill] sm:$0xff] }
 0x1aa   : > { %vm7832_vm15 = vcmp.eq.s32.totalorder %v8384_v63, 1  ;;  %v2082_v27 = vsel %vm1899_vm9, 1, %v7978_v35  ;;  %v2207_v1 = vadd.f32 %v8386_v15, %v8385_v49  ;;  %v2224_v54 = vmul.f32 %v8387_v29, %v6191_v31  ;;  %v8390_v29 = vld [vmem:[#allocation92_spill] sm:$0xff] }
 0x1ab   : > { %v2240_v34 = vsel %vm8388_vm8, %v8252_v11, 0.0  ;;  %v2044_v62 = vadd.f32 %v2036_v33, %v2019_v61  ;;  %vm1626_vm2 = vcmp.ge.s32.totalorder %v1618_v56, 0  ;;  %vm1634_vm11 = vcmp.lt.s32.totalorder %v1618_v56, 8 }
 0x1ac   : > { %vm2669_vm3 = vcmp.ge.s32.totalorder %v2661_v57, 0  ;;  %2105 = vperm.xlu1 %3736, %v2082_v27   ;;  %vm1642_vm7 = vmand %vm1626_vm2, %vm1634_vm11  ;;  %vm2677_vm1 = vcmp.lt.s32.totalorder %v2661_v57, 8  ;;  %v2232_v0 = vadd.f32 %v2224_v54, %v2207_v1  ;;  %v2249_v23 = vmul.f32 %v8389_v46, %v2240_v34  ;;  %v8391_v54 = vld [vmem:[#allocation130_spill] sm:$0xff] }
 0x1ad   : > { %v2265_v15 = vsel %vm1035_vm5, %v5965_v40, 0.0  ;;  %v2069_v49 = vadd.f32 %v2061_v42, %v2044_v62  ;;  %v1825_v31 = vsel %vm1642_vm7, 1, %v7978_v35  ;;  %vm2685_vm0 = vmand %vm2669_vm3, %vm2677_vm1  ;;  %v2290_v33 = vsel %vm1149_vm12, %v5973_v37, 0.0  ;;  %v8392_v42 = vld [vmem:[#allocation129_spill] sm:$0xff] }
 0x1ae   : > { %v2274_v19 = vmul.f32 %v8390_v29, %v2265_v15  ;;  %1844 = vperm.xlu0 %3735, %v1825_v31   ;;  %v2868_v61 = vsel %vm2685_vm0, 1, %v7978_v35  ;;  %v2257_v1 = vadd.f32 %v2249_v23, %v2232_v0  ;;  %v2299_v56 = vmul.f32 %v8391_v54, %v2290_v33  ;;  %v6322_v23 = vpop.permute.xlu2 %917  ;;  %v8395_v31 = vld [vmem:[#allocation50_spill] sm:$0xff]  ;;  %v8401_v54 = vld [vmem:[#allocation53_spill] sm:$0xff] }
 0x1af   : > { %v2315_v57 = vsel %vm7819_vm6, %v5982_v26, 0.0  ;;  %vm7833_vm14 = vcmp.eq.s32.totalorder %v8392_v42, 1  ;;  %v2117_v27 = vsel %vm2109_vm10, %v2069_v49, 0.0  ;;  %vm7831_vm9 = vcmp.eq.s32.totalorder %v6230_v14, 1  ;;  %2885 = vperm.xlu2 %3737, %v2868_v61   ;;  %8393 = vst [vmem:[#allocation132_spill] sm:$0xff] %v6322_v23  ;;  %v8394_v49 = vld [vmem:[#allocation64_spill] sm:$0xff] }
 0x1b0   : > { %v2324_v34 = vmul.f32 %v5815_v55, %v2315_v57  ;;  %v2125_v62 = vadd.f32 %v2117_v27, %v1870_v41  ;;  %v2282_v15 = vadd.f32 %v2274_v19, %v2257_v1  ;;  %vm2372_vm8 = vcmp.eq.s32.totalorder %v6284_v51, 1  ;;  %v1313_v19 = vpop.permute.xlu1 %1312  ;;  %v8396_v41 = vld [vmem:[#allocation177_spill] sm:$0xff]  ;;  %v8397_v1 = vld [vmem:[#allocation3_spill] sm:$0xff]  ;;  %v6334_v27 = vpop.permute.xlu0 %1142 }
 0x1b1   : > { %v2138_v0 = vadd.s32 1, %v6042_v3  ;;  %vm1881_vm2 = vcmp.ge.s32.totalorder %v6126_v28, 0  ;;  %vm7830_vm11 = vcmp.lt.s32.totalorder %v6126_v28, 8  ;;  %v2136_v45 = vadd.s32 1, %v6126_v28 }
 0x1b2   : > { %v744_v33 = vadd.f32 %v8395_v31, %v8394_v49  ;;  %v2307_v61 = vadd.f32 %v2299_v56, %v2282_v15  ;;  %vm1897_vm7 = vmand %vm1881_vm2, %vm7830_vm11  ;;  %v850_v57 = vmul.f32 %v8397_v1, %v8396_v41  ;;  %v930_v56 = vsel %vm7834_vm4, %v8328_v36, 0.0 }
 0x1b3   : > { %vm2146_vm10 = vcmp.ge.s32.totalorder %v2138_v0, 0  ;;  %vm2154_vm3 = vcmp.lt.s32.totalorder %v2138_v0, 8  ;;  %v2080_v23 = vsel %vm1897_vm7, 1, %v7978_v35  ;;  %vm2144_vm0 = vcmp.ge.s32.totalorder %v2136_v45, 0 }
 0x1b4   : > { %vm2162_vm1 = vmand %vm2146_vm10, %vm2154_vm3  ;;  %vm2152_vm13 = vcmp.lt.s32.totalorder %v2136_v45, 8  ;;  %v2332_v15 = vadd.f32 %v2324_v34, %v2307_v61  ;;  %v858_v49 = vadd.f32 %v850_v57, %v744_v33  ;;  %v939_v31 = vmul.f32 %v5467_v39, %v930_v56  ;;  %v8398_v61 = vld [vmem:[#allocation97_spill] sm:$0xff] }
 0x1b5   : > { %v2345_v0 = vsel %vm2162_vm1, 1, %v7978_v35  ;;  %vm2160_vm6 = vmand %vm2144_vm0, %vm2152_vm13  ;;  %v1044_v55 = vsel %vm7833_vm14, %v5581_v48, 0.0  ;;  %v1158_v45 = vsel %vm7832_vm15, %v5640_v24, 0.0  ;;  %v1272_v34 = vsel %vm7831_vm9, %v8336_v25, 0.0  ;;  %v8400_v25 = vld [vmem:[#allocation65_spill] sm:$0xff] }
 0x1b6   : > { %2368 = vperm.xlu1 %3736, %v2345_v0   ;;  %v2343_v41 = vsel %vm2160_vm6, 1, %v7978_v35  ;;  %vm8399_vm13 = vcmp.eq.s32.totalorder %v8277_v58, 1  ;;  %v2380_v57 = vsel %vm2372_vm8, %v2332_v15, 0.0  ;;  %2099 = vperm.xlu0 %3735, %v2080_v23   ;;  %v947_v56 = vadd.f32 %v939_v31, %v858_v49  ;;  %v8403_v23 = vld [vmem:[#allocation178_spill] sm:$0xff]  ;;  %v8404_v49 = vld [vmem:[#allocation199_spill] sm:$0xff] }
 0x1b7   : > { %v6355_v33 = vsel %vm8399_vm13, %v8398_v61, 0.0  ;;  %v1053_v0 = vmul.f32 %v8226_v12, %v1044_v55  ;;  %v6360_v48 = vadd.f32 %v2380_v57, %v2125_v62  ;;  %2362 = vperm.xlu2 %3737, %v2343_v41   ;;  %v1167_v24 = vmul.f32 %v5475_v44, %v1158_v45  ;;  %v8402_v62 = vld [vmem:[#allocation194_spill] sm:$0xff]  ;;  %v6383_v45 = vpop.permute.xlu2 %911 }
 0x1b8   : > { %v1281_v36 = vmul.f32 %v5480_v16, %v1272_v34  ;;  %v1427_v29 = vadd.f32 %v8401_v54, %v8400_v25  ;;  %v1469_v61 = vmul.f32 %v8331_v47, %v6275_v9  ;;  %v1485_v51 = vsel %vm7833_vm14, %v8366_v17, 0.0  ;;  %v8405_v54 = vld [vmem:[#allocation200_spill] sm:$0xff]  ;;  %8406 = vst [vmem:[#allocation113_spill] sm:$0xff] %v6383_v45 }
 0x1b9   : > { %v1061_v58 = vadd.f32 %v1053_v0, %v947_v56  ;;  %v1510_v55 = vsel %vm7832_vm15, %v8368_v10, 0.0  ;;  %vm925_vm6 = vcmp.eq.s32.totalorder %v8402_v62, 1  ;;  %v1494_v31 = vmul.f32 %v8404_v49, %v1485_v51 }
 0x1ba   : > { %v1452_v15 = vadd.f32 %v8403_v23, %v1427_v29  ;;  %v1535_v25 = vsel %vm7831_vm9, %v8371_v18, 0.0  ;;  %vm1592_vm8 = vcmp.eq.s32.totalorder %v6216_v6, 1  ;;  %vm1039_vm2 = vcmp.eq.s32.totalorder %v6286_v7, 1  ;;  %v6390_v23 = vpop.permute.xlu1 %1136 }
 0x1bb   : > { %v1175_v9 = vadd.f32 %v1167_v24, %v1061_v58  ;;  %vm1329_vm10 = vcmp.eq.s32.totalorder %v1313_v19, 1  ;;  %v1519_v41 = vmul.f32 %v8405_v54, %v1510_v55  ;;  %v1544_v57 = vmul.f32 %v8337_v30, %v1535_v25  ;;  %v6392_v24 = vpop.permute.xlu0 %2616  ;;  %v8407_v58 = vld [vmem:[#allocation51_spill] sm:$0xff]  ;;  %v8409_v25 = vld [vmem:[#allocation108_spill] sm:$0xff] }
 0x1bc   : > { %v1477_v34 = vadd.f32 %v1469_v61, %v1452_v15  ;;  %v2399_v29 = vadd.s32 2, %v6126_v28  ;;  %v2401_v56 = vadd.s32 2, %v6042_v3  ;;  %v2664_v51 = vadd.s32 3, %v6042_v3  ;;  %v8408_v55 = vld [vmem:[#allocation127_spill] sm:$0xff] }
 0x1bd   : > { %v1289_v0 = vadd.f32 %v1281_v36, %v1175_v9  ;;  %v2470_v18 = vadd.f32 %v8408_v55, %v8407_v58  ;;  %v2487_v9 = vmul.f32 %v8409_v25, %v6264_v50  ;;  %vm8410_vm4 = vcmp.eq.s32.totalorder %v8329_v4, 1  ;;  %v8411_v19 = vld [vmem:[#allocation207_spill] sm:$0xff]  ;;  %v8413_v55 = vld [vmem:[#allocation109_spill] sm:$0xff] }
 0x1be   : > { %v1502_v10 = vadd.f32 %v1494_v31, %v1477_v34  ;;  %vm2407_vm7 = vcmp.ge.s32.totalorder %v2399_v29, 0  ;;  %vm2415_vm1 = vcmp.lt.s32.totalorder %v2399_v29, 8  ;;  %vm2409_vm0 = vcmp.ge.s32.totalorder %v2401_v56, 0  ;;  %v8417_v25 = vld [vmem:[#allocation79_spill] sm:$0xff] }
 0x1bf   : > { %v1337_v61 = vsel %vm1329_vm10, %v1289_v0, 0.0  ;;  %vm2423_vm13 = vmand %vm2407_vm7, %vm2415_vm1  ;;  %vm2417_vm11 = vcmp.lt.s32.totalorder %v2401_v56, 8  ;;  %vm2672_vm9 = vcmp.ge.s32.totalorder %v2664_v51, 0  ;;  %vm2680_vm15 = vcmp.lt.s32.totalorder %v2664_v51, 8  ;;  %v8412_v51 = vld [vmem:[#allocation111_spill] sm:$0xff] }
 0x1c0   : > { %v1527_v36 = vadd.f32 %v1519_v41, %v1502_v10  ;;  %v2606_v15 = vsel %vm2423_vm13, 1, %v7978_v35  ;;  %vm2425_vm14 = vmand %vm2409_vm0, %vm2417_vm11  ;;  %v2503_v31 = vsel %vm8410_vm4, %v8287_v59, 0.0  ;;  %v2528_v10 = vsel %vm1035_vm5, %v6151_v53, 0.0 }
 0x1c1   : > { %2625 = vperm.xlu1 %3736, %v2606_v15   ;;  %v2608_v34 = vsel %vm2425_vm14, 1, %v7978_v35  ;;  %vm2688_vm3 = vmand %vm2672_vm9, %vm2680_vm15  ;;  %v2512_v29 = vmul.f32 %v8411_v19, %v2503_v31  ;;  %v2553_v41 = vsel %vm1149_vm12, %v6159_v43, 0.0  ;;  %v2495_v0 = vadd.f32 %v2487_v9, %v2470_v18  ;;  %v8414_v31 = vld [vmem:[#allocation110_spill] sm:$0xff]  ;;  %v8419_v9 = vld [vmem:[#allocation161_spill] sm:$0xff] }
 0x1c2   : > { %v1552_v56 = vadd.f32 %v1544_v57, %v1527_v36  ;;  %2631 = vperm.xlu0 %3735, %v2608_v34   ;;  %v2871_v50 = vsel %vm2688_vm3, 1, %v7978_v35  ;;  %v2537_v58 = vmul.f32 %v8412_v51, %v2528_v10  ;;  %vm7906_vm4 = vcmp.eq.s32.totalorder %v6270_v32, 1  ;;  %v8416_v19 = vld [vmem:[#allocation86_spill] sm:$0xff] }
 0x1c3   : > { %2894 = vperm.xlu2 %3737, %v2871_v50   ;;  %v2562_v15 = vmul.f32 %v8413_v55, %v2553_v41  ;;  %vm8415_vm15 = vcmp.eq.s32.totalorder %v5927_v5, 1  ;;  %v1430_v17 = vadd.f32 %v8417_v25, %v8416_v19  ;;  %v2520_v36 = vadd.f32 %v2512_v29, %v2495_v0  ;;  %v8418_v34 = vld [vmem:[#allocation186_spill] sm:$0xff]  ;;  %v1585_v50 = vpop.permute.xlu2 %1584 }
 0x1c4   : > { %v2578_v3 = vsel %vm8415_vm15, %v8414_v31, 0.0  ;;  %v1600_v57 = vsel %vm1592_vm8, %v1552_v56, 0.0  ;;  %v8420_v10 = vld [vmem:[#allocation42_spill] sm:$0xff]  ;;  %v1463_v41 = vsel %vm925_vm6, %v8287_v59, 0.0  ;;  %v1488_v25 = vsel %vm1039_vm2, %v6151_v53, 0.0  ;;  %vm8432_vm1 = vmmov %vm8415_vm15 }
 0x1c5   : > { %v2587_v18 = vmul.f32 %v8418_v34, %v2578_v3  ;;  %v1447_v51 = vmul.f32 %v8420_v10, %v8419_v9  ;;  %v6425_v45 = vadd.f32 %v1600_v57, %v1337_v61  ;;  %vm8421_vm14 = vcmp.eq.s32.totalorder %v6334_v27, 1  ;;  %v2880_v9 = vpop.permute.xlu1 %2879  ;;  %v6444_v34 = vpop.permute.xlu0 %1838 }
 0x1c6   : > { %v1513_v6 = vsel %vm8421_vm14, %v6159_v43, 0.0  ;;  %v2545_v19 = vadd.f32 %v2537_v58, %v2520_v36  ;;  %v1472_v29 = vmul.f32 %v8331_v47, %v1463_v41  ;;  %v1497_v61 = vmul.f32 %v8404_v49, %v1488_v25  ;;  %v8424_v41 = vld [vmem:[#allocation152_spill] sm:$0xff]  ;;  %v8427_v47 = vld [vmem:[#allocation191_spill] sm:$0xff] }
 0x1c7   : > { %v1455_v3 = vadd.f32 %v1447_v51, %v1430_v17  ;;  %vm2635_vm9 = vcmp.eq.s32.totalorder %v6392_v24, 1  ;;  %v1522_v56 = vmul.f32 %v8405_v54, %v1513_v6  ;;  %v1538_v0 = vsel %vm7906_vm4, %v8414_v31, 0.0  ;;  %v8422_v17 = vld [vmem:[#allocation52_spill] sm:$0xff]  ;;  %v8425_v6 = vld [vmem:[#allocation14_spill] sm:$0xff] }
 0x1c8   : > { %v2662_v57 = vadd.s32 3, %v6126_v28  ;;  %v2570_v55 = vadd.f32 %v2562_v15, %v2545_v19  ;;  %vm1595_vm11 = vcmp.eq.s32.totalorder %v1585_v50, 1  ;;  %v8423_v51 = vld [vmem:[#allocation128_spill] sm:$0xff]  ;;  %v2750_v25 = vmul.f32 %v8424_v41, %v6355_v33  ;;  %v8428_v15 = vld [vmem:[#allocation202_spill] sm:$0xff]  ;;  %v8449_v50 = vld [vmem:[#allocation67_spill] sm:$0xff] }
 0x1c9   : > { %v1480_v58 = vadd.f32 %v1472_v29, %v1455_v3  ;;  %v2733_v36 = vadd.f32 %v8423_v51, %v8422_v17  ;;  %vm8426_vm3 = vcmp.eq.s32.totalorder %v8329_v4, 1  ;;  %v2791_v19 = vsel %vm1035_vm5, %v8428_v15, 0.0  ;;  %v8430_v51 = vld [vmem:[#allocation204_spill] sm:$0xff] }
 0x1ca   : > { %vm2670_vm8 = vcmp.ge.s32.totalorder %v2662_v57, 0  ;;  %vm2678_vm10 = vcmp.lt.s32.totalorder %v2662_v57, 8  ;;  %v2766_v54 = vsel %vm8426_vm3, %v8425_v6, 0.0  ;;  %v2595_v49 = vadd.f32 %v2587_v18, %v2570_v55  ;;  %v8429_v57 = vld [vmem:[#allocation192_spill] sm:$0xff] }
 0x1cb   : > { %v1505_v28 = vadd.f32 %v1497_v61, %v1480_v58  ;;  %vm2686_vm7 = vmand %vm2670_vm8, %vm2678_vm10  ;;  %v2775_v10 = vmul.f32 %v8427_v47, %v2766_v54  ;;  %v2758_v29 = vadd.f32 %v2750_v25, %v2733_v36  ;;  %v2800_v17 = vmul.f32 %v8429_v57, %v2791_v19  ;;  %v8431_v54 = vld [vmem:[#allocation206_spill] sm:$0xff]  ;;  %v8434_v19 = vld [vmem:[#allocation40_spill] sm:$0xff] }
 0x1cc   : > { %v2869_v3 = vsel %vm2686_vm7, 1, %v7978_v35  ;;  %v2816_v33 = vsel %vm1149_vm12, %v8430_v51, 0.0  ;;  %v2643_v4 = vsel %vm2635_vm9, %v2595_v49, 0.0  ;;  %v1547_v18 = vmul.f32 %v8337_v30, %v1538_v0  ;;  %v8433_v36 = vld [vmem:[#allocation62_spill] sm:$0xff]  ;;  %v8436_v47 = vld [vmem:[#allocation55_spill] sm:$0xff]  ;;  %v8437_v49 = vld [vmem:[#allocation180_spill] sm:$0xff] }
 0x1cd   : > { %v1530_v55 = vadd.f32 %v1522_v56, %v1505_v28  ;;  %2888 = vperm.xlu0 %3735, %v2869_v3   ;;  %v2841_v60 = vsel %vm8432_vm1, %v8431_v54, 0.0  ;;  %v2651_v61 = vadd.f32 %v2643_v4, %v6360_v48  ;;  %v2783_v58 = vadd.f32 %v2775_v10, %v2758_v29  ;;  %v8435_v57 = vld [vmem:[#allocation66_spill] sm:$0xff]  ;;  %v8438_v28 = vld [vmem:[#allocation43_spill] sm:$0xff]  ;;  %v8440_v3 = vld [vmem:[#allocation5_spill] sm:$0xff] }
 0x1ce   : > { %v2825_v25 = vmul.f32 %v8433_v36, %v2816_v33  ;;  %v2850_v35 = vmul.f32 %v8434_v19, %v2841_v60  ;;  %v1690_v24 = vadd.f32 %v8436_v47, %v8435_v57  ;;  %v1707_v56 = vmul.f32 %v8438_v28, %v8437_v49  ;;  %v8443_v29 = vld [vmem:[#allocation35_spill] sm:$0xff]  ;;  %v8444_v47 = vld [vmem:[#allocation112_spill] sm:$0xff]  ;;  %v8447_v60 = vld [vmem:[#allocation209_spill] sm:$0xff]  ;;  %v6496_v19 = vpop.permute.xlu0 %1250 }
 0x1cf   : > { %v1555_v22 = vadd.f32 %v1547_v18, %v1530_v55  ;;  %vm8439_vm5 = vcmp.eq.s32.totalorder %v8359_v21, 1  ;;  %v2808_v5 = vadd.f32 %v2800_v17, %v2783_v58  ;;  %vm8441_vm12 = vcmp.eq.s32.totalorder %v8392_v42, 1  ;;  %v8446_v55 = vld [vmem:[#allocation208_spill] sm:$0xff] }
 0x1d0   : > { %v1723_v0 = vsel %vm8439_vm5, %v4064_v38, 0.0  ;;  %v1748_v48 = vsel %vm8441_vm12, %v5864_v8, 0.0  ;;  %vm8442_vm0 = vcmp.eq.s32.totalorder %v8384_v63, 1  ;;  %vm8445_vm13 = vcmp.eq.s32.totalorder %v8444_v47, 1  ;;  %vm8452_vm9 = vmmov %vm8439_vm5 }
 0x1d1   : > { %v1732_v30 = vmul.f32 %v8440_v3, %v1723_v0  ;;  %v1773_v10 = vsel %vm8442_vm0, %v5872_v2, 0.0  ;;  %v2721_v57 = vsel %vm8445_vm13, %v8443_v29, 0.0  ;;  %v6489_v33 = vsel %vm1595_vm11, %v1555_v22, 0.0  ;;  %v2094_v0 = vpop.permute.xlu1 %2093  ;;  %v8450_v22 = vld [vmem:[#allocation56_spill] sm:$0xff]  ;;  %vm8453_vm11 = vmmov %vm8441_vm12 }
 0x1d2   : > { %v1715_v4 = vadd.f32 %v1707_v56, %v1690_v24  ;;  %v1757_v17 = vmul.f32 %v8446_v55, %v1748_v48  ;;  %v2833_v18 = vadd.f32 %v2825_v25, %v2808_v5  ;;  %vm2898_vm15 = vcmp.eq.s32.totalorder %v2880_v9, 1  ;;  %v8451_v24 = vld [vmem:[#allocation181_spill] sm:$0xff]  ;;  %vm8454_vm8 = vmmov %vm8442_vm0 }
 0x1d3   : > { %v1782_v58 = vmul.f32 %v8447_v60, %v1773_v10  ;;  %vm8448_vm14 = vcmp.eq.s32.totalorder %v6230_v14, 1  ;;  %v1945_v47 = vadd.f32 %v8450_v22, %v8449_v50  ;;  %v1962_v56 = vmul.f32 %v8375_v20, %v8451_v24  ;;  %v8456_v22 = vld [vmem:[#allocation213_spill] sm:$0xff]  ;;  %v8457_v24 = vld [vmem:[#allocation175_spill] sm:$0xff] }
 0x1d4   : > { %v1798_v49 = vsel %vm8448_vm14, %v8381_v52, 0.0  ;;  %v1740_v2 = vadd.f32 %v1732_v30, %v1715_v4  ;;  %v2858_v25 = vadd.f32 %v2850_v35, %v2833_v18  ;;  %v1978_v5 = vsel %vm8452_vm9, %v8252_v11, 0.0  ;;  %v8458_v35 = vld [vmem:[#allocation32_spill] sm:$0xff]  ;;  %vm8460_vm3 = vmmov %vm8448_vm14 }
 0x1d5   : > { %v1807_v29 = vmul.f32 %v8372_v13, %v1798_v49  ;;  %v2003_v48 = vsel %vm8453_vm11, %v5965_v40, 0.0  ;;  %v2028_v30 = vsel %vm8454_vm8, %v5973_v37, 0.0  ;;  %v1970_v4 = vadd.f32 %v1962_v56, %v1945_v47  ;;  %v8455_v49 = vld [vmem:[#allocation212_spill] sm:$0xff]  ;;  %v8461_v47 = vld [vmem:[#allocation214_spill] sm:$0xff]  ;;  %vm8488_vm14 = vmmov %vm8452_vm9 }
 0x1d6   : > { %v1765_v10 = vadd.f32 %v1757_v17, %v1740_v2  ;;  %v1987_v50 = vmul.f32 %v8455_v49, %v1978_v5  ;;  %v2012_v52 = vmul.f32 %v8456_v22, %v2003_v48  ;;  %v6516_v18 = vmul.f32 %v8458_v35, %v8457_v24  ;;  %v8462_v5 = vld [vmem:[#allocation215_spill] sm:$0xff]  ;;  %v8464_v49 = vld [vmem:[#allocation80_spill] sm:$0xff]  ;;  %v8465_v35 = vld [vmem:[#allocation162_spill] sm:$0xff] }
 0x1d7   : > { %v2906_v20 = vsel %vm2898_vm15, %v2858_v25, 0.0  ;;  %vm1855_vm10 = vcmp.eq.s32.totalorder %v6444_v34, 1  ;;  %v2053_v8 = vsel %vm8460_vm3, %v5982_v26, 0.0  ;;  %v2037_v56 = vmul.f32 %v8461_v47, %v2028_v30  ;;  %v8463_v22 = vld [vmem:[#allocation87_spill] sm:$0xff] }
 0x1d8   : > { %8459 = vst [vmem:[#allocation44_spill] sm:$0xff] %v6516_v18  ;;  %v6523_v38 = vadd.f32 %v2906_v20, %v2651_v61  ;;  %v1790_v2 = vadd.f32 %v1782_v58, %v1765_v10  ;;  %v1995_v17 = vadd.f32 %v1987_v50, %v1970_v4  ;;  %v2062_v48 = vmul.f32 %v8462_v5, %v2053_v8  ;;  %v8466_v58 = vld [vmem:[#allocation176_spill] sm:$0xff]  ;;  %v8467_v8 = vld [vmem:[#allocation33_spill] sm:$0xff] }
 0x1d9   : > { %v1693_v24 = vadd.f32 %v8464_v49, %v8463_v22  ;;  %v1710_v9 = vmul.f32 %v8438_v28, %v8465_v35  ;;  %v1726_v25 = vsel %vm925_vm6, %v8425_v6, 0.0  ;;  %v1751_v61 = vsel %vm1039_vm2, %v8428_v15, 0.0  ;;  %v1322_v35 = vpop.permute.xlu1 %1321 }
 0x1da   : > { %v1815_v18 = vadd.f32 %v1807_v29, %v1790_v2  ;;  %v2020_v36 = vadd.f32 %v2012_v52, %v1995_v17  ;;  %v1735_v20 = vmul.f32 %v8440_v3, %v1726_v25  ;;  %v6540_v30 = vmul.f32 %v8467_v8, %v8466_v58  ;;  %v6548_v29 = vpop.permute.xlu2 %1145  ;;  %v8472_v25 = vld [vmem:[#allocation78_spill] sm:$0xff]  ;;  %v6557_v58 = vpop.permute.xlu0 %1031 }
 0x1db   : > { %v1718_v10 = vadd.f32 %v1710_v9, %v1693_v24  ;;  %v1760_v4 = vmul.f32 %v8446_v55, %v1751_v61  ;;  %vm8469_vm7 = vcmp.eq.s32.totalorder %v6334_v27, 1  ;;  %8470 = vst [vmem:[#allocation155_spill] sm:$0xff] %v6548_v29  ;;  %vm2110_vm1 = vcmp.eq.s32.totalorder %v2094_v0, 1  ;;  %v8471_v9 = vld [vmem:[#allocation85_spill] sm:$0xff]  ;;  %v8504_v55 = vld [vmem:[#allocation192_spill] sm:$0xff]  ;;  %v8505_v3 = vld [vmem:[#allocation62_spill] sm:$0xff] }
 0x1dc   : > { %8468 = vst [vmem:[#allocation115_spill] sm:$0xff] %v6540_v30  ;;  %v1776_v49 = vsel %vm8469_vm7, %v8430_v51, 0.0  ;;  %v1863_v52 = vsel %vm1855_vm10, %v1815_v18, 0.0  ;;  %v2045_v50 = vadd.f32 %v2037_v56, %v2020_v36  ;;  %v1801_v22 = vsel %vm7906_vm4, %v8431_v54, 0.0  ;;  %v8474_v18 = vld [vmem:[#allocation160_spill] sm:$0xff]  ;;  %vm8477_vm5 = vmmov %vm8469_vm7 }
 0x1dd   : > { %v1871_v2 = vadd.f32 %v1863_v52, %v6425_v45  ;;  %v1743_v17 = vadd.f32 %v1735_v20, %v1718_v10  ;;  %v1785_v24 = vmul.f32 %v8447_v60, %v1776_v49  ;;  %v747_v61 = vadd.f32 %v8472_v25, %v8471_v9  ;;  %8473 = vst [vmem:[#allocation45_spill] sm:$0xff] %v6557_v58  ;;  %v8475_v20 = vld [vmem:[#allocation36_spill] sm:$0xff] }
 0x1de   : > { %v2070_v34 = vadd.f32 %v2062_v48, %v2045_v50  ;;  %v853_v36 = vmul.f32 %v8397_v1, %v8474_v18  ;;  %v933_v56 = vsel %vm925_vm6, %v8252_v11, 0.0  ;;  %v1047_v45 = vsel %vm1039_vm2, %v5965_v40, 0.0  ;;  %v8478_v52 = vld [vmem:[#allocation60_spill] sm:$0xff]  ;;  %v8479_v50 = vld [vmem:[#allocation137_spill] sm:$0xff] }
 0x1df   : > { %v6568_v8 = vmul.f32 %v8475_v20, %v2721_v57  ;;  %v1768_v10 = vadd.f32 %v1760_v4, %v1743_v17  ;;  %v942_v49 = vmul.f32 %v5467_v39, %v933_v56  ;;  %v1161_v48 = vsel %vm8477_vm5, %v5973_v37, 0.0  ;;  %v8481_v58 = vld [vmem:[#allocation96_spill] sm:$0xff]  ;;  %v8483_v20 = vld [vmem:[#allocation154_spill] sm:$0xff] }
 0x1e0   : > { %vm8480_vm12 = vcmp.eq.s32.totalorder %v8479_v50, 1  ;;  %v2118_v25 = vsel %vm2110_vm1, %v2070_v34, 0.0  ;;  %v861_v18 = vadd.f32 %v853_v36, %v747_v61  ;;  %v1056_v30 = vmul.f32 %v8226_v12, %v1047_v45  ;;  %v8485_v36 = vld [vmem:[#allocation75_spill] sm:$0xff]  ;;  %v8487_v45 = vld [vmem:[#allocation6_spill] sm:$0xff]  ;;  %vm8496_vm1 = vmmov %vm8488_vm14 }
 0x1e1   : > { %8476 = vst [vmem:[#allocation116_spill] sm:$0xff] %v6568_v8  ;;  %v2216_v9 = vsel %vm8480_vm12, %v8478_v52, 0.0  ;;  %vm8482_vm0 = vmmov %vm8480_vm12  ;;  %v6582_v4 = vadd.f32 %v2118_v25, %v1871_v2  ;;  %v1793_v17 = vadd.f32 %v1785_v24, %v1768_v10  ;;  %v1810_v56 = vmul.f32 %v8372_v13, %v1801_v22  ;;  %v8484_v8 = vld [vmem:[#allocation182_spill] sm:$0xff] }
 0x1e2   : > { %v2742_v57 = vsel %vm8482_vm0, %v8481_v58, 0.0  ;;  %vm923_vm13 = vcmp.eq.s32.totalorder %v8483_v20, 1  ;;  %vm1037_vm15 = vcmp.eq.s32.totalorder %v8484_v8, 1  ;;  %v950_v29 = vadd.f32 %v942_v49, %v861_v18  ;;  %v8486_v58 = vld [vmem:[#allocation57_spill] sm:$0xff]  ;;  %v8489_v18 = vld [vmem:[#allocation92_spill] sm:$0xff]  ;;  %v8494_v13 = vld [vmem:[#allocation130_spill] sm:$0xff] }
 0x1e3   : > { %v1170_v0 = vmul.f32 %v5475_v44, %v1161_v48  ;;  %v1275_v61 = vsel %vm7906_vm4, %v5982_v26, 0.0  ;;  %v6591_v34 = vadd.f32 %v1810_v56, %v1793_v17  ;;  %v2208_v2 = vadd.f32 %v8486_v58, %v8485_v36  ;;  %v1848_v56 = vpop.permute.xlu2 %1847  ;;  %v8492_v58 = vld [vmem:[#allocation59_spill] sm:$0xff]  ;;  %vm8500_vm12 = vmmov %vm8453_vm11  ;;  %v8660_v20 = vld [vmem:[#allocation205_spill] sm:$0xff] }
 0x1e4   : > { %v2225_v24 = vmul.f32 %v8487_v45, %v2216_v9  ;;  %v2241_v22 = vsel %vm8488_vm14, %v8287_v59, 0.0  ;;  %vm1151_vm9 = vcmp.eq.s32.totalorder %v6390_v23, 1  ;;  %v1064_v10 = vadd.f32 %v1056_v30, %v950_v29  ;;  %v8491_v29 = vld [vmem:[#allocation77_spill] sm:$0xff]  ;;  %vm8502_vm0 = vmmov %vm8454_vm8 }
 0x1e5   : > { %v2250_v49 = vmul.f32 %v8389_v46, %v2241_v22  ;;  %v2266_v48 = vsel %vm8453_vm11, %v6151_v53, 0.0  ;;  %v2291_v52 = vsel %vm8454_vm8, %v6159_v43, 0.0  ;;  %vm1265_vm10 = vcmp.eq.s32.totalorder %v6496_v19, 1  ;;  %v6615_v53 = vpop.permute.xlu1 %1025  ;;  %v2357_v43 = vpop.permute.xlu0 %2356 }
 0x1e6   : > { %v1284_v9 = vmul.f32 %v5480_v16, %v1275_v61  ;;  %v2233_v25 = vadd.f32 %v2225_v24, %v2208_v2  ;;  %v2275_v17 = vmul.f32 %v8489_v18, %v2266_v48  ;;  %v1178_v36 = vadd.f32 %v1170_v0, %v1064_v10  ;;  %8493 = vst [vmem:[#allocation184_spill] sm:$0xff] %v6615_v53  ;;  %v8495_v2 = vld [vmem:[#allocation15_spill] sm:$0xff]  ;;  %v2920_v24 = vld [vmem:[%s7606_s4] sm:$0x1]  ;;  %v8497_v10 = vld [vmem:[#allocation113_spill] sm:$0xff] }
 0x1e7   : > { %vm1332_vm3 = vcmp.eq.s32.totalorder %v1322_v35, 1  ;;  %vm8490_vm7 = vcmp.eq.s32.totalorder %v6230_v14, 1  ;;  %v2734_v22 = vadd.f32 %v8492_v58, %v8491_v29  ;;  %v2300_v60 = vmul.f32 %v8494_v13, %v2291_v52  ;;  %v8498_v29 = vld [vmem:[#allocation191_spill] sm:$0xff]  ;;  %v8499_v53 = vld [vmem:[#allocation37_spill] sm:$0xff] }
 0x1e8   : > { %v2316_v30 = vsel %vm8490_vm7, %v8414_v31, 0.0  ;;  %v2258_v59 = vadd.f32 %v2250_v49, %v2233_v25  ;;  %v2751_v61 = vmul.f32 %v8424_v41, %v2742_v57  ;;  %v2767_v0 = vsel %vm8496_vm1, %v8495_v2, 0.0  ;;  %v8501_v52 = vld [vmem:[#allocation203_spill] sm:$0xff]  ;;  %v8503_v41 = vld [vmem:[#allocation185_spill] sm:$0xff] }
 0x1e9   : > { %vm924_vm5 = vcmp.eq.s32.totalorder %v8497_v10, 1  ;;  %v1292_v48 = vadd.f32 %v1284_v9, %v1178_v36  ;;  %v2776_v58 = vmul.f32 %v8498_v29, %v2767_v0  ;;  %v2792_v49 = vsel %vm8500_vm12, %v8499_v53, 0.0 }
 0x1ea   : > { %v2817_v57 = vsel %vm8502_vm0, %v8501_v52, 0.0  ;;  %v2283_v25 = vadd.f32 %v2275_v17, %v2258_v59  ;;  %v2325_v31 = vmul.f32 %v8503_v41, %v2316_v30  ;;  %v2759_v26 = vadd.f32 %v2751_v61, %v2734_v22  ;;  %v8507_v59 = vld [vmem:[#allocation19_spill] sm:$0xff]  ;;  %v8508_v17 = vld [vmem:[#allocation144_spill] sm:$0xff]  ;;  %v8510_v61 = vld [vmem:[#allocation42_spill] sm:$0xff] }
 0x1eb   : > { %v2801_v5 = vmul.f32 %v8504_v55, %v2792_v49  ;;  %vm1858_vm14 = vcmp.eq.s32.totalorder %v1848_v56, 1  ;;  %v1340_v37 = vsel %vm1332_vm3, %v1292_v48, 0.0  ;;  %vm2373_vm11 = vcmp.eq.s32.totalorder %v2357_v43, 1  ;;  %v8509_v22 = vld [vmem:[#allocation99_spill] sm:$0xff]  ;;  %v8511_v55 = vld [vmem:[#allocation10_spill] sm:$0xff]  ;;  %v8533_v56 = vld [vmem:[#allocation89_spill] sm:$0xff] }
 0x1ec   : > { %v2921_v9 = vunpack.c.l.bf16 %v2920_v24  ;;  %v6637_v36 = vadd.f32 %v6489_v33, %v1340_v37  ;;  %v2308_v0 = vadd.f32 %v2300_v60, %v2283_v25  ;;  %v2784_v29 = vadd.f32 %v2776_v58, %v2759_v26  ;;  %v8512_v33 = vld [vmem:[#allocation183_spill] sm:$0xff]  ;;  %v8513_v60 = vld [vmem:[#allocation106_spill] sm:$0xff] }
 0x1ed   : > { %v2826_v40 = vmul.f32 %v8505_v3, %v2817_v57  ;;  %vm7897_vm8 = vcmask 261120   ;;  %v1428_v30 = vadd.f32 %v8508_v17, %v8507_v59  ;;  %v1445_v49 = vmul.f32 %v8510_v61, %v8509_v22  ;;  %v8515_v57 = vld [vmem:[#allocation4_spill] sm:$0xff]  ;;  %v8518_v17 = vld [vmem:[#allocation9_spill] sm:$0xff] }
 0x1ee   : > { %v6640_v28 = vperm.slane %v2921_v9, 0  ;;  %v2333_v35 = vadd.f32 %v2325_v31, %v2308_v0  ;;  %v2809_v48 = vadd.f32 %v2801_v5, %v2784_v29  ;;  %v1461_v37 = vsel %vm923_vm13, %v8511_v55, 0.0  ;;  %v8516_v9 = vld [vmem:[#allocation199_spill] sm:$0xff]  ;;  %v8517_v29 = vld [vmem:[#allocation8_spill] sm:$0xff] }
 0x1ef   : > { %v1486_v26 = vsel %vm1037_vm15, %v8512_v33, 0.0  ;;  %v1453_v58 = vadd.f32 %v1445_v49, %v1428_v30  ;;  %v1470_v25 = vmul.f32 %v8515_v57, %v1461_v37  ;;  %v1511_v0 = vsel %vm1151_vm9, %v8517_v29, 0.0  ;;  %v8519_v37 = vld [vmem:[#allocation200_spill] sm:$0xff]  ;;  %v1579_v29 = vpop.permute.xlu1 %1578 }
 0x1f0   : > { %8506 = vst [vmem:[#allocation135_spill] sm:$0xff] %v6640_v28  ;;  %v6654_v24 = vadd.f32 %v6640_v28, %v8513_v60  ;;  %v1495_v59 = vmul.f32 %v8516_v9, %v1486_v26  ;;  %v2381_v31 = vsel %vm2373_vm11, %v2333_v35, 0.0  ;;  %v6659_v5 = vadd.f32 %v2826_v40, %v2809_v48  ;;  %v8520_v35 = vld [vmem:[#allocation97_spill] sm:$0xff]  ;;  %v8522_v48 = vld [vmem:[#allocation168_spill] sm:$0xff] }
 0x1f1   : > { %v1536_v22 = vsel %vm1265_vm10, %v8518_v17, 0.0  ;;  %v6668_v60 = vadd.f32 %v2381_v31, %v6582_v4  ;;  %v1478_v49 = vadd.f32 %v1470_v25, %v1453_v58  ;;  %v1520_v43 = vmul.f32 %v8519_v37, %v1511_v0  ;;  %v8524_v17 = vld [vmem:[#allocation201_spill] sm:$0xff]  ;;  %v8525_v4 = vld [vmem:[#allocation18_spill] sm:$0xff]  ;;  %v8526_v31 = vld [vmem:[#allocation143_spill] sm:$0xff] }
 0x1f2   : > { %8514 = vst [vmem:[#allocation190_spill] sm:$0xff] %v6654_v24  ;;  %v2935_v30 = vsel %vm7897_vm8, %v6654_v24, 0.0  ;;  %vm8521_vm3 = vcmp.eq.s32.totalorder %v8479_v50, 1  ;;  %v6678_v26 = vmul.f32 %v8510_v61, %v8522_v48  ;;  %v1545_v33 = vmul.f32 %v8524_v17, %v1536_v22  ;;  %v8527_v24 = vld [vmem:[#allocation98_spill] sm:$0xff]  ;;  %v8528_v25 = vld [vmem:[#allocation12_spill] sm:$0xff]  ;;  %v8529_v0 = vld [vmem:[#allocation193_spill] sm:$0xff] }
 0x1f3   : > { %v2479_v40 = vsel %vm8521_vm3, %v8520_v35, 0.0  ;;  %2936 = vadd.xlane.f32.xlu2 %v2935_v30  ;;  %v745_v55 = vadd.f32 %v8526_v31, %v8525_v4  ;;  %v1503_v9 = vadd.f32 %v1495_v59, %v1478_v49  ;;  %v851_v58 = vmul.f32 %v8397_v1, %v8527_v24  ;;  %v6700_v59 = vpop.permute.xlu2 %1259  ;;  %v8531_v49 = vld [vmem:[#allocation217_spill] sm:$0xff]  ;;  %v1316_v31 = vpop.permute.xlu0 %1315  ;;  %v8532_v17 = vld [vmem:[#allocation218_spill] sm:$0xff] }
 0x1f4   : > { %8523 = vst [vmem:[#allocation107_spill] sm:$0xff] %v6678_v26  ;;  %v931_v50 = vsel %vm923_vm13, %v8528_v25, 0.0  ;;  %v1045_v35 = vsel %vm1037_vm15, %v8529_v0, 0.0  ;;  %v6694_v30 = vsel %vm924_vm5, %v8252_v11, 0.0  ;;  %v6698_v22 = vsel %vm1858_vm14, %v6591_v34, 0.0  ;;  %v8534_v1 = vld [vmem:[#allocation82_spill] sm:$0xff] }
 0x1f5   : > { %8530 = vst [vmem:[#allocation133_spill] sm:$0xff] %v6694_v30  ;;  %v940_v24 = vmul.f32 %v5467_v39, %v931_v50  ;;  %v1159_v48 = vsel %vm1151_vm9, %v8531_v49, 0.0  ;;  %v1528_v4 = vadd.f32 %v1520_v43, %v1503_v9  ;;  %vm1593_vm7 = vcmp.eq.s32.totalorder %v1579_v29, 1  ;;  %v8535_v50 = vld [vmem:[#allocation164_spill] sm:$0xff] }
 0x1f6   : > { %v859_v26 = vadd.f32 %v851_v58, %v745_v55  ;;  %v1054_v10 = vmul.f32 %v8226_v12, %v1045_v35  ;;  %v1168_v30 = vmul.f32 %v5475_v44, %v1159_v48  ;;  %v1273_v34 = vsel %vm1265_vm10, %v8532_v17, 0.0  ;;  %v8536_v9 = vld [vmem:[#allocation16_spill] sm:$0xff]  ;;  %v8538_v12 = vld [vmem:[#allocation61_spill] sm:$0xff]  ;;  %v8546_v17 = vld [vmem:[#allocation58_spill] sm:$0xff] }
 0x1f7   : > { %v2211_v37 = vadd.f32 %v8534_v1, %v8533_v56  ;;  %v2228_v39 = vmul.f32 %v8487_v45, %v8535_v50  ;;  %v1553_v57 = vadd.f32 %v1545_v33, %v1528_v4  ;;  %v2244_v55 = vsel %vm925_vm6, %v8536_v9, 0.0  ;;  %v8537_v43 = vld [vmem:[#allocation188_spill] sm:$0xff]  ;;  %v8540_v56 = vld [vmem:[#allocation205_spill] sm:$0xff] }
 0x1f8   : > { %v948_v61 = vadd.f32 %v940_v24, %v859_v26  ;;  %v2269_v58 = vsel %vm1039_vm2, %v8537_v43, 0.0  ;;  %v2253_v48 = vmul.f32 %v8389_v46, %v2244_v55  ;;  %vm8539_vm1 = vcmp.eq.s32.totalorder %v6334_v27, 1  ;;  %v8544_v43 = vld [vmem:[#allocation216_spill] sm:$0xff] }
 0x1f9   : > { %v2236_v35 = vadd.f32 %v2228_v39, %v2211_v37  ;;  %v2278_v44 = vmul.f32 %v8489_v18, %v2269_v58  ;;  %v2294_v1 = vsel %vm8539_vm1, %v8538_v12, 0.0  ;;  %vm8541_vm12 = vcmp.eq.s32.totalorder %v6230_v14, 1  ;;  %v8542_v37 = vld [vmem:[#allocation41_spill] sm:$0xff]  ;;  %v8545_v9 = vld [vmem:[#allocation76_spill] sm:$0xff] }
 0x1fa   : > { %v2842_v33 = vsel %vm8541_vm12, %v8540_v56, 0.0  ;;  %v1062_v26 = vadd.f32 %v1054_v10, %v948_v61  ;;  %v1282_v24 = vmul.f32 %v5480_v16, %v1273_v34  ;;  %vm1330_vm0 = vcmp.eq.s32.totalorder %v1316_v31, 1  ;;  %v8547_v61 = vld [vmem:[#allocation108_spill] sm:$0xff] }
 0x1fb   : > { %v1601_v4 = vsel %vm1593_vm7, %v1553_v57, 0.0  ;;  %v2261_v50 = vadd.f32 %v2253_v48, %v2236_v35  ;;  %v2303_v39 = vmul.f32 %v8494_v13, %v2294_v1  ;;  %v6734_v55 = vadd.f32 %v6640_v28, %v8542_v37  ;;  %v8550_v1 = vld [vmem:[#allocation207_spill] sm:$0xff]  ;;  %v6753_v37 = vpop.permute.xlu1 %1139  ;;  %vm8553_vm7 = vmmov %vm8541_vm12 }
 0x1fc   : > { %v1176_v58 = vadd.f32 %v1168_v30, %v1062_v26  ;;  %v2319_v12 = vsel %vm7906_vm4, %v8544_v43, 0.0  ;;  %v2471_v10 = vadd.f32 %v8546_v17, %v8545_v9  ;;  %v2488_v34 = vmul.f32 %v8547_v61, %v2479_v40  ;;  %v8551_v17 = vld [vmem:[#allocation111_spill] sm:$0xff]  ;;  %v2883_v40 = vpop.permute.xlu2 %2882 }
 0x1fd   : > { %8543 = vst [vmem:[#allocation114_spill] sm:$0xff] %v6734_v55  ;;  %v2286_v16 = vadd.f32 %v2278_v44, %v2261_v50  ;;  %v2932_v57 = vsel %vm7897_vm8, %v6734_v55, 0.0  ;;  %vm8548_vm14 = vcmp.eq.s32.totalorder %v8359_v21, 1  ;;  %vm8549_vm11 = vcmp.eq.s32.totalorder %v8392_v42, 1  ;;  %v8557_v55 = vld [vmem:[#allocation147_spill] sm:$0xff] }
 0x1fe   : > { %v2504_v29 = vsel %vm8548_vm14, %v8425_v6, 0.0  ;;  %v2529_v30 = vsel %vm8549_vm11, %v8428_v15, 0.0  ;;  %v1290_v35 = vadd.f32 %v1282_v24, %v1176_v58  ;;  %2933 = vadd.xlane.f32.xlu1 %v2932_v57  ;;  %v2496_v48 = vadd.f32 %v2488_v34, %v2471_v10  ;;  %v2620_v58 = vpop.permute.xlu0 %2619  ;;  %v8554_v34 = vld [vmem:[#allocation109_spill] sm:$0xff] }
 0x1ff   : > { %v2513_v26 = vmul.f32 %v8550_v1, %v2504_v29  ;;  %v2538_v9 = vmul.f32 %v8551_v17, %v2529_v30  ;;  %v2311_v44 = vadd.f32 %v2303_v39, %v2286_v16  ;;  %v2328_v50 = vmul.f32 %v8503_v41, %v2319_v12  ;;  %v8555_v29 = vld [vmem:[#allocation186_spill] sm:$0xff] }
 0x200   : > { %vm8552_vm3 = vcmp.eq.s32.totalorder %v8384_v63, 1  ;;  %v2579_v42 = vsel %vm8553_vm7, %v8431_v54, 0.0  ;;  %v1338_v24 = vsel %vm1330_vm0, %v1290_v35, 0.0  ;;  %v8556_v30 = vld [vmem:[#allocation22_spill] sm:$0xff]  ;;  %v2242_v31 = vsel %vm923_vm13, %v8425_v6, 0.0 }
 0x201   : > { %v2554_v21 = vsel %vm8552_vm3, %v8430_v51, 0.0  ;;  %v2521_v10 = vadd.f32 %v2513_v26, %v2496_v48  ;;  %v2588_v16 = vmul.f32 %v8555_v29, %v2579_v42  ;;  %v6764_v39 = vadd.f32 %v1601_v4, %v1338_v24  ;;  %v8558_v17 = vld [vmem:[#allocation102_spill] sm:$0xff]  ;;  %v8559_v48 = vld [vmem:[#allocation40_spill] sm:$0xff] }
 0x202   : > { %v2563_v57 = vmul.f32 %v8554_v34, %v2554_v21  ;;  %v6766_v12 = vadd.f32 %v2328_v50, %v2311_v44  ;;  %v2209_v63 = vadd.f32 %v8557_v55, %v8556_v30  ;;  %v2226_v1 = vmul.f32 %v8487_v45, %v8558_v17  ;;  %v8561_v30 = vld [vmem:[#allocation88_spill] sm:$0xff] }
 0x203   : > { %v2546_v14 = vadd.f32 %v2538_v9, %v2521_v10  ;;  %v2267_v35 = vsel %vm1037_vm15, %v8428_v15, 0.0  ;;  %v2292_v4 = vsel %vm1151_vm9, %v8430_v51, 0.0  ;;  %v2851_v26 = vmul.f32 %v8559_v48, %v2842_v33 }
 0x204   : > { %v2234_v44 = vadd.f32 %v2226_v1, %v2209_v63  ;;  %v2251_v55 = vmul.f32 %v8389_v46, %v2242_v31  ;;  %v2276_v17 = vmul.f32 %v8489_v18, %v2267_v35  ;;  %vm2636_vm1 = vcmp.eq.s32.totalorder %v2620_v58, 1  ;;  %v8563_v63 = vld [vmem:[#allocation163_spill] sm:$0xff]  ;;  %v8578_v18 = vld [vmem:[#allocation209_spill] sm:$0xff] }
 0x205   : > { %v2571_v9 = vadd.f32 %v2563_v57, %v2546_v14  ;;  %v2301_v50 = vmul.f32 %v8494_v13, %v2292_v4  ;;  %v2317_v21 = vsel %vm1265_vm10, %v8431_v54, 0.0  ;;  %v6791_v10 = vadd.f32 %v6640_v28, %v6523_v38  ;;  %v8562_v57 = vld [vmem:[#allocation81_spill] sm:$0xff]  ;;  %v8564_v14 = vld [vmem:[#allocation211_spill] sm:$0xff]  ;;  %v8565_v38 = vld [vmem:[#allocation212_spill] sm:$0xff] }
 0x206   : > { %v2259_v42 = vadd.f32 %v2251_v55, %v2234_v44  ;;  %v2326_v24 = vmul.f32 %v8503_v41, %v2317_v21  ;;  %v1874_v33 = vadd.f32 %v6698_v22, %v6637_v36  ;;  %v1948_v58 = vadd.f32 %v8562_v57, %v8561_v30  ;;  %v8582_v46 = vld [vmem:[#allocation45_spill] sm:$0xff] }
 0x207   : > { %8560 = vst [vmem:[#allocation93_spill] sm:$0xff] %v6791_v10  ;;  %v2596_v1 = vadd.f32 %v2588_v16, %v2571_v9  ;;  %v1965_v31 = vmul.f32 %v8564_v14, %v8563_v63  ;;  %v1981_v35 = vsel %vm925_vm6, %v8495_v2, 0.0  ;;  %v2938_v44 = vsel %vm7897_vm8, %v6791_v10, 0.0  ;;  %v8566_v9 = vld [vmem:[#allocation213_spill] sm:$0xff] }
 0x208   : > { %v2284_v4 = vadd.f32 %v2276_v17, %v2259_v42  ;;  %v1990_v55 = vmul.f32 %v8565_v38, %v1981_v35  ;;  %v2006_v36 = vsel %vm1039_vm2, %v8499_v53, 0.0  ;;  %2939 = vadd.xlane.f32.xlu0 %v2938_v44  ;;  %vm8567_vm12 = vcmp.eq.s32.totalorder %v6334_v27, 1  ;;  %v6813_v42 = vpop.permute.xlu2 %2365  ;;  %v2103_v35 = vpop.permute.xlu1 %2102  ;;  %v8568_v44 = vld [vmem:[#allocation20_spill] sm:$0xff]  ;;  %v8585_v53 = vld [vmem:[#allocation101_spill] sm:$0xff] }
 0x209   : > { %v2644_v22 = vsel %vm2636_vm1, %v2596_v1, 0.0  ;;  %v1973_v16 = vadd.f32 %v1965_v31, %v1948_v58  ;;  %v2015_v21 = vmul.f32 %v8566_v9, %v2006_v36  ;;  %v2031_v30 = vsel %vm8567_vm12, %v8501_v52, 0.0  ;;  %v1842_v31 = vpop.permute.xlu0 %1841  ;;  %v8569_v36 = vld [vmem:[#allocation145_spill] sm:$0xff]  ;;  %v8577_v52 = vld [vmem:[#allocation95_spill] sm:$0xff] }
 0x20a   : > { %v2859_v17 = vadd.f32 %v2851_v26, %v6659_v5  ;;  %vm2899_vm0 = vcmp.eq.s32.totalorder %v2883_v40, 1  ;;  %v2652_v57 = vadd.f32 %v2644_v22, %v6668_v60  ;;  %v2309_v63 = vadd.f32 %v2301_v50, %v2284_v4  ;;  %v8570_v5 = vld [vmem:[#allocation100_spill] sm:$0xff]  ;;  %v8571_v40 = vld [vmem:[#allocation43_spill] sm:$0xff]  ;;  %v8572_v50 = vld [vmem:[#allocation153_spill] sm:$0xff] }
 0x20b   : > { %v1998_v10 = vadd.f32 %v1990_v55, %v1973_v16  ;;  %v2040_v1 = vmul.f32 %v8461_v47, %v2031_v30  ;;  %v2056_v58 = vsel %vm7906_vm4, %v8540_v56, 0.0  ;;  %v1691_v41 = vadd.f32 %v8569_v36, %v8568_v44  ;;  %v8573_v16 = vld [vmem:[#allocation5_spill] sm:$0xff]  ;;  %v8574_v56 = vld [vmem:[#allocation159_spill] sm:$0xff] }
 0x20c   : > { %v6822_v13 = vadd.f32 %v2326_v24, %v2309_v63  ;;  %v1708_v26 = vmul.f32 %v8571_v40, %v8570_v5  ;;  %v1724_v60 = vsel %vm923_vm13, %v8252_v11, 0.0  ;;  %v1749_v4 = vsel %vm1037_vm15, %v8572_v50, 0.0  ;;  %v8575_v63 = vld [vmem:[#allocation215_spill] sm:$0xff]  ;;  %v8576_v5 = vld [vmem:[#allocation208_spill] sm:$0xff] }
 0x20d   : > { %v2907_v55 = vsel %vm2899_vm0, %v2859_v17, 0.0  ;;  %v2023_v22 = vadd.f32 %v2015_v21, %v1998_v10  ;;  %v1733_v30 = vmul.f32 %v8573_v16, %v1724_v60  ;;  %v1774_v24 = vsel %vm1151_vm9, %v8574_v56, 0.0  ;;  %v8579_v10 = vld [vmem:[#allocation210_spill] sm:$0xff]  ;;  %v8580_v60 = vld [vmem:[#allocation132_spill] sm:$0xff]  ;;  %v8581_v16 = vld [vmem:[#allocation155_spill] sm:$0xff] }
 0x20e   : > { %v2065_v44 = vmul.f32 %v8575_v63, %v2056_v58  ;;  %v1716_v36 = vadd.f32 %v1708_v26, %v1691_v41  ;;  %v1758_v40 = vmul.f32 %v8576_v5, %v1749_v4  ;;  %v1799_v11 = vsel %vm1265_vm10, %v8577_v52, 0.0  ;;  %v8583_v26 = vld [vmem:[#allocation21_spill] sm:$0xff]  ;;  %v8584_v4 = vld [vmem:[#allocation146_spill] sm:$0xff] }
 0x20f   : > { %v2048_v29 = vadd.f32 %v2040_v1, %v2023_v22  ;;  %vm2113_vm14 = vcmp.eq.s32.totalorder %v2103_v35, 1  ;;  %v1783_v17 = vmul.f32 %v8578_v18, %v1774_v24  ;;  %v1808_v21 = vmul.f32 %v8579_v10, %v1799_v11  ;;  %v8586_v22 = vld [vmem:[#allocation13_spill] sm:$0xff]  ;;  %v8588_v18 = vld [vmem:[#allocation131_spill] sm:$0xff] }
 0x210   : > { %vm926_vm11 = vcmp.eq.s32.totalorder %v8580_v60, 1  ;;  %vm1154_vm3 = vcmp.eq.s32.totalorder %v8581_v16, 1  ;;  %vm7913_vm7 = vcmp.eq.s32.totalorder %v8582_v46, 1  ;;  %v1741_v58 = vadd.f32 %v1733_v30, %v1716_v36  ;;  %v8587_v11 = vld [vmem:[#allocation105_spill] sm:$0xff]  ;;  %v6869_v45 = vpop.permute.xlu2 %2359  ;;  %v8732_v16 = vld [vmem:[#allocation218_spill] sm:$0xff] }
 0x211   : > { %v2915_v41 = vadd.f32 %v2907_v55, %v2652_v57  ;;  %v1946_v5 = vadd.f32 %v8584_v4, %v8583_v26  ;;  %v1963_v2 = vmul.f32 %v8564_v14, %v8585_v53  ;;  %v2073_v1 = vadd.f32 %v2065_v44, %v2048_v29  ;;  %v8590_v4 = vld [vmem:[#allocation110_spill] sm:$0xff] }
 0x212   : > { %v1979_v24 = vsel %vm923_vm13, %v8586_v22, 0.0  ;;  %v2004_v10 = vsel %vm1037_vm15, %v8587_v11, 0.0  ;;  %v2029_v30 = vsel %vm1151_vm9, %v8588_v18, 0.0  ;;  %v1766_v57 = vadd.f32 %v1758_v40, %v1741_v58 }
 0x213   : > { %v6860_v55 = vadd.f32 %v6640_v28, %v2915_v41  ;;  %v1971_v36 = vadd.f32 %v1963_v2, %v1946_v5  ;;  %v1988_v53 = vmul.f32 %v8565_v38, %v1979_v24  ;;  %v2121_v29 = vsel %vm2113_vm14, %v2073_v1, 0.0  ;;  %v2097_v5 = vpop.permute.xlu1 %2096  ;;  %v8591_v41 = vld [vmem:[#allocation91_spill] sm:$0xff]  ;;  %v8592_v1 = vld [vmem:[#allocation84_spill] sm:$0xff]  ;;  %v8621_v28 = vld [vmem:[#allocation61_spill] sm:$0xff] }
 0x214   : > { %v2013_v44 = vmul.f32 %v8566_v9, %v2004_v10  ;;  %v2038_v26 = vmul.f32 %v8461_v47, %v2029_v30  ;;  %v2054_v14 = vsel %vm1265_vm10, %v8590_v4, 0.0  ;;  %v6871_v34 = vadd.f32 %v2121_v29, %v1874_v33  ;;  %v6877_v10 = vpop.permute.xlu0 %1253  ;;  %v8593_v29 = vld [vmem:[#allocation166_spill] sm:$0xff]  ;;  %v8600_v47 = vld [vmem:[#allocation157_spill] sm:$0xff] }
 0x215   : > { %8589 = vst [vmem:[#allocation179_spill] sm:$0xff] %v6860_v55  ;;  %v1791_v40 = vadd.f32 %v1783_v17, %v1766_v57  ;;  %v2941_v2 = vsel %vm7897_vm8, %v6860_v55, 0.0  ;;  %v1996_v58 = vadd.f32 %v1988_v53, %v1971_v36  ;;  %vm7924_vm1 = vcmp.eq.s32.totalorder %v6700_v59, 1  ;;  %v8594_v17 = vld [vmem:[#allocation152_spill] sm:$0xff]  ;;  %v8598_v55 = vld [vmem:[#allocation218_spill] sm:$0xff] }
 0x216   : > { %vm1856_vm12 = vcmp.eq.s32.totalorder %v1842_v31, 1  ;;  %2942 = vadd.xlane.f32.xlu2 %v2941_v2  ;;  %v2063_v35 = vmul.f32 %v8575_v63, %v2054_v14  ;;  %v2737_v24 = vadd.f32 %v8592_v1, %v8591_v41  ;;  %v2754_v57 = vmul.f32 %v8594_v17, %v8593_v29  ;;  %v8595_v31 = vld [vmem:[#allocation191_spill] sm:$0xff]  ;;  %v8599_v63 = vld [vmem:[#allocation69_spill] sm:$0xff] }
 0x217   : > { %v1816_v30 = vadd.f32 %v1808_v21, %v1791_v40  ;;  %v2021_v33 = vadd.f32 %v2013_v44, %v1996_v58  ;;  %v2770_v36 = vsel %vm925_vm6, %v8528_v25, 0.0  ;;  %vm2376_vm0 = vcmp.eq.s32.totalorder %v6813_v42, 1  ;;  %v8597_v58 = vld [vmem:[#allocation192_spill] sm:$0xff] }
 0x218   : > { %v2779_v53 = vmul.f32 %v8595_v31, %v2770_v36  ;;  %v2795_v14 = vsel %vm1039_vm2, %v8529_v0, 0.0  ;;  %vm8596_vm14 = vcmp.eq.s32.totalorder %v6334_v27, 1  ;;  %v2762_v2 = vadd.f32 %v2754_v57, %v2737_v24  ;;  %v8604_v42 = vld [vmem:[#allocation184_spill] sm:$0xff] }
 0x219   : > { %v2820_v21 = vsel %vm8596_vm14, %v8531_v49, 0.0  ;;  %v1864_v44 = vsel %vm1856_vm12, %v1816_v30, 0.0  ;;  %v2046_v40 = vadd.f32 %v2038_v26, %v2021_v33  ;;  %v2804_v41 = vmul.f32 %v8597_v58, %v2795_v14  ;;  %v8601_v49 = vld [vmem:[#allocation120_spill] sm:$0xff]  ;;  %v8602_v30 = vld [vmem:[#allocation42_spill] sm:$0xff]  ;;  %v8605_v14 = vld [vmem:[#allocation199_spill] sm:$0xff] }
 0x21a   : > { %v1872_v1 = vadd.f32 %v1864_v44, %v6764_v39  ;;  %vm2111_vm8 = vcmp.eq.s32.totalorder %v2097_v5, 1  ;;  %v2829_v29 = vmul.f32 %v8505_v3, %v2820_v21  ;;  %v2845_v36 = vsel %vm7906_vm4, %v8598_v55, 0.0  ;;  %v8603_v33 = vld [vmem:[#allocation4_spill] sm:$0xff] }
 0x21b   : > { %v2071_v25 = vadd.f32 %v2063_v35, %v2046_v40  ;;  %v2787_v0 = vadd.f32 %v2779_v53, %v2762_v2  ;;  %v1431_v9 = vadd.f32 %v8600_v47, %v8599_v63  ;;  %v1448_v26 = vmul.f32 %v8602_v30, %v8601_v49  ;;  %v1588_v44 = vpop.permute.xlu1 %1587  ;;  %v8606_v2 = vld [vmem:[#allocation200_spill] sm:$0xff] }
 0x21c   : > { %v6907_v24 = vsel %vm2376_vm0, %v6766_v12, 0.0  ;;  %v1464_v39 = vsel %vm926_vm11, %v8425_v6, 0.0  ;;  %v1489_v5 = vsel %vm7913_vm7, %v8428_v15, 0.0  ;;  %v1514_v47 = vsel %vm1154_vm3, %v8430_v51, 0.0  ;;  %v8607_v30 = vld [vmem:[#allocation68_spill] sm:$0xff] }
 0x21d   : > { %v2119_v63 = vsel %vm2111_vm8, %v2071_v25, 0.0  ;;  %v2812_v35 = vadd.f32 %v2804_v41, %v2787_v0  ;;  %v1456_v49 = vadd.f32 %v1448_v26, %v1431_v9  ;;  %v1473_v57 = vmul.f32 %v8603_v33, %v1464_v39  ;;  %v6929_v0 = vpop.permute.xlu2 %1581  ;;  %v1325_v39 = vpop.permute.xlu0 %1324  ;;  %v8613_v51 = vld [vmem:[#allocation196_spill] sm:$0xff] }
 0x21e   : > { %vm1038_vm12 = vcmp.eq.s32.totalorder %v8604_v42, 1  ;;  %vm1152_vm0 = vcmp.eq.s32.totalorder %v6753_v37, 1  ;;  %v6921_v12 = vadd.f32 %v2119_v63, %v1872_v1  ;;  %vm1266_vm14 = vcmp.eq.s32.totalorder %v6877_v10, 1  ;;  %v8608_v1 = vld [vmem:[#allocation156_spill] sm:$0xff]  ;;  %v8610_v63 = vld [vmem:[#allocation3_spill] sm:$0xff] }
 0x21f   : > { %v2854_v53 = vmul.f32 %v8559_v48, %v2845_v36  ;;  %v1498_v21 = vmul.f32 %v8605_v14, %v1489_v5  ;;  %v1539_v25 = vsel %vm7924_vm1, %v8431_v54, 0.0  ;;  %v2837_v9 = vadd.f32 %v2829_v29, %v2812_v35  ;;  %v8609_v36 = vld [vmem:[#allocation119_spill] sm:$0xff] }
 0x220   : > { %v1481_v40 = vadd.f32 %v1473_v57, %v1456_v49  ;;  %v1523_v41 = vmul.f32 %v8606_v2, %v1514_v47  ;;  %v748_v26 = vadd.f32 %v8608_v1, %v8607_v30  ;;  %vm2374_vm8 = vcmp.eq.s32.totalorder %v6869_v45, 1  ;;  %v8611_v57 = vld [vmem:[#allocation201_spill] sm:$0xff]  ;;  %v8612_v1 = vld [vmem:[#allocation195_spill] sm:$0xff] }
 0x221   : > { %v854_v5 = vmul.f32 %v8610_v63, %v8609_v36  ;;  %v934_v55 = vsel %vm926_vm11, %v8586_v22, 0.0  ;;  %v1048_v29 = vsel %vm7913_vm7, %v8587_v11, 0.0  ;;  %v1162_v47 = vsel %vm1154_vm3, %v8588_v18, 0.0  ;;  %v8614_v22 = vld [vmem:[#allocation197_spill] sm:$0xff]  ;;  %v8615_v18 = vld [vmem:[#allocation24_spill] sm:$0xff] }
 0x222   : > { %v6946_v35 = vadd.f32 %v2854_v53, %v2837_v9  ;;  %v1506_v49 = vadd.f32 %v1498_v21, %v1481_v40  ;;  %v1548_v30 = vmul.f32 %v8611_v57, %v1539_v25  ;;  %v943_v54 = vmul.f32 %v8612_v1, %v934_v55  ;;  %v8616_v53 = vld [vmem:[#allocation149_spill] sm:$0xff]  ;;  %v8617_v40 = vld [vmem:[#allocation104_spill] sm:$0xff] }
 0x223   : > { %vm1596_vm4 = vcmp.eq.s32.totalorder %v1588_v44, 1  ;;  %v862_v36 = vadd.f32 %v854_v5, %v748_v26  ;;  %v1057_v15 = vmul.f32 %v8613_v51, %v1048_v29  ;;  %v1276_v6 = vsel %vm7924_vm1, %v8590_v4, 0.0  ;;  %v8618_v55 = vld [vmem:[#allocation16_spill] sm:$0xff] }
 0x224   : > { %v1531_v11 = vadd.f32 %v1523_v41, %v1506_v49  ;;  %v1171_v38 = vmul.f32 %v8614_v22, %v1162_v47  ;;  %vm1333_vm7 = vcmp.eq.s32.totalorder %v1325_v39, 1  ;;  %v2735_v9 = vadd.f32 %v8616_v53, %v8615_v18  ;;  %v8619_v5 = vld [vmem:[#allocation188_spill] sm:$0xff]  ;;  %v8620_v41 = vld [vmem:[#allocation198_spill] sm:$0xff] }
 0x225   : > { %v951_v21 = vadd.f32 %v943_v54, %v862_v36  ;;  %v2752_v25 = vmul.f32 %v8594_v17, %v8617_v40  ;;  %v2768_v26 = vsel %vm923_vm13, %v8618_v55, 0.0  ;;  %v2793_v29 = vsel %vm1037_vm15, %v8619_v5, 0.0 }
 0x226   : > { %v1556_v4 = vadd.f32 %v1548_v30, %v1531_v11  ;;  %v1285_v49 = vmul.f32 %v8620_v41, %v1276_v6  ;;  %v2777_v47 = vmul.f32 %v8595_v31, %v2768_v26  ;;  %v2818_v54 = vsel %vm1151_vm9, %v8621_v28, 0.0  ;;  %v8622_v30 = vld [vmem:[#allocation25_spill] sm:$0xff]  ;;  %v8623_v26 = vld [vmem:[#allocation134_spill] sm:$0xff]  ;;  %v8624_v28 = vld [vmem:[#allocation167_spill] sm:$0xff] }
 0x227   : > { %v1065_v18 = vadd.f32 %v1057_v15, %v951_v21  ;;  %v2760_v36 = vadd.f32 %v2752_v25, %v2735_v9  ;;  %v2802_v53 = vmul.f32 %v8597_v58, %v2793_v29  ;;  %v2843_v40 = vsel %vm1265_vm10, %v8544_v43, 0.0  ;;  %v8625_v9 = vld [vmem:[#allocation10_spill] sm:$0xff]  ;;  %v2892_v29 = vpop.permute.xlu2 %2891 }
 0x228   : > { %v1604_v55 = vsel %vm1596_vm4, %v1556_v4, 0.0  ;;  %v2827_v11 = vmul.f32 %v8505_v3, %v2818_v54  ;;  %v2852_v6 = vmul.f32 %v8559_v48, %v2843_v40  ;;  %v746_v5 = vadd.f32 %v8623_v26, %v8622_v30  ;;  %v8627_v4 = vld [vmem:[#allocation183_spill] sm:$0xff]  ;;  %v8628_v40 = vld [vmem:[#allocation8_spill] sm:$0xff]  ;;  %v8630_v43 = vld [vmem:[#allocation26_spill] sm:$0xff] }
 0x229   : > { %v1179_v31 = vadd.f32 %v1171_v38, %v1065_v18  ;;  %v2785_v17 = vadd.f32 %v2777_v47, %v2760_v36  ;;  %v852_v15 = vmul.f32 %v8610_v63, %v8624_v28  ;;  %v932_v25 = vsel %vm924_vm5, %v8625_v9, 0.0  ;;  %v8629_v38 = vld [vmem:[#allocation9_spill] sm:$0xff]  ;;  %v8631_v48 = vld [vmem:[#allocation136_spill] sm:$0xff] }
 0x22a   : > { %v941_v44 = vmul.f32 %v8612_v1, %v932_v25  ;;  %v1046_v54 = vsel %vm1038_vm12, %v8627_v4, 0.0  ;;  %v1160_v30 = vsel %vm1152_vm0, %v8628_v40, 0.0  ;;  %v1274_v47 = vsel %vm1266_vm14, %v8629_v38, 0.0 }
 0x22b   : > { %v1293_v28 = vadd.f32 %v1285_v49, %v1179_v31  ;;  %v2810_v63 = vadd.f32 %v2802_v53, %v2785_v17  ;;  %v860_v18 = vadd.f32 %v852_v15, %v746_v5  ;;  %v1055_v36 = vmul.f32 %v8613_v51, %v1046_v54  ;;  %v8632_v31 = vld [vmem:[#allocation133_spill] sm:$0xff]  ;;  %v1319_v51 = vpop.permute.xlu1 %1318  ;;  %v8633_v49 = vld [vmem:[#allocation107_spill] sm:$0xff]  ;;  %v8638_v54 = vld [vmem:[#allocation38_spill] sm:$0xff] }
 0x22c   : > { %v2382_v1 = vsel %vm2374_vm8, %v6822_v13, 0.0  ;;  %v1169_v26 = vmul.f32 %v8614_v22, %v1160_v30  ;;  %v1283_v25 = vmul.f32 %v8620_v41, %v1274_v47  ;;  %v1429_v3 = vadd.f32 %v8631_v48, %v8630_v43  ;;  %v8642_v47 = vld [vmem:[#allocation111_spill] sm:$0xff] }
 0x22d   : > { %v1341_v58 = vsel %vm1333_vm7, %v1293_v28, 0.0  ;;  %v2835_v40 = vadd.f32 %v2827_v11, %v2810_v63  ;;  %v949_v38 = vadd.f32 %v941_v44, %v860_v18  ;;  %v1471_v17 = vmul.f32 %v8603_v33, %v8632_v31  ;;  %v8643_v18 = vld [vmem:[#allocation109_spill] sm:$0xff] }
 0x22e   : > { %v7005_v5 = vadd.f32 %v1604_v55, %v1341_v58  ;;  %v1454_v45 = vadd.f32 %v8633_v49, %v1429_v3  ;;  %v1487_v13 = vsel %vm1038_vm12, %v8572_v50, 0.0  ;;  %v1512_v43 = vsel %vm1152_vm0, %v8574_v56, 0.0  ;;  %v8634_v55 = vld [vmem:[#allocation90_spill] sm:$0xff]  ;;  %v8635_v50 = vld [vmem:[#allocation83_spill] sm:$0xff]  ;;  %v8647_v49 = vld [vmem:[#allocation140_spill] sm:$0xff] }
 0x22f   : > { %v2860_v48 = vadd.f32 %v2852_v6, %v2835_v40  ;;  %v1063_v22 = vadd.f32 %v1055_v36, %v949_v38  ;;  %v1496_v39 = vmul.f32 %v8605_v14, %v1487_v13  ;;  %v1521_v41 = vmul.f32 %v8606_v2, %v1512_v43  ;;  %v8636_v6 = vld [vmem:[#allocation165_spill] sm:$0xff]  ;;  %v8637_v2 = vld [vmem:[#allocation7_spill] sm:$0xff]  ;;  %v2886_v63 = vpop.permute.xlu2 %2885  ;;  %v8648_v43 = vld [vmem:[#allocation172_spill] sm:$0xff] }
 0x230   : > { %v1479_v33 = vadd.f32 %v1471_v17, %v1454_v45  ;;  %v1537_v58 = vsel %vm1266_vm14, %v8577_v52, 0.0  ;;  %v2392_v3 = vadd.f32 %v6907_v24, %v6871_v34  ;;  %v2474_v53 = vadd.f32 %v8635_v50, %v8634_v55  ;;  %v8639_v34 = vld [vmem:[#allocation48_spill] sm:$0xff]  ;;  %v8641_v38 = vld [vmem:[#allocation207_spill] sm:$0xff] }
 0x231   : > { %v1177_v11 = vadd.f32 %v1169_v26, %v1063_v22  ;;  %vm1331_vm4 = vcmp.eq.s32.totalorder %v1319_v51, 1  ;;  %v1546_v56 = vmul.f32 %v8611_v57, %v1537_v58  ;;  %v2491_v14 = vmul.f32 %v8547_v61, %v8636_v6  ;;  %v2629_v26 = vpop.permute.xlu0 %2628  ;;  %v8644_v17 = vld [vmem:[#allocation39_spill] sm:$0xff]  ;;  %v8649_v22 = vld [vmem:[#allocation6_spill] sm:$0xff] }
 0x232   : > { %v1504_v15 = vadd.f32 %v1496_v39, %v1479_v33  ;;  %v2507_v44 = vsel %vm925_vm6, %v8637_v2, 0.0  ;;  %v2532_v52 = vsel %vm1039_vm2, %v8638_v54, 0.0  ;;  %vm8640_vm7 = vcmp.eq.s32.totalorder %v6334_v27, 1  ;;  %v8651_v33 = vld [vmem:[#allocation37_spill] sm:$0xff]  ;;  %v8652_v55 = vld [vmem:[#allocation187_spill] sm:$0xff] }
 0x233   : > { %v2557_v24 = vsel %vm8640_vm7, %v8639_v34, 0.0  ;;  %v1291_v40 = vadd.f32 %v1283_v25, %v1177_v11  ;;  %v2499_v30 = vadd.f32 %v2491_v14, %v2474_v53  ;;  %v2516_v57 = vmul.f32 %v8641_v38, %v2507_v44  ;;  %v8646_v25 = vld [vmem:[#allocation29_spill] sm:$0xff]  ;;  %v8654_v44 = vld [vmem:[#allocation186_spill] sm:$0xff] }
 0x234   : > { %v2541_v28 = vmul.f32 %v8642_v47, %v2532_v52  ;;  %vm1594_vm8 = vcmp.eq.s32.totalorder %v6929_v0, 1  ;;  %vm2902_vm1 = vcmp.eq.s32.totalorder %v2892_v29, 1  ;;  %v1529_v62 = vadd.f32 %v1521_v41, %v1504_v15  ;;  %v8650_v29 = vld [vmem:[#allocation15_spill] sm:$0xff] }
 0x235   : > { %v2566_v36 = vmul.f32 %v8643_v18, %v2557_v24  ;;  %v1339_v7 = vsel %vm1331_vm4, %v1291_v40, 0.0  ;;  %v2524_v31 = vadd.f32 %v2516_v57, %v2499_v30  ;;  %vm8645_vm6 = vcmp.eq.s32.totalorder %v6270_v32, 1  ;;  %v8655_v24 = vld [vmem:[#allocation203_spill] sm:$0xff] }
 0x236   : > { %v2582_v27 = vsel %vm8645_vm6, %v8644_v17, 0.0  ;;  %v2210_v45 = vadd.f32 %v8647_v49, %v8646_v25  ;;  %v1554_v13 = vadd.f32 %v1546_v56, %v1529_v62  ;;  %v2227_v39 = vmul.f32 %v8649_v22, %v8648_v43  ;;  %v8653_v56 = vld [vmem:[#allocation92_spill] sm:$0xff]  ;;  %v8656_v57 = vld [vmem:[#allocation23_spill] sm:$0xff]  ;;  %v8659_v43 = vld [vmem:[#allocation130_spill] sm:$0xff] }
 0x237   : > { %v2243_v41 = vsel %vm924_vm5, %v8650_v29, 0.0  ;;  %v2268_v51 = vsel %vm1038_vm12, %v8651_v33, 0.0  ;;  %v7054_v58 = vsel %vm2902_vm1, %v6946_v35, 0.0  ;;  %vm2900_vm2 = vcmp.eq.s32.totalorder %v2886_v63, 1  ;;  %v8658_v62 = vld [vmem:[#allocation103_spill] sm:$0xff] }
 0x238   : > { %v2549_v32 = vadd.f32 %v2541_v28, %v2524_v31  ;;  %v2252_v50 = vmul.f32 %v8652_v55, %v2243_v41  ;;  %v1602_v53 = vsel %vm1594_vm8, %v1554_v13, 0.0  ;;  %vm2639_vm4 = vcmp.eq.s32.totalorder %v2629_v26, 1  ;;  %v8657_v28 = vld [vmem:[#allocation148_spill] sm:$0xff] }
 0x239   : > { %v2235_v11 = vadd.f32 %v2227_v39, %v2210_v45  ;;  %v2277_v6 = vmul.f32 %v8653_v56, %v2268_v51  ;;  %v7060_v14 = vadd.f32 %v1602_v53, %v1339_v7  ;;  %v2591_v52 = vmul.f32 %v8654_v44, %v2582_v27  ;;  %v1851_v26 = vpop.permute.xlu0 %1850 }
 0x23a   : > { %v2574_v15 = vadd.f32 %v2566_v36, %v2549_v32  ;;  %v2293_v35 = vsel %vm1152_vm0, %v8655_v24, 0.0  ;;  %v2390_v30 = vadd.f32 %v2382_v1, %v6921_v12  ;;  %v2472_v0 = vadd.f32 %v8657_v28, %v8656_v57  ;;  %v2623_v32 = vpop.permute.xlu1 %2622 }
 0x23b   : > { %v2260_v40 = vadd.f32 %v2252_v50, %v2235_v11  ;;  %v2489_v31 = vmul.f32 %v8547_v61, %v8658_v62  ;;  %v2505_v36 = vsel %vm923_vm13, %v8650_v29, 0.0  ;;  %v2530_v7 = vsel %vm1037_vm15, %v8651_v33, 0.0  ;;  %v8661_v11 = vld [vmem:[#allocation70_spill] sm:$0xff] }
 0x23c   : > { %v2599_v25 = vadd.f32 %v2591_v52, %v2574_v15  ;;  %v2555_v27 = vsel %vm1151_vm9, %v8655_v24, 0.0  ;;  %v2514_v49 = vmul.f32 %v8641_v38, %v2505_v36  ;;  %v2539_v45 = vmul.f32 %v8642_v47, %v2530_v7  ;;  %v8663_v52 = vld [vmem:[#allocation121_spill] sm:$0xff]  ;;  %v8668_v36 = vld [vmem:[#allocation208_spill] sm:$0xff] }
 0x23d   : > { %v2285_v12 = vadd.f32 %v2277_v6, %v2260_v40  ;;  %v2497_v1 = vadd.f32 %v2489_v31, %v2472_v0  ;;  %v2302_v39 = vmul.f32 %v8659_v43, %v2293_v35  ;;  %v2318_v41 = vsel %vm1266_vm14, %v8660_v20, 0.0  ;;  %v8662_v6 = vld [vmem:[#allocation158_spill] sm:$0xff]  ;;  %v8664_v35 = vld [vmem:[#allocation43_spill] sm:$0xff]  ;;  %v8667_v0 = vld [vmem:[#allocation5_spill] sm:$0xff] }
 0x23e   : > { %v2647_v13 = vsel %vm2639_vm4, %v2599_v25, 0.0  ;;  %v2580_v8 = vsel %vm1265_vm10, %v8660_v20, 0.0  ;;  %v7091_v23 = vsel %vm2900_vm2, %v2860_v48, 0.0  ;;  %v2564_v53 = vmul.f32 %v8643_v18, %v2555_v27 }
 0x23f   : > { %v2655_v51 = vadd.f32 %v2647_v13, %v2392_v3  ;;  %v2522_v50 = vadd.f32 %v2514_v49, %v2497_v1  ;;  %v1694_v15 = vadd.f32 %v8662_v6, %v8661_v11  ;;  %v1711_v40 = vmul.f32 %v8664_v35, %v8663_v52  ;;  %v8666_v3 = vld [vmem:[#allocation185_spill] sm:$0xff]  ;;  %v8671_v13 = vld [vmem:[#allocation116_spill] sm:$0xff]  ;;  %v8674_v11 = vld [vmem:[#allocation191_spill] sm:$0xff] }
 0x240   : > { %v1727_v19 = vsel %vm926_vm11, %v8650_v29, 0.0  ;;  %vm8665_vm13 = vcmp.eq.s32.totalorder %v8582_v46, 1  ;;  %v2327_v63 = vmul.f32 %v8666_v3, %v2318_v41  ;;  %v2589_v28 = vmul.f32 %v8654_v44, %v2580_v8  ;;  %v8672_v8 = vld [vmem:[#allocation125_spill] sm:$0xff] }
 0x241   : > { %v1752_v48 = vsel %vm8665_vm13, %v8651_v33, 0.0  ;;  %v2547_v57 = vadd.f32 %v2539_v45, %v2522_v50  ;;  %v1736_v62 = vmul.f32 %v8667_v0, %v1727_v19  ;;  %v2310_v31 = vadd.f32 %v2302_v39, %v2285_v12  ;;  %v8670_v45 = vld [vmem:[#allocation74_spill] sm:$0xff]  ;;  %v8673_v12 = vld [vmem:[#allocation152_spill] sm:$0xff]  ;;  %vm8675_vm1 = vmmov %vm8665_vm13 }
 0x242   : > { %vm2637_vm15 = vcmp.eq.s32.totalorder %v2623_v32, 1  ;;  %v1719_v25 = vadd.f32 %v1711_v40, %v1694_v15  ;;  %v1761_v7 = vmul.f32 %v8668_v36, %v1752_v48  ;;  %v1777_v1 = vsel %vm1154_vm3, %v8655_v24, 0.0  ;;  %v8677_v40 = vld [vmem:[#allocation209_spill] sm:$0xff]  ;;  %vm8692_vm8 = vmmov %vm8675_vm1 }
 0x243   : > { %v2572_v27 = vadd.f32 %v2564_v53, %v2547_v57  ;;  %vm8669_vm9 = vcmp.eq.s32.totalorder %v6700_v59, 1  ;;  %vm1859_vm10 = vcmp.eq.s32.totalorder %v1851_v26, 1  ;;  %v2738_v41 = vadd.f32 %v8671_v13, %v8670_v45  ;;  %v8678_v57 = vld [vmem:[#allocation192_spill] sm:$0xff]  ;;  %v8679_v45 = vld [vmem:[#allocation210_spill] sm:$0xff]  ;;  %v8681_v29 = vld [vmem:[#allocation9_spill] sm:$0xff] }
 0x244   : > { %v1802_v33 = vsel %vm8669_vm9, %v8660_v20, 0.0  ;;  %v1744_v49 = vadd.f32 %v1736_v62, %v1719_v25  ;;  %v2755_v39 = vmul.f32 %v8673_v12, %v8672_v8  ;;  %v2771_v50 = vsel %vm926_vm11, %v8625_v9, 0.0  ;;  %v8676_v20 = vld [vmem:[#allocation8_spill] sm:$0xff]  ;;  %vm8682_vm7 = vmmov %vm8669_vm9  ;;  %v8702_v26 = vld [vmem:[#allocation138_spill] sm:$0xff] }
 0x245   : > { %v2597_v53 = vadd.f32 %v2589_v28, %v2572_v27  ;;  %v2780_v6 = vmul.f32 %v8674_v11, %v2771_v50  ;;  %v2796_v24 = vsel %vm8675_vm1, %v8627_v4, 0.0  ;;  %v2821_v15 = vsel %vm1154_vm3, %v8676_v20, 0.0  ;;  %v8680_v27 = vld [vmem:[#allocation62_spill] sm:$0xff]  ;;  %v8689_v20 = vld [vmem:[#allocation16_spill] sm:$0xff]  ;;  %vm8699_vm2 = vmmov %vm8682_vm7  ;;  %v1845_v11 = vpop.permute.xlu0 %1844 }
 0x246   : > { %v1769_v52 = vadd.f32 %v1761_v7, %v1744_v49  ;;  %v1786_v19 = vmul.f32 %v8677_v40, %v1777_v1  ;;  %v2763_v48 = vadd.f32 %v2755_v39, %v2738_v41  ;;  %v2805_v62 = vmul.f32 %v8678_v57, %v2796_v24  ;;  %v8683_v49 = vld [vmem:[#allocation135_spill] sm:$0xff]  ;;  %vm8712_vm13 = vmmov %vm8675_vm1 }
 0x247   : > { %v2645_v25 = vsel %vm2637_vm15, %v2597_v53, 0.0  ;;  %v1811_v28 = vmul.f32 %v8679_v45, %v1802_v33  ;;  %v2830_v13 = vmul.f32 %v8680_v27, %v2821_v15  ;;  %v2918_v8 = vadd.f32 %v7054_v58, %v2655_v51  ;;  %v8685_v41 = vld [vmem:[#allocation71_spill] sm:$0xff]  ;;  %v8687_v53 = vld [vmem:[#allocation122_spill] sm:$0xff]  ;;  %vm8714_vm9 = vmmov %vm8699_vm2 }
 0x248   : > { %v2653_v50 = vadd.f32 %v2645_v25, %v2390_v30  ;;  %v1794_v4 = vadd.f32 %v1786_v19, %v1769_v52  ;;  %v2788_v9 = vadd.f32 %v2780_v6, %v2763_v48  ;;  %v2846_v7 = vsel %vm8682_vm7, %v8681_v29, 0.0  ;;  %v8686_v39 = vld [vmem:[#allocation171_spill] sm:$0xff]  ;;  %v8690_v6 = vld [vmem:[#allocation212_spill] sm:$0xff]  ;;  %v8694_v25 = vld [vmem:[#allocation213_spill] sm:$0xff] }
 0x249   : > { %v7138_v1 = vadd.f32 %v8683_v49, %v2918_v8  ;;  %v1949_v32 = vadd.f32 %v8686_v39, %v8685_v41  ;;  %v8688_v24 = vld [vmem:[#allocation211_spill] sm:$0xff]  ;;  %v1982_v58 = vsel %vm926_vm11, %v8689_v20, 0.0  ;;  %v8691_v52 = vld [vmem:[#allocation188_spill] sm:$0xff]  ;;  %vm8693_vm6 = vcmask 261120   ;;  %v8695_v41 = vld [vmem:[#allocation61_spill] sm:$0xff] }
 0x24a   : > { %v1966_v33 = vmul.f32 %v8688_v24, %v8687_v53  ;;  %v1819_v30 = vadd.f32 %v1811_v28, %v1794_v4  ;;  %v2813_v51 = vadd.f32 %v2805_v62, %v2788_v9  ;;  %v1991_v15 = vmul.f32 %v8690_v6, %v1982_v58  ;;  %v8696_v28 = vld [vmem:[#allocation40_spill] sm:$0xff]  ;;  %v2106_v58 = vpop.permute.xlu1 %2105  ;;  %vm8713_vm15 = vmmov %vm8693_vm6 }
 0x24b   : > { %8684 = vst [vmem:[#allocation46_spill] sm:$0xff] %v7138_v1  ;;  %v2007_v29 = vsel %vm8692_vm8, %v8691_v52, 0.0  ;;  %v2950_v19 = vsel %vm8693_vm6, %v7138_v1, 0.0  ;;  %v2032_v39 = vsel %vm1154_vm3, %v8695_v41, 0.0  ;;  %v7157_v53 = vadd.f32 %v2327_v63, %v2310_v31  ;;  %v8697_v1 = vld [vmem:[#allocation214_spill] sm:$0xff]  ;;  %v8701_v63 = vld [vmem:[#allocation27_spill] sm:$0xff]  ;;  %vm8730_vm6 = vmmov %vm8712_vm13 }
 0x24c   : > { %v1974_v48 = vadd.f32 %v1966_v33, %v1949_v32  ;;  %v2016_v8 = vmul.f32 %v8694_v25, %v2007_v29  ;;  %v1867_v9 = vsel %vm1859_vm10, %v1819_v30, 0.0  ;;  %v2838_v62 = vadd.f32 %v2830_v13, %v2813_v51  ;;  %2951 = vadd.xlane.f32.xlu1 %v2950_v19  ;;  %v8698_v33 = vld [vmem:[#allocation216_spill] sm:$0xff]  ;;  %v8703_v13 = vld [vmem:[#allocation169_spill] sm:$0xff] }
 0x24d   : > { %v2855_v4 = vmul.f32 %v8696_v28, %v2846_v7  ;;  %v1875_v27 = vadd.f32 %v1867_v9, %v7005_v5  ;;  %v2041_v32 = vmul.f32 %v8697_v1, %v2032_v39  ;;  %v2057_v29 = vsel %vm8699_vm2, %v8698_v33, 0.0  ;;  %v8704_v30 = vld [vmem:[#allocation13_spill] sm:$0xff]  ;;  %v8706_v39 = vld [vmem:[#allocation131_spill] sm:$0xff] }
 0x24e   : > { %v1999_v57 = vadd.f32 %v1991_v15, %v1974_v48  ;;  %v1692_v31 = vadd.f32 %v8702_v26, %v8701_v63  ;;  %v1709_v7 = vmul.f32 %v8664_v35, %v8703_v13  ;;  %v1725_v5 = vsel %vm924_vm5, %v8704_v30, 0.0  ;;  %v8705_v19 = vld [vmem:[#allocation105_spill] sm:$0xff]  ;;  %v8709_v30 = vld [vmem:[#allocation72_spill] sm:$0xff] }
 0x24f   : > { %v7166_v12 = vadd.f32 %v2855_v4, %v2838_v62  ;;  %v1734_v15 = vmul.f32 %v8667_v0, %v1725_v5  ;;  %v1750_v48 = vsel %vm1038_vm12, %v8705_v19, 0.0  ;;  %v1775_v9 = vsel %vm1152_vm0, %v8706_v39, 0.0  ;;  %v8707_v62 = vld [vmem:[#allocation215_spill] sm:$0xff]  ;;  %v8710_v39 = vld [vmem:[#allocation44_spill] sm:$0xff] }
 0x250   : > { %v2024_v51 = vadd.f32 %v2016_v8, %v1999_v57  ;;  %v2066_v4 = vmul.f32 %v8707_v62, %v2057_v29  ;;  %vm2114_vm4 = vcmp.eq.s32.totalorder %v2106_v58, 1  ;;  %v1717_v63 = vadd.f32 %v1709_v7, %v1692_v31  ;;  %v8708_v57 = vld [vmem:[#allocation110_spill] sm:$0xff]  ;;  %v8711_v29 = vld [vmem:[#allocation123_spill] sm:$0xff] }
 0x251   : > { %8700 = vst [vmem:[#allocation117_spill] sm:$0xff] %v7166_v12  ;;  %v1759_v35 = vmul.f32 %v8668_v36, %v1750_v48  ;;  %v1784_v13 = vmul.f32 %v8677_v40, %v1775_v9  ;;  %v1800_v0 = vsel %vm1266_vm14, %v8708_v57, 0.0  ;;  %v2916_v8 = vadd.f32 %v7091_v23, %v2653_v50  ;;  %v8716_v57 = vld [vmem:[#allocation139_spill] sm:$0xff] }
 0x252   : > { %v2049_v26 = vadd.f32 %v2041_v32, %v2024_v51  ;;  %v1742_v5 = vadd.f32 %v1734_v15, %v1717_v63  ;;  %v1809_v19 = vmul.f32 %v8679_v45, %v1800_v0  ;;  %v2212_v12 = vadd.f32 %v8710_v39, %v8709_v30  ;;  %v7205_v51 = vpop.permute.xlu2 %2362 }
 0x253   : > { %v2229_v31 = vmul.f32 %v8649_v22, %v8711_v29  ;;  %v7195_v36 = vadd.f32 %v8683_v49, %v2916_v8  ;;  %v2245_v40 = vsel %vm926_vm11, %v8637_v2, 0.0  ;;  %v2270_v23 = vsel %vm8712_vm13, %v8638_v54, 0.0  ;;  %v8717_v8 = vld [vmem:[#allocation170_spill] sm:$0xff] }
 0x254   : > { %v2074_v7 = vadd.f32 %v2066_v4, %v2049_v26  ;;  %v1767_v50 = vadd.f32 %v1759_v35, %v1742_v5  ;;  %v2254_v32 = vmul.f32 %v8652_v55, %v2245_v40  ;;  %v2279_v30 = vmul.f32 %v8653_v56, %v2270_v23  ;;  %v2369_v55 = vpop.permute.xlu1 %2368  ;;  %v2100_v35 = vpop.permute.xlu0 %2099  ;;  %v8715_v26 = vld [vmem:[#allocation28_spill] sm:$0xff] }
 0x255   : > { %v2237_v45 = vadd.f32 %v2229_v31, %v2212_v12  ;;  %v2944_v15 = vsel %vm8713_vm15, %v7195_v36, 0.0  ;;  %v2295_v48 = vsel %vm1154_vm3, %v8639_v34, 0.0  ;;  %v2320_v9 = vsel %vm8714_vm9, %v8644_v17, 0.0  ;;  %v8719_v31 = vld [vmem:[#allocation202_spill] sm:$0xff]  ;;  %v8720_v23 = vld [vmem:[#allocation204_spill] sm:$0xff] }
 0x256   : > { %v2122_v22 = vsel %vm2114_vm4, %v2074_v7, 0.0  ;;  %v1792_v4 = vadd.f32 %v1784_v13, %v1767_v50  ;;  %vm1857_vm10 = vcmp.eq.s32.totalorder %v1845_v11, 1  ;;  %2945 = vadd.xlane.f32.xlu2 %v2944_v15  ;;  %v2304_v58 = vmul.f32 %v8659_v43, %v2295_v48  ;;  %v8718_v13 = vld [vmem:[#allocation14_spill] sm:$0xff] }
 0x257   : > { %v2130_v12 = vadd.f32 %v2122_v22, %v1875_v27  ;;  %v2262_v56 = vadd.f32 %v2254_v32, %v2237_v45  ;;  %v2329_v63 = vmul.f32 %v8666_v3, %v2320_v9  ;;  %v1947_v0 = vadd.f32 %v8716_v57, %v8715_v26  ;;  %v8721_v45 = vld [vmem:[#allocation206_spill] sm:$0xff]  ;;  %v8723_v9 = vld [vmem:[#allocation141_spill] sm:$0xff] }
 0x258   : > { %v1964_v5 = vmul.f32 %v8688_v24, %v8717_v8  ;;  %vm2375_vm1 = vcmp.eq.s32.totalorder %v7205_v51, 1  ;;  %v1817_v39 = vadd.f32 %v1809_v19, %v1792_v4  ;;  %v1980_v29 = vsel %vm924_vm5, %v8718_v13, 0.0  ;;  %v8722_v48 = vld [vmem:[#allocation30_spill] sm:$0xff] }
 0x259   : > { %v2287_v27 = vadd.f32 %v2279_v30, %v2262_v56  ;;  %v2005_v43 = vsel %vm1038_vm12, %v8719_v31, 0.0  ;;  %v1989_v7 = vmul.f32 %v8690_v6, %v1980_v29  ;;  %v2030_v24 = vsel %vm1152_vm0, %v8720_v23, 0.0  ;;  %v8724_v56 = vld [vmem:[#allocation173_spill] sm:$0xff] }
 0x25a   : > { %v1972_v3 = vadd.f32 %v1964_v5, %v1947_v0  ;;  %v2014_v40 = vmul.f32 %v8694_v25, %v2005_v43  ;;  %v1865_v19 = vsel %vm1857_vm10, %v1817_v39, 0.0  ;;  %vm2377_vm7 = vcmp.eq.s32.totalorder %v2369_v55, 1  ;;  %v8725_v31 = vld [vmem:[#allocation73_spill] sm:$0xff]  ;;  %v8726_v43 = vld [vmem:[#allocation115_spill] sm:$0xff] }
 0x25b   : > { %v2312_v50 = vadd.f32 %v2304_v58, %v2287_v27  ;;  %v2055_v32 = vsel %vm1266_vm14, %v8721_v45, 0.0  ;;  %v1873_v30 = vadd.f32 %v1865_v19, %v7060_v14  ;;  %v2039_v15 = vmul.f32 %v8697_v1, %v2030_v24  ;;  %v8729_v19 = vld [vmem:[#allocation193_spill] sm:$0xff] }
 0x25c   : > { %v1997_v22 = vadd.f32 %v1989_v7, %v1972_v3  ;;  %v2064_v6 = vmul.f32 %v8707_v62, %v2055_v32  ;;  %v2473_v4 = vadd.f32 %v8723_v9, %v8722_v48  ;;  %v2490_v11 = vmul.f32 %v8547_v61, %v8724_v56  ;;  %v2626_v27 = vpop.permute.xlu1 %2625  ;;  %v8727_v3 = vld [vmem:[#allocation124_spill] sm:$0xff]  ;;  %v2632_v23 = vpop.permute.xlu0 %2631  ;;  %v8734_v56 = vld [vmem:[#allocation31_spill] sm:$0xff] }
 0x25d   : > { %v2337_v25 = vadd.f32 %v2329_v63, %v2312_v50  ;;  %v2506_v55 = vsel %vm924_vm5, %v8689_v20, 0.0  ;;  %v2531_v14 = vsel %vm1038_vm12, %v8691_v52, 0.0  ;;  %v2556_v1 = vsel %vm1152_vm0, %v8695_v41, 0.0  ;;  %v8731_v50 = vld [vmem:[#allocation217_spill] sm:$0xff] }
 0x25e   : > { %v2022_v58 = vadd.f32 %v2014_v40, %v1997_v22  ;;  %v2515_v26 = vmul.f32 %v8641_v38, %v2506_v55  ;;  %vm2112_vm8 = vcmp.eq.s32.totalorder %v2100_v35, 1  ;;  %v2498_v63 = vadd.f32 %v2490_v11, %v2473_v4  ;;  %v8737_v55 = vld [vmem:[#allocation152_spill] sm:$0xff] }
 0x25f   : > { %v2385_v62 = vsel %vm2377_vm7, %v2337_v25, 0.0  ;;  %v2540_v57 = vmul.f32 %v8642_v47, %v2531_v14  ;;  %v2565_v5 = vmul.f32 %v8643_v18, %v2556_v1  ;;  %v2581_v39 = vsel %vm1266_vm14, %v8698_v33, 0.0  ;;  %v8739_v1 = vld [vmem:[#allocation192_spill] sm:$0xff] }
 0x260   : > { %v2393_v0 = vadd.f32 %v2385_v62, %v2130_v12  ;;  %v2047_v8 = vadd.f32 %v2039_v15, %v2022_v58  ;;  %v2523_v29 = vadd.f32 %v2515_v26, %v2498_v63  ;;  %v2590_v52 = vmul.f32 %v8654_v44, %v2581_v39  ;;  %v8728_v12 = vld [vmem:[#allocation12_spill] sm:$0xff]  ;;  %v8738_v26 = vld [vmem:[#allocation191_spill] sm:$0xff] }
 0x261   : > { %v2475_v41 = vadd.f32 %v8726_v43, %v8725_v31  ;;  %v2492_v7 = vmul.f32 %v8547_v61, %v8727_v3  ;;  %v2508_v24 = vsel %vm926_vm11, %v8728_v12, 0.0  ;;  %v2533_v33 = vsel %vm8730_vm6, %v8729_v19, 0.0 }
 0x262   : > { %v2072_v40 = vadd.f32 %v2064_v6, %v2047_v8  ;;  %v2558_v45 = vsel %vm1154_vm3, %v8731_v50, 0.0  ;;  %v2548_v32 = vadd.f32 %v2540_v57, %v2523_v29  ;;  %v2517_v15 = vmul.f32 %v8641_v38, %v2508_v24  ;;  %vm8733_vm3 = vmmov %vm8699_vm2  ;;  %v8735_v38 = vld [vmem:[#allocation142_spill] sm:$0xff]  ;;  %v2895_v57 = vpop.permute.xlu2 %2894 }
 0x263   : > { %v2500_v22 = vadd.f32 %v2492_v7, %v2475_v41  ;;  %v2542_v61 = vmul.f32 %v8642_v47, %v2533_v33  ;;  %v2383_v6 = vsel %vm2375_vm1, %v7157_v53, 0.0  ;;  %vm2638_vm11 = vcmp.eq.s32.totalorder %v2626_v27, 1  ;;  %v8736_v47 = vld [vmem:[#allocation174_spill] sm:$0xff]  ;;  %v8741_v7 = vld [vmem:[#allocation117_spill] sm:$0xff] }
 0x264   : > { %v2120_v60 = vsel %vm2112_vm8, %v2072_v40, 0.0  ;;  %v2567_v46 = vmul.f32 %v8643_v18, %v2558_v45  ;;  %v2573_v48 = vadd.f32 %v2565_v5, %v2548_v32  ;;  %v2583_v4 = vsel %vm8733_vm3, %v8732_v16, 0.0  ;;  %v8740_v29 = vld [vmem:[#allocation62_spill] sm:$0xff]  ;;  %v2889_v37 = vpop.permute.xlu0 %2888 }
 0x265   : > { %v2128_v25 = vadd.f32 %v2120_v60, %v1873_v30  ;;  %v2525_v9 = vadd.f32 %v2517_v15, %v2500_v22  ;;  %v2736_v11 = vadd.f32 %v8735_v38, %v8734_v56  ;;  %v2753_v58 = vmul.f32 %v8737_v55, %v8736_v47  ;;  %v8745_v16 = vld [vmem:[#allocation114_spill] sm:$0xff] }
 0x266   : > { %v2769_v53 = vsel %vm924_vm5, %v8637_v2, 0.0  ;;  %v2794_v18 = vsel %vm1038_vm12, %v8638_v54, 0.0  ;;  %v2598_v35 = vadd.f32 %v2590_v52, %v2573_v48  ;;  %vm2640_vm2 = vcmp.eq.s32.totalorder %v2632_v23, 1  ;;  %v8744_v48 = vld [vmem:[#allocation190_spill] sm:$0xff] }
 0x267   : > { %v2391_v51 = vadd.f32 %v2383_v6, %v2128_v25  ;;  %v2550_v30 = vadd.f32 %v2542_v61, %v2525_v9  ;;  %v2778_v59 = vmul.f32 %v8738_v26, %v2769_v53  ;;  %v2761_v14 = vadd.f32 %v2753_v58, %v2736_v11  ;;  %v8748_v58 = vld [vmem:[#allocation93_spill] sm:$0xff]  ;;  %v8750_v26 = vld [vmem:[#allocation179_spill] sm:$0xff] }
 0x268   : > { %v2803_v62 = vmul.f32 %v8739_v1, %v2794_v18  ;;  %v2819_v63 = vsel %vm1152_vm0, %v8639_v34, 0.0  ;;  %v2646_v21 = vsel %vm2638_vm11, %v2598_v35, 0.0  ;;  %v2592_v42 = vmul.f32 %v8654_v44, %v2583_v4  ;;  %vm8742_vm0 = vmmov %vm8713_vm15 }
 0x269   : > { %v2575_v8 = vadd.f32 %v2567_v46, %v2550_v30  ;;  %v2844_v54 = vsel %vm1266_vm14, %v8644_v17, 0.0  ;;  %v2654_v5 = vadd.f32 %v2646_v21, %v2391_v51  ;;  %v2786_v39 = vadd.f32 %v2778_v59, %v2761_v14  ;;  %vm8743_vm14 = vmmov %vm8742_vm0 }
 0x26a   : > { %v2828_v52 = vmul.f32 %v8740_v29, %v2819_v63  ;;  %v3793_v43 = vmov 32.0   ;;  %vm2903_vm5 = vcmp.eq.s32.totalorder %v2895_v57, 1  ;;  %v2853_v27 = vmul.f32 %v8696_v28, %v2844_v54  ;;  %v2937_v61 = vpop.xlane.xlu2 %2936  ;;  %vm8746_vm13 = vmmov %vm8742_vm0  ;;  %v8752_v57 = vld [vmem:[#allocation46_spill] sm:$0xff] }
 0x26b   : > { %v2600_v31 = vadd.f32 %v2592_v42, %v2575_v8  ;;  %3738 = vrcp.f32 %v3793_v43  ;;  %v2811_v34 = vadd.f32 %v2803_v62, %v2786_v39  ;;  %v2911_v40 = vsel %vm2903_vm5, %v8741_v7, 0.0  ;;  %vm8747_vm15 = vmmov %vm8742_vm0 }
 0x26c   : > { %vm2901_vm12 = vcmp.eq.s32.totalorder %v2889_v37, 1  ;;  %vm8749_vm9 = vmmov %vm8742_vm0  ;;  %v8755_v43 = vmov 0   ;;  %v8756_v37 = vld [vmem:[#allocation2_spill] sm:$0xff] }
 0x26d   : > { %v2648_v41 = vsel %vm2640_vm2, %v2600_v31, 0.0  ;;  %v2836_v44 = vadd.f32 %v2828_v52, %v2811_v34  ;;  %vm8751_vm10 = vmmov %vm8742_vm0  ;;  %vm8757_vm8 = vcmp.lt.s32.totalorder %v8756_v37, 8 }
 0x26e   : > { %v2656_v3 = vadd.f32 %v2648_v41, %v2393_v0  ;;  %vm8753_vm1 = vmmov %vm8742_vm0  ;;  %v3285_v34 = vsel %vm8757_vm8, 1, %v8755_v43 }
 0x26f   : > { %v2861_v10 = vadd.f32 %v2853_v27, %v2836_v44  ;;  %vm8754_vm7 = vmmov %vm8742_vm0 }
 0x270   : > { %v2919_v17 = vadd.f32 %v2911_v40, %v2656_v3  ;;  %vm8758_vm6 = vmmov %vm8742_vm0 }
 0x271   : > { %v3739_v24 = vpop.eup %3738  ;;  %v2909_v19 = vsel %vm2901_vm12, %v2861_v10, 0.0  ;;  %v2934_v6 = vpop.xlane.xlu1 %2933  ;;  %vm8761_vm3 = vmmov %vm8742_vm0 }
 0x272   : > { %v2930_v33 = vadd.f32 %v8683_v49, %v2919_v17  ;;  %v2957_v50 = vmul.f32 32.0, %v3739_v24  ;;  %v2917_v45 = vadd.f32 %v2909_v19, %v2654_v5  ;;  %vm2961_vm4 = vweird.f32 %v3739_v24  ;;  %v8759_v17 = vld [vmem:[#allocation151_spill] sm:$0xff]  ;;  %vm8772_vm8 = vmmov %vm8761_vm3 }
 0x273   : > { %vm8760_vm11 = vcmp.lt.s32.totalorder %v8759_v17, 8  ;;  %v8770_v17 = vld [vmem:[#allocation94_spill] sm:$0xff] }
 0x274   : > { %v2953_v32 = vsel %vm8742_vm0, %v2930_v33, 0.0  ;;  %v2958_v22 = vsub.f32 1.0, %v2957_v50  ;;  %v2928_v28 = vadd.f32 %v8683_v49, %v2917_v45 }
 0x275   : > { %2954 = vadd.xlane.f32.xlu0 %v2953_v32 }
 0x276   : > { %v2959_v23 = vmul.f32 %v3739_v24, %v2958_v22  ;;  %v2947_v0 = vsel %vm8743_vm14, %v2928_v28, 0.0  ;;  %v8762_v22 = vld [vmem:[#allocation189_spill] sm:$0xff] }
 0x277   : > { %2948 = vadd.xlane.f32.xlu1 %v2947_v0  ;;  %vm8763_vm2 = vcmp.lt.s32.totalorder %v8762_v22, 8 }
 0x278   : > { %v2960_v15 = vadd.f32 %v3739_v24, %v2959_v23 }
 0x27a   : > { %v7312_v60 = vsel %vm2961_vm4, %v3739_v24, %v2960_v15  ;;  %v3288_v24 = vsel %vm8760_vm11, 1, %v8755_v43 }
 0x27b   : > { %v2964_v46 = vmul.f32 %v7312_v60, %v2937_v61  ;;  %v2963_v25 = vmul.f32 %v7312_v60, %v2934_v6  ;;  %v2940_v38 = vpop.xlane.xlu0 %2939  ;;  %v3680_v6 = vld [vmem:[%s7609_s7 + $0x8] sm:$0xff]  }
 0x27c   : > { %v2965_v47 = vmul.f32 %v7312_v60, %v2940_v38 }
 0x27d   : > { %v7317_v9 = vsub.f32 %v8744_v48, %v2964_v46  ;;  %v7320_v4 = vsub.f32 %v8745_v16, %v2963_v25  ;;  %v3636_v46 = vld [vmem:[%s7609_s7] sm:$0xff]   ;;  %v3642_v48 = vunpack.c.h.bf16 %v3680_v6  ;;  %v3641_v16 = vunpack.c.l.bf16 %v3680_v6 }
 0x27e   : > { %v7330_v53 = vsub.f32 %v8748_v58, %v2965_v47 }
 0x27f   : > { %v2980_v49 = vmul.f32 %v7317_v9, %v7317_v9  ;;  %v2979_v56 = vmul.f32 %v7320_v4, %v7320_v4  ;;  %3184 = vmatpush.msra.mxu0 %v3642_v48  ;;  %3688 = vmatpush.msra.mxu3 %v3642_v48 }
 0x280   : > { %v2981_v18 = vmul.f32 %v7330_v53, %v7330_v53 }
 0x281   : > { %v2990_v11 = vsel %vm8746_vm13, %v2980_v49, 0.0  ;;  %v2987_v55 = vsel %vm8747_vm15, %v2979_v56, 0.0  ;;  %v3638_v56 = vunpack.c.h.bf16 %v3636_v46  ;;  %3185 = vmatpush.msra.mxu0 %v3641_v16  ;;  %3689 = vmatpush.msra.mxu3 %v3641_v16 }
 0x282   : > { %2991 = vadd.xlane.f32.xlu0 %v2990_v11  ;;  %2988 = vadd.xlane.f32.xlu2 %v2987_v55  ;;  %v2993_v51 = vsel %vm8749_vm9, %v2981_v18, 0.0  ;;  %v3637_v55 = vunpack.c.l.bf16 %v3636_v46  ;;  %v8764_v18 = vld [vmem:[#allocation34_spill] sm:$0xff] }
 0x283   : > { %2994 = vadd.xlane.f32.xlu1 %v2993_v51  ;;  %vm8765_vm5 = vcmp.lt.s32.totalorder %v8764_v18, 8  ;;  %3186 = vmatpush.msra.mxu0 %v3638_v56 }
 0x284   : > { %v3287_v51 = vsel %vm8765_vm5, 1, %v8755_v43  ;;  %3690 = vmatpush.msra.mxu3 %v3638_v56 }
 0x285   : > { %3187 = vmatpush.msra.mxu0 %v3637_v55 }
 0x286   : > { %3691 = vmatpush.msra.mxu3 %v3637_v55 }
 0x289   : > { %v2943_v35 = vpop.xlane.xlu2 %2942 }
 0x28a   : > { %v2966_v30 = vmul.f32 %v7312_v60, %v2943_v35 }
 0x28c   : > { %v7337_v59 = vsub.f32 %v8750_v26, %v2966_v30  ;;  %v3115_v30 = vld [vmem:[%s7607_s5] sm:$0x1]  ;;  %v8766_v26 = vld [vmem:[#allocation17_spill] sm:$0xff] }
 0x28d   : > { %vm8767_vm12 = vcmp.lt.s32.totalorder %v8766_v26, 8 }
 0x28e   : > { %v2982_v14 = vmul.f32 %v7337_v59, %v7337_v59 }
 0x290   : > { %v2996_v1 = vsel %vm8751_vm10, %v2982_v14, 0.0  ;;  %v3286_v14 = vsel %vm8767_vm12, 1, %v8755_v43 }
 0x291   : > { %2997 = vadd.xlane.f32.xlu2 %v2996_v1 }
 0x2bf   : > { %v2952_v62 = vpop.xlane.xlu1 %2951 }
 0x2c0   : > { %v2969_v63 = vmul.f32 %v7312_v60, %v2952_v62 }
 0x2c2   : > { %v7344_v21 = vsub.f32 %v8752_v57, %v2969_v63  ;;  %v3126_v57 = vld [vmem:[%s7608_s6] sm:$0x1] }
 0x2c3   : > { %v3127_v37 = vunpack.c.l.bf16 %v3126_v57 }
 0x2c4   : > { %v2985_v8 = vmul.f32 %v7344_v21, %v7344_v21 }
 0x2c6   : > { %v3005_v42 = vsel %vm8753_vm1, %v2985_v8, 0.0  ;;  %vm8771_vm1 = vcmp.lt.s32.totalorder %v8770_v17, 8 }
 0x2c7   : > { %3006 = vadd.xlane.f32.xlu0 %v3005_v42 }
 0x2c9   : > { %v2946_v54 = vpop.xlane.xlu2 %2945 }
 0x2ca   : > { %v2967_v5 = vmul.f32 %v7312_v60, %v2946_v54 }
 0x2cc   : > { %v7351_v39 = vsub.f32 %v7195_v36, %v2967_v5  ;;  %v3116_v5 = vunpack.c.l.bf16 %v3115_v30 }
 0x2ce   : > { %v2983_v29 = vmul.f32 %v7351_v39, %v7351_v39 }
 0x2d0   : > { %v2999_v52 = vsel %vm8754_vm7, %v2983_v29, 0.0 }
 0x2d1   : > { %3000 = vadd.xlane.f32.xlu1 %v2999_v52 }
 0x2e8   : > { %v2955_v31 = vpop.xlane.xlu0 %2954 }
 0x2e9   : > { %v2970_v27 = vmul.f32 %v7312_v60, %v2955_v31 }
 0x2ea   : > { %v2949_v3 = vpop.xlane.xlu1 %2948  ;;  %3294 = vperm.xlu1 %3736, %v3285_v34  }
 0x2eb   : > { %v7360_v41 = vsub.f32 %v2930_v33, %v2970_v27  ;;  %v2968_v36 = vmul.f32 %v7312_v60, %v2949_v3 }
 0x2ed   : > { %v2986_v44 = vmul.f32 %v7360_v41, %v7360_v41  ;;  %v7365_v7 = vsub.f32 %v2928_v28, %v2968_v36  ;;  %v3291_v28 = vsel %vm8763_vm2, 1, %v8755_v43  ;;  %v7403_v36 = vperm.slane %v3116_v5, 0  ;;  %vm8775_vm2 = vmmov %vm8772_vm8 }
 0x2ee   : > { %vm8776_vm5 = vmmov %vm8775_vm2 }
 0x2ef   : > { %v3008_v40 = vsel %vm8758_vm6, %v2986_v44, 0.0  ;;  %v2984_v10 = vmul.f32 %v7365_v7, %v7365_v7 }
 0x2f0   : > { %3009 = vadd.xlane.f32.xlu2 %v3008_v40  ;;  %v8768_v40 = vld [vmem:[#allocation219_spill] sm:$0xff] }
 0x2f1   : > { %v3002_v19 = vsel %vm8761_vm3, %v2984_v10, 0.0  ;;  %vm8769_vm9 = vcmp.lt.s32.totalorder %v8768_v40, 8 }
 0x2f2   : > { %3003 = vadd.xlane.f32.xlu0 %v3002_v19  ;;  %3303 = vperm.xlu1 %3736, %v3288_v24   ;;  %v3289_v10 = vsel %vm8769_vm9, 1, %v8755_v43  ;;  %v3290_v24 = vsel %vm8771_vm1, 1, %v8755_v43  ;;  %vm8778_vm1 = vmmov %vm8775_vm2 }
 0x2f5   : > { %v2992_v33 = vpop.xlane.xlu0 %2991  ;;  %v2989_v50 = vpop.xlane.xlu2 %2988 }
 0x2f6   : > { %v3012_v45 = vmul.f32 %v2992_v33, %v7312_v60  ;;  %v3011_v32 = vmul.f32 %v2989_v50, %v7312_v60  ;;  %v2995_v15 = vpop.xlane.xlu1 %2994  ;;  %v7412_v50 = vperm.slane %v3127_v37, 0 }
 0x2f7   : > { %v3013_v61 = vmul.f32 %v2995_v15, %v7312_v60 }
 0x2f8   : > { %v3020_v23 = vadd.f32 1e-05, %v3012_v45  ;;  %v3019_v0 = vadd.f32 1e-05, %v3011_v32 }
 0x2f9   : > { %v7386_v25 = vadd.f32 1e-05, %v3013_v61 }
 0x2fa   : > { %3740 = vrsqrt.f32 %v3020_v23  ;;  %3312 = vperm.xlu1 %3736, %v3291_v28   ;;  %vm3033_vm4 = vweird.f32 %v3019_v0  ;;  %vm3043_vm15 = vweird.f32 %v3020_v23 }
 0x2fb   : > { %3742 = vrsqrt.f32 %v3019_v0  ;;  %vm3053_vm6 = vweird.f32 %v7386_v25 }
 0x2fc   : > { %3744 = vrsqrt.f32 %v7386_v25 }
 0x300   : > { %v3741_v49 = vpop.eup %3740 }
 0x301   : > { %v3743_v38 = vpop.eup %3742  ;;  %v3038_v11 = vmul.f32 %v3741_v49, %v3020_v23  ;;  %vm3044_vm14 = vweird.f32 %v3741_v49 }
 0x302   : > { %v3028_v47 = vmul.f32 %v3743_v38, %v3019_v0  ;;  %v3745_v62 = vpop.eup %3744  ;;  %vm3034_vm0 = vweird.f32 %v3743_v38  ;;  %vm3045_vm10 = vmor %vm3043_vm15, %vm3044_vm14 }
 0x303   : > { %v3039_v58 = vmul.f32 %v3741_v49, %v3038_v11  ;;  %v3048_v42 = vmul.f32 %v3745_v62, %v7386_v25  ;;  %vm3035_vm13 = vmor %vm3033_vm4, %vm3034_vm0  ;;  %vm3054_vm7 = vweird.f32 %v3745_v62 }
 0x304   : > { %v3029_v35 = vmul.f32 %v3743_v38, %v3028_v47  ;;  %v2998_v54 = vpop.xlane.xlu2 %2997  ;;  %vm3055_vm3 = vmor %vm3053_vm6, %vm3054_vm7 }
 0x305   : > { %v3040_v1 = vmul.f32 0.5, %v3039_v58  ;;  %v3049_v52 = vmul.f32 %v3745_v62, %v3048_v42  ;;  %v3014_v31 = vmul.f32 %v2998_v54, %v7312_v60  ;;  %vm8777_vm4 = vmmov %vm8775_vm2 }
 0x306   : > { %v3030_v63 = vmul.f32 0.5, %v3029_v35  ;;  %3300 = vperm.xlu0 %3735, %v3287_v51   ;;  %vm8779_vm6 = vmmov %vm8778_vm1 }
 0x307   : > { %v3041_v8 = vsub.f32 1.5, %v3040_v1  ;;  %v3050_v3 = vmul.f32 0.5, %v3049_v52  ;;  %v3022_v19 = vadd.f32 1e-05, %v3014_v31 }
 0x308   : > { %3297 = vperm.xlu2 %3737, %v3286_v14   ;;  %v3031_v29 = vsub.f32 1.5, %v3030_v63 }
 0x309   : > { %v3042_v34 = vmul.f32 %v3741_v49, %v3041_v8  ;;  %v3051_v32 = vsub.f32 1.5, %v3050_v3  ;;  %3746 = vrsqrt.f32 %v3022_v19  ;;  %vm3063_vm0 = vweird.f32 %v3022_v19 }
 0x30a   : > { %v3032_v27 = vmul.f32 %v3743_v38, %v3031_v29 }
 0x30b   : > { %v3046_v45 = vsel %vm3045_vm10, %v3741_v49, %v3042_v34  ;;  %v3052_v0 = vmul.f32 %v3745_v62, %v3051_v32 }
 0x30c   : > { %v3036_v44 = vsel %vm3035_vm13, %v3743_v38, %v3032_v27  ;;  %v3108_v23 = vmul.f32 %v3046_v45, %v7317_v9 }
 0x30d   : > { %v3107_v33 = vmul.f32 %v3036_v44, %v7320_v4  ;;  %v8773_v4 = vld [vmem:[#allocation63_spill] sm:$0xff]  ;;  %v3056_v6 = vsel %vm3055_vm3, %v3745_v62, %v3052_v0 }
 0x30e   : > { %3306 = vperm.xlu0 %3735, %v3289_v10   ;;  %vm8774_vm11 = vcmp.lt.s32.totalorder %v8773_v4, 8  ;;  %v3119_v61 = vmul.f32 %v7403_v36, %v3108_v23  ;;  %v3109_v9 = vmul.f32 %v3056_v6, %v7330_v53 }
 0x30f   : > { %v3118_v22 = vmul.f32 %v7403_v36, %v3107_v33  ;;  %v3292_v15 = vsel %vm8774_vm11, 1, %v8755_v43  ;;  %v3747_v46 = vpop.eup %3746 }
 0x310   : > { %3309 = vperm.xlu2 %3737, %v3290_v24   ;;  %v3130_v48 = vadd.f32 %v7412_v50, %v3119_v61  ;;  %v3058_v16 = vmul.f32 %v3747_v46, %v3022_v19  ;;  %v3120_v49 = vmul.f32 %v7403_v36, %v3109_v9  ;;  %vm3064_vm12 = vweird.f32 %v3747_v46 }
 0x311   : > { %v3129_v28 = vadd.f32 %v7412_v50, %v3118_v22  ;;  %vm3065_vm14 = vmor %vm3063_vm0, %vm3064_vm12 }
 0x312   : > { %v3059_v25 = vmul.f32 %v3747_v46, %v3058_v16  ;;  %v3131_v56 = vadd.f32 %v7412_v50, %v3120_v49 }
 0x313   : > { %3595 = vmatmul.msk.f32.vlgmr.msra.gmra.mxu0 %vm8772_vm8, %v3129_v28 }
 0x314   : > { %v3060_v38 = vmul.f32 0.5, %v3059_v25 }
 0x316   : > { %3315 = vperm.xlu0 %3735, %v3292_v15   ;;  %v3061_v43 = vsub.f32 1.5, %v3060_v38 }
 0x318   : > { %v3062_v11 = vmul.f32 %v3747_v46, %v3061_v43 }
 0x31a   : > { %v3066_v47 = vsel %vm3065_vm14, %v3747_v46, %v3062_v11  ;;  %vm8780_vm14 = vmmov %vm8778_vm1 }
 0x31b   : > { %3596 = vmatmul.msk.f32.gmra.mxu0 %vm8775_vm2, %v3130_v48  ;;  %v3110_v55 = vmul.f32 %v3066_v47, %v7337_v59 }
 0x31d   : > { %v3121_v53 = vmul.f32 %v7403_v36, %v3110_v55 }
 0x31f   : > { %v3132_v58 = vadd.f32 %v7412_v50, %v3121_v53 }
 0x323   : > { %3597 = vmatmul.msk.f32.gmra.mxu0 %vm8776_vm5, %v3131_v56 }
 0x32b   : > { %3598 = vmatmul.msk.f32.gmra.mxu0 %vm8777_vm4, %v3132_v58  ;;  %vm8781_vm4 = vmmov %vm8778_vm1 }
 0x33a   : > { %v3007_v18 = vpop.xlane.xlu0 %3006 }
 0x33b   : > { %v3017_v51 = vmul.f32 %v3007_v18, %v7312_v60 }
 0x33d   : > { %v3025_v35 = vadd.f32 1e-05, %v3017_v51 }
 0x33f   : > { %3748 = vrsqrt.f32 %v3025_v35  ;;  %vm3093_vm15 = vweird.f32 %v3025_v35 }
 0x344   : > { %v3001_v30 = vpop.xlane.xlu1 %3000 }
 0x345   : > { %v3749_v26 = vpop.eup %3748  ;;  %v3015_v14 = vmul.f32 %v3001_v30, %v7312_v60 }
 0x346   : > { %v3088_v1 = vmul.f32 %v3749_v26, %v3025_v35  ;;  %vm3094_vm13 = vweird.f32 %v3749_v26 }
 0x347   : > { %v3023_v62 = vadd.f32 1e-05, %v3015_v14  ;;  %vm3095_vm9 = vmor %vm3093_vm15, %vm3094_vm13 }
 0x348   : > { %v3089_v63 = vmul.f32 %v3749_v26, %v3088_v1 }
 0x349   : > { %3750 = vrsqrt.f32 %v3023_v62  ;;  %vm3073_vm7 = vweird.f32 %v3023_v62 }
 0x34a   : > { %v3090_v59 = vmul.f32 0.5, %v3089_v63 }
 0x34c   : > { %v3091_v57 = vsub.f32 1.5, %v3090_v59 }
 0x34e   : > { %v3092_v8 = vmul.f32 %v3749_v26, %v3091_v57 }
 0x34f   : > { %v3751_v42 = vpop.eup %3750 }
 0x350   : > { %v3096_v54 = vsel %vm3095_vm9, %v3749_v26, %v3092_v8  ;;  %v3068_v5 = vmul.f32 %v3751_v42, %v3023_v62  ;;  %vm3074_vm10 = vweird.f32 %v3751_v42 }
 0x351   : > { %v3113_v29 = vmul.f32 %v3096_v54, %v7344_v21  ;;  %vm3075_vm8 = vmor %vm3073_vm7, %vm3074_vm10 }
 0x352   : > { %v3069_v52 = vmul.f32 %v3751_v42, %v3068_v5 }
 0x353   : > { %v3124_v31 = vmul.f32 %v7403_v36, %v3113_v29 }
 0x354   : > { %v3070_v37 = vmul.f32 0.5, %v3069_v52 }
 0x355   : > { %v3135_v34 = vadd.f32 %v7412_v50, %v3124_v31 }
 0x356   : > { %v3071_v27 = vsub.f32 1.5, %v3070_v37 }
 0x357   : > { %3601 = vmatmul.msk.f32.vlgmr.msra.gmra.mxu3 %vm8778_vm1, %v3135_v34 }
 0x358   : > { %v3072_v3 = vmul.f32 %v3751_v42, %v3071_v27 }
 0x35a   : > { %v3076_v44 = vsel %vm3075_vm8, %v3751_v42, %v3072_v3 }
 0x35b   : > { %v3111_v40 = vmul.f32 %v3076_v44, %v7351_v39 }
 0x35d   : > { %v3122_v10 = vmul.f32 %v7403_v36, %v3111_v40 }
 0x35f   : > { %v3133_v21 = vadd.f32 %v7412_v50, %v3122_v10 }
 0x361   : > { %3599 = vmatmul.msk.f32.gmra.mxu0 %vm8779_vm6, %v3133_v21 }
 0x363   : > { %v3010_v17 = vpop.xlane.xlu2 %3009 }
 0x364   : > { %v3018_v24 = vmul.f32 %v3010_v17, %v7312_v60 }
 0x365   : > { %v3004_v33 = vpop.xlane.xlu0 %3003 }
 0x366   : > { %v3026_v19 = vadd.f32 1e-05, %v3018_v24  ;;  %v3016_v45 = vmul.f32 %v3004_v33, %v7312_v60 }
 0x368   : > { %3752 = vrsqrt.f32 %v3026_v19  ;;  %v3024_v32 = vadd.f32 1e-05, %v3016_v45  ;;  %vm3103_vm3 = vweird.f32 %v3026_v19 }
 0x36a   : > { %3754 = vrsqrt.f32 %v3024_v32  ;;  %vm3083_vm12 = vweird.f32 %v3024_v32 }
 0x36e   : > { %v3753_v22 = vpop.eup %3752 }
 0x36f   : > { %v3098_v28 = vmul.f32 %v3753_v22, %v3026_v19  ;;  %vm3104_vm11 = vweird.f32 %v3753_v22 }
 0x370   : > { %v3755_v23 = vpop.eup %3754  ;;  %vm3105_vm2 = vmor %vm3103_vm3, %vm3104_vm11 }
 0x371   : > { %v3099_v39 = vmul.f32 %v3753_v22, %v3098_v28  ;;  %v3078_v0 = vmul.f32 %v3755_v23, %v3024_v32  ;;  %vm3084_vm5 = vweird.f32 %v3755_v23 }
 0x372   : > { %vm3085_vm0 = vmor %vm3083_vm12, %vm3084_vm5 }
 0x373   : > { %v3100_v4 = vmul.f32 0.5, %v3099_v39  ;;  %v3079_v15 = vmul.f32 %v3755_v23, %v3078_v0  ;;  %v3295_v39 = vpop.permute.xlu1 %3294 }
 0x374   : > { %vm3317_vm15 = vcmp.eq.s32.totalorder %v3295_v39, 1 }
 0x375   : > { %v3101_v61 = vsub.f32 1.5, %v3100_v4  ;;  %v3080_v6 = vmul.f32 0.5, %v3079_v15 }
 0x377   : > { %v3102_v46 = vmul.f32 %v3753_v22, %v3101_v61  ;;  %v3081_v48 = vsub.f32 1.5, %v3080_v6 }
 0x379   : > { %v3106_v9 = vsel %vm3105_vm2, %v3753_v22, %v3102_v46  ;;  %v3082_v60 = vmul.f32 %v3755_v23, %v3081_v48  ;;  %v3301_v48 = vpop.permute.xlu0 %3300 }
 0x37a   : > { %v3114_v16 = vmul.f32 %v3106_v9, %v7360_v41  ;;  %v3145_v41 = vld [vmem:[%s7610_s8] sm:$0x1]  ;;  %vm3319_vm9 = vcmp.eq.s32.totalorder %v3301_v48, 1 }
 0x37b   : > { %v3086_v49 = vsel %vm3085_vm0, %v3755_v23, %v3082_v60  ;;  %v3146_v58 = vunpack.c.l.bf16 %v3145_v41 }
 0x37c   : > { %v3125_v25 = vmul.f32 %v7403_v36, %v3114_v16  ;;  %v3112_v56 = vmul.f32 %v3086_v49, %v7365_v7 }
 0x37d   : > { %v3147_v7 = vperm.slane %v3146_v58, 0 }
 0x37e   : > { %v3136_v38 = vadd.f32 %v7412_v50, %v3125_v25  ;;  %v3123_v43 = vmul.f32 %v7403_v36, %v3112_v56 }
 0x380   : > { %3602 = vmatmul.msk.f32.gmra.mxu3 %vm8780_vm14, %v3136_v38  ;;  %v3134_v11 = vadd.f32 %v7412_v50, %v3123_v43 }
 0x382   : > { %3600 = vmatmul.msk.f32.gmra.mxu0 %vm8781_vm4, %v3134_v11  ;;  %vm3522_vm4 = vcmask 257024  }
 0x390   : > { %v3189_v47 = vpop.f32.mrf.mxu0 }
 0x391   : > { %v3190_v35 = vadd.f32 %v3189_v47, %v3147_v7 }
 0x393   : > { %v3221_v50 = vmul.f32 0.044715, %v3190_v35  ;;  %v3213_v41 = vmul.f32 0.5, %v3190_v35 }
 0x395   : > { %v3229_v57 = vmul.f32 %v3221_v50, %v3190_v35 }
 0x397   : > { %v3237_v31 = vmul.f32 %v3229_v57, %v3190_v35 }
 0x398   : > { %v3192_v55 = vpop.f32.mrf.mxu0 }
 0x399   : > { %v3193_v51 = vadd.f32 %v3192_v55, %v3147_v7  ;;  %v3245_v40 = vadd.f32 %v3237_v31, %v3190_v35 }
 0x39b   : > { %v3222_v26 = vmul.f32 0.044715, %v3193_v51  ;;  %v3253_v33 = vmul.f32 0.7978846, %v3245_v40  ;;  %v3214_v11 = vmul.f32 0.5, %v3193_v51 }
 0x39d   : > { %v3230_v63 = vmul.f32 %v3222_v26, %v3193_v51 }
 0x39f   : > { %v3238_v5 = vmul.f32 %v3230_v63, %v3193_v51 }
 0x3a0   : > { %v3195_v53 = vpop.f32.mrf.mxu0 }
 0x3a1   : > { %v7456_v30 = vadd.f32 %v3195_v53, %v3147_v7  ;;  %v3246_v27 = vadd.f32 %v3238_v5, %v3193_v51 }
 0x3a3   : > { %v3223_v1 = vmul.f32 0.044715, %v7456_v30  ;;  %v3254_v17 = vmul.f32 0.7978846, %v3246_v27  ;;  %v3215_v26 = vmul.f32 0.5, %v7456_v30 }
 0x3a5   : > { %v3231_v42 = vmul.f32 %v3223_v1, %v7456_v30  ;;  %3756 = vtanh.f32 %v3254_v17  ;;  %v3304_v1 = vpop.permute.xlu1 %3303 }
 0x3a6   : > { %3758 = vtanh.f32 %v3253_v33  ;;  %vm3320_vm10 = vcmp.eq.s32.totalorder %v3304_v1, 1 }
 0x3a7   : > { %v3239_v37 = vmul.f32 %v3231_v42, %v7456_v30 }
 0x3a8   : > { %v3198_v18 = vpop.f32.mrf.mxu0 }
 0x3a9   : > { %v7458_v14 = vadd.f32 %v3198_v18, %v3147_v7  ;;  %v3247_v10 = vadd.f32 %v3239_v37, %v7456_v30  ;;  %v3298_v18 = vpop.permute.xlu2 %3297  ;;  %v3307_v37 = vpop.permute.xlu0 %3306 }
 0x3aa   : > { %vm3318_vm13 = vcmp.eq.s32.totalorder %v3298_v18, 1  ;;  %vm3321_vm1 = vcmp.eq.s32.totalorder %v3307_v37, 1 }
 0x3ab   : > { %v3224_v59 = vmul.f32 0.044715, %v7458_v14  ;;  %v3255_v45 = vmul.f32 0.7978846, %v3247_v10  ;;  %v3757_v15 = vpop.eup %3756  ;;  %v3216_v57 = vmul.f32 0.5, %v7458_v14 }
 0x3ac   : > { %v3759_v6 = vpop.eup %3758  ;;  %v3270_v49 = vadd.f32 1.0, %v3757_v15 }
 0x3ad   : > { %v3232_v29 = vmul.f32 %v3224_v59, %v7458_v14  ;;  %3760 = vtanh.f32 %v3255_v45  ;;  %v3269_v38 = vadd.f32 1.0, %v3759_v6  ;;  %v3313_v33 = vpop.permute.xlu1 %3312 }
 0x3ae   : > { %vm3323_vm7 = vcmp.eq.s32.totalorder %v3313_v33, 1 }
 0x3af   : > { %v3240_v3 = vmul.f32 %v3232_v29, %v7458_v14  ;;  %v7487_v63 = vmul.f32 %v3269_v38, %v3213_v41 }
 0x3b1   : > { %v3248_v24 = vadd.f32 %v3240_v3, %v7458_v14  ;;  %v3325_v14 = vsel %vm3317_vm15, %v7487_v63, 0.0 }
 0x3b3   : > { %v3256_v22 = vmul.f32 0.7978846, %v3248_v24  ;;  %v3761_v46 = vpop.eup %3760 }
 0x3b4   : > { %v3271_v47 = vadd.f32 1.0, %v3761_v46  ;;  %v3316_v46 = vpop.permute.xlu0 %3315 }
 0x3b5   : > { %3762 = vtanh.f32 %v3256_v22  ;;  %v3310_v22 = vpop.permute.xlu2 %3309  ;;  %vm3324_vm6 = vcmp.eq.s32.totalorder %v3316_v46, 1 }
 0x3b6   : > { %v7489_v51 = vmul.f32 %v3271_v47, %v3215_v26  ;;  %vm3322_vm8 = vcmp.eq.s32.totalorder %v3310_v22, 1 }
 0x3bb   : > { %v3763_v56 = vpop.eup %3762 }
 0x3bc   : > { %v3272_v50 = vadd.f32 1.0, %v3763_v56 }
 0x3be   : > { %v7494_v5 = vmul.f32 %v3272_v50, %v3216_v57 }
 0x3c0   : > { %v3328_v40 = vsel %vm3320_vm10, %v7494_v5, 0.0 }
 0x3da   : > { %v3207_v8 = vpop.f32.mrf.mxu3 }
 0x3db   : > { %v7467_v52 = vadd.f32 %v3207_v8, %v3147_v7 }
 0x3dd   : > { %v3227_v44 = vmul.f32 0.044715, %v7467_v52  ;;  %v3219_v17 = vmul.f32 0.5, %v7467_v52 }
 0x3de   : > { %v3201_v36 = vpop.f32.mrf.mxu0 }
 0x3df   : > { %v7461_v62 = vadd.f32 %v3201_v36, %v3147_v7  ;;  %v3235_v19 = vmul.f32 %v3227_v44, %v7467_v52  ;;  %v7483_v36 = vmul.f32 %v3270_v49, %v3214_v11 }
 0x3e1   : > { %v3225_v54 = vmul.f32 0.044715, %v7461_v62  ;;  %v3243_v28 = vmul.f32 %v3235_v19, %v7467_v52  ;;  %v3217_v30 = vmul.f32 0.5, %v7461_v62 }
 0x3e3   : > { %v3233_v34 = vmul.f32 %v3225_v54, %v7461_v62  ;;  %v3251_v0 = vadd.f32 %v3243_v28, %v7467_v52  ;;  %v3326_v54 = vsel %vm3318_vm13, %v7483_v36, 0.0 }
 0x3e4   : > { %v3334_v44 = vmul.f32 %v3326_v54, %v3326_v54 }
 0x3e5   : > { %v3241_v21 = vmul.f32 %v3233_v34, %v7461_v62  ;;  %v3259_v9 = vmul.f32 0.7978846, %v3251_v0  ;;  %v3327_v34 = vsel %vm3319_vm9, %v7489_v51, 0.0 }
 0x3e7   : > { %v3249_v32 = vadd.f32 %v3241_v21, %v7461_v62  ;;  %v3333_v62 = vmul.f32 %v3325_v14, %v3325_v14  ;;  %v3335_v21 = vmul.f32 %v3327_v34, %v3327_v34 }
 0x3e9   : > { %v3257_v23 = vmul.f32 0.7978846, %v3249_v32  ;;  %v3341_v45 = vadd.f32 %v3334_v44, %v3333_v62  ;;  %v3336_v32 = vmul.f32 %v3328_v40, %v3328_v40  ;;  %v3687_v44 = vld [vmem:[%s7613_s11 + $0x38] sm:$0xff]   ;;  %v3686_v40 = vld [vmem:[%s7613_s11 + $0x30] sm:$0xff]  }
 0x3ea   : > { %v3673_v62 = vunpack.c.l.bf16 %v3687_v44 }
 0x3eb   : > { %3764 = vtanh.f32 %v3257_v23  ;;  %v3342_v0 = vadd.f32 %v3341_v45, %v3335_v21  ;;  %v3670_v21 = vunpack.c.h.bf16 %v3686_v40 }
 0x3ec   : > { %3766 = vtanh.f32 %v3259_v9 }
 0x3ed   : > { %v3343_v52 = vadd.f32 %v3342_v0, %v3336_v32  ;;  %v3684_v32 = vld [vmem:[%s7613_s11 + $0x20] sm:$0xff]  }
 0x3ee   : > { %v3662_v0 = vunpack.c.h.bf16 %v3684_v32  ;;  %v3661_v46 = vunpack.c.l.bf16 %v3684_v32 }
 0x3f1   : > { %v3765_v53 = vpop.eup %3764 }
 0x3f2   : > { %v3273_v8 = vadd.f32 1.0, %v3765_v53  ;;  %v3767_v31 = vpop.eup %3766 }
 0x3f3   : > { %v3275_v10 = vadd.f32 1.0, %v3767_v31  ;;  %v3794_v31 = vmov 128.0  }
 0x3f4   : > { %v7500_v27 = vmul.f32 %v3273_v8, %v3217_v30 }
 0x3f5   : > { %v7505_v28 = vmul.f32 %v3275_v10, %v3219_v17  ;;  %v3674_v10 = vunpack.c.h.bf16 %v3687_v44 }
 0x3f6   : > { %v3329_v24 = vsel %vm3321_vm1, %v7500_v27, 0.0 }
 0x3f7   : > { %3465 = vmatpush.msra.mxu1 %v3674_v10  ;;  %3692 = vmatpush.msra.mxu2 %v3674_v10 }
 0x3f8   : > { %3693 = vmatpush.msrb.mxu3 %v3674_v10 }
 0x3f9   : > { %3466 = vmatpush.msra.mxu1 %v3673_v62  ;;  %3694 = vmatpush.msra.mxu2 %v3673_v62 }
 0x3fa   : > { %3695 = vmatpush.msrb.mxu3 %v3673_v62 }
 0x3fb   : > { %3467 = vmatpush.msra.mxu1 %v3670_v21  ;;  %3696 = vmatpush.msra.mxu2 %v3670_v21 }
 0x3fc   : > { %3697 = vmatpush.msrb.mxu3 %v3670_v21 }
 0x3ff   : > { %v3204_v4 = vpop.f32.mrf.mxu0 }
 0x400   : > { %v3205_v61 = vadd.f32 %v3204_v4, %v3147_v7  ;;  %v3337_v4 = vmul.f32 %v3329_v24, %v3329_v24  ;;  %v3685_v24 = vld [vmem:[%s7613_s11 + $0x28] sm:$0xff]  }
 0x401   : > { %v3666_v33 = vunpack.c.h.bf16 %v3685_v24  ;;  %v3665_v22 = vunpack.c.l.bf16 %v3685_v24 }
 0x402   : > { %v3226_v60 = vmul.f32 0.044715, %v3205_v61  ;;  %v3218_v23 = vmul.f32 0.5, %v3205_v61  ;;  %v3344_v49 = vadd.f32 %v3343_v52, %v3337_v4  ;;  %v3683_v4 = vld [vmem:[%s7613_s11 + $0x18] sm:$0xff]  }
 0x403   : > { %v3210_v16 = vpop.f32.mrf.mxu3  ;;  %v3658_v52 = vunpack.c.h.bf16 %v3683_v4 }
 0x404   : > { %v7480_v25 = vadd.f32 %v3210_v16, %v3147_v7  ;;  %v3234_v43 = vmul.f32 %v3226_v60, %v3205_v61  ;;  %v3331_v60 = vsel %vm3323_vm7, %v7505_v28, 0.0 }
 0x405   : > { %v3339_v38 = vmul.f32 %v3331_v60, %v3331_v60 }
 0x406   : > { %v3228_v55 = vmul.f32 0.044715, %v7480_v25  ;;  %v3242_v58 = vmul.f32 %v3234_v43, %v3205_v61  ;;  %v3220_v48 = vmul.f32 0.5, %v7480_v25 }
 0x408   : > { %v3236_v7 = vmul.f32 %v3228_v55, %v7480_v25  ;;  %v3250_v59 = vadd.f32 %v3242_v58, %v3205_v61 }
 0x40a   : > { %v3244_v35 = vmul.f32 %v3236_v7, %v7480_v25  ;;  %v3258_v42 = vmul.f32 0.7978846, %v3250_v59 }
 0x40c   : > { %v3252_v29 = vadd.f32 %v3244_v35, %v7480_v25  ;;  %3768 = vtanh.f32 %v3258_v42 }
 0x40e   : > { %v3260_v3 = vmul.f32 0.7978846, %v3252_v29 }
 0x410   : > { %3770 = vtanh.f32 %v3260_v3 }
 0x412   : > { %v3769_v19 = vpop.eup %3768 }
 0x413   : > { %v3274_v39 = vadd.f32 1.0, %v3769_v19  ;;  %v3669_v19 = vunpack.c.l.bf16 %v3686_v40 }
 0x415   : > { %v7507_v6 = vmul.f32 %v3274_v39, %v3218_v23  ;;  %3468 = vmatpush.msra.mxu1 %v3669_v19  ;;  %3698 = vmatpush.msra.mxu2 %v3669_v19 }
 0x416   : > { %v3771_v15 = vpop.eup %3770  ;;  %3699 = vmatpush.msrb.mxu3 %v3669_v19 }
 0x417   : > { %v3276_v9 = vadd.f32 1.0, %v3771_v15  ;;  %v3330_v16 = vsel %vm3322_vm8, %v7507_v6, 0.0  ;;  %3469 = vmatpush.msra.mxu1 %v3666_v33  ;;  %3700 = vmatpush.msra.mxu2 %v3666_v33 }
 0x418   : > { %v3338_v56 = vmul.f32 %v3330_v16, %v3330_v16  ;;  %3701 = vmatpush.msrb.mxu3 %v3666_v33  ;;  %v3681_v16 = vld [vmem:[%s7613_s11 + $0x8] sm:$0xff]  }
 0x419   : > { %v7512_v61 = vmul.f32 %v3276_v9, %v3220_v48  ;;  %3470 = vmatpush.msra.mxu1 %v3665_v22  ;;  %3702 = vmatpush.msra.mxu2 %v3665_v22  ;;  %v3682_v48 = vld [vmem:[%s7613_s11 + $0x10] sm:$0xff]   ;;  %v3657_v9 = vunpack.c.l.bf16 %v3683_v4 }
 0x41a   : > { %v3345_v43 = vadd.f32 %v3344_v49, %v3338_v56  ;;  %3703 = vmatpush.msrb.mxu3 %v3665_v22  ;;  %v3654_v60 = vunpack.c.h.bf16 %v3682_v48  ;;  %v3653_v56 = vunpack.c.l.bf16 %v3682_v48 }
 0x41b   : > { %v3332_v11 = vsel %vm3324_vm6, %v7512_v61, 0.0  ;;  %3471 = vmatpush.msra.mxu1 %v3662_v0  ;;  %3704 = vmatpush.msra.mxu2 %v3662_v0 }
 0x41c   : > { %v3340_v47 = vmul.f32 %v3332_v11, %v3332_v11  ;;  %v3346_v55 = vadd.f32 %v3345_v43, %v3339_v38  ;;  %3705 = vmatpush.msrb.mxu3 %v3662_v0  ;;  %v3650_v43 = vunpack.c.h.bf16 %v3681_v16 }
 0x41d   : > { %3472 = vmatpush.msra.mxu1 %v3661_v46  ;;  %3706 = vmatpush.msra.mxu2 %v3661_v46 }
 0x41e   : > { %v3347_v53 = vadd.f32 %v3346_v55, %v3340_v47  ;;  %3707 = vmatpush.msrb.mxu3 %v3661_v46  ;;  %v3644_v47 = vld [vmem:[%s7613_s11] sm:$0xff]  }
 0x41f   : > { %3473 = vmatpush.msra.mxu1 %v3658_v52  ;;  %3708 = vmatpush.msra.mxu2 %v3658_v52 }
 0x420   : > { %v3348_v41 = vrot.slane %v3347_v53, 4  ;;  %3709 = vmatpush.msrb.mxu3 %v3658_v52 }
 0x421   : > { %3474 = vmatpush.msra.mxu1 %v3657_v9  ;;  %3710 = vmatpush.msra.mxu2 %v3657_v9 }
 0x422   : > { %v3349_v58 = vadd.f32 %v3348_v41, %v3347_v53  ;;  %3711 = vmatpush.msrb.mxu3 %v3657_v9  ;;  %v3649_v53 = vunpack.c.l.bf16 %v3681_v16  ;;  %v3392_v41 = vld [vmem:[%s7611_s9] sm:$0x1] }
 0x423   : > { %3475 = vmatpush.msra.mxu1 %v3654_v60  ;;  %3712 = vmatpush.msra.mxu2 %v3654_v60 }
 0x424   : > { %v3350_v25 = vrot.slane %v3349_v58, 2  ;;  %3713 = vmatpush.msrb.mxu3 %v3654_v60 }
 0x425   : > { %3476 = vmatpush.msra.mxu1 %v3653_v56  ;;  %3714 = vmatpush.msra.mxu2 %v3653_v56 }
 0x426   : > { %v3351_v18 = vadd.f32 %v3350_v25, %v3349_v58  ;;  %3715 = vmatpush.msrb.mxu3 %v3653_v56 }
 0x427   : > { %3477 = vmatpush.msra.mxu1 %v3650_v43  ;;  %3716 = vmatpush.msra.mxu2 %v3650_v43 }
 0x428   : > { %v3352_v26 = vrot.slane %v3351_v18, 1  ;;  %3717 = vmatpush.msrb.mxu3 %v3650_v43 }
 0x429   : > { %3478 = vmatpush.msra.mxu1 %v3649_v53  ;;  %3718 = vmatpush.msra.mxu2 %v3649_v53 }
 0x42a   : > { %v3353_v50 = vadd.f32 %v3352_v26, %v3351_v18  ;;  %v3646_v18 = vunpack.c.h.bf16 %v3644_v47  ;;  %v3411_v26 = vld [vmem:[%s7612_s10] sm:$0x1]  ;;  %3719 = vmatpush.msrb.mxu3 %v3649_v53 }
 0x42c   : > { %3772 = vrsqrt.f32 %v3353_v50  ;;  %vm3361_vm11 = vcmp.eq.f32.partialorder %v3353_v50, inf  ;;  %v3364_v54 = vand.u32 2147483648, %v3353_v50  ;;  %vm3363_vm3 = vcmp.eq.f32.partialorder %v3353_v50, 0.0  ;;  %3479 = vmatpush.msra.mxu1 %v3646_v18  ;;  %3720 = vmatpush.msra.mxu2 %v3646_v18 }
 0x42d   : > { %3774 = vrcp.f32 %v3794_v31  ;;  %3721 = vmatpush.msrb.mxu3 %v3646_v18 }
 0x432   : > { %v3773_v7 = vpop.eup %3772 }
 0x433   : > { %v3355_v1 = vmul.f32 %v3773_v7, %v3353_v50  ;;  %v3775_v37 = vpop.eup %3774 }
 0x434   : > { %v3369_v14 = vmul.f32 128.0, %v3775_v37  ;;  %vm3373_vm2 = vweird.f32 %v3775_v37 }
 0x435   : > { %v3356_v59 = vmul.f32 %v3773_v7, %v3355_v1 }
 0x436   : > { %v3370_v34 = vsub.f32 1.0, %v3369_v14 }
 0x437   : > { %v3357_v57 = vmul.f32 0.5, %v3356_v59  ;;  %v3645_v59 = vunpack.c.l.bf16 %v3644_v47 }
 0x438   : > { %v3371_v3 = vmul.f32 %v3775_v37, %v3370_v34 }
 0x439   : > { %v3358_v8 = vsub.f32 1.5, %v3357_v57  ;;  %3480 = vmatpush.msra.mxu1 %v3645_v59  ;;  %3722 = vmatpush.msra.mxu2 %v3645_v59 }
 0x43a   : > { %v3372_v17 = vadd.f32 %v3775_v37, %v3371_v3  ;;  %3723 = vmatpush.msrb.mxu3 %v3645_v59 }
 0x43b   : > { %v3359_v35 = vmul.f32 %v3773_v7, %v3358_v8  ;;  %v3393_v7 = vunpack.c.l.bf16 %v3392_v41  ;;  %v3412_v8 = vunpack.c.l.bf16 %v3411_v26 }
 0x43c   : > { %v3374_v45 = vsel %vm3373_vm2, %v3775_v37, %v3372_v17 }
 0x43d   : > { %v3360_v42 = vmul.f32 %v3359_v35, %v3353_v50  ;;  %v3413_v31 = vperm.slane %v3412_v8, 0 }
 0x43f   : > { %v3362_v30 = vsel %vm3361_vm11, %v3353_v50, %v3360_v42 }
 0x440   : > { %v7515_v29 = vsel %vm3363_vm3, %v3364_v54, %v3362_v30  ;;  %v3402_v54 = vperm.slane %v3393_v7, 0 }
 0x441   : > { %3366 = vadd.xlane.f32.xlu2 %v7515_v29 }
 0x4b4   : > { %v3367_v23 = vpop.xlane.xlu2 %3366 }
 0x4b5   : > { %v3375_v39 = vmul.f32 %v3374_v45, %v3367_v23 }
 0x4b7   : > { %v3376_v15 = vadd.f32 1e-06, %v3375_v39 }
 0x4b9   : > { %3776 = vrcp.f32 %v3376_v15  ;;  %v3388_v55 = vand.u32 2147483648, %v3376_v15  ;;  %v3386_v25 = vand.u32 2147483647, %v3376_v15  ;;  %vm3382_vm12 = vweird.f32 %v3376_v15 }
 0x4bb   : > { %v3389_v1 = vor.u32 1.1754944e-38, %v3388_v55  ;;  %vm3387_vm14 = vcmp.eq.f32.partialorder %v3386_v25, 8.507059e+37 }
 0x4bf   : > { %v3777_v49 = vpop.eup %3776 }
 0x4c0   : > { %v3378_v38 = vmul.f32 %v3777_v49, %v3376_v15  ;;  %vm3383_vm5 = vweird.f32 %v3777_v49 }
 0x4c1   : > { %vm3384_vm0 = vmor %vm3382_vm12, %vm3383_vm5 }
 0x4c2   : > { %v3379_v11 = vsub.f32 1.0, %v3378_v38 }
 0x4c4   : > { %v3380_v58 = vmul.f32 %v3777_v49, %v3379_v11 }
 0x4c6   : > { %v3381_v50 = vadd.f32 %v3777_v49, %v3380_v58  ;;  %v8783_v58 = vld [vmem:[#allocation15_spill] sm:$0xff] }
 0x4c8   : > { %v3385_v57 = vsel %vm3384_vm0, %v3777_v49, %v3381_v50 }
 0x4c9   : > { %v3390_v35 = vsel %vm3387_vm14, %v3389_v1, %v3385_v57 }
 0x4ca   : > { %v3391_v42 = vmul.f32 %v3390_v35, %v7515_v29 }
 0x4cc   : > { %v3394_v30 = vmul.f32 %v3391_v42, %v7487_v63  ;;  %v3397_v37 = vmul.f32 %v3391_v42, %v7494_v5  ;;  %v3400_v14 = vmul.f32 %v3391_v42, %v7505_v28  ;;  %v3395_v34 = vmul.f32 %v3391_v42, %v7483_v36 }
 0x4cd   : > { %v3398_v10 = vmul.f32 %v3391_v42, %v7500_v27  ;;  %v3401_v29 = vmul.f32 %v3391_v42, %v7512_v61  ;;  %v3396_v0 = vmul.f32 %v3391_v42, %v7489_v51  ;;  %v3399_v4 = vmul.f32 %v3391_v42, %v7507_v6  ;;  %v8784_v42 = vld [vmem:[#allocation13_spill] sm:$0xff] }
 0x4ce   : > { %v3403_v3 = vmul.f32 %v3402_v54, %v3394_v30  ;;  %v3406_v44 = vmul.f32 %v3402_v54, %v3397_v37  ;;  %v3409_v40 = vmul.f32 %v3402_v54, %v3400_v14  ;;  %v3404_v24 = vmul.f32 %v3402_v54, %v3395_v34  ;;  %v8785_v37 = vld [vmem:[#allocation10_spill] sm:$0xff] }
 0x4cf   : > { %v3407_v32 = vmul.f32 %v3402_v54, %v3398_v10  ;;  %v3410_v22 = vmul.f32 %v3402_v54, %v3401_v29  ;;  %v3405_v52 = vmul.f32 %v3402_v54, %v3396_v0 }
 0x4d0   : > { %v3414_v62 = vadd.f32 %v3413_v31, %v3403_v3  ;;  %v3417_v21 = vadd.f32 %v3413_v31, %v3406_v44  ;;  %v3420_v17 = vadd.f32 %v3413_v31, %v3409_v40  ;;  %v3415_v23 = vadd.f32 %v3413_v31, %v3404_v24 }
 0x4d1   : > { %v3418_v39 = vadd.f32 %v3413_v31, %v3407_v32  ;;  %v3421_v15 = vadd.f32 %v3413_v31, %v3410_v22  ;;  %v3416_v48 = vadd.f32 %v3413_v31, %v3405_v52 }
 0x4d2   : > { %v3422_v19 = vadd.f32 %v3414_v62, %v7487_v63  ;;  %v3425_v33 = vadd.f32 %v3417_v21, %v7494_v5  ;;  %v3428_v45 = vadd.f32 %v3420_v17, %v7505_v28  ;;  %v3423_v46 = vadd.f32 %v3415_v23, %v7483_v36  ;;  %v3462_v36 = vld [vmem:[%s7614_s12] sm:$0x1] }
 0x4d3   : > { %v3426_v63 = vadd.f32 %v3418_v39, %v7500_v27  ;;  %v3408_v5 = vmul.f32 %v3402_v54, %v3399_v4  ;;  %v3429_v28 = vadd.f32 %v3421_v15, %v7512_v61  ;;  %v3424_v60 = vadd.f32 %v3416_v48, %v7489_v51 }
 0x4d4   : > { %3481 = vmatmul.f32.vlgmr.msra.gmra.mxu1 %v3422_v19  ;;  %3490 = vmatmul.f32.vlgmr.msra.gmra.mxu2 %v3425_v33  ;;  %v3463_v27 = vunpack.c.l.bf16 %v3462_v36 }
 0x4d5   : > { %3499 = vmatmul.f32.vlgmr.msrb.gmra.mxu3 %v3428_v45  ;;  %v3419_v9 = vadd.f32 %v3413_v31, %v3408_v5 }
 0x4d6   : > { %v3464_v49 = vperm.slane %v3463_v27, 0 }
 0x4d7   : > { %v3427_v16 = vadd.f32 %v3419_v9, %v7507_v6 }
 0x4dc   : > { %3484 = vmatmul.f32.gmra.mxu1 %v3423_v46  ;;  %3493 = vmatmul.f32.gmra.mxu2 %v3426_v63 }
 0x4dd   : > { %3502 = vmatmul.f32.gmra.mxu3 %v3429_v28 }
 0x4e4   : > { %3487 = vmatmul.f32.gmra.mxu1 %v3424_v60  ;;  %3496 = vmatmul.f32.gmra.mxu2 %v3427_v16 }
 0x551   : > { %v3482_v56 = vpop.f32.mrf.mxu1 }
 0x552   : > { %v3483_v61 = vadd.f32 %v3482_v56, %v3464_v49 }
 0x554   : > { %v3506_v38 = vadd.f32 %v8637_v2, %v3483_v61  ;;  %v8782_v2 = vld [vmem:[#allocation11_spill] sm:$0xff] }
 0x556   : > { %v3514_v51 = vpack.c.bf16 %v3506_v38, %v3506_v38 }
 0x557   : > { %v3491_v6 = vpop.f32.mrf.mxu2 }
 0x558   : > { %3523 = vst.msk [vmem:[%s7574_s18] sm:$0xf] %vm3522_vm4, %v3514_v51  ;;  %v3492_v43 = vadd.f32 %v3491_v6, %v3464_v49  ;;  %v3500_v11 = vpop.f32.mrf.mxu3 }
 0x559   : > { %v3501_v47 = vadd.f32 %v3500_v11, %v3464_v49  ;;  %v3485_v55 = vpop.f32.mrf.mxu1 }
 0x55a   : > { %v3509_v53 = vadd.f32 %v8782_v2, %v3492_v43  ;;  %v3486_v41 = vadd.f32 %v3485_v55, %v3464_v49 }
 0x55b   : > { %v3512_v25 = vadd.f32 %v8783_v58, %v3501_v47 }
 0x55c   : > { %v3517_v18 = vpack.c.bf16 %v3509_v53, %v3509_v53  ;;  %v3507_v26 = vadd.f32 %v8728_v12, %v3486_v41 }
 0x55d   : > { %v3520_v50 = vpack.c.bf16 %v3512_v25, %v3512_v25 }
 0x55e   : > { %3526 = vst.msk [vmem:[%s7574_s18 + $0xc] sm:$0xf] %vm3522_vm4, %v3517_v18  ;;  %v3515_v7 = vpack.c.bf16 %v3507_v26, %v3507_v26 }
 0x55f   : > { %3529 = vst.msk [vmem:[%s7574_s18 + $0x18] sm:$0xf] %vm3522_vm4, %v3520_v50  ;;  %v3494_v1 = vpop.f32.mrf.mxu2 }
 0x560   : > { %3524 = vst.msk [vmem:[%s7574_s18 + $0x4] sm:$0xf] %vm3522_vm4, %v3515_v7  ;;  %v3495_v59 = vadd.f32 %v3494_v1, %v3464_v49  ;;  %v3503_v57 = vpop.f32.mrf.mxu3 }
 0x561   : > { %v3504_v8 = vadd.f32 %v3503_v57, %v3464_v49  ;;  %v3488_v35 = vpop.f32.mrf.mxu1 }
 0x562   : > { %v3510_v54 = vadd.f32 %v8784_v42, %v3495_v59  ;;  %v3489_v12 = vadd.f32 %v3488_v35, %v3464_v49 }
 0x563   : > { %v3513_v30 = vadd.f32 %v8689_v20, %v3504_v8 }
 0x564   : > { %v3518_v31 = vpack.c.bf16 %v3510_v54, %v3510_v54  ;;  %v3508_v14 = vadd.f32 %v8785_v37, %v3489_v12 }
 0x565   : > { %v3521_v34 = vpack.c.bf16 %v3513_v30, %v3513_v30 }
 0x566   : > { %3527 = vst.msk [vmem:[%s7574_s18 + $0x10] sm:$0xf] %vm3522_vm4, %v3518_v31  ;;  %v3516_v3 = vpack.c.bf16 %v3508_v14, %v3508_v14 }
 0x567   : > { %3530 = vst.msk [vmem:[%s7574_s18 + $0x1c] sm:$0xf] %vm3522_vm4, %v3521_v34  ;;  %v3497_v44 = vpop.f32.mrf.mxu2 }
 0x568   : > { %3525 = vst.msk [vmem:[%s7574_s18 + $0x8] sm:$0xf] %vm3522_vm4, %v3516_v3  ;;  %v3498_v40 = vadd.f32 %v3497_v44, %v3464_v49 }
 0x56a   : > { %v3511_v10 = vadd.f32 %v8718_v13, %v3498_v40 }
 0x56c   : > { %v3519_v29 = vpack.c.bf16 %v3511_v10, %v3511_v10 }
 0x56e   : > { %3528 = vst.msk [vmem:[%s7574_s18 + $0x14] sm:$0xf] %vm3522_vm4, %v3519_v29 }
 0x56f PF: > { %s23_s25 = sadd.s32 1, %s3790_s25  }
 0x570   : > { %p20_p4 = scmp.ge.s32.totalorder %s23_s25, 4  }
 0x572   :  { %22 = sbr.rel (!%p20_p4) target bundleno = 1 (0x1), region = 102 }

</bundles_post_ra>
